<compile_context>
chip_gen: v7x
topology: tpu7x:2x2x1
jax: 0.10.0
libtpu: 0.0.40
codegen_flags: <defaults>
</compile_context>

<pallas_src>
import functools

import jax
import jax.numpy as jnp
from jax import lax
from jax.experimental import pallas as pl
from jax.experimental.pallas import tpu as pltpu

LANE = 128
TB = 8            # samples per grid step (batch block)


def _round_up(v, m):
    return ((v + m - 1) // m) * m


# ---------------------------------------------------------------------------
# Fused kernel: one grid step = TB samples.
#   backbone (1x1 conv + ReLU + spatial mean)  ->  masked view max-pool +
#   view-utilization histogram  ->  fc classifier.
# ---------------------------------------------------------------------------
def mvcnn_fused_kernel(Cf, MV, HW, nv_ref, x_ref, cw_ref, cb_ref, fw_ref, fb_ref,
                       logits_ref, k_ref, u_ref):
    blk = pl.program_id(0)
    TBk, Cfp = k_ref.shape
    MVP = u_ref.shape[1]
    MVHW = MV * HW
    inv_hw = 1.0 / HW
    inv_cf = 1.0 / Cf
    NEG = float(jnp.finfo(jnp.float32).min)          # finite mask value (no NaN paths)

    cw = cw_ref[...]                                 # (Cfp, Cin) bf16, resident
    cb = jnp.broadcast_to(cb_ref[...], (Cfp, MVHW))  # bias broadcast hoisted out of the loop
    vidx = lax.broadcasted_iota(jnp.int32, (Cfp, MV), 1)   # view index (lanes)
    chan = lax.broadcasted_iota(jnp.int32, (Cfp, MV), 0)   # channel index (sublanes)

    k_cols = []   # per-sample (Cfp, 1) pooled-max columns (channels in sublanes)
    u_rows = []   # per-sample (1, MV) utilization rows
    for t in range(TBk):                             # static unroll, TB is small
        nv_t = nv_ref[blk * TBk + t]                 # valid-view count (SMEM scalar)

        # --- backbone: 1x1 conv as ONE MXU dot (K=Cin), bias+ReLU on the VPU,
        #     per-view spatial mean via lane reduces over aligned HW slices.
        xs = x_ref[t]                                                    # (Cin, MV*HW) bf16
        fm = jnp.dot(cw, xs, preferred_element_type=jnp.float32)         # (Cfp, MV*HW) f32
        fm = jnp.maximum(fm + cb, 0.0)
        pooled = jnp.concatenate(
            [jnp.sum(fm[:, v * HW:(v + 1) * HW], axis=1, keepdims=True)
             for v in range(MV)], axis=1) * inv_hw                       # (Cfp, MV)

        # --- masked max over the valid views (channels stay in sublanes).
        # NOTE: nv == 0 degenerates (reference divides 0/0); matches only for nv > 0.
        masked = jnp.where(vidx < nv_t, pooled, NEG)
        kcol = jnp.max(masked, axis=1, keepdims=True)                    # (Cfp, 1)
        k_cols.append(kcol)

        # --- view utilization: first-argmax view per *real* channel, histogram / Cf.
        # (max and the equality test use the exact same f32 values -> stable argmax)
        is_max = masked == kcol
        first = jnp.min(jnp.where(is_max, vidx, MV), axis=1, keepdims=True)   # (Cfp, 1)
        votes = jnp.where((vidx == first) & (chan < Cf), 1.0, 0.0)            # (Cfp, MV)
        u_rows.append(jnp.sum(votes, axis=0, keepdims=True) * inv_cf)         # (1, MV)

    # --- assemble the TB block: one tiny (Cfp, TB) transpose, lane-dense full-tile stores.
    k_blk = jnp.concatenate(k_cols, axis=1).T                    # (TB, Cfp)
    k_ref[...] = k_blk

    u_blk = jnp.concatenate(u_rows, axis=0)                      # (TB, MV)
    u_ref[...] = jnp.concatenate(
        [u_blk, jnp.zeros((TBk, MVP - MV), jnp.float32)], axis=1)

    # --- classifier: batched (TB, Cfp) x (Cfp, nclsp) MXU matmul (padded rows/cols are 0).
    logits_ref[...] = (
        jnp.dot(k_blk, fw_ref[...], preferred_element_type=jnp.float32) + fb_ref[...]
    )


# ---------------------------------------------------------------------------
# Wrapper: pad batch to a multiple of TB, pad channels/classes/views to 128 lanes,
# feed x as bf16 in (batch, Cin, MV*HW) layout, single fused pallas_call.
# Eval-mode semantics: returns (logits, k, u) like the PyTorch module.
# ---------------------------------------------------------------------------
@functools.partial(jax.jit, static_argnums=(0, 1))
def mvcnn_new_forward(batch_size, max_num_views, num_views, x, params):
    N, Cin, H, W = x.shape
    HW = H * W
    MV = max_num_views
    Cf, ncls = params["fc_w"].shape

    Cfp = _round_up(Cf, LANE)
    nclsp = _round_up(ncls, LANE)
    MVP = _round_up(MV, LANE)
    Bp = _round_up(max(batch_size, TB), TB)

    # Resident, zero-padded weights (lane-dense / full-dim last axes).
    cw = jnp.zeros((Cfp, Cin), jnp.bfloat16).at[:Cf, :].set(
        params["conv_w"].astype(jnp.bfloat16))
    cb = jnp.zeros((Cfp, 1), jnp.float32).at[:Cf, 0].set(params["conv_b"])
    fw = jnp.zeros((Cfp, nclsp), jnp.float32).at[:Cf, :ncls].set(params["fc_w"])
    fb = jnp.zeros((1, nclsp), jnp.float32).at[:, :ncls].set(params["fc_b"])

    # x: (batch*MV, Cin, H, W) -> (Bp, Cin, MV*HW) bf16 (f32 accumulation in-kernel).
    xr = (x.reshape(batch_size, MV, Cin, HW)
            .transpose(0, 2, 1, 3)
            .reshape(batch_size, Cin, MV * HW)
            .astype(jnp.bfloat16))
    x_pad = jnp.zeros((Bp, Cin, MV * HW), jnp.bfloat16).at[:batch_size].set(xr)
    nv_pad = jnp.zeros((Bp,), jnp.int32).at[:batch_size].set(num_views.astype(jnp.int32))

    kernel = functools.partial(mvcnn_fused_kernel, Cf, MV, HW)

    logits_p, k_p, u_p = pl.pallas_call(
        kernel,
        out_shape=(
            jax.ShapeDtypeStruct((Bp, nclsp), jnp.float32),
            jax.ShapeDtypeStruct((Bp, Cfp), jnp.float32),
            jax.ShapeDtypeStruct((Bp, MVP), jnp.float32),
        ),
        grid_spec=pltpu.PrefetchScalarGridSpec(
            num_scalar_prefetch=1,                       # num_views -> SMEM
            grid=(Bp // TB,),
            in_specs=[
                pl.BlockSpec((TB, Cin, MV * HW), lambda b, nv: (b, 0, 0)),
                pl.BlockSpec((Cfp, Cin), lambda b, nv: (0, 0)),      # resident weights
                pl.BlockSpec((Cfp, 1), lambda b, nv: (0, 0)),
                pl.BlockSpec((Cfp, nclsp), lambda b, nv: (0, 0)),
                pl.BlockSpec((1, nclsp), lambda b, nv: (0, 0)),
            ],
            out_specs=[
                pl.BlockSpec((TB, nclsp), lambda b, nv: (b, 0)),
                pl.BlockSpec((TB, Cfp), lambda b, nv: (b, 0)),
                pl.BlockSpec((TB, MVP), lambda b, nv: (b, 0)),
            ],
        ),
        compiler_params=pltpu.CompilerParams(
            # Batch-block axis is embarrassingly parallel (sharded over v7x's 2 TCs).
            dimension_semantics=("parallel",),
            # Explicit VMEM budget; sized well under v7x's 64 MiB physical VMEM.
            vmem_limit_bytes=32 * 1024 * 1024,
        ),
    )(nv_pad, x_pad, cw, cb, fw, fb)

    return (logits_p[:batch_size, :ncls],
            k_p[:batch_size, :Cf],
            u_p[:batch_size, :MV])


# ---------------------------------------------------------------------------
# Pure-JAX reference (mirrors the PyTorch forward semantics, eval mode).
# x / conv_w are quantized to bf16 to match the kernel's bf16 feed (f32 math).
# ---------------------------------------------------------------------------
def ref_forward(batch_size, max_num_views, num_views, x, params):
    N, Cin, H, W = x.shape
    xq = x.astype(jnp.bfloat16).astype(jnp.float32)
    cwq = params["conv_w"].astype(jnp.bfloat16).astype(jnp.float32)
    xf = xq.reshape(N, Cin, H * W)
    fm = jnp.einsum("fc,nch->nfh", cwq, xf) + params["conv_b"][None, :, None]
    fm = jnp.maximum(fm, 0.0)
    feats = fm.mean(-1)                                   # (N, Cf) extractor output
    ks, us = [], []
    for i in range(batch_size):
        nv = int(num_views[i])
        z = feats[i * max_num_views: i * max_num_views + nv]   # (nv, Cf)
        ks.append(z.max(0))
        amax = jnp.argmax(z, axis=0)                            # first max index
        util = jnp.zeros(max_num_views).at[amax].add(1.0)
        us.append(util / util.sum())
    k = jnp.stack(ks)
    u = jnp.stack(us)
    logits = k @ params["fc_w"] + params["fc_b"][None, :]
    return logits, k, u


if __name__ == "__main__":
    batch_size = 16            # -> 2 batch blocks of TB=8 (even parallel grid)
    max_num_views = 3
    Cin, H, W = 4, 16, 16
    Cf, ncls = 32, 10
    N = batch_size * max_num_views

    key = jax.random.PRNGKey(0)
    k1, k2, k3, k4, k5, k6 = jax.random.split(key, 6)
    params = {
        "conv_w": jax.random.normal(k1, (Cf, Cin), jnp.float32) * 0.1,
        "conv_b": jax.random.normal(k2, (Cf,), jnp.float32) * 0.1,
        "fc_w": jax.random.normal(k3, (Cf, ncls), jnp.float32) * 0.1,
        "fc_b": jax.random.normal(k4, (ncls,), jnp.float32) * 0.1,
    }
    x = jax.random.normal(k5, (N, Cin, H, W), jnp.float32)
    num_views = jax.random.randint(k6, (batch_size,), 1, max_num_views + 1).astype(jnp.int32)

    logits, k, u = mvcnn_new_forward(batch_size, max_num_views, num_views, x, params)
    jax.block_until_ready((logits, k, u))

    ref_logits, ref_k, ref_u = ref_forward(batch_size, max_num_views, num_views, x, params)
    assert jnp.allclose(k, ref_k, atol=1e-3, rtol=1e-3), float(jnp.abs(k - ref_k).max())
    assert jnp.allclose(u, ref_u, atol=1e-3, rtol=1e-3), float(jnp.abs(u - ref_u).max())
    assert jnp.allclose(logits, ref_logits, atol=1e-3, rtol=1e-3), \
        float(jnp.abs(logits - ref_logits).max())

    print("KERNEL_OK")
</pallas_src>

<mosaic_0001>
module attributes {stable_mosaic.version = 11 : i64} {
  func.func @mvcnn_fused_kernel(%arg0: i32, %arg1: memref<16xi32, #tpu.memory_space<smem>>, %arg2: memref<8x4x768xbf16, #tpu.memory_space<vmem>>, %arg3: memref<128x4xbf16, #tpu.memory_space<vmem>>, %arg4: memref<128x1xf32, #tpu.memory_space<vmem>>, %arg5: memref<128x128xf32, #tpu.memory_space<vmem>>, %arg6: memref<1x128xf32, #tpu.memory_space<vmem>>, %arg7: memref<8x128xf32, #tpu.memory_space<vmem>>, %arg8: memref<8x128xf32, #tpu.memory_space<vmem>>, %arg9: memref<8x128xf32, #tpu.memory_space<vmem>>) attributes {dimension_semantics = [#tpu.dimension_semantics<parallel>], iteration_bounds = array<i64: 2>, scalar_prefetch = 1 : i64, scratch_operands = 0 : i64, tpu.core_type = #tpu.core_type<tc>, window_params = [{transform_indices = @transform_0, window_bounds = array<i64: 8, 4, 768>}, {pipeline_mode = #tpu.pipeline_mode<synchronous>, transform_indices = @transform_1, window_bounds = array<i64: 128, 4>}, {pipeline_mode = #tpu.pipeline_mode<synchronous>, transform_indices = @transform_2, window_bounds = array<i64: 128, 1>}, {pipeline_mode = #tpu.pipeline_mode<synchronous>, transform_indices = @transform_3, window_bounds = array<i64: 128, 128>}, {pipeline_mode = #tpu.pipeline_mode<synchronous>, transform_indices = @transform_4, window_bounds = array<i64: 1, 128>}, {transform_indices = @transform_5, window_bounds = array<i64: 8, 128>}, {transform_indices = @transform_6, window_bounds = array<i64: 8, 128>}, {transform_indices = @transform_7, window_bounds = array<i64: 8, 128>}]} {
    %c0 = arith.constant 0 : index
    %c0_0 = arith.constant 0 : index
    %0 = vector.load %arg3[%c0, %c0_0] : memref<128x4xbf16, #tpu.memory_space<vmem>>, vector<128x4xbf16>
    %c0_1 = arith.constant 0 : index
    %c0_2 = arith.constant 0 : index
    %1 = vector.load %arg4[%c0_1, %c0_2] : memref<128x1xf32, #tpu.memory_space<vmem>>, vector<128x1xf32>
    %2 = vector.shape_cast %1 : vector<128x1xf32> to vector<128x1xf32>
    %3 = vector.broadcast %2 : vector<128x1xf32> to vector<128x768xf32>
    %4 = tpu.iota {dimensions = array<i32: 1>} : vector<128x3xi32>
    %5 = tpu.iota {dimensions = array<i32: 0>} : vector<128x3xi32>
    %c8_i32 = arith.constant 8 : i32
    %6 = arith.muli %arg0, %c8_i32 : i32
    %c0_i32 = arith.constant 0 : i32
    %7 = arith.addi %6, %c0_i32 : i32
    %8 = arith.index_cast %7 : i32 to index
    %9 = memref.load %arg1[%8] : memref<16xi32, #tpu.memory_space<smem>>
    %c0_3 = arith.constant 0 : index
    %c0_4 = arith.constant 0 : index
    %c0_5 = arith.constant 0 : index
    %10 = vector.load %arg2[%c0_3, %c0_4, %c0_5] : memref<8x4x768xbf16, #tpu.memory_space<vmem>>, vector<1x4x768xbf16>
    %11 = vector.shape_cast %10 : vector<1x4x768xbf16> to vector<4x768xbf16>
    %cst = arith.constant dense<0.000000e+00> : vector<128x768xf32>
    %12 = tpu.matmul %0, %11, %cst {dimension_numbers = #tpu.dot_dimension_numbers<[1], [0], [0], [1], [0, 0, 1, 1], [], []>} : vector<128x4xbf16>, vector<4x768xbf16>, vector<128x768xf32> -> vector<128x768xf32>
    %13 = arith.addf %12, %3 : vector<128x768xf32>
    %cst_6 = arith.constant 0.000000e+00 : f32
    %14 = vector.broadcast %cst_6 : f32 to vector<128x768xf32>
    %15 = arith.maximumf %13, %14 : vector<128x768xf32>
    %16 = vector.extract_strided_slice %15 {offsets = [0, 0], sizes = [128, 256], strides = [1, 1]} : vector<128x768xf32> to vector<128x256xf32>
    %cst_7 = arith.constant dense<0.000000e+00> : vector<128xf32>
    %17 = vector.multi_reduction <add>, %16, %cst_7 [1] : vector<128x256xf32> to vector<128xf32>
    %18 = vector.shape_cast %17 : vector<128xf32> to vector<128x1xf32>
    %19 = vector.extract_strided_slice %15 {offsets = [0, 256], sizes = [128, 256], strides = [1, 1]} : vector<128x768xf32> to vector<128x256xf32>
    %cst_8 = arith.constant dense<0.000000e+00> : vector<128xf32>
    %20 = vector.multi_reduction <add>, %19, %cst_8 [1] : vector<128x256xf32> to vector<128xf32>
    %21 = vector.shape_cast %20 : vector<128xf32> to vector<128x1xf32>
    %22 = vector.extract_strided_slice %15 {offsets = [0, 512], sizes = [128, 256], strides = [1, 1]} : vector<128x768xf32> to vector<128x256xf32>
    %cst_9 = arith.constant dense<0.000000e+00> : vector<128xf32>
    %23 = vector.multi_reduction <add>, %22, %cst_9 [1] : vector<128x256xf32> to vector<128xf32>
    %24 = vector.shape_cast %23 : vector<128xf32> to vector<128x1xf32>
    %25 = tpu.concatenate %18, %21, %24 in 1 : vector<128x1xf32>, vector<128x1xf32>, vector<128x1xf32> -> vector<128x3xf32>
    %cst_10 = arith.constant 3.906250e-03 : f32
    %26 = vector.broadcast %cst_10 : f32 to vector<128x3xf32>
    %27 = arith.mulf %25, %26 : vector<128x3xf32>
    %28 = vector.broadcast %9 : i32 to vector<128x3xi32>
    %29 = arith.cmpi slt, %4, %28 : vector<128x3xi32>
    %cst_11 = arith.constant -3.40282347E+38 : f32
    %30 = vector.broadcast %cst_11 : f32 to vector<128x3xf32>
    %31 = arith.select %29, %27, %30 : vector<128x3xi1>, vector<128x3xf32>
    %cst_12 = arith.constant dense<0xFF800000> : vector<128xf32>
    %32 = vector.multi_reduction <maximumf>, %31, %cst_12 [1] : vector<128x3xf32> to vector<128xf32>
    %33 = vector.shape_cast %32 : vector<128xf32> to vector<128x1xf32>
    %34 = vector.broadcast %33 : vector<128x1xf32> to vector<128x3xf32>
    %35 = arith.cmpf oeq, %31, %34 : vector<128x3xf32>
    %c3_i32 = arith.constant 3 : i32
    %36 = vector.broadcast %c3_i32 : i32 to vector<128x3xi32>
    %37 = arith.select %35, %4, %36 : vector<128x3xi1>, vector<128x3xi32>
    %cst_13 = arith.constant dense<2147483647> : vector<128xi32>
    %38 = vector.multi_reduction <minsi>, %37, %cst_13 [1] : vector<128x3xi32> to vector<128xi32>
    %39 = vector.shape_cast %38 : vector<128xi32> to vector<128x1xi32>
    %40 = vector.broadcast %39 : vector<128x1xi32> to vector<128x3xi32>
    %41 = arith.cmpi eq, %4, %40 : vector<128x3xi32>
    %c32_i32 = arith.constant 32 : i32
    %42 = vector.broadcast %c32_i32 : i32 to vector<128x3xi32>
    %43 = arith.cmpi slt, %5, %42 : vector<128x3xi32>
    %44 = arith.andi %41, %43 : vector<128x3xi1>
    %cst_14 = arith.constant 1.000000e+00 : f32
    %cst_15 = arith.constant 0.000000e+00 : f32
    %45 = vector.broadcast %cst_14 : f32 to vector<128x3xf32>
    %46 = vector.broadcast %cst_15 : f32 to vector<128x3xf32>
    %47 = arith.select %44, %45, %46 : vector<128x3xi1>, vector<128x3xf32>
    %cst_16 = arith.constant dense<0.000000e+00> : vector<3xf32>
    %48 = vector.multi_reduction <add>, %47, %cst_16 [0] : vector<128x3xf32> to vector<3xf32>
    %49 = vector.shape_cast %48 : vector<3xf32> to vector<1x3xf32>
    %cst_17 = arith.constant 3.125000e-02 : f32
    %50 = vector.broadcast %cst_17 : f32 to vector<1x3xf32>
    %51 = arith.mulf %49, %50 : vector<1x3xf32>
    %c8_i32_18 = arith.constant 8 : i32
    %52 = arith.muli %arg0, %c8_i32_18 : i32
    %c1_i32 = arith.constant 1 : i32
    %53 = arith.addi %52, %c1_i32 : i32
    %54 = arith.index_cast %53 : i32 to index
    %55 = memref.load %arg1[%54] : memref<16xi32, #tpu.memory_space<smem>>
    %c1 = arith.constant 1 : index
    %c0_19 = arith.constant 0 : index
    %c0_20 = arith.constant 0 : index
    %56 = vector.load %arg2[%c1, %c0_19, %c0_20] : memref<8x4x768xbf16, #tpu.memory_space<vmem>>, vector<1x4x768xbf16>
    %57 = vector.shape_cast %56 : vector<1x4x768xbf16> to vector<4x768xbf16>
    %cst_21 = arith.constant dense<0.000000e+00> : vector<128x768xf32>
    %58 = tpu.matmul %0, %57, %cst_21 {dimension_numbers = #tpu.dot_dimension_numbers<[1], [0], [0], [1], [0, 0, 1, 1], [], []>} : vector<128x4xbf16>, vector<4x768xbf16>, vector<128x768xf32> -> vector<128x768xf32>
    %59 = arith.addf %58, %3 : vector<128x768xf32>
    %cst_22 = arith.constant 0.000000e+00 : f32
    %60 = vector.broadcast %cst_22 : f32 to vector<128x768xf32>
    %61 = arith.maximumf %59, %60 : vector<128x768xf32>
    %62 = vector.extract_strided_slice %61 {offsets = [0, 0], sizes = [128, 256], strides = [1, 1]} : vector<128x768xf32> to vector<128x256xf32>
    %cst_23 = arith.constant dense<0.000000e+00> : vector<128xf32>
    %63 = vector.multi_reduction <add>, %62, %cst_23 [1] : vector<128x256xf32> to vector<128xf32>
    %64 = vector.shape_cast %63 : vector<128xf32> to vector<128x1xf32>
    %65 = vector.extract_strided_slice %61 {offsets = [0, 256], sizes = [128, 256], strides = [1, 1]} : vector<128x768xf32> to vector<128x256xf32>
    %cst_24 = arith.constant dense<0.000000e+00> : vector<128xf32>
    %66 = vector.multi_reduction <add>, %65, %cst_24 [1] : vector<128x256xf32> to vector<128xf32>
    %67 = vector.shape_cast %66 : vector<128xf32> to vector<128x1xf32>
    %68 = vector.extract_strided_slice %61 {offsets = [0, 512], sizes = [128, 256], strides = [1, 1]} : vector<128x768xf32> to vector<128x256xf32>
    %cst_25 = arith.constant dense<0.000000e+00> : vector<128xf32>
    %69 = vector.multi_reduction <add>, %68, %cst_25 [1] : vector<128x256xf32> to vector<128xf32>
    %70 = vector.shape_cast %69 : vector<128xf32> to vector<128x1xf32>
    %71 = tpu.concatenate %64, %67, %70 in 1 : vector<128x1xf32>, vector<128x1xf32>, vector<128x1xf32> -> vector<128x3xf32>
    %cst_26 = arith.constant 3.906250e-03 : f32
    %72 = vector.broadcast %cst_26 : f32 to vector<128x3xf32>
    %73 = arith.mulf %71, %72 : vector<128x3xf32>
    %74 = vector.broadcast %55 : i32 to vector<128x3xi32>
    %75 = arith.cmpi slt, %4, %74 : vector<128x3xi32>
    %cst_27 = arith.constant -3.40282347E+38 : f32
    %76 = vector.broadcast %cst_27 : f32 to vector<128x3xf32>
    %77 = arith.select %75, %73, %76 : vector<128x3xi1>, vector<128x3xf32>
    %cst_28 = arith.constant dense<0xFF800000> : vector<128xf32>
    %78 = vector.multi_reduction <maximumf>, %77, %cst_28 [1] : vector<128x3xf32> to vector<128xf32>
    %79 = vector.shape_cast %78 : vector<128xf32> to vector<128x1xf32>
    %80 = vector.broadcast %79 : vector<128x1xf32> to vector<128x3xf32>
    %81 = arith.cmpf oeq, %77, %80 : vector<128x3xf32>
    %c3_i32_29 = arith.constant 3 : i32
    %82 = vector.broadcast %c3_i32_29 : i32 to vector<128x3xi32>
    %83 = arith.select %81, %4, %82 : vector<128x3xi1>, vector<128x3xi32>
    %cst_30 = arith.constant dense<2147483647> : vector<128xi32>
    %84 = vector.multi_reduction <minsi>, %83, %cst_30 [1] : vector<128x3xi32> to vector<128xi32>
    %85 = vector.shape_cast %84 : vector<128xi32> to vector<128x1xi32>
    %86 = vector.broadcast %85 : vector<128x1xi32> to vector<128x3xi32>
    %87 = arith.cmpi eq, %4, %86 : vector<128x3xi32>
    %c32_i32_31 = arith.constant 32 : i32
    %88 = vector.broadcast %c32_i32_31 : i32 to vector<128x3xi32>
    %89 = arith.cmpi slt, %5, %88 : vector<128x3xi32>
    %90 = arith.andi %87, %89 : vector<128x3xi1>
    %cst_32 = arith.constant 1.000000e+00 : f32
    %cst_33 = arith.constant 0.000000e+00 : f32
    %91 = vector.broadcast %cst_32 : f32 to vector<128x3xf32>
    %92 = vector.broadcast %cst_33 : f32 to vector<128x3xf32>
    %93 = arith.select %90, %91, %92 : vector<128x3xi1>, vector<128x3xf32>
    %cst_34 = arith.constant dense<0.000000e+00> : vector<3xf32>
    %94 = vector.multi_reduction <add>, %93, %cst_34 [0] : vector<128x3xf32> to vector<3xf32>
    %95 = vector.shape_cast %94 : vector<3xf32> to vector<1x3xf32>
    %cst_35 = arith.constant 3.125000e-02 : f32
    %96 = vector.broadcast %cst_35 : f32 to vector<1x3xf32>
    %97 = arith.mulf %95, %96 : vector<1x3xf32>
    %c8_i32_36 = arith.constant 8 : i32
    %98 = arith.muli %arg0, %c8_i32_36 : i32
    %c2_i32 = arith.constant 2 : i32
    %99 = arith.addi %98, %c2_i32 : i32
    %100 = arith.index_cast %99 : i32 to index
    %101 = memref.load %arg1[%100] : memref<16xi32, #tpu.memory_space<smem>>
    %c2 = arith.constant 2 : index
    %c0_37 = arith.constant 0 : index
    %c0_38 = arith.constant 0 : index
    %102 = vector.load %arg2[%c2, %c0_37, %c0_38] : memref<8x4x768xbf16, #tpu.memory_space<vmem>>, vector<1x4x768xbf16>
    %103 = vector.shape_cast %102 : vector<1x4x768xbf16> to vector<4x768xbf16>
    %cst_39 = arith.constant dense<0.000000e+00> : vector<128x768xf32>
    %104 = tpu.matmul %0, %103, %cst_39 {dimension_numbers = #tpu.dot_dimension_numbers<[1], [0], [0], [1], [0, 0, 1, 1], [], []>} : vector<128x4xbf16>, vector<4x768xbf16>, vector<128x768xf32> -> vector<128x768xf32>
    %105 = arith.addf %104, %3 : vector<128x768xf32>
    %cst_40 = arith.constant 0.000000e+00 : f32
    %106 = vector.broadcast %cst_40 : f32 to vector<128x768xf32>
    %107 = arith.maximumf %105, %106 : vector<128x768xf32>
    %108 = vector.extract_strided_slice %107 {offsets = [0, 0], sizes = [128, 256], strides = [1, 1]} : vector<128x768xf32> to vector<128x256xf32>
    %cst_41 = arith.constant dense<0.000000e+00> : vector<128xf32>
    %109 = vector.multi_reduction <add>, %108, %cst_41 [1] : vector<128x256xf32> to vector<128xf32>
    %110 = vector.shape_cast %109 : vector<128xf32> to vector<128x1xf32>
    %111 = vector.extract_strided_slice %107 {offsets = [0, 256], sizes = [128, 256], strides = [1, 1]} : vector<128x768xf32> to vector<128x256xf32>
    %cst_42 = arith.constant dense<0.000000e+00> : vector<128xf32>
    %112 = vector.multi_reduction <add>, %111, %cst_42 [1] : vector<128x256xf32> to vector<128xf32>
    %113 = vector.shape_cast %112 : vector<128xf32> to vector<128x1xf32>
    %114 = vector.extract_strided_slice %107 {offsets = [0, 512], sizes = [128, 256], strides = [1, 1]} : vector<128x768xf32> to vector<128x256xf32>
    %cst_43 = arith.constant dense<0.000000e+00> : vector<128xf32>
    %115 = vector.multi_reduction <add>, %114, %cst_43 [1] : vector<128x256xf32> to vector<128xf32>
    %116 = vector.shape_cast %115 : vector<128xf32> to vector<128x1xf32>
    %117 = tpu.concatenate %110, %113, %116 in 1 : vector<128x1xf32>, vector<128x1xf32>, vector<128x1xf32> -> vector<128x3xf32>
    %cst_44 = arith.constant 3.906250e-03 : f32
    %118 = vector.broadcast %cst_44 : f32 to vector<128x3xf32>
    %119 = arith.mulf %117, %118 : vector<128x3xf32>
    %120 = vector.broadcast %101 : i32 to vector<128x3xi32>
    %121 = arith.cmpi slt, %4, %120 : vector<128x3xi32>
    %cst_45 = arith.constant -3.40282347E+38 : f32
    %122 = vector.broadcast %cst_45 : f32 to vector<128x3xf32>
    %123 = arith.select %121, %119, %122 : vector<128x3xi1>, vector<128x3xf32>
    %cst_46 = arith.constant dense<0xFF800000> : vector<128xf32>
    %124 = vector.multi_reduction <maximumf>, %123, %cst_46 [1] : vector<128x3xf32> to vector<128xf32>
    %125 = vector.shape_cast %124 : vector<128xf32> to vector<128x1xf32>
    %126 = vector.broadcast %125 : vector<128x1xf32> to vector<128x3xf32>
    %127 = arith.cmpf oeq, %123, %126 : vector<128x3xf32>
    %c3_i32_47 = arith.constant 3 : i32
    %128 = vector.broadcast %c3_i32_47 : i32 to vector<128x3xi32>
    %129 = arith.select %127, %4, %128 : vector<128x3xi1>, vector<128x3xi32>
    %cst_48 = arith.constant dense<2147483647> : vector<128xi32>
    %130 = vector.multi_reduction <minsi>, %129, %cst_48 [1] : vector<128x3xi32> to vector<128xi32>
    %131 = vector.shape_cast %130 : vector<128xi32> to vector<128x1xi32>
    %132 = vector.broadcast %131 : vector<128x1xi32> to vector<128x3xi32>
    %133 = arith.cmpi eq, %4, %132 : vector<128x3xi32>
    %c32_i32_49 = arith.constant 32 : i32
    %134 = vector.broadcast %c32_i32_49 : i32 to vector<128x3xi32>
    %135 = arith.cmpi slt, %5, %134 : vector<128x3xi32>
    %136 = arith.andi %133, %135 : vector<128x3xi1>
    %cst_50 = arith.constant 1.000000e+00 : f32
    %cst_51 = arith.constant 0.000000e+00 : f32
    %137 = vector.broadcast %cst_50 : f32 to vector<128x3xf32>
    %138 = vector.broadcast %cst_51 : f32 to vector<128x3xf32>
    %139 = arith.select %136, %137, %138 : vector<128x3xi1>, vector<128x3xf32>
    %cst_52 = arith.constant dense<0.000000e+00> : vector<3xf32>
    %140 = vector.multi_reduction <add>, %139, %cst_52 [0] : vector<128x3xf32> to vector<3xf32>
    %141 = vector.shape_cast %140 : vector<3xf32> to vector<1x3xf32>
    %cst_53 = arith.constant 3.125000e-02 : f32
    %142 = vector.broadcast %cst_53 : f32 to vector<1x3xf32>
    %143 = arith.mulf %141, %142 : vector<1x3xf32>
    %c8_i32_54 = arith.constant 8 : i32
    %144 = arith.muli %arg0, %c8_i32_54 : i32
    %c3_i32_55 = arith.constant 3 : i32
    %145 = arith.addi %144, %c3_i32_55 : i32
    %146 = arith.index_cast %145 : i32 to index
    %147 = memref.load %arg1[%146] : memref<16xi32, #tpu.memory_space<smem>>
    %c3 = arith.constant 3 : index
    %c0_56 = arith.constant 0 : index
    %c0_57 = arith.constant 0 : index
    %148 = vector.load %arg2[%c3, %c0_56, %c0_57] : memref<8x4x768xbf16, #tpu.memory_space<vmem>>, vector<1x4x768xbf16>
    %149 = vector.shape_cast %148 : vector<1x4x768xbf16> to vector<4x768xbf16>
    %cst_58 = arith.constant dense<0.000000e+00> : vector<128x768xf32>
    %150 = tpu.matmul %0, %149, %cst_58 {dimension_numbers = #tpu.dot_dimension_numbers<[1], [0], [0], [1], [0, 0, 1, 1], [], []>} : vector<128x4xbf16>, vector<4x768xbf16>, vector<128x768xf32> -> vector<128x768xf32>
    %151 = arith.addf %150, %3 : vector<128x768xf32>
    %cst_59 = arith.constant 0.000000e+00 : f32
    %152 = vector.broadcast %cst_59 : f32 to vector<128x768xf32>
    %153 = arith.maximumf %151, %152 : vector<128x768xf32>
    %154 = vector.extract_strided_slice %153 {offsets = [0, 0], sizes = [128, 256], strides = [1, 1]} : vector<128x768xf32> to vector<128x256xf32>
    %cst_60 = arith.constant dense<0.000000e+00> : vector<128xf32>
    %155 = vector.multi_reduction <add>, %154, %cst_60 [1] : vector<128x256xf32> to vector<128xf32>
    %156 = vector.shape_cast %155 : vector<128xf32> to vector<128x1xf32>
    %157 = vector.extract_strided_slice %153 {offsets = [0, 256], sizes = [128, 256], strides = [1, 1]} : vector<128x768xf32> to vector<128x256xf32>
    %cst_61 = arith.constant dense<0.000000e+00> : vector<128xf32>
    %158 = vector.multi_reduction <add>, %157, %cst_61 [1] : vector<128x256xf32> to vector<128xf32>
    %159 = vector.shape_cast %158 : vector<128xf32> to vector<128x1xf32>
    %160 = vector.extract_strided_slice %153 {offsets = [0, 512], sizes = [128, 256], strides = [1, 1]} : vector<128x768xf32> to vector<128x256xf32>
    %cst_62 = arith.constant dense<0.000000e+00> : vector<128xf32>
    %161 = vector.multi_reduction <add>, %160, %cst_62 [1] : vector<128x256xf32> to vector<128xf32>
    %162 = vector.shape_cast %161 : vector<128xf32> to vector<128x1xf32>
    %163 = tpu.concatenate %156, %159, %162 in 1 : vector<128x1xf32>, vector<128x1xf32>, vector<128x1xf32> -> vector<128x3xf32>
    %cst_63 = arith.constant 3.906250e-03 : f32
    %164 = vector.broadcast %cst_63 : f32 to vector<128x3xf32>
    %165 = arith.mulf %163, %164 : vector<128x3xf32>
    %166 = vector.broadcast %147 : i32 to vector<128x3xi32>
    %167 = arith.cmpi slt, %4, %166 : vector<128x3xi32>
    %cst_64 = arith.constant -3.40282347E+38 : f32
    %168 = vector.broadcast %cst_64 : f32 to vector<128x3xf32>
    %169 = arith.select %167, %165, %168 : vector<128x3xi1>, vector<128x3xf32>
    %cst_65 = arith.constant dense<0xFF800000> : vector<128xf32>
    %170 = vector.multi_reduction <maximumf>, %169, %cst_65 [1] : vector<128x3xf32> to vector<128xf32>
    %171 = vector.shape_cast %170 : vector<128xf32> to vector<128x1xf32>
    %172 = vector.broadcast %171 : vector<128x1xf32> to vector<128x3xf32>
    %173 = arith.cmpf oeq, %169, %172 : vector<128x3xf32>
    %c3_i32_66 = arith.constant 3 : i32
    %174 = vector.broadcast %c3_i32_66 : i32 to vector<128x3xi32>
    %175 = arith.select %173, %4, %174 : vector<128x3xi1>, vector<128x3xi32>
    %cst_67 = arith.constant dense<2147483647> : vector<128xi32>
    %176 = vector.multi_reduction <minsi>, %175, %cst_67 [1] : vector<128x3xi32> to vector<128xi32>
    %177 = vector.shape_cast %176 : vector<128xi32> to vector<128x1xi32>
    %178 = vector.broadcast %177 : vector<128x1xi32> to vector<128x3xi32>
    %179 = arith.cmpi eq, %4, %178 : vector<128x3xi32>
    %c32_i32_68 = arith.constant 32 : i32
    %180 = vector.broadcast %c32_i32_68 : i32 to vector<128x3xi32>
    %181 = arith.cmpi slt, %5, %180 : vector<128x3xi32>
    %182 = arith.andi %179, %181 : vector<128x3xi1>
    %cst_69 = arith.constant 1.000000e+00 : f32
    %cst_70 = arith.constant 0.000000e+00 : f32
    %183 = vector.broadcast %cst_69 : f32 to vector<128x3xf32>
    %184 = vector.broadcast %cst_70 : f32 to vector<128x3xf32>
    %185 = arith.select %182, %183, %184 : vector<128x3xi1>, vector<128x3xf32>
    %cst_71 = arith.constant dense<0.000000e+00> : vector<3xf32>
    %186 = vector.multi_reduction <add>, %185, %cst_71 [0] : vector<128x3xf32> to vector<3xf32>
    %187 = vector.shape_cast %186 : vector<3xf32> to vector<1x3xf32>
    %cst_72 = arith.constant 3.125000e-02 : f32
    %188 = vector.broadcast %cst_72 : f32 to vector<1x3xf32>
    %189 = arith.mulf %187, %188 : vector<1x3xf32>
    %c8_i32_73 = arith.constant 8 : i32
    %190 = arith.muli %arg0, %c8_i32_73 : i32
    %c4_i32 = arith.constant 4 : i32
    %191 = arith.addi %190, %c4_i32 : i32
    %192 = arith.index_cast %191 : i32 to index
    %193 = memref.load %arg1[%192] : memref<16xi32, #tpu.memory_space<smem>>
    %c4 = arith.constant 4 : index
    %c0_74 = arith.constant 0 : index
    %c0_75 = arith.constant 0 : index
    %194 = vector.load %arg2[%c4, %c0_74, %c0_75] : memref<8x4x768xbf16, #tpu.memory_space<vmem>>, vector<1x4x768xbf16>
    %195 = vector.shape_cast %194 : vector<1x4x768xbf16> to vector<4x768xbf16>
    %cst_76 = arith.constant dense<0.000000e+00> : vector<128x768xf32>
    %196 = tpu.matmul %0, %195, %cst_76 {dimension_numbers = #tpu.dot_dimension_numbers<[1], [0], [0], [1], [0, 0, 1, 1], [], []>} : vector<128x4xbf16>, vector<4x768xbf16>, vector<128x768xf32> -> vector<128x768xf32>
    %197 = arith.addf %196, %3 : vector<128x768xf32>
    %cst_77 = arith.constant 0.000000e+00 : f32
    %198 = vector.broadcast %cst_77 : f32 to vector<128x768xf32>
    %199 = arith.maximumf %197, %198 : vector<128x768xf32>
    %200 = vector.extract_strided_slice %199 {offsets = [0, 0], sizes = [128, 256], strides = [1, 1]} : vector<128x768xf32> to vector<128x256xf32>
    %cst_78 = arith.constant dense<0.000000e+00> : vector<128xf32>
    %201 = vector.multi_reduction <add>, %200, %cst_78 [1] : vector<128x256xf32> to vector<128xf32>
    %202 = vector.shape_cast %201 : vector<128xf32> to vector<128x1xf32>
    %203 = vector.extract_strided_slice %199 {offsets = [0, 256], sizes = [128, 256], strides = [1, 1]} : vector<128x768xf32> to vector<128x256xf32>
    %cst_79 = arith.constant dense<0.000000e+00> : vector<128xf32>
    %204 = vector.multi_reduction <add>, %203, %cst_79 [1] : vector<128x256xf32> to vector<128xf32>
    %205 = vector.shape_cast %204 : vector<128xf32> to vector<128x1xf32>
    %206 = vector.extract_strided_slice %199 {offsets = [0, 512], sizes = [128, 256], strides = [1, 1]} : vector<128x768xf32> to vector<128x256xf32>
    %cst_80 = arith.constant dense<0.000000e+00> : vector<128xf32>
    %207 = vector.multi_reduction <add>, %206, %cst_80 [1] : vector<128x256xf32> to vector<128xf32>
    %208 = vector.shape_cast %207 : vector<128xf32> to vector<128x1xf32>
    %209 = tpu.concatenate %202, %205, %208 in 1 : vector<128x1xf32>, vector<128x1xf32>, vector<128x1xf32> -> vector<128x3xf32>
    %cst_81 = arith.constant 3.906250e-03 : f32
    %210 = vector.broadcast %cst_81 : f32 to vector<128x3xf32>
    %211 = arith.mulf %209, %210 : vector<128x3xf32>
    %212 = vector.broadcast %193 : i32 to vector<128x3xi32>
    %213 = arith.cmpi slt, %4, %212 : vector<128x3xi32>
    %cst_82 = arith.constant -3.40282347E+38 : f32
    %214 = vector.broadcast %cst_82 : f32 to vector<128x3xf32>
    %215 = arith.select %213, %211, %214 : vector<128x3xi1>, vector<128x3xf32>
    %cst_83 = arith.constant dense<0xFF800000> : vector<128xf32>
    %216 = vector.multi_reduction <maximumf>, %215, %cst_83 [1] : vector<128x3xf32> to vector<128xf32>
    %217 = vector.shape_cast %216 : vector<128xf32> to vector<128x1xf32>
    %218 = vector.broadcast %217 : vector<128x1xf32> to vector<128x3xf32>
    %219 = arith.cmpf oeq, %215, %218 : vector<128x3xf32>
    %c3_i32_84 = arith.constant 3 : i32
    %220 = vector.broadcast %c3_i32_84 : i32 to vector<128x3xi32>
    %221 = arith.select %219, %4, %220 : vector<128x3xi1>, vector<128x3xi32>
    %cst_85 = arith.constant dense<2147483647> : vector<128xi32>
    %222 = vector.multi_reduction <minsi>, %221, %cst_85 [1] : vector<128x3xi32> to vector<128xi32>
    %223 = vector.shape_cast %222 : vector<128xi32> to vector<128x1xi32>
    %224 = vector.broadcast %223 : vector<128x1xi32> to vector<128x3xi32>
    %225 = arith.cmpi eq, %4, %224 : vector<128x3xi32>
    %c32_i32_86 = arith.constant 32 : i32
    %226 = vector.broadcast %c32_i32_86 : i32 to vector<128x3xi32>
    %227 = arith.cmpi slt, %5, %226 : vector<128x3xi32>
    %228 = arith.andi %225, %227 : vector<128x3xi1>
    %cst_87 = arith.constant 1.000000e+00 : f32
    %cst_88 = arith.constant 0.000000e+00 : f32
    %229 = vector.broadcast %cst_87 : f32 to vector<128x3xf32>
    %230 = vector.broadcast %cst_88 : f32 to vector<128x3xf32>
    %231 = arith.select %228, %229, %230 : vector<128x3xi1>, vector<128x3xf32>
    %cst_89 = arith.constant dense<0.000000e+00> : vector<3xf32>
    %232 = vector.multi_reduction <add>, %231, %cst_89 [0] : vector<128x3xf32> to vector<3xf32>
    %233 = vector.shape_cast %232 : vector<3xf32> to vector<1x3xf32>
    %cst_90 = arith.constant 3.125000e-02 : f32
    %234 = vector.broadcast %cst_90 : f32 to vector<1x3xf32>
    %235 = arith.mulf %233, %234 : vector<1x3xf32>
    %c8_i32_91 = arith.constant 8 : i32
    %236 = arith.muli %arg0, %c8_i32_91 : i32
    %c5_i32 = arith.constant 5 : i32
    %237 = arith.addi %236, %c5_i32 : i32
    %238 = arith.index_cast %237 : i32 to index
    %239 = memref.load %arg1[%238] : memref<16xi32, #tpu.memory_space<smem>>
    %c5 = arith.constant 5 : index
    %c0_92 = arith.constant 0 : index
    %c0_93 = arith.constant 0 : index
    %240 = vector.load %arg2[%c5, %c0_92, %c0_93] : memref<8x4x768xbf16, #tpu.memory_space<vmem>>, vector<1x4x768xbf16>
    %241 = vector.shape_cast %240 : vector<1x4x768xbf16> to vector<4x768xbf16>
    %cst_94 = arith.constant dense<0.000000e+00> : vector<128x768xf32>
    %242 = tpu.matmul %0, %241, %cst_94 {dimension_numbers = #tpu.dot_dimension_numbers<[1], [0], [0], [1], [0, 0, 1, 1], [], []>} : vector<128x4xbf16>, vector<4x768xbf16>, vector<128x768xf32> -> vector<128x768xf32>
    %243 = arith.addf %242, %3 : vector<128x768xf32>
    %cst_95 = arith.constant 0.000000e+00 : f32
    %244 = vector.broadcast %cst_95 : f32 to vector<128x768xf32>
    %245 = arith.maximumf %243, %244 : vector<128x768xf32>
    %246 = vector.extract_strided_slice %245 {offsets = [0, 0], sizes = [128, 256], strides = [1, 1]} : vector<128x768xf32> to vector<128x256xf32>
    %cst_96 = arith.constant dense<0.000000e+00> : vector<128xf32>
    %247 = vector.multi_reduction <add>, %246, %cst_96 [1] : vector<128x256xf32> to vector<128xf32>
    %248 = vector.shape_cast %247 : vector<128xf32> to vector<128x1xf32>
    %249 = vector.extract_strided_slice %245 {offsets = [0, 256], sizes = [128, 256], strides = [1, 1]} : vector<128x768xf32> to vector<128x256xf32>
    %cst_97 = arith.constant dense<0.000000e+00> : vector<128xf32>
    %250 = vector.multi_reduction <add>, %249, %cst_97 [1] : vector<128x256xf32> to vector<128xf32>
    %251 = vector.shape_cast %250 : vector<128xf32> to vector<128x1xf32>
    %252 = vector.extract_strided_slice %245 {offsets = [0, 512], sizes = [128, 256], strides = [1, 1]} : vector<128x768xf32> to vector<128x256xf32>
    %cst_98 = arith.constant dense<0.000000e+00> : vector<128xf32>
    %253 = vector.multi_reduction <add>, %252, %cst_98 [1] : vector<128x256xf32> to vector<128xf32>
    %254 = vector.shape_cast %253 : vector<128xf32> to vector<128x1xf32>
    %255 = tpu.concatenate %248, %251, %254 in 1 : vector<128x1xf32>, vector<128x1xf32>, vector<128x1xf32> -> vector<128x3xf32>
    %cst_99 = arith.constant 3.906250e-03 : f32
    %256 = vector.broadcast %cst_99 : f32 to vector<128x3xf32>
    %257 = arith.mulf %255, %256 : vector<128x3xf32>
    %258 = vector.broadcast %239 : i32 to vector<128x3xi32>
    %259 = arith.cmpi slt, %4, %258 : vector<128x3xi32>
    %cst_100 = arith.constant -3.40282347E+38 : f32
    %260 = vector.broadcast %cst_100 : f32 to vector<128x3xf32>
    %261 = arith.select %259, %257, %260 : vector<128x3xi1>, vector<128x3xf32>
    %cst_101 = arith.constant dense<0xFF800000> : vector<128xf32>
    %262 = vector.multi_reduction <maximumf>, %261, %cst_101 [1] : vector<128x3xf32> to vector<128xf32>
    %263 = vector.shape_cast %262 : vector<128xf32> to vector<128x1xf32>
    %264 = vector.broadcast %263 : vector<128x1xf32> to vector<128x3xf32>
    %265 = arith.cmpf oeq, %261, %264 : vector<128x3xf32>
    %c3_i32_102 = arith.constant 3 : i32
    %266 = vector.broadcast %c3_i32_102 : i32 to vector<128x3xi32>
    %267 = arith.select %265, %4, %266 : vector<128x3xi1>, vector<128x3xi32>
    %cst_103 = arith.constant dense<2147483647> : vector<128xi32>
    %268 = vector.multi_reduction <minsi>, %267, %cst_103 [1] : vector<128x3xi32> to vector<128xi32>
    %269 = vector.shape_cast %268 : vector<128xi32> to vector<128x1xi32>
    %270 = vector.broadcast %269 : vector<128x1xi32> to vector<128x3xi32>
    %271 = arith.cmpi eq, %4, %270 : vector<128x3xi32>
    %c32_i32_104 = arith.constant 32 : i32
    %272 = vector.broadcast %c32_i32_104 : i32 to vector<128x3xi32>
    %273 = arith.cmpi slt, %5, %272 : vector<128x3xi32>
    %274 = arith.andi %271, %273 : vector<128x3xi1>
    %cst_105 = arith.constant 1.000000e+00 : f32
    %cst_106 = arith.constant 0.000000e+00 : f32
    %275 = vector.broadcast %cst_105 : f32 to vector<128x3xf32>
    %276 = vector.broadcast %cst_106 : f32 to vector<128x3xf32>
    %277 = arith.select %274, %275, %276 : vector<128x3xi1>, vector<128x3xf32>
    %cst_107 = arith.constant dense<0.000000e+00> : vector<3xf32>
    %278 = vector.multi_reduction <add>, %277, %cst_107 [0] : vector<128x3xf32> to vector<3xf32>
    %279 = vector.shape_cast %278 : vector<3xf32> to vector<1x3xf32>
    %cst_108 = arith.constant 3.125000e-02 : f32
    %280 = vector.broadcast %cst_108 : f32 to vector<1x3xf32>
    %281 = arith.mulf %279, %280 : vector<1x3xf32>
    %c8_i32_109 = arith.constant 8 : i32
    %282 = arith.muli %arg0, %c8_i32_109 : i32
    %c6_i32 = arith.constant 6 : i32
    %283 = arith.addi %282, %c6_i32 : i32
    %284 = arith.index_cast %283 : i32 to index
    %285 = memref.load %arg1[%284] : memref<16xi32, #tpu.memory_space<smem>>
    %c6 = arith.constant 6 : index
    %c0_110 = arith.constant 0 : index
    %c0_111 = arith.constant 0 : index
    %286 = vector.load %arg2[%c6, %c0_110, %c0_111] : memref<8x4x768xbf16, #tpu.memory_space<vmem>>, vector<1x4x768xbf16>
    %287 = vector.shape_cast %286 : vector<1x4x768xbf16> to vector<4x768xbf16>
    %cst_112 = arith.constant dense<0.000000e+00> : vector<128x768xf32>
    %288 = tpu.matmul %0, %287, %cst_112 {dimension_numbers = #tpu.dot_dimension_numbers<[1], [0], [0], [1], [0, 0, 1, 1], [], []>} : vector<128x4xbf16>, vector<4x768xbf16>, vector<128x768xf32> -> vector<128x768xf32>
    %289 = arith.addf %288, %3 : vector<128x768xf32>
    %cst_113 = arith.constant 0.000000e+00 : f32
    %290 = vector.broadcast %cst_113 : f32 to vector<128x768xf32>
    %291 = arith.maximumf %289, %290 : vector<128x768xf32>
    %292 = vector.extract_strided_slice %291 {offsets = [0, 0], sizes = [128, 256], strides = [1, 1]} : vector<128x768xf32> to vector<128x256xf32>
    %cst_114 = arith.constant dense<0.000000e+00> : vector<128xf32>
    %293 = vector.multi_reduction <add>, %292, %cst_114 [1] : vector<128x256xf32> to vector<128xf32>
    %294 = vector.shape_cast %293 : vector<128xf32> to vector<128x1xf32>
    %295 = vector.extract_strided_slice %291 {offsets = [0, 256], sizes = [128, 256], strides = [1, 1]} : vector<128x768xf32> to vector<128x256xf32>
    %cst_115 = arith.constant dense<0.000000e+00> : vector<128xf32>
    %296 = vector.multi_reduction <add>, %295, %cst_115 [1] : vector<128x256xf32> to vector<128xf32>
    %297 = vector.shape_cast %296 : vector<128xf32> to vector<128x1xf32>
    %298 = vector.extract_strided_slice %291 {offsets = [0, 512], sizes = [128, 256], strides = [1, 1]} : vector<128x768xf32> to vector<128x256xf32>
    %cst_116 = arith.constant dense<0.000000e+00> : vector<128xf32>
    %299 = vector.multi_reduction <add>, %298, %cst_116 [1] : vector<128x256xf32> to vector<128xf32>
    %300 = vector.shape_cast %299 : vector<128xf32> to vector<128x1xf32>
    %301 = tpu.concatenate %294, %297, %300 in 1 : vector<128x1xf32>, vector<128x1xf32>, vector<128x1xf32> -> vector<128x3xf32>
    %cst_117 = arith.constant 3.906250e-03 : f32
    %302 = vector.broadcast %cst_117 : f32 to vector<128x3xf32>
    %303 = arith.mulf %301, %302 : vector<128x3xf32>
    %304 = vector.broadcast %285 : i32 to vector<128x3xi32>
    %305 = arith.cmpi slt, %4, %304 : vector<128x3xi32>
    %cst_118 = arith.constant -3.40282347E+38 : f32
    %306 = vector.broadcast %cst_118 : f32 to vector<128x3xf32>
    %307 = arith.select %305, %303, %306 : vector<128x3xi1>, vector<128x3xf32>
    %cst_119 = arith.constant dense<0xFF800000> : vector<128xf32>
    %308 = vector.multi_reduction <maximumf>, %307, %cst_119 [1] : vector<128x3xf32> to vector<128xf32>
    %309 = vector.shape_cast %308 : vector<128xf32> to vector<128x1xf32>
    %310 = vector.broadcast %309 : vector<128x1xf32> to vector<128x3xf32>
    %311 = arith.cmpf oeq, %307, %310 : vector<128x3xf32>
    %c3_i32_120 = arith.constant 3 : i32
    %312 = vector.broadcast %c3_i32_120 : i32 to vector<128x3xi32>
    %313 = arith.select %311, %4, %312 : vector<128x3xi1>, vector<128x3xi32>
    %cst_121 = arith.constant dense<2147483647> : vector<128xi32>
    %314 = vector.multi_reduction <minsi>, %313, %cst_121 [1] : vector<128x3xi32> to vector<128xi32>
    %315 = vector.shape_cast %314 : vector<128xi32> to vector<128x1xi32>
    %316 = vector.broadcast %315 : vector<128x1xi32> to vector<128x3xi32>
    %317 = arith.cmpi eq, %4, %316 : vector<128x3xi32>
    %c32_i32_122 = arith.constant 32 : i32
    %318 = vector.broadcast %c32_i32_122 : i32 to vector<128x3xi32>
    %319 = arith.cmpi slt, %5, %318 : vector<128x3xi32>
    %320 = arith.andi %317, %319 : vector<128x3xi1>
    %cst_123 = arith.constant 1.000000e+00 : f32
    %cst_124 = arith.constant 0.000000e+00 : f32
    %321 = vector.broadcast %cst_123 : f32 to vector<128x3xf32>
    %322 = vector.broadcast %cst_124 : f32 to vector<128x3xf32>
    %323 = arith.select %320, %321, %322 : vector<128x3xi1>, vector<128x3xf32>
    %cst_125 = arith.constant dense<0.000000e+00> : vector<3xf32>
    %324 = vector.multi_reduction <add>, %323, %cst_125 [0] : vector<128x3xf32> to vector<3xf32>
    %325 = vector.shape_cast %324 : vector<3xf32> to vector<1x3xf32>
    %cst_126 = arith.constant 3.125000e-02 : f32
    %326 = vector.broadcast %cst_126 : f32 to vector<1x3xf32>
    %327 = arith.mulf %325, %326 : vector<1x3xf32>
    %c8_i32_127 = arith.constant 8 : i32
    %328 = arith.muli %arg0, %c8_i32_127 : i32
    %c7_i32 = arith.constant 7 : i32
    %329 = arith.addi %328, %c7_i32 : i32
    %330 = arith.index_cast %329 : i32 to index
    %331 = memref.load %arg1[%330] : memref<16xi32, #tpu.memory_space<smem>>
    %c7 = arith.constant 7 : index
    %c0_128 = arith.constant 0 : index
    %c0_129 = arith.constant 0 : index
    %332 = vector.load %arg2[%c7, %c0_128, %c0_129] : memref<8x4x768xbf16, #tpu.memory_space<vmem>>, vector<1x4x768xbf16>
    %333 = vector.shape_cast %332 : vector<1x4x768xbf16> to vector<4x768xbf16>
    %cst_130 = arith.constant dense<0.000000e+00> : vector<128x768xf32>
    %334 = tpu.matmul %0, %333, %cst_130 {dimension_numbers = #tpu.dot_dimension_numbers<[1], [0], [0], [1], [0, 0, 1, 1], [], []>} : vector<128x4xbf16>, vector<4x768xbf16>, vector<128x768xf32> -> vector<128x768xf32>
    %335 = arith.addf %334, %3 : vector<128x768xf32>
    %cst_131 = arith.constant 0.000000e+00 : f32
    %336 = vector.broadcast %cst_131 : f32 to vector<128x768xf32>
    %337 = arith.maximumf %335, %336 : vector<128x768xf32>
    %338 = vector.extract_strided_slice %337 {offsets = [0, 0], sizes = [128, 256], strides = [1, 1]} : vector<128x768xf32> to vector<128x256xf32>
    %cst_132 = arith.constant dense<0.000000e+00> : vector<128xf32>
    %339 = vector.multi_reduction <add>, %338, %cst_132 [1] : vector<128x256xf32> to vector<128xf32>
    %340 = vector.shape_cast %339 : vector<128xf32> to vector<128x1xf32>
    %341 = vector.extract_strided_slice %337 {offsets = [0, 256], sizes = [128, 256], strides = [1, 1]} : vector<128x768xf32> to vector<128x256xf32>
    %cst_133 = arith.constant dense<0.000000e+00> : vector<128xf32>
    %342 = vector.multi_reduction <add>, %341, %cst_133 [1] : vector<128x256xf32> to vector<128xf32>
    %343 = vector.shape_cast %342 : vector<128xf32> to vector<128x1xf32>
    %344 = vector.extract_strided_slice %337 {offsets = [0, 512], sizes = [128, 256], strides = [1, 1]} : vector<128x768xf32> to vector<128x256xf32>
    %cst_134 = arith.constant dense<0.000000e+00> : vector<128xf32>
    %345 = vector.multi_reduction <add>, %344, %cst_134 [1] : vector<128x256xf32> to vector<128xf32>
    %346 = vector.shape_cast %345 : vector<128xf32> to vector<128x1xf32>
    %347 = tpu.concatenate %340, %343, %346 in 1 : vector<128x1xf32>, vector<128x1xf32>, vector<128x1xf32> -> vector<128x3xf32>
    %cst_135 = arith.constant 3.906250e-03 : f32
    %348 = vector.broadcast %cst_135 : f32 to vector<128x3xf32>
    %349 = arith.mulf %347, %348 : vector<128x3xf32>
    %350 = vector.broadcast %331 : i32 to vector<128x3xi32>
    %351 = arith.cmpi slt, %4, %350 : vector<128x3xi32>
    %cst_136 = arith.constant -3.40282347E+38 : f32
    %352 = vector.broadcast %cst_136 : f32 to vector<128x3xf32>
    %353 = arith.select %351, %349, %352 : vector<128x3xi1>, vector<128x3xf32>
    %cst_137 = arith.constant dense<0xFF800000> : vector<128xf32>
    %354 = vector.multi_reduction <maximumf>, %353, %cst_137 [1] : vector<128x3xf32> to vector<128xf32>
    %355 = vector.shape_cast %354 : vector<128xf32> to vector<128x1xf32>
    %356 = vector.broadcast %355 : vector<128x1xf32> to vector<128x3xf32>
    %357 = arith.cmpf oeq, %353, %356 : vector<128x3xf32>
    %c3_i32_138 = arith.constant 3 : i32
    %358 = vector.broadcast %c3_i32_138 : i32 to vector<128x3xi32>
    %359 = arith.select %357, %4, %358 : vector<128x3xi1>, vector<128x3xi32>
    %cst_139 = arith.constant dense<2147483647> : vector<128xi32>
    %360 = vector.multi_reduction <minsi>, %359, %cst_139 [1] : vector<128x3xi32> to vector<128xi32>
    %361 = vector.shape_cast %360 : vector<128xi32> to vector<128x1xi32>
    %362 = vector.broadcast %361 : vector<128x1xi32> to vector<128x3xi32>
    %363 = arith.cmpi eq, %4, %362 : vector<128x3xi32>
    %c32_i32_140 = arith.constant 32 : i32
    %364 = vector.broadcast %c32_i32_140 : i32 to vector<128x3xi32>
    %365 = arith.cmpi slt, %5, %364 : vector<128x3xi32>
    %366 = arith.andi %363, %365 : vector<128x3xi1>
    %cst_141 = arith.constant 1.000000e+00 : f32
    %cst_142 = arith.constant 0.000000e+00 : f32
    %367 = vector.broadcast %cst_141 : f32 to vector<128x3xf32>
    %368 = vector.broadcast %cst_142 : f32 to vector<128x3xf32>
    %369 = arith.select %366, %367, %368 : vector<128x3xi1>, vector<128x3xf32>
    %cst_143 = arith.constant dense<0.000000e+00> : vector<3xf32>
    %370 = vector.multi_reduction <add>, %369, %cst_143 [0] : vector<128x3xf32> to vector<3xf32>
    %371 = vector.shape_cast %370 : vector<3xf32> to vector<1x3xf32>
    %cst_144 = arith.constant 3.125000e-02 : f32
    %372 = vector.broadcast %cst_144 : f32 to vector<1x3xf32>
    %373 = arith.mulf %371, %372 : vector<1x3xf32>
    %374 = tpu.concatenate %33, %79, %125, %171, %217, %263, %309, %355 in 1 : vector<128x1xf32>, vector<128x1xf32>, vector<128x1xf32>, vector<128x1xf32>, vector<128x1xf32>, vector<128x1xf32>, vector<128x1xf32>, vector<128x1xf32> -> vector<128x8xf32>
    %375 = tpu.transpose %374, [1, 0] : vector<128x8xf32> -> vector<8x128xf32>
    %c0_145 = arith.constant 0 : index
    %c0_146 = arith.constant 0 : index
    %376 = vector.load %arg8[%c0_145, %c0_146] : memref<8x128xf32, #tpu.memory_space<vmem>>, vector<8x128xf32>
    tpu.vector_store %arg8[%c0_145, %c0_146], %375 {strides = array<i32>} : memref<8x128xf32, #tpu.memory_space<vmem>>, vector<8x128xf32>,
    %377 = tpu.concatenate %51, %97, %143, %189, %235, %281, %327, %373 in 0 : vector<1x3xf32>, vector<1x3xf32>, vector<1x3xf32>, vector<1x3xf32>, vector<1x3xf32>, vector<1x3xf32>, vector<1x3xf32>, vector<1x3xf32> -> vector<8x3xf32>
    %cst_147 = arith.constant 0.000000e+00 : f32
    %378 = vector.broadcast %cst_147 : f32 to vector<8x125xf32>
    %379 = tpu.concatenate %377, %378 in 1 : vector<8x3xf32>, vector<8x125xf32> -> vector<8x128xf32>
    %c0_148 = arith.constant 0 : index
    %c0_149 = arith.constant 0 : index
    %380 = vector.load %arg9[%c0_148, %c0_149] : memref<8x128xf32, #tpu.memory_space<vmem>>, vector<8x128xf32>
    tpu.vector_store %arg9[%c0_148, %c0_149], %379 {strides = array<i32>} : memref<8x128xf32, #tpu.memory_space<vmem>>, vector<8x128xf32>,
    %c0_150 = arith.constant 0 : index
    %c0_151 = arith.constant 0 : index
    %381 = vector.load %arg5[%c0_150, %c0_151] : memref<128x128xf32, #tpu.memory_space<vmem>>, vector<128x128xf32>
    %cst_152 = arith.constant dense<0.000000e+00> : vector<8x128xf32>
    %382 = tpu.matmul %375, %381, %cst_152 {dimension_numbers = #tpu.dot_dimension_numbers<[1], [0], [0], [1], [0, 0, 1, 1], [], []>} : vector<8x128xf32>, vector<128x128xf32>, vector<8x128xf32> -> vector<8x128xf32>
    %c0_153 = arith.constant 0 : index
    %c0_154 = arith.constant 0 : index
    %383 = vector.load %arg6[%c0_153, %c0_154] : memref<1x128xf32, #tpu.memory_space<vmem>>, vector<1x128xf32>
    %384 = vector.broadcast %383 : vector<1x128xf32> to vector<8x128xf32>
    %385 = arith.addf %382, %384 : vector<8x128xf32>
    %c0_155 = arith.constant 0 : index
    %c0_156 = arith.constant 0 : index
    %386 = vector.load %arg7[%c0_155, %c0_156] : memref<8x128xf32, #tpu.memory_space<vmem>>, vector<8x128xf32>
    tpu.vector_store %arg7[%c0_155, %c0_156], %385 {strides = array<i32>} : memref<8x128xf32, #tpu.memory_space<vmem>>, vector<8x128xf32>,
    return
  }
  func.func @transform_0(%arg0: i32, %arg1: memref<16xi32, #tpu.memory_space<smem>>) -> (i32, i32, i32) {
    %c0_i32 = arith.constant 0 : i32
    %c0_i32_0 = arith.constant 0 : i32
    %c0_i32_1 = arith.constant 0 : i32
    return %arg0, %c0_i32, %c0_i32_0 : i32, i32, i32
  }
  func.func @transform_1(%arg0: i32, %arg1: memref<16xi32, #tpu.memory_space<smem>>) -> (i32, i32) {
    %c0_i32 = arith.constant 0 : i32
    %c0_i32_0 = arith.constant 0 : i32
    %c0_i32_1 = arith.constant 0 : i32
    return %c0_i32, %c0_i32_0 : i32, i32
  }
  func.func @transform_2(%arg0: i32, %arg1: memref<16xi32, #tpu.memory_space<smem>>) -> (i32, i32) {
    %c0_i32 = arith.constant 0 : i32
    %c0_i32_0 = arith.constant 0 : i32
    %c0_i32_1 = arith.constant 0 : i32
    return %c0_i32, %c0_i32_0 : i32, i32
  }
  func.func @transform_3(%arg0: i32, %arg1: memref<16xi32, #tpu.memory_space<smem>>) -> (i32, i32) {
    %c0_i32 = arith.constant 0 : i32
    %c0_i32_0 = arith.constant 0 : i32
    %c0_i32_1 = arith.constant 0 : i32
    return %c0_i32, %c0_i32_0 : i32, i32
  }
  func.func @transform_4(%arg0: i32, %arg1: memref<16xi32, #tpu.memory_space<smem>>) -> (i32, i32) {
    %c0_i32 = arith.constant 0 : i32
    %c0_i32_0 = arith.constant 0 : i32
    %c0_i32_1 = arith.constant 0 : i32
    return %c0_i32, %c0_i32_0 : i32, i32
  }
  func.func @transform_5(%arg0: i32, %arg1: memref<16xi32, #tpu.memory_space<smem>>) -> (i32, i32) {
    %c0_i32 = arith.constant 0 : i32
    %c0_i32_0 = arith.constant 0 : i32
    return %arg0, %c0_i32 : i32, i32
  }
  func.func @transform_6(%arg0: i32, %arg1: memref<16xi32, #tpu.memory_space<smem>>) -> (i32, i32) {
    %c0_i32 = arith.constant 0 : i32
    %c0_i32_0 = arith.constant 0 : i32
    return %arg0, %c0_i32 : i32, i32
  }
  func.func @transform_7(%arg0: i32, %arg1: memref<16xi32, #tpu.memory_space<smem>>) -> (i32, i32) {
    %c0_i32 = arith.constant 0 : i32
    %c0_i32_0 = arith.constant 0 : i32
    return %arg0, %c0_i32 : i32, i32
  }
}

</mosaic_0001>

<bundles_post_ra>
// kernel: mvcnn_new_forward.1
= control target key start
LH: loop header
LB: loop body
LE: loop exit
PB: predicated region body
PF: predicated region fallthrough
CT: control target
= control target key end

     0   :  { %s15884_s0 = inlined_call_operand.vmem [shape: s32[16], index: 0, kind: input, shape index: {}]   ;;  %s15885_s1 = inlined_call_operand.vmem [shape: bf16[16,4,768], index: 1, kind: input, shape index: {}]   ;;  %s15886_s2 = inlined_call_operand.vmem [shape: bf16[128,4], index: 2, kind: input, shape index: {}]   ;;  %s15887_s3 = inlined_call_operand.vmem [shape: f32[128,1], index: 3, kind: input, shape index: {}]   ;;  %s15888_s4 = inlined_call_operand.vmem [shape: f32[128,128], index: 4, kind: input, shape index: {}]   ;;  %s15889_s5 = inlined_call_operand.vmem [shape: f32[1,128], index: 5, kind: input, shape index: {}]   ;;  %s15890_s6 = inlined_call_operand.hbm [shape: f32[16,128], index: 6, kind: output, shape index: {0}]   ;;  %s15891_s7 = inlined_call_operand.hbm [shape: f32[16,128], index: 7, kind: output, shape index: {1}]   ;;  %s15892_s8 = inlined_call_operand.vmem [shape: f32[16,128], index: 8, kind: output, shape index: {2}]  }
   0x1   :  { %s14_s29 = sshll.u32 %s15884_s0, 4  ;;  %s15_s29 = int_to_ptr.vmem [resolvable:$true] %s14_s29 }
   0x2   :  { %s10185_s30 = scalar_lea.vmem %s15_s29, 16  ;;  %p10190_p1 = scmp.lt.s32.totalorder %s15_s29, %s15_s29 }
   0x3   :  { %p10186_p0 = scmp.ne.s32.totalorder %s15_s29, %s10185_s30  ;;  %p10191_p2 = scmp.lt.s32.totalorder %s10185_s30, %s10185_s30 }
   0x5   :  { %p10192_p3 = por %p10191_p2, %p10190_p1 }
   0x7   :  { %p10193_p4 = pnand %p10192_p3, %p10186_p0 }
   0x9   :  { %10196 = shalt.err (!%p10193_p4)  }
   0xa   :  { %s10295_s9 = smov [#allocation3]  }
   0xb   :  { %17 = dma.vmem_to_smem %s15_s29, 16, %s10295_s9, [#allocation2] }
   0xc   :  { %10269 = dma.done.wait [#allocation2], 16 }
   0xd   :  { %10270 = vsyncadd [#allocation2], 4294967280 }
   0xe   :  { %19 = sfence }
   0xf   :  { %20 = vsyncpa [#allocation5], 0 }
  0x10   :  { %22 = vsyncpa [#allocation5 + $0x1], 0 }
  0x11   :  { %23 = vsyncpa [#allocation7], 0 }
  0x12   :  { %25 = vsyncpa [#allocation7 + $0x1], 0  ;;  %s10351_s10 = smov 0   ;;  %s10353_s0 = smov 0  }
  0x13   :  { %s10355_s11 = smov 0   ;;  %s10357_s12 = smov 0  }
  0x14 LB: > { %s10372_s13 = sadd.s32 4294967295, %s10293_s12   ;;  %s9745_s14 = sadd.s32 4294967294, %s10293_s12   ;;  %s10293_s12 = sphi %s10357_s12, %s16809_s12   ;;  %s10289_s11 = sphi %s10355_s11, %s16808_s11   ;;  %s10285_s0 = sphi %s10353_s0, %s16807_s0   ;;  %s10281_s10 = sphi %s10351_s10, %s16806_s10  }
  0x15   : > { %s10376_s15 = sadd.s32 1, %s10293_s12   ;;  %s148_s16 = sadd.s32 1, %s10289_s11 }
  0x16   : > { %s145_s17 = ssub.s32 %s10293_s12, %s10376_s15  ;;  %p158_p5 = scmp.ne.s32.totalorder %s10289_s11, %s10285_s0 }
  0x17   : > { %p146_p6 = scmp.eq.s32.totalorder %s145_s17, 0  ;;  %p159_p7 = scmp.eq.s32.totalorder %s10372_s13, 1 }
  0x18   : > { %p164_p8 = scmp.ne.s32.totalorder %s10285_s0, %s10281_s10  ;;  %p165_p9 = scmp.eq.s32.totalorder %s9745_s14, 1 }
  0x19   : > { %s10387_s18 = scalar_select %p146_p6, %s10289_s11, %s148_s16  }
  0x1a   : > { %p10389_p10 = por %p159_p7, %p158_p5  ;;  %p10393_p11 = por %p165_p9, %p164_p8 }
  0x1b   : > { %p9748_p12 = scmp.ge.s32.totalorder %s10293_s12, 1  ;;  %p257_p13 = scmp.lt.s32.totalorder %s10293_s12, 3 }
  0x1d   : > { %p258_p0 = pnand %p9748_p12, %p257_p13 }
  0x1f   : > { %261 = sbr.rel (%p258_p0) target bundleno = 1870 (0x74e), region = 40 }
  0x26   : > { %s10400_s21 = sshll.u32 %s10372_s13, 3  ;;  %v423_v0 = vlaneseq  ;;  %v10296_v1 = vmov 1983009808   ;;  %v15893_v3 = vmov 0   ;;  %vm538_vm0 = vcmask 1041408   ;;  %v327_v13 = vld [vmem:[%s15887_s3] sm:$0xff] }
  0x27   : > { %p300_p1 = scmp.lt.s32.totalorder %s10400_s21, 15  ;;  %v490_v2 = vunpack.c.l.s4 %v10296_v1  ;;  %589 = vmatprep.mubr.bf16.mxu0 %v15893_v3  ;;  %702 = vmatprep.mubr.bf16.mxu1 %v15893_v3  ;;  %v329_v20 = vld [vmem:[%s15887_s3 + $0x10] sm:$0xff]  ;;  %v10437_v23 = vld [vmem:[%s15886_s2] sm:$0xff]   ;;  %v328_v25 = vld [vmem:[%s15887_s3 + $0x8] sm:$0xff]  ;;  %vm513_vm1 = vcmask 31744   ;;  %vm1136_vm2 = vcmask 7168  }
  0x28   : > { %v493_v4 = vshrl.u32 %v423_v0, 7  ;;  %10135 = vset.pattern.permute.xlu0 %v15893_v3  ;;  %10136 = vset.pattern.permute.xlu1 %v15893_v3  ;;  %v331_v31 = vld [vmem:[%s15887_s3 + $0x20] sm:$0xff]  ;;  %v330_v32 = vld [vmem:[%s15887_s3 + $0x18] sm:$0xff]  ;;  %v10470_v33 = vld [vmem:[%s15886_s2 + $0x8] sm:$0xff]   ;;  %s11250_s9 = sld [smem:[#allocation3 + %s10400_s21]]  ;;  %vm1153_vm3 = vcmask 15360  }
  0x29   : > { %s301_s22 = scalar_select %p300_p1, %s10400_s21, 15  ;;  %v491_v5 = vunpack.c.0.s8 %v490_v2  ;;  %345 = vperm.xlu0 %10135, %v327_v13   ;;  %355 = vperm.xlu1 %10136, %v329_v20   ;;  %v333_v34 = vld [vmem:[%s15887_s3 + $0x30] sm:$0xff]  ;;  %v332_v35 = vld [vmem:[%s15887_s3 + $0x28] sm:$0xff]  ;;  %v335_v36 = vld [vmem:[%s15887_s3 + $0x40] sm:$0xff]  ;;  %vm1204_vm5 = vcmask 23552  }
  0x2a   : > { %v334_v37 = vld [vmem:[%s15887_s3 + $0x38] sm:$0xff]  ;;  %v10494_v38 = vld [vmem:[%s15886_s2 + $0x10] sm:$0xff]   ;;  %v336_v40 = vld [vmem:[%s15887_s3 + $0x48] sm:$0xff]  ;;  %s2728_s29 = sadd.s32 2, %s10400_s21  ;;  %s7132_s25 = sadd.s32 6, %s10400_s21 }
  0x2b   : > { %s10084_s23 = smul.u32 12, %s301_s22  ;;  %v10409_v6 = vsub.s32 %v491_v5, %v493_v4  ;;  %v337_v39 = vld [vmem:[%s15887_s3 + $0x50] sm:$0xff]  ;;  %v339_v41 = vld [vmem:[%s15887_s3 + $0x60] sm:$0xff]  ;;  %v338_v42 = vld [vmem:[%s15887_s3 + $0x58] sm:$0xff]  ;;  %s12741_s30 = sld [smem:[#allocation3 + %s2728_s29]] }
  0x2c   : > { %v10517_v43 = vld [vmem:[%s15886_s2 + $0x18] sm:$0xff]   ;;  %v341_v44 = vld [vmem:[%s15887_s3 + $0x70] sm:$0xff]  ;;  %v340_v45 = vld [vmem:[%s15887_s3 + $0x68] sm:$0xff]  ;;  %s4930_s22 = sadd.s32 4, %s10400_s21  ;;  %s7133_s28 = sld [smem:[#allocation3 + %s7132_s25]] }
  0x2d   : > { %16010 = vst [vmem:[#allocation11_spill] sm:$0xff] %v10409_v6  ;;  %s10414_s26 = scalar_lea.vmem %s15885_s1, %s10084_s23  ;;  %350 = vperm.xlu0 %10135, %v328_v25   ;;  %360 = vperm.xlu1 %10136, %v330_v32   ;;  %v342_v46 = vld [vmem:[%s15887_s3 + $0x78] sm:$0xff]  ;;  %v10537_v47 = vld [vmem:[%s15886_s2 + $0x20] sm:$0xff]   ;;  %v10548_v48 = vld [vmem:[%s15886_s2 + $0x28] sm:$0xff]   ;;  %s1627_s23 = sadd.s32 1, %s10400_s21 }
  0x2e   : > { %v444_v7 = vld [vmem:[%s10414_s26] sm:$0xff]  ;;  %v9763_v8 = vld.sshfl [vmem:[%s10414_s26 + $0x8] sm:$0x33 pattern:$0x76325410]  ;;  %v9791_v9 = vld [vmem:[%s10414_s26 + $0xc] sm:$0xff] }
  0x2f   : > { %v495_v10 = vrot.slane %v444_v7, %v10409_v6  ;;  %v488_v11 = vcombine.high %v444_v7, %v444_v7  ;;  %v1641_v12 = vrot.slane %v9791_v9, %v10409_v6  ;;  %v1634_v14 = vcombine.high %v9791_v9, %v9791_v9  ;;  %v10443_v26 = vld.sshfl [vmem:[%s10414_s26 + $0x14] sm:$0x33 pattern:$0x76325410]  ;;  %v10570_v50 = vld [vmem:[%s15886_s2 + $0x38] sm:$0xff]   ;;  %v9851_v59 = vld [vmem:[%s10414_s26 + $0x24] sm:$0xff] }
  0x30   : > { %v512_v18 = vcombine.high %v9763_v8, %v9763_v8  ;;  %v552_v27 = vsel %vm538_vm0, %v9763_v8, 0  ;;  %v1658_v30 = vcombine.high %v10443_v26, %v10443_v26  ;;  %v10559_v49 = vld [vmem:[%s15886_s2 + $0x30] sm:$0xff]   ;;  %v9821_v51 = vld [vmem:[%s10414_s26 + $0x18] sm:$0xff]  ;;  %v1672_v57 = vsel %vm538_vm0, %v10443_v26, 0  ;;  %s11763_s24 = sld [smem:[#allocation3 + %s1627_s23]]  ;;  %s8233_s29 = sadd.s32 7, %s10400_s21 }
  0x31   : > { %v503_v15 = vcombine.high %v495_v10, %v495_v10  ;;  %v540_v16 = vsel %vm538_vm0, %v495_v10, 0  ;;  %v502_v17 = vrot.slane %v488_v11, %v10409_v6  ;;  %v10427_v19 = vrot.slane %v1634_v14, %v10409_v6  ;;  %365 = vperm.xlu0 %10135, %v331_v31   ;;  %370 = vperm.xlu1 %10136, %v332_v35   ;;  %v9823_v60 = vld.sshfl [vmem:[%s10414_s26 + $0x20] sm:$0x33 pattern:$0x76325410]  ;;  %s14167_s23 = sld [smem:[#allocation3 + %s4930_s22]] }
  0x32   : > { %v1649_v24 = vcombine.high %v1641_v12, %v1641_v12  ;;  %v1660_v29 = vsel %vm538_vm0, %v1641_v12, 0  ;;  %v2735_v52 = vcombine.high %v9821_v51, %v9821_v51  ;;  %v2742_v53 = vrot.slane %v9821_v51, %v10409_v6  ;;  %v10694_v7 = vld.sshfl [vmem:[%s10414_s26 + $0x2c] sm:$0x33 pattern:$0x76325410] }
  0x33   : > { %9764 = vmatprep.subr.msk.bf16.mxu0 %vm538_vm0, %v503_v15  ;;  %v504_v21 = vcombine.high %v502_v17, %v502_v17  ;;  %v546_v22 = vsel %vm538_vm0, %v502_v17, 0  ;;  %v1650_v28 = vcombine.high %v10427_v19, %v10427_v19  ;;  %v1666_v55 = vsel %vm538_vm0, %v10427_v19, 0 }
  0x34   : > { %558 = vmatpush1.bf16.msra.mxu0 %v540_v16  ;;  %v2749_v54 = vrot.slane %v2735_v52, %v10409_v6  ;;  %v2750_v56 = vcombine.high %v2742_v53, %v2742_v53  ;;  %v3843_v61 = vrot.slane %v9851_v59, %v10409_v6  ;;  %v2761_v62 = vsel %vm538_vm0, %v2742_v53, 0 }
  0x35   : > { %9773 = vmatprep.subr.msk.bf16.mxu1 %vm538_vm0, %v504_v21  ;;  %9782 = vmatprep.subr.msk.bf16.mxu0 %vm538_vm0, %v512_v18  ;;  %v2759_v63 = vcombine.high %v9823_v60, %v9823_v60  ;;  %v3836_v4 = vcombine.high %v9851_v59, %v9851_v59  ;;  %v2773_v8 = vsel %vm538_vm0, %v9823_v60, 0  ;;  %v3860_v11 = vcombine.high %v10694_v7, %v10694_v7 }
  0x36   : > { %671 = vmatpush1.bf16.msra.mxu1 %v546_v22  ;;  %375 = vperm.xlu0 %10135, %v333_v34   ;;  %v2751_v58 = vcombine.high %v2749_v54, %v2749_v54  ;;  %v2767_v1 = vsel %vm538_vm0, %v2749_v54, 0  ;;  %v3851_v2 = vcombine.high %v3843_v61, %v3843_v61  ;;  %v3862_v10 = vsel %vm538_vm0, %v3843_v61, 0 }
  0x37   : > { %9765 = vmatmul.mubr.msk.bf16.vlgmr.msra.gmra.mrb[0].mxu0 %vm513_vm1, %v10437_v23  ;;  %9794 = vmatprep.subr.msk.bf16.mxu1 %vm538_vm0, %v1649_v24  ;;  %v10690_v5 = vrot.slane %v3836_v4, %v10409_v6 }
  0x38   : > { %784 = vmatpush1.bf16.msra.mxu0 %v552_v27  ;;  %599 = vmatprep.mubr.bf16.mxu0 %v15893_v3 }
  0x39   : > { %9774 = vmatmul.mubr.msk.bf16.vlgmr.msra.gmra.mrb[0].mxu1 %vm513_vm1, %v10437_v23  ;;  %9803 = vmatprep.subr.msk.bf16.mxu0 %vm538_vm0, %v1650_v28  ;;  %v3852_v9 = vcombine.high %v10690_v5, %v10690_v5 }
  0x3a   : > { %1678 = vmatpush1.bf16.msra.mxu1 %v1660_v29  ;;  %712 = vmatprep.mubr.bf16.mxu1 %v15893_v3 }
  0x3b   : > { %9812 = vmatprep.subr.msk.bf16.mxu1 %vm538_vm0, %v1658_v30  ;;  %385 = vperm.xlu0 %10135, %v335_v36  }
  0x3c   : > { %380 = vperm.xlu1 %10136, %v334_v37  }
  0x3f   : > { %9766 = vmatmul.mubr.msk.bf16.gmra.mrb[4].mxu0 %vm513_vm1, %v10470_v33  ;;  %395 = vperm.xlu0 %10135, %v337_v39  }
  0x40   : > { %609 = vmatprep.mubr.bf16.mxu0 %v15893_v3  ;;  %390 = vperm.xlu1 %10136, %v336_v40  }
  0x41   : > { %9775 = vmatmul.mubr.msk.bf16.gmra.mrb[4].mxu1 %vm513_vm1, %v10470_v33 }
  0x42   : > { %722 = vmatprep.mubr.bf16.mxu1 %v15893_v3 }
  0x43   : > { %405 = vperm.xlu0 %10135, %v339_v41  }
  0x44   : > { %400 = vperm.xlu1 %10136, %v338_v42  }
  0x47   : > { %9767 = vmatmul.mubr.msk.bf16.gmra.mrb[8].mxu0 %vm513_vm1, %v10494_v38  ;;  %415 = vperm.xlu0 %10135, %v341_v44  }
  0x48   : > { %619 = vmatprep.mubr.bf16.mxu0 %v15893_v3  ;;  %410 = vperm.xlu1 %10136, %v340_v45  }
  0x49   : > { %9776 = vmatmul.mubr.msk.bf16.gmra.mrb[8].mxu1 %vm513_vm1, %v10494_v38 }
  0x4a   : > { %732 = vmatprep.mubr.bf16.mxu1 %v15893_v3 }
  0x4c   : > { %420 = vperm.xlu1 %10136, %v342_v46  }
  0x4f   : > { %9768 = vmatmul.mubr.msk.bf16.gmra.mrb[12].mxu0 %vm513_vm1, %v10517_v43 }
  0x50   : > { %629 = vmatprep.mubr.bf16.mxu0 %v15893_v3 }
  0x51   : > { %9777 = vmatmul.mubr.msk.bf16.gmra.mrb[12].mxu1 %vm513_vm1, %v10517_v43 }
  0x52   : > { %742 = vmatprep.mubr.bf16.mxu1 %v15893_v3 }
  0x57   : > { %9769 = vmatmul.mubr.msk.bf16.gmra.mrb[16].mxu0 %vm513_vm1, %v10537_v47 }
  0x58   : > { %639 = vmatprep.mubr.bf16.mxu0 %v15893_v3 }
  0x59   : > { %9778 = vmatmul.mubr.msk.bf16.gmra.mrb[16].mxu1 %vm513_vm1, %v10537_v47 }
  0x5a   : > { %752 = vmatprep.mubr.bf16.mxu1 %v15893_v3 }
  0x5f   : > { %9770 = vmatmul.mubr.msk.bf16.gmra.mrb[20].mxu0 %vm513_vm1, %v10548_v48 }
  0x60   : > { %649 = vmatprep.mubr.bf16.mxu0 %v15893_v3 }
  0x61   : > { %9779 = vmatmul.mubr.msk.bf16.gmra.mrb[20].mxu1 %vm513_vm1, %v10548_v48 }
  0x62   : > { %762 = vmatprep.mubr.bf16.mxu1 %v15893_v3 }
  0x67   : > { %9771 = vmatmul.mubr.msk.bf16.gmra.mrb[24].mxu0 %vm513_vm1, %v10559_v49 }
  0x68   : > { %659 = vmatprep.mubr.bf16.mxu0 %v15893_v3 }
  0x69   : > { %9780 = vmatmul.mubr.msk.bf16.gmra.mrb[24].mxu1 %vm513_vm1, %v10559_v49 }
  0x6a   : > { %772 = vmatprep.mubr.bf16.mxu1 %v15893_v3 }
  0x6f   : > { %9772 = vmatmul.mubr.msk.bf16.gmra.mrb[28].mxu0 %vm513_vm1, %v10570_v50 }
  0x70   : > { %815 = vmatprep.mubr.bf16.mxu0 %v15893_v3 }
  0x71   : > { %9781 = vmatmul.mubr.msk.bf16.gmra.mrb[28].mxu1 %vm513_vm1, %v10570_v50 }
  0x72   : > { %1709 = vmatprep.mubr.bf16.mxu1 %v15893_v3 }
  0x77   : > { %9783 = vmatmul.mubr.msk.bf16.vlgmr.msra.gmra.mrb[32].mxu0 %vm513_vm1, %v10437_v23 }
  0x78   : > { %1791 = vmatpush1.bf16.msra.mxu0 %v1666_v55  ;;  %825 = vmatprep.mubr.bf16.mxu0 %v15893_v3 }
  0x79   : > { %9795 = vmatmul.mubr.msk.bf16.vlgmr.msra.gmra.mrb[32].mxu1 %vm513_vm1, %v10437_v23  ;;  %9824 = vmatprep.subr.msk.bf16.mxu0 %vm538_vm0, %v2750_v56 }
  0x7a   : > { %1904 = vmatpush1.bf16.msra.mxu1 %v1672_v57  ;;  %1719 = vmatprep.mubr.bf16.mxu1 %v15893_v3 }
  0x7b   : > { %9833 = vmatprep.subr.msk.bf16.mxu1 %vm538_vm0, %v2751_v58 }
  0x7f   : > { %9784 = vmatmul.mubr.msk.bf16.gmra.mrb[36].mxu0 %vm513_vm1, %v10470_v33 }
  0x80   : > { %835 = vmatprep.mubr.bf16.mxu0 %v15893_v3 }
  0x81   : > { %9796 = vmatmul.mubr.msk.bf16.gmra.mrb[36].mxu1 %vm513_vm1, %v10470_v33 }
  0x82   : > { %1729 = vmatprep.mubr.bf16.mxu1 %v15893_v3 }
  0x87   : > { %9785 = vmatmul.mubr.msk.bf16.gmra.mrb[40].mxu0 %vm513_vm1, %v10494_v38 }
  0x88   : > { %845 = vmatprep.mubr.bf16.mxu0 %v15893_v3 }
  0x89   : > { %9797 = vmatmul.mubr.msk.bf16.gmra.mrb[40].mxu1 %vm513_vm1, %v10494_v38 }
  0x8a   : > { %1739 = vmatprep.mubr.bf16.mxu1 %v15893_v3 }
  0x8f   : > { %9786 = vmatmul.mubr.msk.bf16.gmra.mrb[44].mxu0 %vm513_vm1, %v10517_v43 }
  0x90   : > { %855 = vmatprep.mubr.bf16.mxu0 %v15893_v3 }
  0x91   : > { %9798 = vmatmul.mubr.msk.bf16.gmra.mrb[44].mxu1 %vm513_vm1, %v10517_v43 }
  0x92   : > { %1749 = vmatprep.mubr.bf16.mxu1 %v15893_v3 }
  0x97   : > { %9787 = vmatmul.mubr.msk.bf16.gmra.mrb[48].mxu0 %vm513_vm1, %v10537_v47 }
  0x98   : > { %865 = vmatprep.mubr.bf16.mxu0 %v15893_v3 }
  0x99   : > { %9799 = vmatmul.mubr.msk.bf16.gmra.mrb[48].mxu1 %vm513_vm1, %v10537_v47 }
  0x9a   : > { %1759 = vmatprep.mubr.bf16.mxu1 %v15893_v3 }
  0x9f   : > { %9788 = vmatmul.mubr.msk.bf16.gmra.mrb[52].mxu0 %vm513_vm1, %v10548_v48 }
  0xa0   : > { %875 = vmatprep.mubr.bf16.mxu0 %v15893_v3 }
  0xa1   : > { %9800 = vmatmul.mubr.msk.bf16.gmra.mrb[52].mxu1 %vm513_vm1, %v10548_v48 }
  0xa2   : > { %1769 = vmatprep.mubr.bf16.mxu1 %v15893_v3 }
  0xa7   : > { %9789 = vmatmul.mubr.msk.bf16.gmra.mrb[56].mxu0 %vm513_vm1, %v10559_v49 }
  0xa8   : > { %885 = vmatprep.mubr.bf16.mxu0 %v15893_v3  ;;  %v10716_v12 = vpop.permute.xlu0 %345  ;;  %v10723_v13 = vpop.permute.xlu1 %355 }
  0xa9   : > { %9801 = vmatmul.mubr.msk.bf16.gmra.mrb[56].mxu1 %vm513_vm1, %v10559_v49  ;;  %16011 = vst [vmem:[#allocation12_spill] sm:$0xff] %v10723_v13 }
  0xaa   : > { %1779 = vmatprep.mubr.bf16.mxu1 %v15893_v3 }
  0xac   : > { %v10726_v15 = vpop.permute.xlu0 %350  ;;  %v10742_v51 = vpop.permute.xlu1 %360 }
  0xaf   : > { %9790 = vmatmul.mubr.msk.bf16.gmra.mrb[60].mxu0 %vm513_vm1, %v10570_v50 }
  0xb0   : > { %1822 = vmatprep.mubr.bf16.mxu0 %v15893_v3 }
  0xb1   : > { %9802 = vmatmul.mubr.msk.bf16.gmra.mrb[60].mxu1 %vm513_vm1, %v10570_v50 }
  0xb2   : > { %1935 = vmatprep.mubr.bf16.mxu1 %v15893_v3 }
  0xb7   : > { %9804 = vmatmul.mubr.msk.bf16.vlgmr.msra.gmra.mrb[64].mxu0 %vm513_vm1, %v10437_v23 }
  0xb8   : > { %2779 = vmatpush1.bf16.msra.mxu0 %v2761_v62  ;;  %1832 = vmatprep.mubr.bf16.mxu0 %v15893_v3 }
  0xb9   : > { %9813 = vmatmul.mubr.msk.bf16.vlgmr.msra.gmra.mrb[64].mxu1 %vm513_vm1, %v10437_v23  ;;  %9842 = vmatprep.subr.msk.bf16.mxu0 %vm538_vm0, %v2759_v63 }
  0xba   : > { %2892 = vmatpush1.bf16.msra.mxu1 %v2767_v1  ;;  %1945 = vmatprep.mubr.bf16.mxu1 %v15893_v3 }
  0xbb   : > { %9854 = vmatprep.subr.msk.bf16.mxu1 %vm538_vm0, %v3851_v2 }
  0xbf   : > { %9805 = vmatmul.mubr.msk.bf16.gmra.mrb[68].mxu0 %vm513_vm1, %v10470_v33 }
  0xc0   : > { %1842 = vmatprep.mubr.bf16.mxu0 %v15893_v3 }
  0xc1   : > { %9814 = vmatmul.mubr.msk.bf16.gmra.mrb[68].mxu1 %vm513_vm1, %v10470_v33 }
  0xc2   : > { %1955 = vmatprep.mubr.bf16.mxu1 %v15893_v3 }
  0xc7   : > { %9806 = vmatmul.mubr.msk.bf16.gmra.mrb[72].mxu0 %vm513_vm1, %v10494_v38 }
  0xc8   : > { %1852 = vmatprep.mubr.bf16.mxu0 %v15893_v3 }
  0xc9   : > { %9815 = vmatmul.mubr.msk.bf16.gmra.mrb[72].mxu1 %vm513_vm1, %v10494_v38 }
  0xca   : > { %1965 = vmatprep.mubr.bf16.mxu1 %v15893_v3 }
  0xcf   : > { %9807 = vmatmul.mubr.msk.bf16.gmra.mrb[76].mxu0 %vm513_vm1, %v10517_v43 }
  0xd0   : > { %1862 = vmatprep.mubr.bf16.mxu0 %v15893_v3 }
  0xd1   : > { %9816 = vmatmul.mubr.msk.bf16.gmra.mrb[76].mxu1 %vm513_vm1, %v10517_v43 }
  0xd2   : > { %1975 = vmatprep.mubr.bf16.mxu1 %v15893_v3 }
  0xd7   : > { %9808 = vmatmul.mubr.msk.bf16.gmra.mrb[80].mxu0 %vm513_vm1, %v10537_v47 }
  0xd8   : > { %1872 = vmatprep.mubr.bf16.mxu0 %v15893_v3 }
  0xd9   : > { %9817 = vmatmul.mubr.msk.bf16.gmra.mrb[80].mxu1 %vm513_vm1, %v10537_v47 }
  0xda   : > { %1985 = vmatprep.mubr.bf16.mxu1 %v15893_v3 }
  0xdf   : > { %9809 = vmatmul.mubr.msk.bf16.gmra.mrb[84].mxu0 %vm513_vm1, %v10548_v48 }
  0xe0   : > { %1882 = vmatprep.mubr.bf16.mxu0 %v15893_v3 }
  0xe1   : > { %9818 = vmatmul.mubr.msk.bf16.gmra.mrb[84].mxu1 %vm513_vm1, %v10548_v48 }
  0xe2   : > { %1995 = vmatprep.mubr.bf16.mxu1 %v15893_v3 }
  0xe7   : > { %9810 = vmatmul.mubr.msk.bf16.gmra.mrb[88].mxu0 %vm513_vm1, %v10559_v49 }
  0xe8   : > { %1892 = vmatprep.mubr.bf16.mxu0 %v15893_v3 }
  0xe9   : > { %9819 = vmatmul.mubr.msk.bf16.gmra.mrb[88].mxu1 %vm513_vm1, %v10559_v49 }
  0xea   : > { %2005 = vmatprep.mubr.bf16.mxu1 %v15893_v3 }
  0xef   : > { %9811 = vmatmul.mubr.msk.bf16.gmra.mrb[92].mxu0 %vm513_vm1, %v10570_v50 }
  0xf0   : > { %2810 = vmatprep.mubr.bf16.mxu0 %v15893_v3 }
  0xf1   : > { %9820 = vmatmul.mubr.msk.bf16.gmra.mrb[92].mxu1 %vm513_vm1, %v10570_v50 }
  0xf2   : > { %2923 = vmatprep.mubr.bf16.mxu1 %v15893_v3 }
  0xf7   : > { %9825 = vmatmul.mubr.msk.bf16.vlgmr.msra.gmra.mrb[96].mxu0 %vm513_vm1, %v10437_v23 }
  0xf8   : > { %2820 = vmatprep.mubr.bf16.mxu0 %v15893_v3  ;;  %3005 = vmatpush1.bf16.msra.mxu0 %v2773_v8 }
  0xf9   : > { %9834 = vmatmul.mubr.msk.bf16.vlgmr.msra.gmra.mrb[96].mxu1 %vm513_vm1, %v10437_v23  ;;  %9863 = vmatprep.subr.msk.bf16.mxu0 %vm538_vm0, %v3852_v9 }
  0xfa   : > { %2933 = vmatprep.mubr.bf16.mxu1 %v15893_v3  ;;  %3880 = vmatpush1.bf16.msra.mxu1 %v3862_v10 }
  0xfb   : > { %9872 = vmatprep.subr.msk.bf16.mxu1 %vm538_vm0, %v3860_v11 }
  0xff   : > { %9826 = vmatmul.mubr.msk.bf16.gmra.mrb[100].mxu0 %vm513_vm1, %v10470_v33 }
 0x100   : > { %2830 = vmatprep.mubr.bf16.mxu0 %v15893_v3 }
 0x101   : > { %9835 = vmatmul.mubr.msk.bf16.gmra.mrb[100].mxu1 %vm513_vm1, %v10470_v33 }
 0x102   : > { %2943 = vmatprep.mubr.bf16.mxu1 %v15893_v3 }
 0x107   : > { %9827 = vmatmul.mubr.msk.bf16.gmra.mrb[104].mxu0 %vm513_vm1, %v10494_v38 }
 0x108   : > { %2840 = vmatprep.mubr.bf16.mxu0 %v15893_v3 }
 0x109   : > { %9836 = vmatmul.mubr.msk.bf16.gmra.mrb[104].mxu1 %vm513_vm1, %v10494_v38 }
 0x10a   : > { %v591_v14 = vpop.f32.mrb[0].mxu0  ;;  %2953 = vmatprep.mubr.bf16.mxu1 %v15893_v3 }
 0x10b   : > { %v592_v16 = vadd.f32 %v591_v14, %v10716_v12  ;;  %v593_v17 = vpop.f32.mrb[1].mxu0 }
 0x10c   : > { %v594_v18 = vadd.f32 %v593_v17, %v10716_v12  ;;  %v595_v19 = vpop.f32.mrb[2].mxu0  ;;  %v704_v20 = vpop.f32.mrb[0].mxu1 }
 0x10d   : > { %v596_v21 = vadd.f32 %v595_v19, %v10726_v15  ;;  %v705_v22 = vadd.f32 %v704_v20, %v10716_v12  ;;  %v597_v24 = vpop.f32.mrb[3].mxu0  ;;  %v706_v25 = vpop.f32.mrb[1].mxu1  ;;  %v896_v26 = vmax.f32 %v592_v16, 0.0 }
 0x10e   : > { %v598_v27 = vadd.f32 %v597_v24, %v10726_v15  ;;  %v707_v28 = vadd.f32 %v706_v25, %v10716_v12  ;;  %v708_v29 = vpop.f32.mrb[2].mxu1  ;;  %v897_v30 = vmax.f32 %v594_v18, 0.0  ;;  %v10757_v20 = vpop.permute.xlu0 %365 }
 0x10f   : > { %v709_v31 = vadd.f32 %v708_v29, %v10726_v15  ;;  %v710_v32 = vpop.f32.mrb[3].mxu1  ;;  %9828 = vmatmul.mubr.msk.bf16.gmra.mrb[108].mxu0 %vm513_vm1, %v10517_v43  ;;  %v902_v34 = vmax.f32 %v596_v21, 0.0  ;;  %v898_v35 = vmax.f32 %v705_v22, 0.0  ;;  %16012 = vst [vmem:[#allocation13_spill] sm:$0xff] %v10757_v20 }
 0x110   : > { %v711_v36 = vadd.f32 %v710_v32, %v10726_v15  ;;  %v992_v37 = vadd.f32 %v897_v30, %v896_v26  ;;  %v903_v39 = vmax.f32 %v598_v27, 0.0  ;;  %2850 = vmatprep.mubr.bf16.mxu0 %v15893_v3  ;;  %v899_v40 = vmax.f32 %v707_v28, 0.0  ;;  %v10760_v26 = vpop.permute.xlu1 %370 }
 0x111   : > { %9837 = vmatmul.mubr.msk.bf16.gmra.mrb[108].mxu1 %vm513_vm1, %v10517_v43  ;;  %v904_v41 = vmax.f32 %v709_v31, 0.0  ;;  %16013 = vst [vmem:[#allocation14_spill] sm:$0xff] %v10760_v26 }
 0x112   : > { %v601_v42 = vpop.f32.mrb[4].mxu0  ;;  %993 = vadd.xlane.f32.xlu0 %v992_v37  ;;  %v995_v44 = vadd.f32 %v903_v39, %v902_v34  ;;  %v905_v45 = vmax.f32 %v711_v36, 0.0  ;;  %2963 = vmatprep.mubr.bf16.mxu1 %v15893_v3  ;;  %v1040_v46 = vadd.f32 %v899_v40, %v898_v35 }
 0x113   : > { %v602_v52 = vadd.f32 %v601_v42, %v10723_v13  ;;  %v603_v53 = vpop.f32.mrb[5].mxu0 }
 0x114   : > { %v604_v54 = vadd.f32 %v603_v53, %v10723_v13  ;;  %v605_v55 = vpop.f32.mrb[6].mxu0  ;;  %996 = vadd.xlane.f32.xlu1 %v995_v44  ;;  %v714_v56 = vpop.f32.mrb[4].mxu1  ;;  %v1043_v57 = vadd.f32 %v905_v45, %v904_v41 }
 0x115   : > { %v606_v58 = vadd.f32 %v605_v55, %v10742_v51  ;;  %v715_v59 = vadd.f32 %v714_v56, %v10723_v13  ;;  %v607_v60 = vpop.f32.mrb[7].mxu0  ;;  %v716_v61 = vpop.f32.mrb[5].mxu1  ;;  %v908_v62 = vmax.f32 %v602_v52, 0.0 }
 0x116   : > { %v608_v63 = vadd.f32 %v607_v60, %v10742_v51  ;;  %v717_v1 = vadd.f32 %v716_v61, %v10723_v13  ;;  %v718_v2 = vpop.f32.mrb[6].mxu1  ;;  %1044 = vadd.xlane.f32.xlu0 %v1043_v57  ;;  %v909_v4 = vmax.f32 %v604_v54, 0.0 }
 0x117   : > { %v719_v8 = vadd.f32 %v718_v2, %v10742_v51  ;;  %v720_v9 = vpop.f32.mrb[7].mxu1  ;;  %9829 = vmatmul.mubr.msk.bf16.gmra.mrb[112].mxu0 %vm513_vm1, %v10537_v47  ;;  %v910_v10 = vmax.f32 %v715_v59, 0.0  ;;  %v914_v11 = vmax.f32 %v606_v58, 0.0  ;;  %v10775_v59 = vpop.permute.xlu0 %375 }
 0x118   : > { %v721_v14 = vadd.f32 %v720_v9, %v10742_v51  ;;  %1041 = vadd.xlane.f32.xlu1 %v1040_v46  ;;  %v998_v16 = vadd.f32 %v909_v4, %v908_v62  ;;  %v911_v17 = vmax.f32 %v717_v1, 0.0  ;;  %2860 = vmatprep.mubr.bf16.mxu0 %v15893_v3  ;;  %v915_v18 = vmax.f32 %v608_v63, 0.0  ;;  %16014 = vst [vmem:[#allocation15_spill] sm:$0xff] %v10775_v59  ;;  %v10777_v1 = vpop.permute.xlu1 %380 }
 0x119   : > { %9838 = vmatmul.mubr.msk.bf16.gmra.mrb[112].mxu1 %vm513_vm1, %v10537_v47  ;;  %v916_v19 = vmax.f32 %v719_v8, 0.0  ;;  %16015 = vst [vmem:[#allocation16_spill] sm:$0xff] %v10777_v1 }
 0x11a   : > { %v611_v21 = vpop.f32.mrb[8].mxu0  ;;  %999 = vadd.xlane.f32.xlu0 %v998_v16  ;;  %v1046_v22 = vadd.f32 %v911_v17, %v910_v10  ;;  %v1001_v24 = vadd.f32 %v915_v18, %v914_v11  ;;  %2973 = vmatprep.mubr.bf16.mxu1 %v15893_v3  ;;  %v917_v25 = vmax.f32 %v721_v14, 0.0 }
 0x11b   : > { %v612_v27 = vadd.f32 %v611_v21, %v10757_v20  ;;  %v613_v28 = vpop.f32.mrb[9].mxu0 }
 0x11c   : > { %v614_v29 = vadd.f32 %v613_v28, %v10757_v20  ;;  %v615_v30 = vpop.f32.mrb[10].mxu0  ;;  %v724_v31 = vpop.f32.mrb[8].mxu1  ;;  %1047 = vadd.xlane.f32.xlu1 %v1046_v22  ;;  %v1049_v32 = vadd.f32 %v917_v25, %v916_v19 }
 0x11d   : > { %v616_v34 = vadd.f32 %v615_v30, %v10760_v26  ;;  %v725_v35 = vadd.f32 %v724_v31, %v10757_v20  ;;  %v617_v36 = vpop.f32.mrb[11].mxu0  ;;  %v726_v37 = vpop.f32.mrb[9].mxu1  ;;  %v920_v39 = vmax.f32 %v612_v27, 0.0 }
 0x11e   : > { %v618_v40 = vadd.f32 %v617_v36, %v10760_v26  ;;  %v727_v41 = vadd.f32 %v726_v37, %v10757_v20  ;;  %v728_v42 = vpop.f32.mrb[10].mxu1  ;;  %1002 = vadd.xlane.f32.xlu0 %v1001_v24  ;;  %v921_v44 = vmax.f32 %v614_v29, 0.0  ;;  %v10793_v36 = vpop.permute.xlu0 %385 }
 0x11f   : > { %v729_v45 = vadd.f32 %v728_v42, %v10760_v26  ;;  %v730_v46 = vpop.f32.mrb[11].mxu1  ;;  %9830 = vmatmul.mubr.msk.bf16.gmra.mrb[116].mxu0 %vm513_vm1, %v10548_v48  ;;  %v926_v52 = vmax.f32 %v616_v34, 0.0  ;;  %v922_v53 = vmax.f32 %v725_v35, 0.0  ;;  %16016 = vst [vmem:[#allocation17_spill] sm:$0xff] %v10793_v36  ;;  %v10795_v42 = vpop.permute.xlu1 %390 }
 0x120   : > { %v731_v54 = vadd.f32 %v730_v46, %v10760_v26  ;;  %v1004_v55 = vadd.f32 %v921_v44, %v920_v39  ;;  %2870 = vmatprep.mubr.bf16.mxu0 %v15893_v3  ;;  %v927_v56 = vmax.f32 %v618_v40, 0.0  ;;  %v923_v57 = vmax.f32 %v727_v41, 0.0  ;;  %16017 = vst [vmem:[#allocation18_spill] sm:$0xff] %v10795_v42 }
 0x121   : > { %9839 = vmatmul.mubr.msk.bf16.gmra.mrb[116].mxu1 %vm513_vm1, %v10548_v48  ;;  %v928_v58 = vmax.f32 %v729_v45, 0.0 }
 0x122   : > { %v621_v60 = vpop.f32.mrb[12].mxu0  ;;  %1050 = vadd.xlane.f32.xlu0 %v1049_v32  ;;  %1005 = vadd.xlane.f32.xlu1 %v1004_v55  ;;  %v1007_v61 = vadd.f32 %v927_v56, %v926_v52  ;;  %v1052_v62 = vadd.f32 %v923_v57, %v922_v53  ;;  %v929_v63 = vmax.f32 %v731_v54, 0.0 }
 0x123   : > { %v622_v2 = vadd.f32 %v621_v60, %v10775_v59  ;;  %v623_v4 = vpop.f32.mrb[13].mxu0  ;;  %2983 = vmatprep.mubr.bf16.mxu1 %v15893_v3 }
 0x124   : > { %v624_v8 = vadd.f32 %v623_v4, %v10775_v59  ;;  %v625_v9 = vpop.f32.mrb[14].mxu0  ;;  %v734_v48 = vpop.f32.mrb[12].mxu1  ;;  %v1055_v10 = vadd.f32 %v929_v63, %v928_v58 }
 0x125   : > { %v626_v11 = vadd.f32 %v625_v9, %v10777_v1  ;;  %v735_v14 = vadd.f32 %v734_v48, %v10775_v59  ;;  %v627_v16 = vpop.f32.mrb[15].mxu0  ;;  %v736_v17 = vpop.f32.mrb[13].mxu1  ;;  %v932_v18 = vmax.f32 %v622_v2, 0.0  ;;  %v9881_v48 = vld [vmem:[%s10414_s26 + $0x30] sm:$0xff] }
 0x126   : > { %v628_v19 = vadd.f32 %v627_v16, %v10777_v1  ;;  %v737_v21 = vadd.f32 %v736_v17, %v10775_v59  ;;  %v738_v22 = vpop.f32.mrb[14].mxu1  ;;  %1008 = vadd.xlane.f32.xlu0 %v1007_v61  ;;  %1053 = vadd.xlane.f32.xlu1 %v1052_v62  ;;  %v933_v24 = vmax.f32 %v624_v8, 0.0 }
 0x127   : > { %v739_v25 = vadd.f32 %v738_v22, %v10777_v1  ;;  %v740_v27 = vpop.f32.mrb[15].mxu1  ;;  %9831 = vmatmul.mubr.msk.bf16.gmra.mrb[120].mxu0 %vm513_vm1, %v10559_v49  ;;  %v938_v28 = vmax.f32 %v626_v11, 0.0  ;;  %v934_v29 = vmax.f32 %v735_v14, 0.0 }
 0x128   : > { %v741_v30 = vadd.f32 %v740_v27, %v10777_v1  ;;  %v1010_v31 = vadd.f32 %v933_v24, %v932_v18  ;;  %2880 = vmatprep.mubr.bf16.mxu0 %v15893_v3  ;;  %v939_v32 = vmax.f32 %v628_v19, 0.0  ;;  %v935_v34 = vmax.f32 %v737_v21, 0.0  ;;  %v10815_v21 = vpop.permute.xlu0 %395 }
 0x129   : > { %9840 = vmatmul.mubr.msk.bf16.gmra.mrb[120].mxu1 %vm513_vm1, %v10559_v49  ;;  %v940_v35 = vmax.f32 %v739_v25, 0.0  ;;  %v10813_v18 = vrot.slane %v9881_v48, %v10409_v6  ;;  %v4937_v19 = vcombine.high %v9881_v48, %v9881_v48  ;;  %16018 = vst [vmem:[#allocation19_spill] sm:$0xff] %v10815_v21 }
 0x12a   : > { %v631_v37 = vpop.f32.mrb[16].mxu0  ;;  %1056 = vadd.xlane.f32.xlu0 %v1055_v10  ;;  %1011 = vadd.xlane.f32.xlu1 %v1010_v31  ;;  %v1013_v39 = vadd.f32 %v939_v32, %v938_v28  ;;  %v1058_v40 = vadd.f32 %v935_v34, %v934_v29  ;;  %v941_v41 = vmax.f32 %v741_v30, 0.0  ;;  %v10817_v28 = vpop.permute.xlu1 %400 }
 0x12b   : > { %v632_v44 = vadd.f32 %v631_v37, %v10793_v36  ;;  %v633_v45 = vpop.f32.mrb[17].mxu0  ;;  %2993 = vmatprep.mubr.bf16.mxu1 %v15893_v3  ;;  %16019 = vst [vmem:[#allocation20_spill] sm:$0xff] %v10817_v28  ;;  %v3868_v37 = vsel %vm538_vm0, %v10690_v5, 0  ;;  %v3874_v5 = vsel %vm538_vm0, %v10694_v7, 0 }
 0x12c   : > { %v634_v46 = vadd.f32 %v633_v45, %v10793_v36  ;;  %v635_v52 = vpop.f32.mrb[18].mxu0  ;;  %v744_v49 = vpop.f32.mrb[16].mxu1  ;;  %v1061_v53 = vadd.f32 %v941_v41, %v940_v35 }
 0x12d   : > { %v636_v54 = vadd.f32 %v635_v52, %v10795_v42  ;;  %v745_v55 = vadd.f32 %v744_v49, %v10793_v36  ;;  %v637_v56 = vpop.f32.mrb[19].mxu0  ;;  %v746_v57 = vpop.f32.mrb[17].mxu1  ;;  %v944_v58 = vmax.f32 %v632_v44, 0.0 }
 0x12e   : > { %v638_v60 = vadd.f32 %v637_v56, %v10795_v42  ;;  %v747_v61 = vadd.f32 %v746_v57, %v10793_v36  ;;  %v748_v62 = vpop.f32.mrb[18].mxu1  ;;  %1014 = vadd.xlane.f32.xlu0 %v1013_v39  ;;  %1059 = vadd.xlane.f32.xlu1 %v1058_v40  ;;  %v945_v63 = vmax.f32 %v634_v46, 0.0  ;;  %v4952_v46 = vcombine.high %v10813_v18, %v10813_v18 }
 0x12f   : > { %v749_v2 = vadd.f32 %v748_v62, %v10795_v42  ;;  %v750_v4 = vpop.f32.mrb[19].mxu1  ;;  %9832 = vmatmul.mubr.msk.bf16.gmra.mrb[124].mxu0 %vm513_vm1, %v10570_v50  ;;  %v950_v8 = vmax.f32 %v636_v54, 0.0  ;;  %v946_v9 = vmax.f32 %v745_v55, 0.0 }
 0x130   : > { %v751_v10 = vadd.f32 %v750_v4, %v10795_v42  ;;  %v1016_v11 = vadd.f32 %v945_v63, %v944_v58  ;;  %3036 = vmatprep.mubr.bf16.mxu0 %v15893_v3  ;;  %v951_v14 = vmax.f32 %v638_v60, 0.0  ;;  %v947_v16 = vmax.f32 %v747_v61, 0.0  ;;  %v10845_v4 = vpop.permute.xlu0 %405 }
 0x131   : > { %9841 = vmatmul.mubr.msk.bf16.gmra.mrb[124].mxu1 %vm513_vm1, %v10570_v50  ;;  %v952_v17 = vmax.f32 %v749_v2, 0.0  ;;  %v10822_v50 = vrot.slane %v4937_v19, %v10409_v6  ;;  %16020 = vst [vmem:[#allocation21_spill] sm:$0xff] %v10845_v4 }
 0x132   : > { %v641_v22 = vpop.f32.mrb[20].mxu0  ;;  %1062 = vadd.xlane.f32.xlu0 %v1061_v53  ;;  %1017 = vadd.xlane.f32.xlu1 %v1016_v11  ;;  %v1019_v24 = vadd.f32 %v951_v14, %v950_v8  ;;  %v1064_v25 = vadd.f32 %v947_v16, %v946_v9  ;;  %v953_v27 = vmax.f32 %v751_v10, 0.0  ;;  %v10847_v11 = vpop.permute.xlu1 %410 }
 0x133   : > { %v642_v29 = vadd.f32 %v641_v22, %v10815_v21  ;;  %v643_v30 = vpop.f32.mrb[21].mxu0  ;;  %3911 = vmatprep.mubr.bf16.mxu1 %v15893_v3  ;;  %v4953_v60 = vcombine.high %v10822_v50, %v10822_v50  ;;  %16021 = vst [vmem:[#allocation22_spill] sm:$0xff] %v10847_v11 }
 0x134   : > { %v644_v31 = vadd.f32 %v643_v30, %v10815_v21  ;;  %v645_v32 = vpop.f32.mrb[22].mxu0  ;;  %v754_v34 = vpop.f32.mrb[20].mxu1  ;;  %v1067_v35 = vadd.f32 %v953_v27, %v952_v17 }
 0x135   : > { %v646_v39 = vadd.f32 %v645_v32, %v10817_v28  ;;  %v755_v40 = vadd.f32 %v754_v34, %v10815_v21  ;;  %v647_v41 = vpop.f32.mrb[23].mxu0  ;;  %v756_v44 = vpop.f32.mrb[21].mxu1  ;;  %v956_v45 = vmax.f32 %v642_v29, 0.0 }
 0x136   : > { %v648_v52 = vadd.f32 %v647_v41, %v10817_v28  ;;  %v757_v49 = vadd.f32 %v756_v44, %v10815_v21  ;;  %v758_v53 = vpop.f32.mrb[22].mxu1  ;;  %1020 = vadd.xlane.f32.xlu0 %v1019_v24  ;;  %1065 = vadd.xlane.f32.xlu1 %v1064_v25  ;;  %v957_v54 = vmax.f32 %v644_v31, 0.0 }
 0x137   : > { %v759_v55 = vadd.f32 %v758_v53, %v10817_v28  ;;  %v760_v56 = vpop.f32.mrb[23].mxu1  ;;  %9843 = vmatmul.mubr.msk.bf16.vlgmr.msra.gmra.mrb[128].mxu0 %vm513_vm1, %v10437_v23  ;;  %v962_v57 = vmax.f32 %v646_v39, 0.0  ;;  %v958_v58 = vmax.f32 %v755_v40, 0.0  ;;  %v10864_v53 = vpop.permute.xlu0 %415 }
 0x138   : > { %v761_v61 = vadd.f32 %v760_v56, %v10817_v28  ;;  %v1022_v62 = vadd.f32 %v957_v54, %v956_v45  ;;  %3046 = vmatprep.mubr.bf16.mxu0 %v15893_v3  ;;  %v963_v63 = vmax.f32 %v648_v52, 0.0  ;;  %v959_v2 = vmax.f32 %v757_v49, 0.0  ;;  %3993 = vmatpush1.bf16.msra.mxu0 %v3868_v37 }
 0x139   : > { %9855 = vmatmul.mubr.msk.bf16.vlgmr.msra.gmra.mrb[128].mxu1 %vm513_vm1, %v10437_v23  ;;  %v964_v7 = vmax.f32 %v759_v55, 0.0  ;;  %9884 = vmatprep.subr.msk.bf16.mxu0 %vm538_vm0, %v4952_v46 }
 0x13a   : > { %v651_v8 = vpop.f32.mrb[24].mxu0  ;;  %1068 = vadd.xlane.f32.xlu0 %v1067_v35  ;;  %1023 = vadd.xlane.f32.xlu1 %v1022_v62  ;;  %v1025_v9 = vadd.f32 %v963_v63, %v962_v57  ;;  %v1070_v48 = vadd.f32 %v959_v2, %v958_v58  ;;  %v965_v10 = vmax.f32 %v761_v61, 0.0  ;;  %v10866_v57 = vpop.permute.xlu1 %420 }
 0x13b   : > { %v652_v14 = vadd.f32 %v651_v8, %v10845_v4  ;;  %v653_v16 = vpop.f32.mrb[25].mxu0  ;;  %3921 = vmatprep.mubr.bf16.mxu1 %v15893_v3  ;;  %4106 = vmatpush1.bf16.msra.mxu1 %v3874_v5 }
 0x13c   : > { %v654_v23 = vadd.f32 %v653_v16, %v10845_v4  ;;  %v655_v17 = vpop.f32.mrb[26].mxu0  ;;  %v764_v19 = vpop.f32.mrb[24].mxu1  ;;  %v1073_v22 = vadd.f32 %v965_v10, %v964_v7  ;;  %9893 = vmatprep.subr.msk.bf16.mxu1 %vm538_vm0, %v4953_v60 }
 0x13d   : > { %v656_v24 = vadd.f32 %v655_v17, %v10847_v11  ;;  %v765_v25 = vadd.f32 %v764_v19, %v10845_v4  ;;  %v657_v27 = vpop.f32.mrb[27].mxu0  ;;  %v766_v29 = vpop.f32.mrb[25].mxu1  ;;  %v968_v30 = vmax.f32 %v652_v14, 0.0 }
 0x13e   : > { %v658_v31 = vadd.f32 %v657_v27, %v10847_v11  ;;  %v767_v32 = vadd.f32 %v766_v29, %v10845_v4  ;;  %v768_v34 = vpop.f32.mrb[26].mxu1  ;;  %1026 = vadd.xlane.f32.xlu0 %v1025_v9  ;;  %1071 = vadd.xlane.f32.xlu1 %v1070_v48  ;;  %v969_v35 = vmax.f32 %v654_v23, 0.0 }
 0x13f   : > { %v769_v37 = vadd.f32 %v768_v34, %v10847_v11  ;;  %v770_v39 = vpop.f32.mrb[27].mxu1  ;;  %9844 = vmatmul.mubr.msk.bf16.gmra.mrb[132].mxu0 %vm513_vm1, %v10470_v33  ;;  %v974_v40 = vmax.f32 %v656_v24, 0.0  ;;  %v970_v41 = vmax.f32 %v765_v25, 0.0 }
 0x140   : > { %v771_v44 = vadd.f32 %v770_v39, %v10847_v11  ;;  %v1028_v45 = vadd.f32 %v969_v35, %v968_v30  ;;  %3056 = vmatprep.mubr.bf16.mxu0 %v15893_v3  ;;  %v975_v46 = vmax.f32 %v658_v31, 0.0  ;;  %v971_v52 = vmax.f32 %v767_v32, 0.0 }
 0x141   : > { %9856 = vmatmul.mubr.msk.bf16.gmra.mrb[132].mxu1 %vm513_vm1, %v10470_v33  ;;  %v976_v49 = vmax.f32 %v769_v37, 0.0 }
 0x142   : > { %v661_v54 = vpop.f32.mrb[28].mxu0  ;;  %1074 = vadd.xlane.f32.xlu0 %v1073_v22  ;;  %1029 = vadd.xlane.f32.xlu1 %v1028_v45  ;;  %v1031_v5 = vadd.f32 %v975_v46, %v974_v40  ;;  %v1076_v55 = vadd.f32 %v971_v52, %v970_v41  ;;  %v977_v56 = vmax.f32 %v771_v44, 0.0 }
 0x143   : > { %v662_v58 = vadd.f32 %v661_v54, %v10864_v53  ;;  %v663_v60 = vpop.f32.mrb[29].mxu0  ;;  %3931 = vmatprep.mubr.bf16.mxu1 %v15893_v3 }
 0x144   : > { %v664_v61 = vadd.f32 %v663_v60, %v10864_v53  ;;  %v665_v62 = vpop.f32.mrb[30].mxu0  ;;  %v774_v33 = vpop.f32.mrb[28].mxu1  ;;  %v1079_v63 = vadd.f32 %v977_v56, %v976_v49 }
 0x145   : > { %v666_v2 = vadd.f32 %v665_v62, %v10866_v57  ;;  %v775_v7 = vadd.f32 %v774_v33, %v10864_v53  ;;  %v667_v8 = vpop.f32.mrb[31].mxu0  ;;  %v776_v9 = vpop.f32.mrb[29].mxu1  ;;  %v980_v48 = vmax.f32 %v662_v58, 0.0 }
 0x146   : > { %v668_v10 = vadd.f32 %v667_v8, %v10866_v57  ;;  %v777_v14 = vadd.f32 %v776_v9, %v10864_v53  ;;  %v778_v16 = vpop.f32.mrb[30].mxu1  ;;  %1032 = vadd.xlane.f32.xlu0 %v1031_v5  ;;  %1077 = vadd.xlane.f32.xlu1 %v1076_v55  ;;  %v981_v23 = vmax.f32 %v664_v61, 0.0 }
 0x147   : > { %v779_v17 = vadd.f32 %v778_v16, %v10866_v57  ;;  %v780_v19 = vpop.f32.mrb[31].mxu1  ;;  %9845 = vmatmul.mubr.msk.bf16.gmra.mrb[136].mxu0 %vm513_vm1, %v10494_v38  ;;  %v986_v22 = vmax.f32 %v666_v2, 0.0  ;;  %v982_v24 = vmax.f32 %v775_v7, 0.0 }
 0x148   : > { %v781_v25 = vadd.f32 %v780_v19, %v10866_v57  ;;  %v1034_v27 = vadd.f32 %v981_v23, %v980_v48  ;;  %3066 = vmatprep.mubr.bf16.mxu0 %v15893_v3  ;;  %v987_v29 = vmax.f32 %v668_v10, 0.0  ;;  %v983_v30 = vmax.f32 %v777_v14, 0.0 }
 0x149   : > { %9857 = vmatmul.mubr.msk.bf16.gmra.mrb[136].mxu1 %vm513_vm1, %v10494_v38  ;;  %v988_v31 = vmax.f32 %v779_v17, 0.0 }
 0x14a   : > { %v817_v32 = vpop.f32.mrb[32].mxu0  ;;  %1080 = vadd.xlane.f32.xlu0 %v1079_v63  ;;  %1035 = vadd.xlane.f32.xlu1 %v1034_v27  ;;  %v1037_v34 = vadd.f32 %v987_v29, %v986_v22  ;;  %v1082_v35 = vadd.f32 %v983_v30, %v982_v24  ;;  %v989_v37 = vmax.f32 %v781_v25, 0.0 }
 0x14b   : > { %v818_v39 = vadd.f32 %v817_v32, %v10716_v12  ;;  %v819_v40 = vpop.f32.mrb[33].mxu0  ;;  %3941 = vmatprep.mubr.bf16.mxu1 %v15893_v3 }
 0x14c   : > { %v820_v41 = vadd.f32 %v819_v40, %v10716_v12  ;;  %v821_v44 = vpop.f32.mrb[34].mxu0  ;;  %v1711_v45 = vpop.f32.mrb[32].mxu1  ;;  %v1085_v46 = vadd.f32 %v989_v37, %v988_v31 }
 0x14d   : > { %v822_v52 = vadd.f32 %v821_v44, %v10726_v15  ;;  %v1712_v38 = vadd.f32 %v1711_v45, %v10716_v12  ;;  %v823_v49 = vpop.f32.mrb[35].mxu0  ;;  %v1713_v54 = vpop.f32.mrb[33].mxu1  ;;  %v900_v5 = vmax.f32 %v818_v39, 0.0 }
 0x14e   : > { %v824_v55 = vadd.f32 %v823_v49, %v10726_v15  ;;  %v1714_v56 = vadd.f32 %v1713_v54, %v10716_v12  ;;  %v1715_v58 = vpop.f32.mrb[34].mxu1  ;;  %1038 = vadd.xlane.f32.xlu0 %v1037_v34  ;;  %1083 = vadd.xlane.f32.xlu1 %v1082_v35  ;;  %v901_v60 = vmax.f32 %v820_v41, 0.0 }
 0x14f   : > { %v1716_v61 = vadd.f32 %v1715_v58, %v10726_v15  ;;  %v1717_v62 = vpop.f32.mrb[35].mxu1  ;;  %9846 = vmatmul.mubr.msk.bf16.gmra.mrb[140].mxu0 %vm513_vm1, %v10517_v43  ;;  %v906_v33 = vmax.f32 %v822_v52, 0.0  ;;  %v2016_v63 = vmax.f32 %v1712_v38, 0.0 }
 0x150   : > { %v1718_v2 = vadd.f32 %v1717_v62, %v10726_v15  ;;  %v1088_v7 = vadd.f32 %v901_v60, %v900_v5  ;;  %3076 = vmatprep.mubr.bf16.mxu0 %v15893_v3  ;;  %v907_v8 = vmax.f32 %v824_v55, 0.0  ;;  %v2017_v9 = vmax.f32 %v1714_v56, 0.0 }
 0x151   : > { %9858 = vmatmul.mubr.msk.bf16.gmra.mrb[140].mxu1 %vm513_vm1, %v10517_v43  ;;  %v2022_v48 = vmax.f32 %v1716_v61, 0.0 }
 0x152   : > { %v827_v10 = vpop.f32.mrb[36].mxu0  ;;  %1086 = vadd.xlane.f32.xlu0 %v1085_v46  ;;  %1089 = vadd.xlane.f32.xlu1 %v1088_v7  ;;  %v1091_v14 = vadd.f32 %v907_v8, %v906_v33  ;;  %v2112_v16 = vadd.f32 %v2017_v9, %v2016_v63  ;;  %v2023_v23 = vmax.f32 %v1718_v2, 0.0 }
 0x153   : > { %v828_v17 = vadd.f32 %v827_v10, %v10723_v13  ;;  %v829_v19 = vpop.f32.mrb[37].mxu0  ;;  %3951 = vmatprep.mubr.bf16.mxu1 %v15893_v3 }
 0x154   : > { %v830_v22 = vadd.f32 %v829_v19, %v10723_v13  ;;  %v831_v24 = vpop.f32.mrb[38].mxu0  ;;  %v1721_v25 = vpop.f32.mrb[36].mxu1  ;;  %v2115_v27 = vadd.f32 %v2023_v23, %v2022_v48 }
 0x155   : > { %v832_v29 = vadd.f32 %v831_v24, %v10742_v51  ;;  %v1722_v43 = vadd.f32 %v1721_v25, %v10723_v13  ;;  %v833_v30 = vpop.f32.mrb[39].mxu0  ;;  %v1723_v31 = vpop.f32.mrb[37].mxu1  ;;  %v912_v32 = vmax.f32 %v828_v17, 0.0 }
 0x156   : > { %v834_v34 = vadd.f32 %v833_v30, %v10742_v51  ;;  %v1724_v35 = vadd.f32 %v1723_v31, %v10723_v13  ;;  %v1725_v37 = vpop.f32.mrb[38].mxu1  ;;  %1092 = vadd.xlane.f32.xlu0 %v1091_v14  ;;  %2113 = vadd.xlane.f32.xlu1 %v2112_v16  ;;  %v913_v39 = vmax.f32 %v830_v22, 0.0  ;;  %v10921_v22 = vld [vmem:[%s15886_s2 + $0x28] sm:$0xff]  }
 0x157   : > { %v1726_v40 = vadd.f32 %v1725_v37, %v10742_v51  ;;  %v1727_v41 = vpop.f32.mrb[39].mxu1  ;;  %9847 = vmatmul.mubr.msk.bf16.gmra.mrb[144].mxu0 %vm513_vm1, %v10537_v47  ;;  %v918_v44 = vmax.f32 %v832_v29, 0.0  ;;  %v2028_v45 = vmax.f32 %v1722_v43, 0.0 }
 0x158   : > { %v1728_v46 = vadd.f32 %v1727_v41, %v10742_v51  ;;  %v1094_v52 = vadd.f32 %v913_v39, %v912_v32  ;;  %3086 = vmatprep.mubr.bf16.mxu0 %v15893_v3  ;;  %v919_v38 = vmax.f32 %v834_v34, 0.0  ;;  %v2029_v49 = vmax.f32 %v1724_v35, 0.0 }
 0x159   : > { %9859 = vmatmul.mubr.msk.bf16.gmra.mrb[144].mxu1 %vm513_vm1, %v10537_v47  ;;  %v2034_v54 = vmax.f32 %v1726_v40, 0.0 }
 0x15a   : > { %v837_v5 = vpop.f32.mrb[40].mxu0  ;;  %2116 = vadd.xlane.f32.xlu0 %v2115_v27  ;;  %1095 = vadd.xlane.f32.xlu1 %v1094_v52  ;;  %v1097_v55 = vadd.f32 %v919_v38, %v918_v44  ;;  %v2118_v56 = vadd.f32 %v2029_v49, %v2028_v45  ;;  %v2035_v58 = vmax.f32 %v1728_v46, 0.0 }
 0x15b   : > { %v838_v60 = vadd.f32 %v837_v5, %v10757_v20  ;;  %v839_v61 = vpop.f32.mrb[41].mxu0  ;;  %3961 = vmatprep.mubr.bf16.mxu1 %v15893_v3 }
 0x15c   : > { %v840_v62 = vadd.f32 %v839_v61, %v10757_v20  ;;  %v841_v33 = vpop.f32.mrb[42].mxu0  ;;  %v1731_v63 = vpop.f32.mrb[40].mxu1  ;;  %v2121_v2 = vadd.f32 %v2035_v58, %v2034_v54 }
 0x15d   : > { %v842_v7 = vadd.f32 %v841_v33, %v10760_v26  ;;  %v1732_v47 = vadd.f32 %v1731_v63, %v10757_v20  ;;  %v843_v8 = vpop.f32.mrb[43].mxu0  ;;  %v1733_v9 = vpop.f32.mrb[41].mxu1  ;;  %v924_v48 = vmax.f32 %v838_v60, 0.0  ;;  %v10940_v33 = vld [vmem:[%s15886_s2 + $0x30] sm:$0xff]  }
 0x15e   : > { %v844_v10 = vadd.f32 %v843_v8, %v10760_v26  ;;  %v1734_v14 = vadd.f32 %v1733_v9, %v10757_v20  ;;  %v1735_v16 = vpop.f32.mrb[42].mxu1  ;;  %1098 = vadd.xlane.f32.xlu0 %v1097_v55  ;;  %2119 = vadd.xlane.f32.xlu1 %v2118_v56  ;;  %v925_v23 = vmax.f32 %v840_v62, 0.0 }
 0x15f   : > { %v1736_v17 = vadd.f32 %v1735_v16, %v10760_v26  ;;  %v1737_v19 = vpop.f32.mrb[43].mxu1  ;;  %9848 = vmatmul.mubr.msk.bf16.gmra.mrb[148].mxu0 %vm513_vm1, %v10921_v22  ;;  %v930_v24 = vmax.f32 %v842_v7, 0.0  ;;  %v2040_v25 = vmax.f32 %v1732_v47, 0.0 }
 0x160   : > { %v1738_v27 = vadd.f32 %v1737_v19, %v10760_v26  ;;  %v1100_v29 = vadd.f32 %v925_v23, %v924_v48  ;;  %3096 = vmatprep.mubr.bf16.mxu0 %v15893_v3  ;;  %v931_v43 = vmax.f32 %v844_v10, 0.0  ;;  %v2041_v30 = vmax.f32 %v1734_v14, 0.0 }
 0x161   : > { %9860 = vmatmul.mubr.msk.bf16.gmra.mrb[148].mxu1 %vm513_vm1, %v10921_v22  ;;  %v2046_v31 = vmax.f32 %v1736_v17, 0.0 }
 0x162   : > { %v847_v32 = vpop.f32.mrb[44].mxu0  ;;  %2122 = vadd.xlane.f32.xlu0 %v2121_v2  ;;  %1101 = vadd.xlane.f32.xlu1 %v1100_v29  ;;  %v1103_v34 = vadd.f32 %v931_v43, %v930_v24  ;;  %v2124_v35 = vadd.f32 %v2041_v30, %v2040_v25  ;;  %v2047_v37 = vmax.f32 %v1738_v27, 0.0 }
 0x163   : > { %v848_v39 = vadd.f32 %v847_v32, %v10775_v59  ;;  %v849_v40 = vpop.f32.mrb[45].mxu0  ;;  %3971 = vmatprep.mubr.bf16.mxu1 %v15893_v3 }
 0x164   : > { %v850_v41 = vadd.f32 %v849_v40, %v10775_v59  ;;  %v851_v44 = vpop.f32.mrb[46].mxu0  ;;  %v1741_v45 = vpop.f32.mrb[44].mxu1  ;;  %v2127_v46 = vadd.f32 %v2047_v37, %v2046_v31 }
 0x165   : > { %v852_v52 = vadd.f32 %v851_v44, %v10777_v1  ;;  %v1742_v38 = vadd.f32 %v1741_v45, %v10775_v59  ;;  %v853_v49 = vpop.f32.mrb[47].mxu0  ;;  %v1743_v54 = vpop.f32.mrb[45].mxu1  ;;  %v936_v5 = vmax.f32 %v848_v39, 0.0  ;;  %v10959_v45 = vld [vmem:[%s15886_s2 + $0x38] sm:$0xff]  }
 0x166   : > { %v854_v55 = vadd.f32 %v853_v49, %v10777_v1  ;;  %v1744_v56 = vadd.f32 %v1743_v54, %v10775_v59  ;;  %v1745_v58 = vpop.f32.mrb[46].mxu1  ;;  %1104 = vadd.xlane.f32.xlu0 %v1103_v34  ;;  %2125 = vadd.xlane.f32.xlu1 %v2124_v35  ;;  %v937_v60 = vmax.f32 %v850_v41, 0.0 }
 0x167   : > { %v1746_v61 = vadd.f32 %v1745_v58, %v10777_v1  ;;  %v1747_v62 = vpop.f32.mrb[47].mxu1  ;;  %9849 = vmatmul.mubr.msk.bf16.gmra.mrb[152].mxu0 %vm513_vm1, %v10940_v33  ;;  %v942_v63 = vmax.f32 %v852_v52, 0.0  ;;  %v2052_v2 = vmax.f32 %v1742_v38, 0.0 }
 0x168   : > { %v1748_v7 = vadd.f32 %v1747_v62, %v10777_v1  ;;  %v1106_v47 = vadd.f32 %v937_v60, %v936_v5  ;;  %3106 = vmatprep.mubr.bf16.mxu0 %v15893_v3  ;;  %v943_v8 = vmax.f32 %v854_v55, 0.0  ;;  %v2053_v9 = vmax.f32 %v1744_v56, 0.0  ;;  %v10968_v62 = vld.sshfl [vmem:[%s10414_s26 + $0x38] sm:$0x33 pattern:$0x76325410] }
 0x169   : > { %9861 = vmatmul.mubr.msk.bf16.gmra.mrb[152].mxu1 %vm513_vm1, %v10940_v33  ;;  %v2058_v48 = vmax.f32 %v1746_v61, 0.0 }
 0x16a   : > { %v857_v10 = vpop.f32.mrb[48].mxu0  ;;  %2128 = vadd.xlane.f32.xlu0 %v2127_v46  ;;  %1107 = vadd.xlane.f32.xlu1 %v1106_v47  ;;  %v1109_v14 = vadd.f32 %v943_v8, %v942_v63  ;;  %v2130_v16 = vadd.f32 %v2053_v9, %v2052_v2  ;;  %v2059_v23 = vmax.f32 %v1748_v7, 0.0  ;;  %v10973_v7 = vld [vmem:[%s10414_s26 + $0x3c] sm:$0xff] }
 0x16b   : > { %v858_v17 = vadd.f32 %v857_v10, %v10793_v36  ;;  %v859_v19 = vpop.f32.mrb[49].mxu0  ;;  %3981 = vmatprep.mubr.bf16.mxu1 %v15893_v3  ;;  %v4963_v10 = vsel %vm538_vm0, %v10813_v18, 0 }
 0x16c   : > { %v860_v24 = vadd.f32 %v859_v19, %v10793_v36  ;;  %v861_v25 = vpop.f32.mrb[50].mxu0  ;;  %v1751_v27 = vpop.f32.mrb[48].mxu1  ;;  %v2133_v29 = vadd.f32 %v2059_v23, %v2058_v48 }
 0x16d   : > { %v862_v43 = vadd.f32 %v861_v25, %v10795_v42  ;;  %v1752_v30 = vadd.f32 %v1751_v27, %v10793_v36  ;;  %v863_v31 = vpop.f32.mrb[51].mxu0  ;;  %v1753_v32 = vpop.f32.mrb[49].mxu1  ;;  %v948_v34 = vmax.f32 %v858_v17, 0.0  ;;  %v4961_v25 = vcombine.high %v10968_v62, %v10968_v62 }
 0x16e   : > { %v864_v35 = vadd.f32 %v863_v31, %v10795_v42  ;;  %v1754_v37 = vadd.f32 %v1753_v32, %v10793_v36  ;;  %v1755_v39 = vpop.f32.mrb[50].mxu1  ;;  %1110 = vadd.xlane.f32.xlu0 %v1109_v14  ;;  %2131 = vadd.xlane.f32.xlu1 %v2130_v16  ;;  %v949_v40 = vmax.f32 %v860_v24, 0.0  ;;  %v10980_v14 = vrot.slane %v10973_v7, %v10409_v6 }
 0x16f   : > { %v1756_v41 = vadd.f32 %v1755_v39, %v10795_v42  ;;  %v1757_v44 = vpop.f32.mrb[51].mxu1  ;;  %9850 = vmatmul.mubr.msk.bf16.gmra.mrb[156].mxu0 %vm513_vm1, %v10959_v45  ;;  %v954_v46 = vmax.f32 %v862_v43, 0.0  ;;  %v2064_v52 = vmax.f32 %v1752_v30, 0.0  ;;  %v4969_v30 = vsel %vm538_vm0, %v10822_v50, 0 }
 0x170   : > { %v1758_v38 = vadd.f32 %v1757_v44, %v10795_v42  ;;  %v1112_v49 = vadd.f32 %v949_v40, %v948_v34  ;;  %4024 = vmatprep.mubr.bf16.mxu0 %v15893_v3  ;;  %v955_v54 = vmax.f32 %v864_v35, 0.0  ;;  %v2065_v5 = vmax.f32 %v1754_v37, 0.0  ;;  %v10994_v34 = vld [vmem:[%s15886_s2] sm:$0xff]  }
 0x171   : > { %9862 = vmatmul.mubr.msk.bf16.gmra.mrb[156].mxu1 %vm513_vm1, %v10959_v45  ;;  %v2070_v55 = vmax.f32 %v1756_v41, 0.0  ;;  %v6053_v39 = vcombine.high %v10980_v14, %v10980_v14 }
 0x172   : > { %v867_v56 = vpop.f32.mrb[52].mxu0  ;;  %2134 = vadd.xlane.f32.xlu0 %v2133_v29  ;;  %1113 = vadd.xlane.f32.xlu1 %v1112_v49  ;;  %v1115_v58 = vadd.f32 %v955_v54, %v954_v46  ;;  %v2136_v60 = vadd.f32 %v2065_v5, %v2064_v52  ;;  %v2071_v61 = vmax.f32 %v1758_v38, 0.0 }
 0x173   : > { %v868_v63 = vadd.f32 %v867_v56, %v10815_v21  ;;  %v869_v2 = vpop.f32.mrb[53].mxu0  ;;  %4137 = vmatprep.mubr.bf16.mxu1 %v15893_v3 }
 0x174   : > { %v870_v47 = vadd.f32 %v869_v2, %v10815_v21  ;;  %v871_v8 = vpop.f32.mrb[54].mxu0  ;;  %v1761_v9 = vpop.f32.mrb[52].mxu1  ;;  %v2139_v48 = vadd.f32 %v2071_v61, %v2070_v55 }
 0x175   : > { %v872_v16 = vadd.f32 %v871_v8, %v10817_v28  ;;  %v1762_v23 = vadd.f32 %v1761_v9, %v10815_v21  ;;  %v873_v17 = vpop.f32.mrb[55].mxu0  ;;  %v1763_v19 = vpop.f32.mrb[53].mxu1  ;;  %v960_v24 = vmax.f32 %v868_v63, 0.0 }
 0x176   : > { %v874_v27 = vadd.f32 %v873_v17, %v10817_v28  ;;  %v1764_v29 = vadd.f32 %v1763_v19, %v10815_v21  ;;  %v1765_v43 = vpop.f32.mrb[54].mxu1  ;;  %1116 = vadd.xlane.f32.xlu0 %v1115_v58  ;;  %2137 = vadd.xlane.f32.xlu1 %v2136_v60  ;;  %v961_v18 = vmax.f32 %v870_v47, 0.0 }
 0x177   : > { %v1766_v31 = vadd.f32 %v1765_v43, %v10817_v28  ;;  %v1767_v32 = vpop.f32.mrb[55].mxu1  ;;  %9864 = vmatmul.mubr.msk.bf16.vlgmr.msra.gmra.mrb[160].mxu0 %vm513_vm1, %v10994_v34  ;;  %v966_v35 = vmax.f32 %v872_v16, 0.0  ;;  %v2076_v37 = vmax.f32 %v1762_v23, 0.0 }
 0x178   : > { %v1768_v40 = vadd.f32 %v1767_v32, %v10817_v28  ;;  %v1118_v41 = vadd.f32 %v961_v18, %v960_v24  ;;  %4034 = vmatprep.mubr.bf16.mxu0 %v15893_v3  ;;  %v967_v50 = vmax.f32 %v874_v27, 0.0  ;;  %v2077_v44 = vmax.f32 %v1764_v29, 0.0  ;;  %4981 = vmatpush1.bf16.msra.mxu0 %v4963_v10  ;;  %v11017_v24 = vld [vmem:[%s15886_s2 + $0x8] sm:$0xff]  }
 0x179   : > { %9873 = vmatmul.mubr.msk.bf16.vlgmr.msra.gmra.mrb[160].mxu1 %vm513_vm1, %v10994_v34  ;;  %v2082_v46 = vmax.f32 %v1766_v31, 0.0  ;;  %9902 = vmatprep.subr.msk.bf16.mxu0 %vm538_vm0, %v4961_v25 }
 0x17a   : > { %v877_v52 = vpop.f32.mrb[56].mxu0  ;;  %2140 = vadd.xlane.f32.xlu0 %v2139_v48  ;;  %1119 = vadd.xlane.f32.xlu1 %v1118_v41  ;;  %v1121_v38 = vadd.f32 %v967_v50, %v966_v35  ;;  %v2142_v49 = vadd.f32 %v2077_v44, %v2076_v37  ;;  %v2083_v54 = vmax.f32 %v1768_v40, 0.0 }
 0x17b   : > { %v878_v5 = vadd.f32 %v877_v52, %v10845_v4  ;;  %v879_v55 = vpop.f32.mrb[57].mxu0  ;;  %4147 = vmatprep.mubr.bf16.mxu1 %v15893_v3  ;;  %5094 = vmatpush1.bf16.msra.mxu1 %v4969_v30 }
 0x17c   : > { %v880_v56 = vadd.f32 %v879_v55, %v10845_v4  ;;  %v881_v58 = vpop.f32.mrb[58].mxu0  ;;  %v1771_v60 = vpop.f32.mrb[56].mxu1  ;;  %v2145_v61 = vadd.f32 %v2083_v54, %v2082_v46  ;;  %9914 = vmatprep.subr.msk.bf16.mxu1 %vm538_vm0, %v6053_v39 }
 0x17d   : > { %v882_v63 = vadd.f32 %v881_v58, %v10847_v11  ;;  %v1772_v2 = vadd.f32 %v1771_v60, %v10845_v4  ;;  %v883_v47 = vpop.f32.mrb[59].mxu0  ;;  %v1773_v8 = vpop.f32.mrb[57].mxu1  ;;  %v972_v9 = vmax.f32 %v878_v5, 0.0 }
 0x17e   : > { %v884_v48 = vadd.f32 %v883_v47, %v10847_v11  ;;  %v1774_v10 = vadd.f32 %v1773_v8, %v10845_v4  ;;  %v1775_v16 = vpop.f32.mrb[58].mxu1  ;;  %1122 = vadd.xlane.f32.xlu0 %v1121_v38  ;;  %2143 = vadd.xlane.f32.xlu1 %v2142_v49  ;;  %v973_v23 = vmax.f32 %v880_v56, 0.0  ;;  %v11036_v47 = vld [vmem:[%s15886_s2 + $0x10] sm:$0xff]  }
 0x17f   : > { %v1776_v17 = vadd.f32 %v1775_v16, %v10847_v11  ;;  %v1777_v19 = vpop.f32.mrb[59].mxu1  ;;  %9865 = vmatmul.mubr.msk.bf16.gmra.mrb[164].mxu0 %vm513_vm1, %v11017_v24  ;;  %v978_v25 = vmax.f32 %v882_v63, 0.0  ;;  %v2088_v27 = vmax.f32 %v1772_v2, 0.0 }
 0x180   : > { %v1778_v29 = vadd.f32 %v1777_v19, %v10847_v11  ;;  %v1124_v43 = vadd.f32 %v973_v23, %v972_v9  ;;  %4044 = vmatprep.mubr.bf16.mxu0 %v15893_v3  ;;  %v979_v18 = vmax.f32 %v884_v48, 0.0  ;;  %v2089_v30 = vmax.f32 %v1774_v10, 0.0 }
 0x181   : > { %9874 = vmatmul.mubr.msk.bf16.gmra.mrb[164].mxu1 %vm513_vm1, %v11017_v24  ;;  %v2094_v31 = vmax.f32 %v1776_v17, 0.0 }
 0x182   : > { %v887_v32 = vpop.f32.mrb[60].mxu0  ;;  %2146 = vadd.xlane.f32.xlu0 %v2145_v61  ;;  %1125 = vadd.xlane.f32.xlu1 %v1124_v43  ;;  %v1127_v35 = vadd.f32 %v979_v18, %v978_v25  ;;  %v2148_v37 = vadd.f32 %v2089_v30, %v2088_v27  ;;  %v2095_v39 = vmax.f32 %v1778_v29, 0.0 }
 0x183   : > { %v888_v40 = vadd.f32 %v887_v32, %v10864_v53  ;;  %v889_v41 = vpop.f32.mrb[61].mxu0  ;;  %4157 = vmatprep.mubr.bf16.mxu1 %v15893_v3 }
 0x184   : > { %v890_v50 = vadd.f32 %v889_v41, %v10864_v53  ;;  %v891_v44 = vpop.f32.mrb[62].mxu0  ;;  %v1781_v46 = vpop.f32.mrb[60].mxu1  ;;  %v2151_v52 = vadd.f32 %v2095_v39, %v2094_v31 }
 0x185   : > { %v892_v38 = vadd.f32 %v891_v44, %v10866_v57  ;;  %v1782_v49 = vadd.f32 %v1781_v46, %v10864_v53  ;;  %v893_v54 = vpop.f32.mrb[63].mxu0  ;;  %v1783_v5 = vpop.f32.mrb[61].mxu1  ;;  %v984_v55 = vmax.f32 %v888_v40, 0.0 }
 0x186   : > { %v894_v56 = vadd.f32 %v893_v54, %v10866_v57  ;;  %v1784_v58 = vadd.f32 %v1783_v5, %v10864_v53  ;;  %v1785_v60 = vpop.f32.mrb[62].mxu1  ;;  %1128 = vadd.xlane.f32.xlu0 %v1127_v35  ;;  %2149 = vadd.xlane.f32.xlu1 %v2148_v37  ;;  %v985_v61 = vmax.f32 %v890_v50, 0.0  ;;  %v11055_v5 = vld [vmem:[%s15886_s2 + $0x18] sm:$0xff]  }
 0x187   : > { %v1786_v63 = vadd.f32 %v1785_v60, %v10866_v57  ;;  %v1787_v2 = vpop.f32.mrb[63].mxu1  ;;  %9866 = vmatmul.mubr.msk.bf16.gmra.mrb[168].mxu0 %vm513_vm1, %v11036_v47  ;;  %v990_v8 = vmax.f32 %v892_v38, 0.0  ;;  %v2100_v9 = vmax.f32 %v1782_v49, 0.0 }
 0x188   : > { %v1788_v48 = vadd.f32 %v1787_v2, %v10866_v57  ;;  %v1130_v10 = vadd.f32 %v985_v61, %v984_v55  ;;  %4054 = vmatprep.mubr.bf16.mxu0 %v15893_v3  ;;  %v991_v16 = vmax.f32 %v894_v56, 0.0  ;;  %v2101_v23 = vmax.f32 %v1784_v58, 0.0 }
 0x189   : > { %9875 = vmatmul.mubr.msk.bf16.gmra.mrb[168].mxu1 %vm513_vm1, %v11036_v47  ;;  %v2106_v17 = vmax.f32 %v1786_v63, 0.0 }
 0x18a   : > { %v1824_v19 = vpop.f32.mrb[64].mxu0  ;;  %2152 = vadd.xlane.f32.xlu0 %v2151_v52  ;;  %1131 = vadd.xlane.f32.xlu1 %v1130_v10  ;;  %v1133_v25 = vadd.f32 %v991_v16, %v990_v8  ;;  %v2154_v27 = vadd.f32 %v2101_v23, %v2100_v9  ;;  %v2107_v29 = vmax.f32 %v1788_v48, 0.0 }
 0x18b   : > { %v1825_v43 = vadd.f32 %v1824_v19, %v10716_v12  ;;  %v1826_v18 = vpop.f32.mrb[65].mxu0  ;;  %4167 = vmatprep.mubr.bf16.mxu1 %v15893_v3 }
 0x18c   : > { %v1827_v30 = vadd.f32 %v1826_v18, %v10716_v12  ;;  %v1828_v31 = vpop.f32.mrb[66].mxu0  ;;  %v1937_v32 = vpop.f32.mrb[64].mxu1  ;;  %v2157_v35 = vadd.f32 %v2107_v29, %v2106_v17 }
 0x18d   : > { %v1829_v37 = vadd.f32 %v1828_v31, %v10726_v15  ;;  %v1938_v39 = vadd.f32 %v1937_v32, %v10716_v12  ;;  %v1830_v40 = vpop.f32.mrb[67].mxu0  ;;  %v1939_v41 = vpop.f32.mrb[65].mxu1  ;;  %v2018_v50 = vmax.f32 %v1825_v43, 0.0 }
 0x18e   : > { %v1831_v44 = vadd.f32 %v1830_v40, %v10726_v15  ;;  %v1940_v46 = vadd.f32 %v1939_v41, %v10716_v12  ;;  %v1941_v52 = vpop.f32.mrb[66].mxu1  ;;  %1134 = vadd.xlane.f32.xlu0 %v1133_v25  ;;  %2155 = vadd.xlane.f32.xlu1 %v2154_v27  ;;  %v2019_v38 = vmax.f32 %v1827_v30, 0.0 }
 0x18f   : > { %v1942_v49 = vadd.f32 %v1941_v52, %v10726_v15  ;;  %v1943_v54 = vpop.f32.mrb[67].mxu1  ;;  %9867 = vmatmul.mubr.msk.bf16.gmra.mrb[172].mxu0 %vm513_vm1, %v11055_v5  ;;  %v2024_v55 = vmax.f32 %v1829_v37, 0.0  ;;  %v2020_v56 = vmax.f32 %v1938_v39, 0.0 }
 0x190   : > { %v1944_v58 = vadd.f32 %v1943_v54, %v10726_v15  ;;  %v2160_v60 = vadd.f32 %v2019_v38, %v2018_v50  ;;  %4064 = vmatprep.mubr.bf16.mxu0 %v15893_v3  ;;  %v2025_v61 = vmax.f32 %v1831_v44, 0.0  ;;  %v2021_v63 = vmax.f32 %v1940_v46, 0.0  ;;  %v11074_v50 = vld [vmem:[%s15886_s2 + $0x20] sm:$0xff]  }
 0x191   : > { %9876 = vmatmul.mubr.msk.bf16.gmra.mrb[172].mxu1 %vm513_vm1, %v11055_v5  ;;  %v2026_v2 = vmax.f32 %v1942_v49, 0.0 }
 0x192   : > { %v1834_v8 = vpop.f32.mrb[68].mxu0  ;;  %2158 = vadd.xlane.f32.xlu0 %v2157_v35  ;;  %2161 = vadd.xlane.f32.xlu1 %v2160_v60  ;;  %v2163_v9 = vadd.f32 %v2025_v61, %v2024_v55  ;;  %v2208_v48 = vadd.f32 %v2021_v63, %v2020_v56  ;;  %v2027_v10 = vmax.f32 %v1944_v58, 0.0 }
 0x193   : > { %v1835_v16 = vadd.f32 %v1834_v8, %v10723_v13  ;;  %v1836_v23 = vpop.f32.mrb[69].mxu0  ;;  %4177 = vmatprep.mubr.bf16.mxu1 %v15893_v3 }
 0x194   : > { %v1837_v17 = vadd.f32 %v1836_v23, %v10723_v13  ;;  %v1838_v19 = vpop.f32.mrb[70].mxu0  ;;  %v1947_v25 = vpop.f32.mrb[68].mxu1  ;;  %v2211_v27 = vadd.f32 %v2027_v10, %v2026_v2 }
 0x195   : > { %v1839_v29 = vadd.f32 %v1838_v19, %v10742_v51  ;;  %v1948_v43 = vadd.f32 %v1947_v25, %v10723_v13  ;;  %v1840_v18 = vpop.f32.mrb[71].mxu0  ;;  %v1949_v30 = vpop.f32.mrb[69].mxu1  ;;  %v2030_v31 = vmax.f32 %v1835_v16, 0.0 }
 0x196   : > { %v1841_v32 = vadd.f32 %v1840_v18, %v10742_v51  ;;  %v1950_v35 = vadd.f32 %v1949_v30, %v10723_v13  ;;  %v1951_v37 = vpop.f32.mrb[70].mxu1  ;;  %2164 = vadd.xlane.f32.xlu0 %v2163_v9  ;;  %2209 = vadd.xlane.f32.xlu1 %v2208_v48  ;;  %v2031_v39 = vmax.f32 %v1837_v17, 0.0 }
 0x197   : > { %v1952_v40 = vadd.f32 %v1951_v37, %v10742_v51  ;;  %v1953_v41 = vpop.f32.mrb[71].mxu1  ;;  %9868 = vmatmul.mubr.msk.bf16.gmra.mrb[176].mxu0 %vm513_vm1, %v11074_v50  ;;  %v2036_v44 = vmax.f32 %v1839_v29, 0.0  ;;  %v2032_v46 = vmax.f32 %v1948_v43, 0.0 }
 0x198   : > { %v1954_v52 = vadd.f32 %v1953_v41, %v10742_v51  ;;  %v2166_v38 = vadd.f32 %v2031_v39, %v2030_v31  ;;  %4074 = vmatprep.mubr.bf16.mxu0 %v15893_v3  ;;  %v2037_v49 = vmax.f32 %v1841_v32, 0.0  ;;  %v2033_v54 = vmax.f32 %v1950_v35, 0.0 }
 0x199   : > { %9877 = vmatmul.mubr.msk.bf16.gmra.mrb[176].mxu1 %vm513_vm1, %v11074_v50  ;;  %v2038_v55 = vmax.f32 %v1952_v40, 0.0 }
 0x19a   : > { %v1844_v56 = vpop.f32.mrb[72].mxu0  ;;  %2212 = vadd.xlane.f32.xlu0 %v2211_v27  ;;  %2167 = vadd.xlane.f32.xlu1 %v2166_v38  ;;  %v2169_v58 = vadd.f32 %v2037_v49, %v2036_v44  ;;  %v2214_v60 = vadd.f32 %v2033_v54, %v2032_v46  ;;  %v2039_v61 = vmax.f32 %v1954_v52, 0.0 }
 0x19b   : > { %v1845_v63 = vadd.f32 %v1844_v56, %v10757_v20  ;;  %v1846_v2 = vpop.f32.mrb[73].mxu0  ;;  %4187 = vmatprep.mubr.bf16.mxu1 %v15893_v3 }
 0x19c   : > { %v1847_v8 = vadd.f32 %v1846_v2, %v10757_v20  ;;  %v1848_v9 = vpop.f32.mrb[74].mxu0  ;;  %v1957_v48 = vpop.f32.mrb[72].mxu1  ;;  %v2217_v10 = vadd.f32 %v2039_v61, %v2038_v55 }
 0x19d   : > { %v1849_v16 = vadd.f32 %v1848_v9, %v10760_v26  ;;  %v1958_v23 = vadd.f32 %v1957_v48, %v10757_v20  ;;  %v1850_v17 = vpop.f32.mrb[75].mxu0  ;;  %v1959_v19 = vpop.f32.mrb[73].mxu1  ;;  %v2042_v25 = vmax.f32 %v1845_v63, 0.0 }
 0x19e   : > { %v1851_v27 = vadd.f32 %v1850_v17, %v10760_v26  ;;  %v1960_v29 = vadd.f32 %v1959_v19, %v10757_v20  ;;  %v1961_v43 = vpop.f32.mrb[74].mxu1  ;;  %2170 = vadd.xlane.f32.xlu0 %v2169_v58  ;;  %2215 = vadd.xlane.f32.xlu1 %v2214_v60  ;;  %v2043_v18 = vmax.f32 %v1847_v8, 0.0 }
 0x19f   : > { %v1962_v30 = vadd.f32 %v1961_v43, %v10760_v26  ;;  %9869 = vmatmul.mubr.msk.bf16.gmra.mrb[180].mxu0 %vm513_vm1, %v10921_v22  ;;  %v11092_v31 = vpop.xlane.xlu0 %993  ;;  %v1963_v32 = vpop.f32.mrb[75].mxu1  ;;  %v2048_v35 = vmax.f32 %v1849_v16, 0.0  ;;  %v2044_v37 = vmax.f32 %v1958_v23, 0.0 }
 0x1a0   : > { %v1964_v39 = vadd.f32 %v1963_v32, %v10760_v26  ;;  %v2172_v40 = vadd.f32 %v2043_v18, %v2042_v25  ;;  %4084 = vmatprep.mubr.bf16.mxu0 %v15893_v3  ;;  %v2049_v41 = vmax.f32 %v1851_v27, 0.0  ;;  %v2045_v44 = vmax.f32 %v1960_v29, 0.0 }
 0x1a1   : > { %v11096_v46 = vpop.xlane.xlu1 %996  ;;  %9878 = vmatmul.mubr.msk.bf16.gmra.mrb[180].mxu1 %vm513_vm1, %v10921_v22  ;;  %v2050_v52 = vmax.f32 %v1962_v30, 0.0 }
 0x1a2   : > { %v1854_v38 = vpop.f32.mrb[76].mxu0  ;;  %2218 = vadd.xlane.f32.xlu0 %v2217_v10  ;;  %2173 = vadd.xlane.f32.xlu1 %v2172_v40  ;;  %v2175_v49 = vadd.f32 %v2049_v41, %v2048_v35  ;;  %v2220_v54 = vadd.f32 %v2045_v44, %v2044_v37  ;;  %v2051_v55 = vmax.f32 %v1964_v39, 0.0 }
 0x1a3   : > { %v1855_v56 = vadd.f32 %v1854_v38, %v10775_v59  ;;  %v1856_v58 = vpop.f32.mrb[77].mxu0  ;;  %v11101_v60 = vpop.xlane.xlu0 %1044  ;;  %4197 = vmatprep.mubr.bf16.mxu1 %v15893_v3 }
 0x1a4   : > { %v1857_v61 = vadd.f32 %v1856_v58, %v10775_v59  ;;  %v1858_v63 = vpop.f32.mrb[78].mxu0  ;;  %v1967_v2 = vpop.f32.mrb[76].mxu1  ;;  %v2223_v8 = vadd.f32 %v2051_v55, %v2050_v52 }
 0x1a5   : > { %v1859_v22 = vadd.f32 %v1858_v63, %v10777_v1  ;;  %v1968_v9 = vadd.f32 %v1967_v2, %v10775_v59  ;;  %v1860_v48 = vpop.f32.mrb[79].mxu0  ;;  %v1969_v10 = vpop.f32.mrb[77].mxu1  ;;  %v2054_v16 = vmax.f32 %v1855_v56, 0.0 }
 0x1a6   : > { %v1861_v23 = vadd.f32 %v1860_v48, %v10777_v1  ;;  %v1970_v17 = vadd.f32 %v1969_v10, %v10775_v59  ;;  %v11109_v19 = vpop.xlane.xlu1 %1041  ;;  %v1971_v25 = vpop.f32.mrb[78].mxu1  ;;  %2176 = vadd.xlane.f32.xlu0 %v2175_v49  ;;  %2221 = vadd.xlane.f32.xlu1 %v2220_v54  ;;  %v2055_v27 = vmax.f32 %v1857_v61, 0.0 }
 0x1a7   : > { %v1972_v29 = vadd.f32 %v1971_v25, %v10777_v1  ;;  %v1973_v43 = vpop.f32.mrb[79].mxu1  ;;  %9870 = vmatmul.mubr.msk.bf16.gmra.mrb[184].mxu0 %vm513_vm1, %v10940_v33  ;;  %v1000_v18 = vpop.xlane.xlu0 %999  ;;  %v2060_v30 = vmax.f32 %v1859_v22, 0.0  ;;  %v2056_v32 = vmax.f32 %v1968_v9, 0.0 }
 0x1a8   : > { %v1974_v35 = vadd.f32 %v1973_v43, %v10777_v1  ;;  %v2178_v37 = vadd.f32 %v2055_v27, %v2054_v16  ;;  %4094 = vmatprep.mubr.bf16.mxu0 %v15893_v3  ;;  %v2061_v39 = vmax.f32 %v1861_v23, 0.0  ;;  %v2057_v40 = vmax.f32 %v1970_v17, 0.0 }
 0x1a9   : > { %9879 = vmatmul.mubr.msk.bf16.gmra.mrb[184].mxu1 %vm513_vm1, %v10940_v33  ;;  %v2062_v41 = vmax.f32 %v1972_v29, 0.0 }
 0x1aa   : > { %v1048_v44 = vpop.xlane.xlu1 %1047  ;;  %v1864_v52 = vpop.f32.mrb[80].mxu0  ;;  %2224 = vadd.xlane.f32.xlu0 %v2223_v8  ;;  %2179 = vadd.xlane.f32.xlu1 %v2178_v37  ;;  %v2181_v38 = vadd.f32 %v2061_v39, %v2060_v30  ;;  %v2226_v49 = vadd.f32 %v2057_v40, %v2056_v32  ;;  %v2063_v54 = vmax.f32 %v1974_v35, 0.0  ;;  %v6038_v35 = vcombine.high %v10973_v7, %v10973_v7 }
 0x1ab   : > { %v11119_v55 = vsel %vm1136_vm2, %v1000_v18, %v1048_v44  ;;  %v1865_v56 = vadd.f32 %v1864_v52, %v10793_v36  ;;  %v1866_v58 = vpop.f32.mrb[81].mxu0  ;;  %v11122_v61 = vpop.xlane.xlu0 %1002  ;;  %4207 = vmatprep.mubr.bf16.mxu1 %v15893_v3 }
 0x1ac   : > { %v1867_v33 = vadd.f32 %v1866_v58, %v10793_v36  ;;  %v1868_v63 = vpop.f32.mrb[82].mxu0  ;;  %v1977_v2 = vpop.f32.mrb[80].mxu1  ;;  %v2229_v22 = vadd.f32 %v2063_v54, %v2062_v41 }
 0x1ad   : > { %v1869_v8 = vadd.f32 %v1868_v63, %v10795_v42  ;;  %v1978_v9 = vadd.f32 %v1977_v2, %v10793_v36  ;;  %v1870_v48 = vpop.f32.mrb[83].mxu0  ;;  %v1979_v10 = vpop.f32.mrb[81].mxu1  ;;  %v2066_v16 = vmax.f32 %v1865_v56, 0.0 }
 0x1ae   : > { %v1871_v23 = vadd.f32 %v1870_v48, %v10795_v42  ;;  %v1980_v17 = vadd.f32 %v1979_v10, %v10793_v36  ;;  %v1981_v25 = vpop.f32.mrb[82].mxu1  ;;  %2182 = vadd.xlane.f32.xlu0 %v2181_v38  ;;  %2227 = vadd.xlane.f32.xlu1 %v2226_v49  ;;  %v2067_v27 = vmax.f32 %v1867_v33, 0.0  ;;  %v11142_v38 = vrot.slane %v6038_v35, %v10409_v6  ;;  %v11150_v10 = vld.sshfl [vmem:[%s10414_s26 + $0x44] sm:$0x33 pattern:$0x76325410] }
 0x1af   : > { %v2072_v29 = vmax.f32 %v1869_v8, 0.0  ;;  %v1982_v43 = vadd.f32 %v1981_v25, %v10795_v42  ;;  %v1983_v18 = vpop.f32.mrb[83].mxu1  ;;  %9871 = vmatmul.mubr.msk.bf16.gmra.mrb[188].mxu0 %vm513_vm1, %v10959_v45  ;;  %v11133_v30 = vpop.xlane.xlu0 %1050  ;;  %v2068_v32 = vmax.f32 %v1978_v9, 0.0  ;;  %v4975_v48 = vsel %vm538_vm0, %v10968_v62, 0 }
 0x1b0   : > { %v2073_v37 = vmax.f32 %v1871_v23, 0.0  ;;  %v1984_v39 = vadd.f32 %v1983_v18, %v10795_v42  ;;  %v1006_v40 = vpop.xlane.xlu1 %1005  ;;  %v2184_v41 = vadd.f32 %v2067_v27, %v2066_v16  ;;  %5012 = vmatprep.mubr.bf16.mxu0 %v15893_v3  ;;  %v2069_v52 = vmax.f32 %v1980_v17, 0.0 }
 0x1b1   : > { %v2074_v44 = vmax.f32 %v1982_v43, 0.0  ;;  %9880 = vmatmul.mubr.msk.bf16.gmra.mrb[188].mxu1 %vm513_vm1, %v10959_v45  ;;  %v6054_v27 = vcombine.high %v11142_v38, %v11142_v38 }
 0x1b2   : > { %v2075_v49 = vmax.f32 %v1984_v39, 0.0  ;;  %v1874_v54 = vpop.f32.mrb[84].mxu0  ;;  %2230 = vadd.xlane.f32.xlu0 %v2229_v22  ;;  %2185 = vadd.xlane.f32.xlu1 %v2184_v41  ;;  %v2187_v7 = vadd.f32 %v2073_v37, %v2072_v29  ;;  %v2232_v63 = vadd.f32 %v2069_v52, %v2068_v32  ;;  %v6062_v41 = vcombine.high %v11150_v10, %v11150_v10 }
 0x1b3   : > { %v1875_v56 = vadd.f32 %v1874_v54, %v10815_v21  ;;  %v1876_v58 = vpop.f32.mrb[85].mxu0  ;;  %v1009_v33 = vpop.xlane.xlu0 %1008  ;;  %5125 = vmatprep.mubr.bf16.mxu1 %v15893_v3 }
 0x1b4   : > { %v1877_v2 = vadd.f32 %v1876_v58, %v10815_v21  ;;  %v1054_v45 = vpop.xlane.xlu1 %1053  ;;  %v1878_v8 = vpop.f32.mrb[86].mxu0  ;;  %v2235_v9 = vadd.f32 %v2075_v49, %v2074_v44 }
 0x1b5   : > { %v2078_v22 = vmax.f32 %v1875_v56, 0.0  ;;  %v11153_v16 = vsel %vm1136_vm2, %v1006_v40, %v1054_v45  ;;  %v1879_v23 = vadd.f32 %v1878_v8, %v10817_v28  ;;  %v1987_v17 = vpop.f32.mrb[84].mxu1  ;;  %v1880_v25 = vpop.f32.mrb[87].mxu0  ;;  %v6064_v40 = vsel %vm538_vm0, %v10980_v14, 0 }
 0x1b6   : > { %v2079_v29 = vmax.f32 %v1877_v2, 0.0  ;;  %v1988_v43 = vadd.f32 %v1987_v17, %v10815_v21  ;;  %v1881_v18 = vadd.f32 %v1880_v25, %v10817_v28  ;;  %v1989_v32 = vpop.f32.mrb[85].mxu1  ;;  %2188 = vadd.xlane.f32.xlu0 %v2187_v7  ;;  %2233 = vadd.xlane.f32.xlu1 %v2232_v63 }
 0x1b7   : > { %v2084_v62 = vmax.f32 %v1879_v23, 0.0  ;;  %v1990_v35 = vadd.f32 %v1989_v32, %v10815_v21  ;;  %v1991_v37 = vpop.f32.mrb[86].mxu1  ;;  %9885 = vmatmul.mubr.msk.bf16.vlgmr.msra.gmra.mrb[192].mxu0 %vm513_vm1, %v10994_v34  ;;  %v1057_v39 = vpop.xlane.xlu0 %1056 }
 0x1b8   : > { %v2080_v44 = vmax.f32 %v1988_v43, 0.0  ;;  %v2085_v52 = vmax.f32 %v1881_v18, 0.0  ;;  %v1992_v49 = vadd.f32 %v1991_v37, %v10817_v28  ;;  %v1993_v54 = vpop.f32.mrb[87].mxu1  ;;  %v11169_v7 = vsel %vm1136_vm2, %v1009_v33, %v1057_v39  ;;  %v1012_v56 = vpop.xlane.xlu1 %1011  ;;  %5022 = vmatprep.mubr.bf16.mxu0 %v15893_v3  ;;  %5207 = vmatpush1.bf16.msra.mxu0 %v4975_v48 }
 0x1b9   : > { %v2081_v58 = vmax.f32 %v1990_v35, 0.0  ;;  %v1994_v63 = vadd.f32 %v1993_v54, %v10817_v28  ;;  %9894 = vmatmul.mubr.msk.bf16.vlgmr.msra.gmra.mrb[192].mxu1 %vm513_vm1, %v10994_v34  ;;  %v2190_v14 = vadd.f32 %v2079_v29, %v2078_v22  ;;  %9923 = vmatprep.subr.msk.bf16.mxu0 %vm538_vm0, %v6054_v27 }
 0x1ba   : > { %v2086_v2 = vmax.f32 %v1992_v49, 0.0  ;;  %v1884_v45 = vpop.f32.mrb[88].mxu0  ;;  %2236 = vadd.xlane.f32.xlu0 %v2235_v9  ;;  %v2193_v8 = vadd.f32 %v2085_v52, %v2084_v62  ;;  %5135 = vmatprep.mubr.bf16.mxu1 %v15893_v3 }
 0x1bb   : > { %v2087_v33 = vmax.f32 %v1994_v63, 0.0  ;;  %v1885_v23 = vadd.f32 %v1884_v45, %v10845_v4  ;;  %2191 = vadd.xlane.f32.xlu1 %v2190_v14  ;;  %v1886_v48 = vpop.f32.mrb[89].mxu0  ;;  %v1015_v17 = vpop.xlane.xlu0 %1014  ;;  %v2238_v25 = vadd.f32 %v2081_v58, %v2080_v44  ;;  %6082 = vmatpush1.bf16.msra.mxu1 %v6064_v40 }
 0x1bc   : > { %v1887_v43 = vadd.f32 %v1886_v48, %v10845_v4  ;;  %v1060_v34 = vpop.xlane.xlu1 %1059  ;;  %v1888_v22 = vpop.f32.mrb[90].mxu0  ;;  %9932 = vmatprep.subr.msk.bf16.mxu1 %vm538_vm0, %v6062_v41 }
 0x1bd   : > { %v2090_v27 = vmax.f32 %v1885_v23, 0.0  ;;  %v11181_v9 = vsel %vm1136_vm2, %v1012_v56, %v1060_v34  ;;  %v1889_v29 = vadd.f32 %v1888_v22, %v10847_v11  ;;  %v1997_v18 = vpop.f32.mrb[88].mxu1  ;;  %v1890_v32 = vpop.f32.mrb[91].mxu0  ;;  %v2241_v62 = vadd.f32 %v2087_v33, %v2086_v2 }
 0x1be   : > { %v2091_v35 = vmax.f32 %v1887_v43, 0.0  ;;  %v1998_v37 = vadd.f32 %v1997_v18, %v10845_v4  ;;  %v1891_v39 = vadd.f32 %v1890_v32, %v10847_v11  ;;  %v1999_v40 = vpop.f32.mrb[89].mxu1  ;;  %2194 = vadd.xlane.f32.xlu0 %v2193_v8 }
 0x1bf   : > { %v2096_v44 = vmax.f32 %v1889_v29, 0.0  ;;  %v2000_v52 = vadd.f32 %v1999_v40, %v10845_v4  ;;  %v2001_v41 = vpop.f32.mrb[90].mxu1  ;;  %2239 = vadd.xlane.f32.xlu1 %v2238_v25  ;;  %9886 = vmatmul.mubr.msk.bf16.gmra.mrb[196].mxu0 %vm513_vm1, %v11017_v24  ;;  %v1063_v49 = vpop.xlane.xlu0 %1062 }
 0x1c0   : > { %v2092_v54 = vmax.f32 %v1998_v37, 0.0  ;;  %v2097_v56 = vmax.f32 %v1891_v39, 0.0  ;;  %v2002_v58 = vadd.f32 %v2001_v41, %v10847_v11  ;;  %v2003_v63 = vpop.f32.mrb[91].mxu1  ;;  %v11191_v14 = vsel %vm1136_vm2, %v1015_v17, %v1063_v49  ;;  %v1018_v2 = vpop.xlane.xlu1 %1017  ;;  %5032 = vmatprep.mubr.bf16.mxu0 %v15893_v3 }
 0x1c1   : > { %v2093_v45 = vmax.f32 %v2000_v52, 0.0  ;;  %v2004_v8 = vadd.f32 %v2003_v63, %v10847_v11  ;;  %9895 = vmatmul.mubr.msk.bf16.gmra.mrb[196].mxu1 %vm513_vm1, %v11017_v24  ;;  %v2196_v33 = vadd.f32 %v2091_v35, %v2090_v27 }
 0x1c2   : > { %v2098_v23 = vmax.f32 %v2002_v58, 0.0  ;;  %v1894_v48 = vpop.f32.mrb[92].mxu0  ;;  %2242 = vadd.xlane.f32.xlu0 %v2241_v62  ;;  %v2199_v25 = vadd.f32 %v2097_v56, %v2096_v44  ;;  %5145 = vmatprep.mubr.bf16.mxu1 %v15893_v3 }
 0x1c3   : > { %v2099_v43 = vmax.f32 %v2004_v8, 0.0  ;;  %v1895_v17 = vadd.f32 %v1894_v48, %v10864_v53  ;;  %2197 = vadd.xlane.f32.xlu1 %v2196_v33  ;;  %v1896_v34 = vpop.f32.mrb[93].mxu0  ;;  %v1021_v22 = vpop.xlane.xlu0 %1020  ;;  %v2244_v29 = vadd.f32 %v2093_v45, %v2092_v54 }
 0x1c4   : > { %v1897_v18 = vadd.f32 %v1896_v34, %v10864_v53  ;;  %v1066_v32 = vpop.xlane.xlu1 %1065  ;;  %v1898_v37 = vpop.f32.mrb[94].mxu0 }
 0x1c5   : > { %v2102_v39 = vmax.f32 %v1895_v17, 0.0  ;;  %v11201_v24 = vsel %vm1136_vm2, %v1018_v2, %v1066_v32  ;;  %v1899_v27 = vadd.f32 %v1898_v37, %v10866_v57  ;;  %v2007_v62 = vpop.f32.mrb[92].mxu1  ;;  %v1900_v35 = vpop.f32.mrb[95].mxu0  ;;  %v2247_v40 = vadd.f32 %v2099_v43, %v2098_v23 }
 0x1c6   : > { %v2103_v44 = vmax.f32 %v1897_v18, 0.0  ;;  %v2008_v52 = vadd.f32 %v2007_v62, %v10864_v53  ;;  %v1901_v41 = vadd.f32 %v1900_v35, %v10866_v57  ;;  %v2009_v49 = vpop.f32.mrb[93].mxu1  ;;  %2200 = vadd.xlane.f32.xlu0 %v2199_v25 }
 0x1c7   : > { %v2108_v54 = vmax.f32 %v1899_v27, 0.0  ;;  %v2010_v56 = vadd.f32 %v2009_v49, %v10864_v53  ;;  %v2011_v58 = vpop.f32.mrb[94].mxu1  ;;  %2245 = vadd.xlane.f32.xlu1 %v2244_v29  ;;  %9887 = vmatmul.mubr.msk.bf16.gmra.mrb[200].mxu0 %vm513_vm1, %v11036_v47  ;;  %v1069_v63 = vpop.xlane.xlu0 %1068 }
 0x1c8   : > { %v2104_v2 = vmax.f32 %v2008_v52, 0.0  ;;  %v2109_v45 = vmax.f32 %v1901_v41, 0.0  ;;  %v2012_v8 = vadd.f32 %v2011_v58, %v10866_v57  ;;  %v2013_v33 = vpop.f32.mrb[95].mxu1  ;;  %v11211_v23 = vsel %vm1136_vm2, %v1021_v22, %v1069_v63  ;;  %v1024_v48 = vpop.xlane.xlu1 %1023  ;;  %5042 = vmatprep.mubr.bf16.mxu0 %v15893_v3 }
 0x1c9   : > { %v2105_v25 = vmax.f32 %v2010_v56, 0.0  ;;  %v2014_v43 = vadd.f32 %v2013_v33, %v10866_v57  ;;  %9896 = vmatmul.mubr.msk.bf16.gmra.mrb[200].mxu1 %vm513_vm1, %v11036_v47  ;;  %v2202_v17 = vadd.f32 %v2103_v44, %v2102_v39 }
 0x1ca   : > { %v2110_v34 = vmax.f32 %v2012_v8, 0.0  ;;  %v2812_v29 = vpop.f32.mrb[96].mxu0  ;;  %2248 = vadd.xlane.f32.xlu0 %v2247_v40  ;;  %v2205_v18 = vadd.f32 %v2109_v45, %v2108_v54  ;;  %5155 = vmatprep.mubr.bf16.mxu1 %v15893_v3 }
 0x1cb   : > { %v2111_v32 = vmax.f32 %v2014_v43, 0.0  ;;  %v2813_v22 = vadd.f32 %v2812_v29, %v10716_v12  ;;  %2203 = vadd.xlane.f32.xlu1 %v2202_v17  ;;  %v2814_v37 = vpop.f32.mrb[97].mxu0  ;;  %v1027_v27 = vpop.xlane.xlu0 %1026  ;;  %v2250_v62 = vadd.f32 %v2105_v25, %v2104_v2 }
 0x1cc   : > { %v2815_v35 = vadd.f32 %v2814_v37, %v10716_v12  ;;  %v1072_v52 = vpop.xlane.xlu1 %1071  ;;  %v2816_v41 = vpop.f32.mrb[98].mxu0 }
 0x1cd   : > { %v3117_v49 = vmax.f32 %v2813_v22, 0.0  ;;  %v11221_v47 = vsel %vm1136_vm2, %v1024_v48, %v1072_v52  ;;  %v2817_v39 = vadd.f32 %v2816_v41, %v10726_v15  ;;  %v2925_v40 = vpop.f32.mrb[96].mxu1  ;;  %v2818_v44 = vpop.f32.mrb[99].mxu0  ;;  %v2253_v54 = vadd.f32 %v2111_v32, %v2110_v34 }
 0x1ce   : > { %v3118_v56 = vmax.f32 %v2815_v35, 0.0  ;;  %v2926_v58 = vadd.f32 %v2925_v40, %v10716_v12  ;;  %v2819_v63 = vadd.f32 %v2818_v44, %v10726_v15  ;;  %v2927_v45 = vpop.f32.mrb[97].mxu1  ;;  %2206 = vadd.xlane.f32.xlu0 %v2205_v18 }
 0x1cf   : > { %v3123_v2 = vmax.f32 %v2817_v39, 0.0  ;;  %v2928_v8 = vadd.f32 %v2927_v45, %v10716_v12  ;;  %v2929_v33 = vpop.f32.mrb[98].mxu1  ;;  %2251 = vadd.xlane.f32.xlu1 %v2250_v62  ;;  %9888 = vmatmul.mubr.msk.bf16.gmra.mrb[204].mxu0 %vm513_vm1, %v11055_v5  ;;  %v1075_v48 = vpop.xlane.xlu0 %1074 }
 0x1d0   : > { %v3119_v25 = vmax.f32 %v2926_v58, 0.0  ;;  %v3124_v43 = vmax.f32 %v2819_v63, 0.0  ;;  %v2930_v17 = vadd.f32 %v2929_v33, %v10726_v15  ;;  %v2931_v34 = vpop.f32.mrb[99].mxu1  ;;  %v11231_v29 = vsel %vm1136_vm2, %v1027_v27, %v1075_v48  ;;  %v1030_v32 = vpop.xlane.xlu1 %1029  ;;  %5052 = vmatprep.mubr.bf16.mxu0 %v15893_v3 }
 0x1d1   : > { %v3120_v18 = vmax.f32 %v2928_v8, 0.0  ;;  %v2932_v22 = vadd.f32 %v2931_v34, %v10726_v15  ;;  %9897 = vmatmul.mubr.msk.bf16.gmra.mrb[204].mxu1 %vm513_vm1, %v11055_v5  ;;  %v3213_v37 = vadd.f32 %v3118_v56, %v3117_v49 }
 0x1d2   : > { %v3125_v62 = vmax.f32 %v2930_v17, 0.0  ;;  %v2822_v35 = vpop.f32.mrb[100].mxu0  ;;  %2254 = vadd.xlane.f32.xlu0 %v2253_v54  ;;  %v3216_v52 = vadd.f32 %v3124_v43, %v3123_v2  ;;  %5165 = vmatprep.mubr.bf16.mxu1 %v15893_v3 }
 0x1d3   : > { %v3126_v41 = vmax.f32 %v2932_v22, 0.0  ;;  %v2823_v27 = vadd.f32 %v2822_v35, %v10723_v13  ;;  %3214 = vadd.xlane.f32.xlu1 %v3213_v37  ;;  %v2824_v39 = vpop.f32.mrb[101].mxu0  ;;  %v1033_v40 = vpop.xlane.xlu0 %1032  ;;  %v3261_v44 = vadd.f32 %v3120_v18, %v3119_v25 }
 0x1d4   : > { %v2825_v58 = vadd.f32 %v2824_v39, %v10723_v13  ;;  %v1078_v63 = vpop.xlane.xlu1 %1077  ;;  %v2826_v45 = vpop.f32.mrb[102].mxu0 }
 0x1d5   : > { %v3129_v8 = vmax.f32 %v2823_v27, 0.0  ;;  %v11241_v5 = vsel %vm1136_vm2, %v1030_v32, %v1078_v63  ;;  %v2827_v49 = vadd.f32 %v2826_v45, %v10742_v51  ;;  %v2935_v54 = vpop.f32.mrb[100].mxu1  ;;  %v2828_v56 = vpop.f32.mrb[103].mxu0  ;;  %v3264_v2 = vadd.f32 %v3126_v41, %v3125_v62 }
 0x1d6   : > { %v3130_v33 = vmax.f32 %v2825_v58, 0.0  ;;  %v2936_v48 = vadd.f32 %v2935_v54, %v10723_v13  ;;  %v2829_v43 = vadd.f32 %v2828_v56, %v10742_v51  ;;  %v2937_v25 = vpop.f32.mrb[101].mxu1  ;;  %3217 = vadd.xlane.f32.xlu0 %v3216_v52 }
 0x1d7   : > { %v3135_v17 = vmax.f32 %v2827_v49, 0.0  ;;  %v2938_v34 = vadd.f32 %v2937_v25, %v10723_v13  ;;  %v2939_v18 = vpop.f32.mrb[102].mxu1  ;;  %3262 = vadd.xlane.f32.xlu1 %v3261_v44  ;;  %9889 = vmatmul.mubr.msk.bf16.gmra.mrb[208].mxu0 %vm513_vm1, %v11074_v50  ;;  %v1081_v32 = vpop.xlane.xlu0 %1080 }
 0x1d8   : > { %v3131_v22 = vmax.f32 %v2936_v48, 0.0  ;;  %v3136_v37 = vmax.f32 %v2829_v43, 0.0  ;;  %v2940_v62 = vadd.f32 %v2939_v18, %v10742_v51  ;;  %v2941_v35 = vpop.f32.mrb[103].mxu1  ;;  %v11254_v41 = vsel %vm1136_vm2, %v1033_v40, %v1081_v32  ;;  %v1036_v52 = vpop.xlane.xlu1 %1035  ;;  %5062 = vmatprep.mubr.bf16.mxu0 %v15893_v3 }
 0x1d9   : > { %v3132_v27 = vmax.f32 %v2938_v34, 0.0  ;;  %v2942_v39 = vadd.f32 %v2941_v35, %v10742_v51  ;;  %9898 = vmatmul.mubr.msk.bf16.gmra.mrb[208].mxu1 %vm513_vm1, %v11074_v50  ;;  %v3219_v44 = vadd.f32 %v3130_v33, %v3129_v8  ;;  %v11263_v43 = vand.u32 127, %v423_v0 }
 0x1da   : > { %v3137_v58 = vmax.f32 %v2940_v62, 0.0  ;;  %v2832_v63 = vpop.f32.mrb[104].mxu0  ;;  %3265 = vadd.xlane.f32.xlu0 %v3264_v2  ;;  %v3222_v45 = vadd.f32 %v3136_v37, %v3135_v17  ;;  %5175 = vmatprep.mubr.bf16.mxu1 %v15893_v3  ;;  %v1137_v35 = vsel %vm1136_vm2, %v11092_v31, %v11109_v19 }
 0x1db   : > { %v3138_v49 = vmax.f32 %v2942_v39, 0.0  ;;  %v2833_v40 = vadd.f32 %v2832_v63, %v10757_v20  ;;  %3220 = vadd.xlane.f32.xlu1 %v3219_v44  ;;  %v2834_v54 = vpop.f32.mrb[105].mxu0  ;;  %v1039_v56 = vpop.xlane.xlu0 %1038  ;;  %v3267_v48 = vadd.f32 %v3132_v27, %v3131_v22  ;;  %16022 = vst [vmem:[#allocation23_spill] sm:$0xff] %v11263_v43  ;;  %v11279_v44 = vld [vmem:[%s15886_s2 + $0x28] sm:$0xff]   ;;  %v1186_v63 = vstv %s11250_s9 }
 0x1dc   : > { %v2835_v25 = vadd.f32 %v2834_v54, %v10757_v20  ;;  %v1084_v50 = vpop.xlane.xlu1 %1083  ;;  %v2836_v8 = vpop.f32.mrb[106].mxu0  ;;  %vm11303_vm4 = vcmp.lt.s32.totalorder %v11263_v43, %v1186_v63 }
 0x1dd   : > { %v3141_v33 = vmax.f32 %v2833_v40, 0.0  ;;  %v11267_v2 = vsel %vm1136_vm2, %v1036_v52, %v1084_v50  ;;  %v2837_v17 = vadd.f32 %v2836_v8, %v10760_v26  ;;  %v2945_v34 = vpop.f32.mrb[104].mxu1  ;;  %v2838_v18 = vpop.f32.mrb[107].mxu0  ;;  %v3270_v32 = vadd.f32 %v3138_v49, %v3137_v58 }
 0x1de   : > { %v3142_v37 = vmax.f32 %v2835_v25, 0.0  ;;  %v2946_v22 = vadd.f32 %v2945_v34, %v10757_v20  ;;  %v2839_v0 = vadd.f32 %v2838_v18, %v10760_v26  ;;  %v2947_v62 = vpop.f32.mrb[105].mxu1  ;;  %3223 = vadd.xlane.f32.xlu0 %v3222_v45 }
 0x1df   : > { %v3147_v52 = vmax.f32 %v2837_v17, 0.0  ;;  %v2948_v27 = vadd.f32 %v2947_v62, %v10757_v20  ;;  %v2949_v39 = vpop.f32.mrb[106].mxu1  ;;  %3268 = vadd.xlane.f32.xlu1 %v3267_v48  ;;  %9890 = vmatmul.mubr.msk.bf16.gmra.mrb[212].mxu0 %vm513_vm1, %v11279_v44  ;;  %v1087_v58 = vpop.xlane.xlu0 %1086  ;;  %v1138_v17 = vsel %vm1136_vm2, %v11096_v46, %v11101_v60 }
 0x1e0   : > { %v3143_v45 = vmax.f32 %v2946_v22, 0.0  ;;  %v3148_v49 = vmax.f32 %v2839_v0, 0.0  ;;  %v2950_v40 = vadd.f32 %v2949_v39, %v10760_v26  ;;  %v2951_v31 = vpop.f32.mrb[107].mxu1  ;;  %v11286_v19 = vsel %vm1136_vm2, %v1039_v56, %v1087_v58  ;;  %v1090_v54 = vpop.xlane.xlu1 %1089  ;;  %5072 = vmatprep.mubr.bf16.mxu0 %v15893_v3 }
 0x1e1   : > { %v3144_v48 = vmax.f32 %v2948_v27, 0.0  ;;  %v2952_v25 = vadd.f32 %v2951_v31, %v10760_v26  ;;  %v1154_v50 = vsel %vm1153_vm3, %v1137_v35, %v1090_v54  ;;  %9899 = vmatmul.mubr.msk.bf16.gmra.mrb[212].mxu1 %vm513_vm1, %v11279_v44  ;;  %v3225_v8 = vadd.f32 %v3142_v37, %v3141_v33 }
 0x1e2   : > { %v3149_v34 = vmax.f32 %v2950_v40, 0.0  ;;  %v2842_v18 = vpop.f32.mrb[108].mxu0  ;;  %3271 = vadd.xlane.f32.xlu0 %v3270_v32  ;;  %v3228_v56 = vadd.f32 %v3148_v49, %v3147_v52  ;;  %5185 = vmatprep.mubr.bf16.mxu1 %v15893_v3  ;;  %v1170_v0 = vmul.f32 0.00390625, %v1154_v50 }
 0x1e3   : > { %v3150_v22 = vmax.f32 %v2952_v25, 0.0  ;;  %v2843_v62 = vadd.f32 %v2842_v18, %v10775_v59  ;;  %3226 = vadd.xlane.f32.xlu1 %v3225_v8  ;;  %v2844_v35 = vpop.f32.mrb[109].mxu0  ;;  %v1093_v27 = vpop.xlane.xlu0 %1092  ;;  %v3273_v39 = vadd.f32 %v3144_v48, %v3143_v45  ;;  %v11314_v18 = vld [vmem:[%s15886_s2 + $0x30] sm:$0xff]  }
 0x1e4   : > { %v2845_v33 = vadd.f32 %v2844_v35, %v10775_v59  ;;  %v1155_v37 = vsel %vm1153_vm3, %v1138_v17, %v1093_v27  ;;  %v11300_v58 = vpop.xlane.xlu1 %2113  ;;  %v2846_v46 = vpop.f32.mrb[110].mxu0 }
 0x1e5   : > { %16023 = vst [vmem:[#allocation24_spill] sm:$0xff] %v11300_v58  ;;  %v3153_v32 = vmax.f32 %v2843_v62, 0.0  ;;  %v1171_v52 = vmul.f32 0.00390625, %v1155_v37  ;;  %v2847_v49 = vadd.f32 %v2846_v46, %v10777_v1  ;;  %v2955_v40 = vpop.f32.mrb[108].mxu1  ;;  %v2848_v31 = vpop.f32.mrb[111].mxu0  ;;  %v3276_v54 = vadd.f32 %v3150_v22, %v3149_v34 }
 0x1e6   : > { %v3154_v45 = vmax.f32 %v2845_v33, 0.0  ;;  %v2956_v48 = vadd.f32 %v2955_v40, %v10775_v59  ;;  %v2849_v25 = vadd.f32 %v2848_v31, %v10777_v1  ;;  %v2957_v50 = vpop.f32.mrb[109].mxu1  ;;  %3229 = vadd.xlane.f32.xlu0 %v3228_v56  ;;  %v11322_v22 = vsel %vm11303_vm4, %v1170_v0, -3.4028235e+38 }
 0x1e7   : > { %v3159_v8 = vmax.f32 %v2847_v49, 0.0  ;;  %v2958_v63 = vadd.f32 %v2957_v50, %v10775_v59  ;;  %v2959_v17 = vpop.f32.mrb[110].mxu1  ;;  %3274 = vadd.xlane.f32.xlu1 %v3273_v39  ;;  %9891 = vmatmul.mubr.msk.bf16.gmra.mrb[216].mxu0 %vm513_vm1, %v11314_v18  ;;  %v11318_v34 = vpop.xlane.xlu0 %2116  ;;  %16027 = vst [vmem:[#allocation26_spill] sm:$0xff] %v11322_v22  ;;  %v11328_v33 = vsel %vm11303_vm4, %v1171_v52, -3.4028235e+38 }
 0x1e8   : > { %16026 = vst [vmem:[#allocation25_spill] sm:$0xff] %v11318_v34  ;;  %v3155_v56 = vmax.f32 %v2956_v48, 0.0  ;;  %v3160_v62 = vmax.f32 %v2849_v25, 0.0  ;;  %v2960_v35 = vadd.f32 %v2959_v17, %v10777_v1  ;;  %v2961_v27 = vpop.f32.mrb[111].mxu1  ;;  %v1096_v39 = vpop.xlane.xlu1 %1095  ;;  %5082 = vmatprep.mubr.bf16.mxu0 %v15893_v3  ;;  %16028 = vst [vmem:[#allocation27_spill] sm:$0xff] %v11328_v33  ;;  %v3231_v49 = vadd.f32 %v3154_v45, %v3153_v32 }
 0x1e9   : > { %v3156_v37 = vmax.f32 %v2958_v63, 0.0  ;;  %v2962_v46 = vadd.f32 %v2961_v27, %v10777_v1  ;;  %v1156_v0 = vsel %vm1153_vm3, %v11119_v55, %v1096_v39  ;;  %9900 = vmatmul.mubr.msk.bf16.gmra.mrb[216].mxu1 %vm513_vm1, %v11314_v18  ;;  %v1205_v48 = vsel %vm1204_vm5, %v11322_v22, -inf }
 0x1ea   : > { %v3161_v40 = vmax.f32 %v2960_v35, 0.0  ;;  %v2852_v31 = vpop.f32.mrb[112].mxu0  ;;  %3277 = vadd.xlane.f32.xlu0 %v3276_v54  ;;  %5195 = vmatprep.mubr.bf16.mxu1 %v15893_v3  ;;  %v3234_v52 = vadd.f32 %v3160_v62, %v3159_v8  ;;  %v1140_v32 = vsel %vm1136_vm2, %v11122_v61, %v11133_v30  ;;  %v1172_v45 = vmul.f32 0.00390625, %v1156_v0 }
 0x1eb   : > { %v3162_v25 = vmax.f32 %v2962_v46, 0.0  ;;  %v2853_v50 = vadd.f32 %v2852_v31, %v10793_v36  ;;  %1206 = vmax.xlane.f32.xlu1 %v1205_v48  ;;  %v2854_v63 = vpop.f32.mrb[113].mxu0  ;;  %v1099_v17 = vpop.xlane.xlu0 %1098  ;;  %v3279_v55 = vadd.f32 %v3156_v37, %v3155_v56  ;;  %v1208_v8 = vsel %vm1204_vm5, %v11328_v33, -inf }
 0x1ec   : > { %v2855_v54 = vadd.f32 %v2854_v63, %v10793_v36  ;;  %v11343_v35 = vpop.xlane.xlu1 %2119  ;;  %v2856_v27 = vpop.f32.mrb[114].mxu0  ;;  %v1157_v39 = vsel %vm1153_vm3, %v1140_v32, %v1099_v17 }
 0x1ed   : > { %16029 = vst [vmem:[#allocation28_spill] sm:$0xff] %v11343_v35  ;;  %v3165_v62 = vmax.f32 %v2853_v50, 0.0  ;;  %v2857_v46 = vadd.f32 %v2856_v27, %v10795_v42  ;;  %v2965_v31 = vpop.f32.mrb[112].mxu1  ;;  %v2858_v56 = vpop.f32.mrb[115].mxu0  ;;  %v3282_v37 = vadd.f32 %v3162_v25, %v3161_v40  ;;  %v11355_v50 = vld [vmem:[%s15886_s2 + $0x38] sm:$0xff]   ;;  %v1173_v25 = vmul.f32 0.00390625, %v1157_v39 }
 0x1ee   : > { %v3166_v48 = vmax.f32 %v2855_v54, 0.0  ;;  %v2966_v61 = vadd.f32 %v2965_v31, %v10793_v36  ;;  %v2859_v30 = vadd.f32 %v2858_v56, %v10795_v42  ;;  %v2967_v0 = vpop.f32.mrb[113].mxu1  ;;  %1209 = vmax.xlane.f32.xlu0 %v1208_v8  ;;  %v11368_v56 = vsel %vm11303_vm4, %v1172_v45, -3.4028235e+38  ;;  %v9941_v39 = vld [vmem:[%s10414_s26 + $0x48] sm:$0xff] }
 0x1ef   : > { %v3171_v63 = vmax.f32 %v2857_v46, 0.0  ;;  %v2968_v3 = vadd.f32 %v2967_v0, %v10793_v36  ;;  %v2969_v22 = vpop.f32.mrb[114].mxu1  ;;  %3232 = vadd.xlane.f32.xlu1 %v3231_v49  ;;  %9892 = vmatmul.mubr.msk.bf16.gmra.mrb[220].mxu0 %vm513_vm1, %v11355_v50  ;;  %v11359_v40 = vpop.xlane.xlu0 %2122  ;;  %v16031_v46 = vmov 0   ;;  %16032 = vst [vmem:[#allocation30_spill] sm:$0xff] %v11368_v56  ;;  %v7139_v43 = vcombine.high %v9941_v39, %v9941_v39 }
 0x1f0   : > { %16030 = vst [vmem:[#allocation29_spill] sm:$0xff] %v11359_v40  ;;  %v3167_v17 = vmax.f32 %v2966_v61, 0.0  ;;  %v3172_v32 = vmax.f32 %v2859_v30, 0.0  ;;  %v2970_v54 = vadd.f32 %v2969_v22, %v10795_v42  ;;  %v2971_v27 = vpop.f32.mrb[115].mxu1  ;;  %v1102_v8 = vpop.xlane.xlu1 %1101  ;;  %5238 = vmatprep.mubr.bf16.mxu0 %v16031_v46  ;;  %v11370_v0 = vadd.f32 %v3166_v48, %v3165_v62 }
 0x1f1   : > { %v3168_v49 = vmax.f32 %v2968_v3, 0.0  ;;  %v2972_v31 = vadd.f32 %v2971_v27, %v10795_v42  ;;  %9901 = vmatmul.mubr.msk.bf16.gmra.mrb[220].mxu1 %vm513_vm1, %v11355_v50  ;;  %v11377_v3 = vrot.slane %v9941_v39, %v10409_v6 }
 0x1f2   : > { %v3173_v61 = vmax.f32 %v2970_v54, 0.0  ;;  %v2862_v30 = vpop.f32.mrb[116].mxu0  ;;  %3235 = vadd.xlane.f32.xlu0 %v3234_v52  ;;  %6113 = vmatprep.mubr.bf16.mxu1 %v16031_v46  ;;  %v11374_v22 = vadd.f32 %v3172_v32, %v3171_v63  ;;  %v1211_v63 = vsel %vm1204_vm5, %v11368_v56, -inf  ;;  %v11389_v32 = vsel %vm11303_vm4, %v1173_v25, -3.4028235e+38 }
 0x1f3   : > { %v3174_v27 = vmax.f32 %v2972_v31, 0.0  ;;  %v2863_v33 = vadd.f32 %v2862_v30, %v10815_v21  ;;  %3280 = vadd.xlane.f32.xlu1 %v3279_v55  ;;  %v2864_v40 = vpop.f32.mrb[117].mxu0  ;;  %v1105_v45 = vpop.xlane.xlu0 %1104  ;;  %v11380_v35 = vadd.f32 %v3168_v49, %v3167_v17  ;;  %16034 = vst [vmem:[#allocation32_spill] sm:$0xff] %v11389_v32  ;;  %v6070_v54 = vsel %vm538_vm0, %v11142_v38, 0 }
 0x1f4   : > { %v2865_v62 = vadd.f32 %v2864_v40, %v10815_v21  ;;  %v11383_v48 = vpop.xlane.xlu1 %2125  ;;  %v2866_v52 = vpop.f32.mrb[118].mxu0  ;;  %v7154_v40 = vcombine.high %v11377_v3, %v11377_v3 }
 0x1f5   : > { %16033 = vst [vmem:[#allocation31_spill] sm:$0xff] %v11383_v48  ;;  %v3177_v55 = vmax.f32 %v2863_v33, 0.0  ;;  %v2867_v31 = vadd.f32 %v2866_v52, %v10817_v28  ;;  %v2975_v17 = vpop.f32.mrb[116].mxu1  ;;  %v2868_v49 = vpop.f32.mrb[119].mxu0  ;;  %v11394_v30 = vadd.f32 %v3174_v27, %v3173_v61  ;;  %v11404_v61 = vld [vmem:[%s15886_s2] sm:$0xff]  }
 0x1f6   : > { %v3178_v48 = vmax.f32 %v2865_v62, 0.0  ;;  %v2976_v56 = vadd.f32 %v2975_v17, %v10815_v21  ;;  %v2869_v34 = vadd.f32 %v2868_v49, %v10817_v28  ;;  %v2977_v25 = vpop.f32.mrb[117].mxu1  ;;  %3283 = vadd.xlane.f32.xlu0 %v3282_v37  ;;  %v6076_v62 = vsel %vm538_vm0, %v11150_v10, 0 }
 0x1f7   : > { %v3183_v58 = vmax.f32 %v2867_v31, 0.0  ;;  %v2978_v38 = vadd.f32 %v2977_v25, %v10815_v21  ;;  %v2979_v33 = vpop.f32.mrb[118].mxu1  ;;  %1212 = vmax.xlane.f32.xlu1 %v1211_v63  ;;  %9903 = vmatmul.mubr.msk.bf16.vlgmr.msra.gmra.mrb[224].mxu0 %vm513_vm1, %v11404_v61  ;;  %v11408_v27 = vpop.xlane.xlu0 %2128  ;;  %v1158_v37 = vsel %vm1153_vm3, %v11153_v16, %v1102_v8  ;;  %v1214_v10 = vsel %vm1204_vm5, %v11389_v32, -inf }
 0x1f8   : > { %16035 = vst [vmem:[#allocation33_spill] sm:$0xff] %v11408_v27  ;;  %v3179_v39 = vmax.f32 %v2976_v56, 0.0  ;;  %v3184_v52 = vmax.f32 %v2869_v34, 0.0  ;;  %v2980_v63 = vadd.f32 %v2979_v33, %v10817_v28  ;;  %v2981_v31 = vpop.f32.mrb[119].mxu1  ;;  %v11415_v17 = vpop.xlane.xlu1 %1107  ;;  %5248 = vmatprep.mubr.bf16.mxu0 %v16031_v46  ;;  %6195 = vmatpush1.bf16.msra.mxu0 %v6070_v54  ;;  %v11423_v16 = vadd.f32 %v3178_v48, %v3177_v55 }
 0x1f9   : > { %v3180_v49 = vmax.f32 %v2978_v38, 0.0  ;;  %v2982_v25 = vadd.f32 %v2981_v31, %v10817_v28  ;;  %9915 = vmatmul.mubr.msk.bf16.vlgmr.msra.gmra.mrb[224].mxu1 %vm513_vm1, %v11404_v61  ;;  %9944 = vmatprep.subr.msk.bf16.mxu0 %vm538_vm0, %v7154_v40  ;;  %v1159_v34 = vsel %vm1153_vm3, %v11169_v7, %v1105_v45  ;;  %v11432_v38 = vrot.slane %v7139_v43, %v10409_v6 }
 0x1fa   : > { %v3185_v8 = vmax.f32 %v2980_v63, 0.0  ;;  %v2872_v56 = vpop.f32.mrb[120].mxu0  ;;  %1215 = vmax.xlane.f32.xlu0 %v1214_v10  ;;  %6123 = vmatprep.mubr.bf16.mxu1 %v16031_v46  ;;  %v11429_v54 = vadd.f32 %v3184_v52, %v3183_v58  ;;  %v1174_v33 = vmul.f32 0.00390625, %v1158_v37  ;;  %v1175_v52 = vmul.f32 0.00390625, %v1159_v34 }
 0x1fb   : > { %v3186_v31 = vmax.f32 %v2982_v25, 0.0  ;;  %v2873_v48 = vadd.f32 %v2872_v56, %v10845_v4  ;;  %3238 = vadd.xlane.f32.xlu1 %v11370_v0  ;;  %v2874_v55 = vpop.f32.mrb[121].mxu0  ;;  %v1111_v40 = vpop.xlane.xlu0 %1110  ;;  %v11436_v32 = vadd.f32 %v3180_v49, %v3179_v39  ;;  %6308 = vmatpush1.bf16.msra.mxu1 %v6076_v62  ;;  %v7155_v43 = vcombine.high %v11432_v38, %v11432_v38 }
 0x1fc   : > { %v2875_v7 = vadd.f32 %v2874_v55, %v10845_v4  ;;  %v11439_v45 = vpop.xlane.xlu1 %2131  ;;  %v2876_v58 = vpop.f32.mrb[122].mxu0 }
 0x1fd   : > { %16036 = vst [vmem:[#allocation34_spill] sm:$0xff] %v11439_v45  ;;  %v3189_v37 = vmax.f32 %v2873_v48, 0.0  ;;  %v2877_v63 = vadd.f32 %v2876_v58, %v10847_v11  ;;  %v2985_v25 = vpop.f32.mrb[120].mxu1  ;;  %v2878_v10 = vpop.f32.mrb[123].mxu0  ;;  %v11444_v0 = vadd.f32 %v3186_v31, %v3185_v8  ;;  %9953 = vmatprep.subr.msk.bf16.mxu1 %vm538_vm0, %v7155_v43  ;;  %v11455_v8 = vld [vmem:[%s15886_s2 + $0x8] sm:$0xff]  }
 0x1fe   : > { %v3190_v56 = vmax.f32 %v2875_v7, 0.0  ;;  %v2986_v39 = vadd.f32 %v2985_v25, %v10845_v4  ;;  %v2879_v62 = vadd.f32 %v2878_v10, %v10847_v11  ;;  %v2987_v49 = vpop.f32.mrb[121].mxu1  ;;  %3241 = vadd.xlane.f32.xlu0 %v11374_v22  ;;  %16037 = vst [vmem:[#allocation35_spill] sm:$0xff] %v11455_v8  ;;  %v1192_v22 = vsel %vm11303_vm4, %v1174_v33, -3.4028235e+38 }
 0x1ff   : > { %v3195_v55 = vmax.f32 %v2877_v63, 0.0  ;;  %v2988_v34 = vadd.f32 %v2987_v49, %v10845_v4  ;;  %v2989_v48 = vpop.f32.mrb[122].mxu1  ;;  %3286 = vadd.xlane.f32.xlu1 %v11380_v35  ;;  %9904 = vmatmul.mubr.msk.bf16.gmra.mrb[228].mxu0 %vm513_vm1, %v11455_v8  ;;  %v11459_v31 = vpop.xlane.xlu0 %2134  ;;  %v1193_v49 = vsel %vm11303_vm4, %v1175_v52, -3.4028235e+38 }
 0x200   : > { %16038 = vst [vmem:[#allocation36_spill] sm:$0xff] %v11459_v31  ;;  %v3191_v7 = vmax.f32 %v2986_v39, 0.0  ;;  %v3196_v58 = vmax.f32 %v2879_v62, 0.0  ;;  %v2990_v43 = vadd.f32 %v2989_v48, %v10847_v11  ;;  %v2991_v63 = vpop.f32.mrb[123].mxu1  ;;  %v11464_v25 = vpop.xlane.xlu1 %1113  ;;  %5258 = vmatprep.mubr.bf16.mxu0 %v16031_v46  ;;  %v11472_v31 = vadd.f32 %v3190_v56, %v3189_v37 }
 0x201   : > { %v3192_v35 = vmax.f32 %v2988_v34, 0.0  ;;  %v2992_v10 = vadd.f32 %v2991_v63, %v10847_v11  ;;  %9916 = vmatmul.mubr.msk.bf16.gmra.mrb[228].mxu1 %vm513_vm1, %v11455_v8  ;;  %v1217_v62 = vsel %vm1204_vm5, %v1192_v22, -inf  ;;  %v1160_v37 = vsel %vm1153_vm3, %v11181_v9, %v11415_v17 }
 0x202   : > { %v3197_v33 = vmax.f32 %v2990_v43, 0.0  ;;  %v2882_v39 = vpop.f32.mrb[124].mxu0  ;;  %3289 = vadd.xlane.f32.xlu0 %v11394_v30  ;;  %6133 = vmatprep.mubr.bf16.mxu1 %v16031_v46  ;;  %v11477_v48 = vadd.f32 %v3196_v58, %v3195_v55  ;;  %v1220_v55 = vsel %vm1204_vm5, %v1193_v49, -inf  ;;  %v1161_v58 = vsel %vm1153_vm3, %v11191_v14, %v1111_v40  ;;  %v11503_v14 = vld [vmem:[%s15886_s2 + $0x10] sm:$0xff]  }
 0x203   : > { %v3198_v34 = vmax.f32 %v2992_v10, 0.0  ;;  %v2883_v63 = vadd.f32 %v2882_v39, %v10864_v53  ;;  %1218 = vmax.xlane.f32.xlu1 %v1217_v62  ;;  %v2884_v45 = vpop.f32.mrb[125].mxu0  ;;  %v11480_v27 = vpop.xlane.xlu0 %1116  ;;  %v11482_v52 = vadd.f32 %v3192_v35, %v3191_v7 }
 0x204   : > { %v2885_v30 = vadd.f32 %v2884_v45, %v10864_v53  ;;  %v11488_v56 = vpop.xlane.xlu1 %2137  ;;  %v2886_v22 = vpop.f32.mrb[126].mxu0 }
 0x205   : > { %16039 = vst [vmem:[#allocation37_spill] sm:$0xff] %v11488_v56  ;;  %v3201_v43 = vmax.f32 %v2883_v63, 0.0  ;;  %v2887_v10 = vadd.f32 %v2886_v22, %v10866_v57  ;;  %v2995_v39 = vpop.f32.mrb[124].mxu1  ;;  %v2888_v7 = vpop.f32.mrb[127].mxu0  ;;  %v11494_v35 = vadd.f32 %v3198_v34, %v3197_v33  ;;  %v1176_v56 = vmul.f32 0.00390625, %v1160_v37 }
 0x206   : > { %v3202_v62 = vmax.f32 %v2885_v30, 0.0  ;;  %v2996_v9 = vadd.f32 %v2995_v39, %v10864_v53  ;;  %v2889_v17 = vadd.f32 %v2888_v7, %v10866_v57  ;;  %v2997_v45 = vpop.f32.mrb[125].mxu1  ;;  %1221 = vmax.xlane.f32.xlu0 %v1220_v55  ;;  %v1177_v33 = vmul.f32 0.00390625, %v1161_v58 }
 0x207   : > { %v3207_v8 = vmax.f32 %v2887_v10, 0.0  ;;  %v2998_v49 = vadd.f32 %v2997_v45, %v10864_v53  ;;  %v2999_v11 = vpop.f32.mrb[126].mxu1  ;;  %3244 = vadd.xlane.f32.xlu1 %v11423_v16  ;;  %9905 = vmatmul.mubr.msk.bf16.gmra.mrb[232].mxu0 %vm513_vm1, %v11503_v14  ;;  %v11507_v40 = vpop.xlane.xlu0 %2140 }
 0x208   : > { %16040 = vst [vmem:[#allocation38_spill] sm:$0xff] %v11507_v40  ;;  %v3203_v34 = vmax.f32 %v2996_v9, 0.0  ;;  %v3208_v63 = vmax.f32 %v2889_v17, 0.0  ;;  %v3000_v37 = vadd.f32 %v2999_v11, %v10866_v57  ;;  %v3001_v30 = vpop.f32.mrb[127].mxu1  ;;  %v11510_v22 = vpop.xlane.xlu1 %1119  ;;  %5268 = vmatprep.mubr.bf16.mxu0 %v16031_v46  ;;  %v11516_v10 = vadd.f32 %v3202_v62, %v3201_v43 }
 0x209   : > { %v3204_v16 = vmax.f32 %v2998_v49, 0.0  ;;  %v3002_v55 = vadd.f32 %v3001_v30, %v10866_v57  ;;  %9917 = vmatmul.mubr.msk.bf16.gmra.mrb[232].mxu1 %vm513_vm1, %v11503_v14  ;;  %v1194_v43 = vsel %vm11303_vm4, %v1176_v56, -3.4028235e+38 }
 0x20a   : > { %v3209_v39 = vmax.f32 %v3000_v37, 0.0  ;;  %v3038_v7 = vpop.f32.mrb[128].mxu0  ;;  %3247 = vadd.xlane.f32.xlu0 %v11429_v54  ;;  %6143 = vmatprep.mubr.bf16.mxu1 %v16031_v46  ;;  %v11520_v11 = vadd.f32 %v3208_v63, %v3207_v8  ;;  %v1195_v8 = vsel %vm11303_vm4, %v1177_v33, -3.4028235e+38  ;;  %v1162_v33 = vsel %vm1153_vm3, %v11201_v24, %v11464_v25 }
 0x20b   : > { %v3210_v58 = vmax.f32 %v3002_v55, 0.0  ;;  %v3039_v9 = vadd.f32 %v3038_v7, %v10716_v12  ;;  %3292 = vadd.xlane.f32.xlu1 %v11436_v32  ;;  %v3040_v17 = vpop.f32.mrb[129].mxu0  ;;  %v11524_v45 = vpop.xlane.xlu0 %1122  ;;  %v11528_v62 = vadd.f32 %v3204_v16, %v3203_v34  ;;  %v1163_v24 = vsel %vm1153_vm3, %v11211_v23, %v11480_v27 }
 0x20c   : > { %v3041_v49 = vadd.f32 %v3040_v17, %v10716_v12  ;;  %v11531_v54 = vpop.xlane.xlu1 %2143  ;;  %v3042_v37 = vpop.f32.mrb[130].mxu0  ;;  %v1223_v17 = vsel %vm1204_vm5, %v1194_v43, -inf }
 0x20d   : > { %16041 = vst [vmem:[#allocation39_spill] sm:$0xff] %v11531_v54  ;;  %v3121_v63 = vmax.f32 %v3039_v9, 0.0  ;;  %v3043_v30 = vadd.f32 %v3042_v37, %v10726_v15  ;;  %v3913_v32 = vpop.f32.mrb[128].mxu1  ;;  %v3044_v55 = vpop.f32.mrb[131].mxu0  ;;  %v11536_v7 = vadd.f32 %v3210_v58, %v3209_v39  ;;  %v11549_v39 = vld [vmem:[%s15886_s2 + $0x18] sm:$0xff]   ;;  %v1226_v58 = vsel %vm1204_vm5, %v1195_v8, -inf }
 0x20e   : > { %v3122_v40 = vmax.f32 %v3041_v49, 0.0  ;;  %v3914_v56 = vadd.f32 %v3913_v32, %v10716_v12  ;;  %v3045_v34 = vadd.f32 %v3044_v55, %v10726_v15  ;;  %v3915_v16 = vpop.f32.mrb[129].mxu1  ;;  %3295 = vadd.xlane.f32.xlu0 %v11444_v0 }
 0x20f   : > { %v3127_v9 = vmax.f32 %v3043_v30, 0.0  ;;  %v3916_v37 = vadd.f32 %v3915_v16, %v10716_v12  ;;  %v3917_v54 = vpop.f32.mrb[130].mxu1  ;;  %1224 = vmax.xlane.f32.xlu1 %v1223_v17  ;;  %9906 = vmatmul.mubr.msk.bf16.gmra.mrb[236].mxu0 %vm513_vm1, %v11549_v39  ;;  %v11553_v0 = vpop.xlane.xlu0 %2146 }
 0x210   : > { %16042 = vst [vmem:[#allocation40_spill] sm:$0xff] %v11553_v0  ;;  %v4218_v25 = vmax.f32 %v3914_v56, 0.0  ;;  %v3128_v43 = vmax.f32 %v3045_v34, 0.0  ;;  %v3918_v49 = vadd.f32 %v3917_v54, %v10726_v15  ;;  %v3919_v30 = vpop.f32.mrb[131].mxu1  ;;  %v1126_v32 = vpop.xlane.xlu1 %1125  ;;  %5278 = vmatprep.mubr.bf16.mxu0 %v16031_v46  ;;  %v11566_v8 = vadd.f32 %v3122_v40, %v3121_v63 }
 0x211   : > { %v4219_v55 = vmax.f32 %v3916_v37, 0.0  ;;  %v3920_v16 = vadd.f32 %v3919_v30, %v10726_v15  ;;  %v1166_v17 = vsel %vm1153_vm3, %v11241_v5, %v1126_v32  ;;  %9918 = vmatmul.mubr.msk.bf16.gmra.mrb[236].mxu1 %vm513_vm1, %v11549_v39  ;;  %v1178_v34 = vmul.f32 0.00390625, %v1162_v33 }
 0x212   : > { %v11568_v23 = vadd.f32 %v3128_v43, %v3127_v9  ;;  %v4224_v27 = vmax.f32 %v3918_v49, 0.0  ;;  %v11570_v56 = vmul.f32 0.00390625, %v1166_v17  ;;  %v3048_v54 = vpop.f32.mrb[132].mxu0  ;;  %1227 = vmax.xlane.f32.xlu0 %v1226_v58  ;;  %6153 = vmatprep.mubr.bf16.mxu1 %v16031_v46  ;;  %v1179_v63 = vmul.f32 0.00390625, %v1163_v24 }
 0x213   : > { %v11573_v37 = vadd.f32 %v4219_v55, %v4218_v25  ;;  %v4225_v30 = vmax.f32 %v3920_v16, 0.0  ;;  %v3049_v5 = vadd.f32 %v3048_v54, %v10723_v13  ;;  %3250 = vadd.xlane.f32.xlu1 %v11472_v31  ;;  %v3050_v32 = vpop.f32.mrb[133].mxu0  ;;  %v1129_v40 = vpop.xlane.xlu0 %1128 }
 0x214   : > { %v3051_v9 = vadd.f32 %v3050_v32, %v10723_v13  ;;  %v1167_v43 = vsel %vm1153_vm3, %v11254_v41, %v1129_v40  ;;  %v11580_v49 = vpop.xlane.xlu1 %2149  ;;  %v3052_v58 = vpop.f32.mrb[134].mxu0 }
 0x215   : > { %v11585_v25 = vadd.f32 %v4225_v30, %v4224_v27  ;;  %v3133_v55 = vmax.f32 %v3049_v5, 0.0  ;;  %v11587_v16 = vmul.f32 0.00390625, %v1167_v43  ;;  %v3053_v31 = vadd.f32 %v3052_v58, %v10742_v51  ;;  %v3923_v24 = vpop.f32.mrb[132].mxu1  ;;  %v3054_v17 = vpop.f32.mrb[135].mxu0  ;;  %v11598_v30 = vld [vmem:[%s15886_s2 + $0x20] sm:$0xff]  }
 0x216   : > { %v3134_v54 = vmax.f32 %v3051_v9, 0.0  ;;  %v3924_v32 = vadd.f32 %v3923_v24, %v10723_v13  ;;  %v3055_v41 = vadd.f32 %v3054_v17, %v10742_v51  ;;  %v3925_v40 = vpop.f32.mrb[133].mxu1  ;;  %3253 = vadd.xlane.f32.xlu0 %v11477_v48  ;;  %v1196_v9 = vsel %vm11303_vm4, %v1178_v34, -3.4028235e+38 }
 0x217   : > { %v3139_v0 = vmax.f32 %v3053_v31, 0.0  ;;  %v3926_v33 = vadd.f32 %v3925_v40, %v10723_v13  ;;  %v3927_v27 = vpop.f32.mrb[134].mxu1  ;;  %3298 = vadd.xlane.f32.xlu1 %v11482_v52  ;;  %9907 = vmatmul.mubr.msk.bf16.gmra.mrb[240].mxu0 %vm513_vm1, %v11598_v30  ;;  %v11602_v5 = vpop.xlane.xlu0 %2152 }
 0x218   : > { %16043 = vst [vmem:[#allocation41_spill] sm:$0xff] %v11602_v5  ;;  %v11609_v43 = vadd.f32 %v3134_v54, %v3133_v55  ;;  %v4230_v52 = vmax.f32 %v3924_v32, 0.0  ;;  %v3140_v58 = vmax.f32 %v3055_v41, 0.0  ;;  %v3928_v31 = vadd.f32 %v3927_v27, %v10742_v51  ;;  %v3929_v24 = vpop.f32.mrb[135].mxu1  ;;  %v1132_v17 = vpop.xlane.xlu1 %1131  ;;  %5288 = vmatprep.mubr.bf16.mxu0 %v16031_v46 }
 0x219   : > { %v4231_v40 = vmax.f32 %v3926_v33, 0.0  ;;  %v3930_v5 = vadd.f32 %v3929_v24, %v10742_v51  ;;  %v1168_v34 = vsel %vm1153_vm3, %v11267_v2, %v1132_v17  ;;  %9919 = vmatmul.mubr.msk.bf16.gmra.mrb[240].mxu1 %vm513_vm1, %v11598_v30  ;;  %v1197_v55 = vsel %vm11303_vm4, %v1179_v63, -3.4028235e+38 }
 0x21a   : > { %v11620_v54 = vadd.f32 %v3140_v58, %v3139_v0  ;;  %v4236_v32 = vmax.f32 %v3928_v31, 0.0  ;;  %v11622_v41 = vmul.f32 0.00390625, %v1168_v34  ;;  %v3058_v27 = vpop.f32.mrb[136].mxu0  ;;  %3301 = vadd.xlane.f32.xlu0 %v11494_v35  ;;  %v1229_v33 = vsel %vm1204_vm5, %v1196_v9, -inf  ;;  %6163 = vmatprep.mubr.bf16.mxu1 %v16031_v46 }
 0x21b   : > { %v1164_v2 = vsel %vm1153_vm3, %v11221_v47, %v11510_v22  ;;  %v11630_v24 = vadd.f32 %v4231_v40, %v4230_v52  ;;  %v4237_v17 = vmax.f32 %v3930_v5, 0.0  ;;  %v3059_v0 = vadd.f32 %v3058_v27, %v10757_v20  ;;  %1230 = vmax.xlane.f32.xlu1 %v1229_v33  ;;  %v3060_v63 = vpop.f32.mrb[137].mxu0  ;;  %v1135_v58 = vpop.xlane.xlu0 %1134 }
 0x21c   : > { %v3061_v31 = vadd.f32 %v3060_v63, %v10757_v20  ;;  %v1169_v35 = vsel %vm1153_vm3, %v11286_v19, %v1135_v58  ;;  %v11636_v9 = vpop.xlane.xlu1 %2155  ;;  %v3062_v34 = vpop.f32.mrb[138].mxu0  ;;  %v1232_v48 = vsel %vm1204_vm5, %v1197_v55, -inf  ;;  %v1180_v63 = vmul.f32 0.00390625, %v1164_v2 }
 0x21d   : > { %16044 = vst [vmem:[#allocation42_spill] sm:$0xff] %v11636_v9  ;;  %v11642_v22 = vadd.f32 %v4237_v17, %v4236_v32  ;;  %v3145_v5 = vmax.f32 %v3059_v0, 0.0  ;;  %v11644_v52 = vmul.f32 0.00390625, %v1169_v35  ;;  %v3063_v40 = vadd.f32 %v3062_v34, %v10760_v26  ;;  %v3933_v27 = vpop.f32.mrb[136].mxu1  ;;  %v3064_v33 = vpop.f32.mrb[139].mxu0 }
 0x21e   : > { %v3146_v19 = vmax.f32 %v3061_v31, 0.0  ;;  %v3934_v58 = vadd.f32 %v3933_v27, %v10757_v20  ;;  %v3065_v9 = vadd.f32 %v3064_v33, %v10760_v26  ;;  %v3935_v55 = vpop.f32.mrb[137].mxu1  ;;  %1233 = vmax.xlane.f32.xlu0 %v1232_v48  ;;  %v1165_v32 = vsel %vm1153_vm3, %v11231_v29, %v11524_v45 }
 0x21f   : > { %v3151_v17 = vmax.f32 %v3063_v40, 0.0  ;;  %v3936_v0 = vadd.f32 %v3935_v55, %v10757_v20  ;;  %v3937_v35 = vpop.f32.mrb[138].mxu1  ;;  %3256 = vadd.xlane.f32.xlu1 %v11516_v10  ;;  %9908 = vmatmul.mubr.msk.bf16.gmra.mrb[244].mxu0 %vm513_vm1, %v11279_v44  ;;  %v11656_v2 = vpop.xlane.xlu0 %2158  ;;  %v1181_v55 = vmul.f32 0.00390625, %v1165_v32 }
 0x220   : > { %16045 = vst [vmem:[#allocation43_spill] sm:$0xff] %v11656_v2  ;;  %v11661_v48 = vadd.f32 %v3146_v19, %v3145_v5  ;;  %v4242_v34 = vmax.f32 %v3934_v58, 0.0  ;;  %v3152_v27 = vmax.f32 %v3065_v9, 0.0  ;;  %v3938_v29 = vadd.f32 %v3937_v35, %v10760_v26  ;;  %v3939_v45 = vpop.f32.mrb[139].mxu1  ;;  %v11664_v40 = vpop.xlane.xlu1 %2161  ;;  %5298 = vmatprep.mubr.bf16.mxu0 %v16031_v46 }
 0x221   : > { %v4243_v10 = vmax.f32 %v3936_v0, 0.0  ;;  %v3940_v33 = vadd.f32 %v3939_v45, %v10760_v26  ;;  %9920 = vmatmul.mubr.msk.bf16.gmra.mrb[244].mxu1 %vm513_vm1, %v11279_v44  ;;  %v1198_v9 = vsel %vm11303_vm4, %v1180_v63, -3.4028235e+38 }
 0x222   : > { %v11670_v47 = vadd.f32 %v3152_v27, %v3151_v17  ;;  %v4248_v5 = vmax.f32 %v3938_v29, 0.0  ;;  %v3068_v19 = vpop.f32.mrb[140].mxu0  ;;  %3259 = vadd.xlane.f32.xlu0 %v11520_v11  ;;  %6173 = vmatprep.mubr.bf16.mxu1 %v16031_v46 }
 0x223   : > { %v11676_v58 = vadd.f32 %v4243_v10, %v4242_v34  ;;  %v4249_v0 = vmax.f32 %v3940_v33, 0.0  ;;  %v3069_v35 = vadd.f32 %v3068_v19, %v10775_v59  ;;  %3304 = vadd.xlane.f32.xlu1 %v11528_v62  ;;  %v3070_v44 = vpop.f32.mrb[141].mxu0  ;;  %v11680_v32 = vpop.xlane.xlu0 %2164  ;;  %v1235_v33 = vsel %vm1204_vm5, %v1198_v9, -inf }
 0x224   : > { %v3071_v17 = vadd.f32 %v3070_v44, %v10775_v59  ;;  %v11683_v27 = vpop.xlane.xlu1 %2209  ;;  %v3072_v11 = vpop.f32.mrb[142].mxu0  ;;  %v1199_v44 = vsel %vm11303_vm4, %v1181_v55, -3.4028235e+38 }
 0x225   : > { %v11685_v29 = vadd.f32 %v4249_v0, %v4248_v5  ;;  %v3157_v63 = vmax.f32 %v3069_v35, 0.0  ;;  %v3073_v45 = vadd.f32 %v3072_v11, %v10777_v1  ;;  %v3943_v34 = vpop.f32.mrb[140].mxu1  ;;  %v3074_v10 = vpop.f32.mrb[143].mxu0 }
 0x226   : > { %v3158_v19 = vmax.f32 %v3071_v17, 0.0  ;;  %v3944_v62 = vadd.f32 %v3943_v34, %v10775_v59  ;;  %v3075_v31 = vadd.f32 %v3074_v10, %v10777_v1  ;;  %v3945_v2 = vpop.f32.mrb[141].mxu1  ;;  %3307 = vadd.xlane.f32.xlu0 %v11536_v7 }
 0x227   : > { %v3163_v5 = vmax.f32 %v3073_v45, 0.0  ;;  %v3946_v0 = vadd.f32 %v3945_v2, %v10775_v59  ;;  %v3947_v35 = vpop.f32.mrb[142].mxu1  ;;  %1236 = vmax.xlane.f32.xlu1 %v1235_v33  ;;  %9909 = vmatmul.mubr.msk.bf16.gmra.mrb[248].mxu0 %vm513_vm1, %v11314_v18  ;;  %v11697_v9 = vpop.xlane.xlu0 %2212  ;;  %v1238_v45 = vsel %vm1204_vm5, %v1199_v44, -inf }
 0x228   : > { %v11699_v17 = vadd.f32 %v3158_v19, %v3157_v63  ;;  %v4254_v11 = vmax.f32 %v3944_v62, 0.0  ;;  %v3164_v34 = vmax.f32 %v3075_v31, 0.0  ;;  %v3948_v10 = vadd.f32 %v3947_v35, %v10777_v1  ;;  %v3949_v7 = vpop.f32.mrb[143].mxu1  ;;  %v11702_v26 = vpop.xlane.xlu1 %2167  ;;  %5308 = vmatprep.mubr.bf16.mxu0 %v16031_v46 }
 0x229   : > { %v4255_v55 = vmax.f32 %v3946_v0, 0.0  ;;  %v3950_v2 = vadd.f32 %v3949_v7, %v10777_v1  ;;  %9921 = vmatmul.mubr.msk.bf16.gmra.mrb[248].mxu1 %vm513_vm1, %v11314_v18 }
 0x22a   : > { %v11709_v33 = vadd.f32 %v3164_v34, %v3163_v5  ;;  %v4260_v63 = vmax.f32 %v3948_v10, 0.0  ;;  %v3078_v19 = vpop.f32.mrb[144].mxu0  ;;  %1239 = vmax.xlane.f32.xlu0 %v1238_v45  ;;  %6183 = vmatprep.mubr.bf16.mxu1 %v16031_v46 }
 0x22b   : > { %v11712_v31 = vadd.f32 %v4255_v55, %v4254_v11  ;;  %v4261_v62 = vmax.f32 %v3950_v2, 0.0  ;;  %v3079_v35 = vadd.f32 %v3078_v19, %v10793_v36  ;;  %3310 = vadd.xlane.f32.xlu1 %v11566_v8  ;;  %v3080_v0 = vpop.f32.mrb[145].mxu0  ;;  %v11716_v7 = vpop.xlane.xlu0 %2170 }
 0x22c   : > { %v3081_v18 = vadd.f32 %v3080_v0, %v10793_v36  ;;  %v11719_v44 = vpop.xlane.xlu1 %2215  ;;  %v3082_v5 = vpop.f32.mrb[146].mxu0 }
 0x22d   : > { %v11721_v34 = vadd.f32 %v4261_v62, %v4260_v63  ;;  %v3169_v10 = vmax.f32 %v3079_v35, 0.0  ;;  %v3083_v45 = vadd.f32 %v3082_v5, %v10795_v42  ;;  %v3953_v11 = vpop.f32.mrb[144].mxu1  ;;  %v3084_v55 = vpop.f32.mrb[147].mxu0 }
 0x22e   : > { %v3170_v2 = vmax.f32 %v3081_v18, 0.0  ;;  %v3954_v19 = vadd.f32 %v3953_v11, %v10793_v36  ;;  %v3085_v8 = vadd.f32 %v3084_v55, %v10795_v42  ;;  %v3955_v1 = vpop.f32.mrb[145].mxu1  ;;  %3313 = vadd.xlane.f32.xlu0 %v11568_v23 }
 0x22f   : > { %v3175_v59 = vmax.f32 %v3083_v45, 0.0  ;;  %v3956_v0 = vadd.f32 %v3955_v1, %v10793_v36  ;;  %v3957_v20 = vpop.f32.mrb[146].mxu1  ;;  %4315 = vadd.xlane.f32.xlu1 %v11573_v37  ;;  %9910 = vmatmul.mubr.msk.bf16.gmra.mrb[252].mxu0 %vm513_vm1, %v11355_v50  ;;  %v11731_v63 = vpop.xlane.xlu0 %2218 }
 0x230   : > { %v11733_v62 = vadd.f32 %v3170_v2, %v3169_v10  ;;  %v4266_v35 = vmax.f32 %v3954_v19, 0.0  ;;  %v3176_v18 = vmax.f32 %v3085_v8, 0.0  ;;  %v3958_v5 = vadd.f32 %v3957_v20, %v10795_v42  ;;  %v3959_v11 = vpop.f32.mrb[147].mxu1  ;;  %v11736_v23 = vpop.xlane.xlu1 %2173  ;;  %6226 = vmatprep.mubr.bf16.mxu0 %v16031_v46 }
 0x231   : > { %v4267_v1 = vmax.f32 %v3956_v0, 0.0  ;;  %v3960_v37 = vadd.f32 %v3959_v11, %v10795_v42  ;;  %9922 = vmatmul.mubr.msk.bf16.gmra.mrb[252].mxu1 %vm513_vm1, %v11355_v50  ;;  %v16046_v20 = vsel %vm11303_vm4, %v11570_v56, -3.4028235e+38 }
 0x232   : > { %v11743_v45 = vadd.f32 %v3176_v18, %v3175_v59  ;;  %v4272_v10 = vmax.f32 %v3958_v5, 0.0  ;;  %v3088_v55 = vpop.f32.mrb[148].mxu0  ;;  %4318 = vadd.xlane.f32.xlu0 %v11585_v25  ;;  %v1241_v2 = vsel %vm1204_vm5, %v16046_v20, -inf  ;;  %6339 = vmatprep.mubr.bf16.mxu1 %v16031_v46  ;;  %v11758_v18 = vld [vmem:[%s10414_s26 + $0x54] sm:$0xff] }
 0x233   : > { %v11752_v19 = vadd.f32 %v4267_v1, %v4266_v35  ;;  %v4273_v8 = vmax.f32 %v3960_v37, 0.0  ;;  %v3089_v50 = vadd.f32 %v3088_v55, %v10815_v21  ;;  %1242 = vmax.xlane.f32.xlu1 %v1241_v2  ;;  %v3090_v59 = vpop.f32.mrb[149].mxu0  ;;  %v11755_v0 = vpop.xlane.xlu0 %2176  ;;  %16048 = vst [vmem:[#allocation45_spill] sm:$0xff] %v11758_v18  ;;  %v7165_v35 = vsel %vm538_vm0, %v11377_v3, 0 }
 0x234   : > { %v3091_v25 = vadd.f32 %v3090_v59, %v10815_v21  ;;  %v11761_v5 = vpop.xlane.xlu1 %2221  ;;  %v3092_v56 = vpop.f32.mrb[150].mxu0  ;;  %v11769_v11 = vrot.slane %v11758_v18, %v10409_v6  ;;  %v16050_v59 = vsel %vm11303_vm4, %v11587_v16, -3.4028235e+38 }
 0x235   : > { %16047 = vst [vmem:[#allocation44_spill] sm:$0xff] %v11752_v19  ;;  %v11771_v1 = vadd.f32 %v4273_v8, %v4272_v10  ;;  %v3181_v37 = vmax.f32 %v3089_v50, 0.0  ;;  %v3093_v55 = vadd.f32 %v3092_v56, %v10817_v28  ;;  %v3963_v20 = vpop.f32.mrb[148].mxu1  ;;  %v3094_v2 = vpop.f32.mrb[151].mxu0  ;;  %v1244_v42 = vsel %vm1204_vm5, %v16050_v59, -inf }
 0x236   : > { %16049 = vst [vmem:[#allocation46_spill] sm:$0xff] %v11769_v11  ;;  %v3182_v36 = vmax.f32 %v3091_v25, 0.0  ;;  %v3964_v3 = vadd.f32 %v3963_v20, %v10815_v21  ;;  %v3095_v19 = vadd.f32 %v3094_v2, %v10817_v28  ;;  %v3965_v6 = vpop.f32.mrb[149].mxu1  ;;  %1245 = vmax.xlane.f32.xlu0 %v1244_v42  ;;  %v7171_v25 = vsel %vm538_vm0, %v11432_v38, 0 }
 0x237   : > { %v3187_v10 = vmax.f32 %v3093_v55, 0.0  ;;  %v3966_v8 = vadd.f32 %v3965_v6, %v10815_v21  ;;  %v3967_v50 = vpop.f32.mrb[150].mxu1  ;;  %3316 = vadd.xlane.f32.xlu1 %v11609_v43  ;;  %9924 = vmatmul.mubr.msk.bf16.vlgmr.msra.gmra.mrb[0].mxu0 %vm513_vm1, %v11404_v61  ;;  %v11785_v16 = vpop.xlane.xlu0 %2224  ;;  %v8255_v56 = vcombine.high %v11769_v11, %v11769_v11  ;;  %v11801_v38 = vld.sshfl [vmem:[%s10414_s26 + $0x50] sm:$0x33 pattern:$0x76325410] }
 0x238   : > { %v11791_v20 = vadd.f32 %v3182_v36, %v3181_v37  ;;  %v4278_v42 = vmax.f32 %v3964_v3, 0.0  ;;  %v3188_v55 = vmax.f32 %v3095_v19, 0.0  ;;  %v3968_v6 = vadd.f32 %v3967_v50, %v10817_v28  ;;  %v3969_v2 = vpop.f32.mrb[151].mxu1  ;;  %v11794_v43 = vpop.xlane.xlu1 %2179  ;;  %6236 = vmatprep.mubr.bf16.mxu0 %v16031_v46  ;;  %7183 = vmatpush1.bf16.msra.mxu0 %v7165_v35  ;;  %16051 = vst [vmem:[#allocation47_spill] sm:$0xff] %v11801_v38  ;;  %v16052_v3 = vld [vmem:[#allocation24_spill] sm:$0xff] }
 0x239   : > { %v4279_v59 = vmax.f32 %v3966_v8, 0.0  ;;  %v3970_v21 = vadd.f32 %v3969_v2, %v10817_v28  ;;  %9933 = vmatmul.mubr.msk.bf16.vlgmr.msra.gmra.mrb[0].mxu1 %vm513_vm1, %v11404_v61  ;;  %v2256_v35 = vsel %vm1136_vm2, %v16052_v3, %v11664_v40  ;;  %v2304_v40 = vstv %s11763_s24  ;;  %s6031_s24 = sadd.s32 5, %s10400_s21 }
 0x23a   : > { %v11803_v36 = vadd.f32 %v3188_v55, %v3187_v10  ;;  %v4284_v37 = vmax.f32 %v3968_v6, 0.0  ;;  %v3098_v19 = vpop.f32.mrb[152].mxu0  ;;  %3319 = vadd.xlane.f32.xlu0 %v11620_v54  ;;  %6349 = vmatprep.mubr.bf16.mxu1 %v16031_v46  ;;  %v2272_v54 = vsel %vm1153_vm3, %v2256_v35, %v11683_v27  ;;  %s6032_s27 = sld [smem:[#allocation3 + %s6031_s24]]  ;;  %s10004_s24 = sshll.u32 %s10372_s13, 7 }
 0x23b   : > { %v11810_v8 = vadd.f32 %v4279_v59, %v4278_v42  ;;  %v4285_v50 = vmax.f32 %v3970_v21, 0.0  ;;  %v3099_v61 = vadd.f32 %v3098_v19, %v10845_v4  ;;  %4321 = vadd.xlane.f32.xlu1 %v11630_v24  ;;  %v3100_v10 = vpop.f32.mrb[153].mxu0  ;;  %v11814_v55 = vpop.xlane.xlu0 %2182  ;;  %7296 = vmatpush1.bf16.msra.mxu1 %v7171_v25  ;;  %v7163_v21 = vcombine.high %v11801_v38, %v11801_v38  ;;  %v16053_v59 = vld [vmem:[#allocation22_spill] sm:$0xff] }
 0x23c   : > { %v3101_v6 = vadd.f32 %v3100_v10, %v10845_v4  ;;  %v11819_v2 = vpop.xlane.xlu1 %2227  ;;  %v3102_v28 = vpop.f32.mrb[154].mxu0  ;;  %9974 = vmatprep.subr.msk.bf16.mxu1 %vm538_vm0, %v8255_v56  ;;  %v16054_v38 = vsel %vm11303_vm4, %v11622_v41, -3.4028235e+38 }
 0x23d   : > { %v11825_v42 = vadd.f32 %v4285_v50, %v4284_v37  ;;  %v3193_v24 = vmax.f32 %v3099_v61, 0.0  ;;  %v3103_v19 = vadd.f32 %v3102_v28, %v16053_v59  ;;  %v3973_v25 = vpop.f32.mrb[152].mxu1  ;;  %v3104_v3 = vpop.f32.mrb[155].mxu0  ;;  %v1247_v56 = vsel %vm1204_vm5, %v16054_v38, -inf  ;;  %9962 = vmatprep.subr.msk.bf16.mxu0 %vm538_vm0, %v7163_v21 }
 0x23e   : > { %v3194_v11 = vmax.f32 %v3101_v6, 0.0  ;;  %v3974_v27 = vadd.f32 %v3973_v25, %v10845_v4  ;;  %v3105_v35 = vadd.f32 %v3104_v3, %v16053_v59  ;;  %v3975_v10 = vpop.f32.mrb[153].mxu1  ;;  %4324 = vadd.xlane.f32.xlu0 %v11642_v22  ;;  %v2288_v37 = vmul.f32 0.00390625, %v2272_v54  ;;  %v16055_v6 = vld [vmem:[#allocation35_spill] sm:$0xff] }
 0x23f   : > { %v3199_v28 = vmax.f32 %v3103_v19, 0.0  ;;  %v3976_v50 = vadd.f32 %v3975_v10, %v10845_v4  ;;  %v3977_v61 = vpop.f32.mrb[154].mxu1  ;;  %1248 = vmax.xlane.f32.xlu1 %v1247_v56  ;;  %9925 = vmatmul.mubr.msk.bf16.gmra.mrb[4].mxu0 %vm513_vm1, %v16055_v6  ;;  %v11840_v25 = vpop.xlane.xlu0 %2230  ;;  %v16056_v22 = vld [vmem:[#allocation23_spill] sm:$0xff]  ;;  %v16059_v56 = vld [vmem:[#allocation25_spill] sm:$0xff] }
 0x240   : > { %vm11843_vm6 = vcmp.lt.s32.totalorder %v16056_v22, %v2304_v40  ;;  %v11847_v41 = vadd.f32 %v3194_v11, %v3193_v24  ;;  %v4290_v38 = vmax.f32 %v3974_v27, 0.0  ;;  %v3200_v21 = vmax.f32 %v3105_v35, 0.0  ;;  %v3979_v19 = vpop.f32.mrb[155].mxu1  ;;  %v11850_v10 = vpop.xlane.xlu1 %2185  ;;  %6246 = vmatprep.mubr.bf16.mxu0 %v16031_v46 }
 0x241   : > { %v3978_v54 = vadd.f32 %v3977_v61, %v16053_v59  ;;  %v2257_v4 = vsel %vm1136_vm2, %v16059_v56, %v11680_v32  ;;  %v4291_v18 = vmax.f32 %v3976_v50, 0.0  ;;  %v3980_v40 = vadd.f32 %v3979_v19, %v16053_v59  ;;  %9934 = vmatmul.mubr.msk.bf16.gmra.mrb[4].mxu1 %vm513_vm1, %v16055_v6  ;;  %v16062_v56 = vld [vmem:[#allocation28_spill] sm:$0xff] }
 0x242   : > { %v16060_v11 = vsel %vm11303_vm4, %v11644_v52, -3.4028235e+38  ;;  %v2273_v27 = vsel %vm1153_vm3, %v2257_v4, %v11697_v9  ;;  %v11866_v35 = vadd.f32 %v3200_v21, %v3199_v28  ;;  %v3108_v22 = vpop.f32.mrb[156].mxu0  ;;  %6359 = vmatprep.mubr.bf16.mxu1 %v16031_v46  ;;  %v11880_v28 = vsel %vm11843_vm6, %v2288_v37, -3.4028235e+38 }
 0x243   : > { %v1250_v24 = vsel %vm1204_vm5, %v16060_v11, -inf  ;;  %v4296_v61 = vmax.f32 %v3978_v54, 0.0  ;;  %v11869_v32 = vadd.f32 %v4291_v18, %v4290_v38  ;;  %v4297_v50 = vmax.f32 %v3980_v40, 0.0  ;;  %3322 = vadd.xlane.f32.xlu1 %v11661_v48  ;;  %v3110_v60 = vpop.f32.mrb[157].mxu0  ;;  %v11873_v52 = vpop.xlane.xlu0 %2188  ;;  %16061 = vst [vmem:[#allocation24_spill] sm:$0xff] %v11880_v28 }
 0x244   : > { %1251 = vmax.xlane.f32.xlu0 %v1250_v24  ;;  %v3109_v6 = vadd.f32 %v3108_v22, %v10864_v53  ;;  %v3111_v19 = vadd.f32 %v3110_v60, %v10864_v53  ;;  %v11876_v4 = vpop.xlane.xlu1 %2233  ;;  %v3112_v9 = vpop.f32.mrb[158].mxu0  ;;  %v2289_v21 = vmul.f32 0.00390625, %v2273_v27  ;;  %v2258_v40 = vsel %vm1136_vm2, %v16062_v56, %v11702_v26 }
 0x245   : > { %v11882_v18 = vadd.f32 %v4297_v50, %v4296_v61  ;;  %v3113_v22 = vadd.f32 %v3112_v9, %v10866_v57  ;;  %v3983_v54 = vpop.f32.mrb[156].mxu1  ;;  %v3114_v48 = vpop.f32.mrb[159].mxu0  ;;  %v2274_v37 = vsel %vm1153_vm3, %v2258_v40, %v11719_v44 }
 0x246   : > { %v3205_v38 = vmax.f32 %v3109_v6, 0.0  ;;  %v3206_v11 = vmax.f32 %v3111_v19, 0.0  ;;  %v3984_v24 = vadd.f32 %v3983_v54, %v10864_v53  ;;  %v3115_v60 = vadd.f32 %v3114_v48, %v10866_v57  ;;  %v3985_v59 = vpop.f32.mrb[157].mxu1 }
 0x247   : > { %v3211_v27 = vmax.f32 %v3113_v22, 0.0  ;;  %v3986_v61 = vadd.f32 %v3985_v59, %v10864_v53  ;;  %v3987_v50 = vpop.f32.mrb[158].mxu1  ;;  %4327 = vadd.xlane.f32.xlu1 %v11676_v58  ;;  %9926 = vmatmul.mubr.msk.bf16.gmra.mrb[8].mxu0 %vm513_vm1, %v11503_v14  ;;  %v11897_v26 = vpop.xlane.xlu0 %2236  ;;  %v2322_v6 = vsel %vm1204_vm5, %v11880_v28, -inf  ;;  %v16063_v58 = vld [vmem:[#allocation29_spill] sm:$0xff]  ;;  %v2290_v40 = vmul.f32 0.00390625, %v2274_v37  ;;  %v16065_v37 = vld [vmem:[#allocation31_spill] sm:$0xff] }
 0x248   : > { %3325 = vadd.xlane.f32.xlu0 %v11670_v47  ;;  %v11901_v19 = vadd.f32 %v3206_v11, %v3205_v38  ;;  %v4302_v47 = vmax.f32 %v3984_v24, 0.0  ;;  %v3212_v9 = vmax.f32 %v3115_v60, 0.0  ;;  %v3988_v44 = vadd.f32 %v3987_v50, %v10866_v57  ;;  %v3989_v22 = vpop.f32.mrb[159].mxu1  ;;  %v11904_v54 = vpop.xlane.xlu1 %2191  ;;  %6256 = vmatprep.mubr.bf16.mxu0 %v16031_v46 }
 0x249   : > { %v2259_v59 = vsel %vm1136_vm2, %v16063_v58, %v11716_v7  ;;  %v4303_v48 = vmax.f32 %v3986_v61, 0.0  ;;  %v3990_v56 = vadd.f32 %v3989_v22, %v10866_v57  ;;  %9935 = vmatmul.mubr.msk.bf16.gmra.mrb[8].mxu1 %vm513_vm1, %v11503_v14  ;;  %v11915_v38 = vsel %vm11843_vm6, %v2289_v21, -3.4028235e+38 }
 0x24a   : > { %16064 = vst [vmem:[#allocation35_spill] sm:$0xff] %v11915_v38  ;;  %v2275_v11 = vsel %vm1153_vm3, %v2259_v59, %v11731_v63  ;;  %v11919_v24 = vadd.f32 %v3212_v9, %v3211_v27  ;;  %v4308_v60 = vmax.f32 %v3988_v44, 0.0  ;;  %v4026_v50 = vpop.f32.mrb[160].mxu0  ;;  %6369 = vmatprep.mubr.bf16.mxu1 %v16031_v46  ;;  %v2260_v63 = vsel %vm1136_vm2, %v16065_v37, %v11736_v23 }
 0x24b   : > { %v11923_v7 = vadd.f32 %v4303_v48, %v4302_v47  ;;  %v4309_v61 = vmax.f32 %v3990_v56, 0.0  ;;  %v4027_v14 = vadd.f32 %v4026_v50, %v10716_v12  ;;  %2323 = vmax.xlane.f32.xlu1 %v2322_v6  ;;  %v4028_v21 = vpop.f32.mrb[161].mxu0  ;;  %v11926_v22 = vpop.xlane.xlu0 %2194  ;;  %v2325_v47 = vsel %vm1204_vm5, %v11915_v38, -inf }
 0x24c   : > { %4330 = vadd.xlane.f32.xlu0 %v11685_v29  ;;  %v4029_v27 = vadd.f32 %v4028_v21, %v10716_v12  ;;  %v11932_v9 = vpop.xlane.xlu1 %2239  ;;  %v4030_v29 = vpop.f32.mrb[162].mxu0  ;;  %v2291_v44 = vmul.f32 0.00390625, %v2275_v11  ;;  %v11943_v37 = vsel %vm11843_vm6, %v2290_v40, -3.4028235e+38  ;;  %v16067_v11 = vld [vmem:[#allocation33_spill] sm:$0xff] }
 0x24d   : > { %v11936_v58 = vadd.f32 %v4309_v61, %v4308_v60  ;;  %v4220_v59 = vmax.f32 %v4027_v14, 0.0  ;;  %v4031_v6 = vadd.f32 %v4030_v29, %v10726_v15  ;;  %v4139_v48 = vpop.f32.mrb[160].mxu1  ;;  %v4032_v56 = vpop.f32.mrb[163].mxu0  ;;  %16066 = vst [vmem:[#allocation25_spill] sm:$0xff] %v11943_v37  ;;  %v2261_v60 = vsel %vm1136_vm2, %v16067_v11, %v11755_v0 }
 0x24e   : > { %v4221_v50 = vmax.f32 %v4029_v27, 0.0  ;;  %v4140_v28 = vadd.f32 %v4139_v48, %v10716_v12  ;;  %v4033_v23 = vadd.f32 %v4032_v56, %v10726_v15  ;;  %v4141_v21 = vpop.f32.mrb[161].mxu1  ;;  %v2276_v61 = vsel %vm1153_vm3, %v2260_v63, %v11761_v5 }
 0x24f   : > { %v4226_v14 = vmax.f32 %v4031_v6, 0.0  ;;  %v4142_v27 = vadd.f32 %v4141_v21, %v10716_v12  ;;  %v4143_v29 = vpop.f32.mrb[162].mxu1  ;;  %3328 = vadd.xlane.f32.xlu1 %v11699_v17  ;;  %9927 = vmatmul.mubr.msk.bf16.gmra.mrb[12].mxu0 %vm513_vm1, %v11549_v39  ;;  %v2277_v5 = vsel %vm1153_vm3, %v2261_v60, %v11785_v16  ;;  %v11975_v16 = vmul.f32 0.00390625, %v2276_v61 }
 0x250   : > { %2326 = vmax.xlane.f32.xlu0 %v2325_v47  ;;  %v11954_v47 = vpop.xlane.xlu0 %2242  ;;  %v11956_v40 = vadd.f32 %v4221_v50, %v4220_v59  ;;  %v4222_v48 = vmax.f32 %v4140_v28, 0.0  ;;  %v4227_v56 = vmax.f32 %v4033_v23, 0.0  ;;  %v4144_v0 = vadd.f32 %v4143_v29, %v10726_v15  ;;  %v4145_v11 = vpop.f32.mrb[163].mxu1  ;;  %6266 = vmatprep.mubr.bf16.mxu0 %v16031_v46 }
 0x251   : > { %v2198_v38 = vpop.xlane.xlu1 %2197  ;;  %v4223_v63 = vmax.f32 %v4142_v27, 0.0  ;;  %v4146_v17 = vadd.f32 %v4145_v11, %v10726_v15  ;;  %9936 = vmatmul.mubr.msk.bf16.gmra.mrb[12].mxu1 %vm513_vm1, %v11549_v39  ;;  %v11967_v59 = vsel %vm11843_vm6, %v2291_v44, -3.4028235e+38  ;;  %v2328_v23 = vsel %vm1204_vm5, %v11943_v37, -inf }
 0x252   : > { %16068 = vst [vmem:[#allocation28_spill] sm:$0xff] %v11967_v59  ;;  %v11969_v28 = vadd.f32 %v4227_v56, %v4226_v14  ;;  %v4228_v6 = vmax.f32 %v4144_v0, 0.0  ;;  %v4036_v50 = vpop.f32.mrb[164].mxu0  ;;  %6379 = vmatprep.mubr.bf16.mxu1 %v16031_v46  ;;  %v11981_v27 = vmul.f32 0.00390625, %v2277_v5  ;;  %v2331_v61 = vsel %vm1204_vm5, %v11967_v59, -inf  ;;  %v16069_v59 = vld [vmem:[#allocation41_spill] sm:$0xff] }
 0x253   : > { %v11977_v21 = vadd.f32 %v4223_v63, %v4222_v48  ;;  %v4229_v39 = vmax.f32 %v4146_v17, 0.0  ;;  %v4037_v60 = vadd.f32 %v4036_v50, %v10723_v13  ;;  %4333 = vadd.xlane.f32.xlu1 %v11712_v31  ;;  %v4038_v44 = vpop.f32.mrb[165].mxu0 }
 0x254   : > { %3331 = vadd.xlane.f32.xlu0 %v11709_v33  ;;  %v2201_v14 = vpop.xlane.xlu0 %2200  ;;  %v2268_v33 = vsel %vm1136_vm2, %v11580_v49, %v2198_v38  ;;  %v4039_v29 = vadd.f32 %v4038_v44, %v10723_v13  ;;  %v4040_v0 = vpop.f32.mrb[166].mxu0 }
 0x255   : > { %v2246_v56 = vpop.xlane.xlu1 %2245  ;;  %v11988_v48 = vadd.f32 %v4229_v39, %v4228_v6  ;;  %v4232_v11 = vmax.f32 %v4037_v60, 0.0  ;;  %v4041_v31 = vadd.f32 %v4040_v0, %v10742_v51  ;;  %v4149_v17 = vpop.f32.mrb[164].mxu1  ;;  %v2269_v6 = vsel %vm1136_vm2, %v16069_v59, %v2201_v14 }
 0x256   : > { %v2284_v63 = vsel %vm1153_vm3, %v2268_v33, %v2246_v56  ;;  %v4042_v5 = vpop.f32.mrb[167].mxu0  ;;  %v4233_v50 = vmax.f32 %v4039_v29, 0.0  ;;  %v4150_v49 = vadd.f32 %v4149_v17, %v10723_v13  ;;  %v4151_v44 = vpop.f32.mrb[165].mxu1  ;;  %v2310_v56 = vsel %vm11843_vm6, %v11975_v16, -3.4028235e+38 }
 0x257   : > { %v11992_v37 = vmul.f32 0.00390625, %v2284_v63  ;;  %v4043_v38 = vadd.f32 %v4042_v5, %v10742_v51  ;;  %v4238_v39 = vmax.f32 %v4041_v31, 0.0  ;;  %v4152_v60 = vadd.f32 %v4151_v44, %v10723_v13  ;;  %v4153_v33 = vpop.f32.mrb[166].mxu1  ;;  %2329 = vmax.xlane.f32.xlu1 %v2328_v23  ;;  %9928 = vmatmul.mubr.msk.bf16.gmra.mrb[16].mxu0 %vm513_vm1, %v11598_v30  ;;  %v16070_v44 = vld [vmem:[#allocation42_spill] sm:$0xff] }
 0x258   : > { %4336 = vadd.xlane.f32.xlu0 %v11721_v34  ;;  %v2249_v29 = vpop.xlane.xlu0 %2248  ;;  %v12005_v0 = vadd.f32 %v4233_v50, %v4232_v11  ;;  %v4234_v63 = vmax.f32 %v4150_v49, 0.0  ;;  %v4154_v17 = vadd.f32 %v4153_v33, %v10742_v51  ;;  %v4155_v59 = vpop.f32.mrb[167].mxu1  ;;  %6276 = vmatprep.mubr.bf16.mxu0 %v16031_v46 }
 0x259   : > { %v4239_v34 = vmax.f32 %v4043_v38, 0.0  ;;  %v2204_v14 = vpop.xlane.xlu1 %2203  ;;  %v4235_v31 = vmax.f32 %v4152_v60, 0.0  ;;  %v4156_v23 = vadd.f32 %v4155_v59, %v10742_v51  ;;  %v2285_v5 = vsel %vm1153_vm3, %v2269_v6, %v2249_v29  ;;  %9937 = vmatmul.mubr.msk.bf16.gmra.mrb[16].mxu1 %vm513_vm1, %v11598_v30  ;;  %v16072_v6 = vld [vmem:[#allocation34_spill] sm:$0xff] }
 0x25a   : > { %v2270_v13 = vsel %vm1136_vm2, %v16070_v44, %v2204_v14  ;;  %v4240_v11 = vmax.f32 %v4154_v17, 0.0  ;;  %v12017_v50 = vmul.f32 0.00390625, %v2285_v5  ;;  %v4046_v49 = vpop.f32.mrb[168].mxu0  ;;  %6389 = vmatprep.mubr.bf16.mxu1 %v16031_v46  ;;  %v2262_v60 = vsel %vm1136_vm2, %v16072_v6, %v11794_v43 }
 0x25b   : > { %v12015_v16 = vadd.f32 %v4239_v34, %v4238_v39  ;;  %v12026_v33 = vadd.f32 %v4235_v31, %v4234_v63  ;;  %v4241_v30 = vmax.f32 %v4156_v23, 0.0  ;;  %v16074_v39 = vld [vmem:[#allocation13_spill] sm:$0xff]  ;;  %3334 = vadd.xlane.f32.xlu1 %v11733_v62  ;;  %v4048_v34 = vpop.f32.mrb[169].mxu0  ;;  %v2334_v5 = vsel %vm1204_vm5, %v2310_v56, -inf  ;;  %v16075_v23 = vld [vmem:[#allocation14_spill] sm:$0xff] }
 0x25c   : > { %2332 = vmax.xlane.f32.xlu0 %v2331_v61  ;;  %v4047_v29 = vadd.f32 %v4046_v49, %v16074_v39  ;;  %v2207_v17 = vpop.xlane.xlu0 %2206  ;;  %v4049_v61 = vadd.f32 %v4048_v34, %v16074_v39  ;;  %v4050_v14 = vpop.f32.mrb[170].mxu0  ;;  %v2311_v44 = vsel %vm11843_vm6, %v11981_v27, -3.4028235e+38 }
 0x25d   : > { %16071 = vst [vmem:[#allocation29_spill] sm:$0xff] %v12015_v16  ;;  %16073 = vst [vmem:[#allocation31_spill] sm:$0xff] %v12026_v33  ;;  %v2252_v59 = vpop.xlane.xlu1 %2251  ;;  %v12038_v63 = vadd.f32 %v4241_v30, %v4240_v11  ;;  %v4051_v49 = vadd.f32 %v4050_v14, %v16075_v23  ;;  %v4159_v6 = vpop.f32.mrb[168].mxu1  ;;  %v2278_v11 = vsel %vm1153_vm3, %v2262_v60, %v11819_v2  ;;  %v16077_v30 = vld [vmem:[#allocation43_spill] sm:$0xff] }
 0x25e   : > { %v4244_v31 = vmax.f32 %v4047_v29, 0.0  ;;  %v2286_v62 = vsel %vm1153_vm3, %v2270_v13, %v2252_v59  ;;  %v4052_v34 = vpop.f32.mrb[171].mxu0  ;;  %v4245_v38 = vmax.f32 %v4049_v61, 0.0  ;;  %v4160_v56 = vadd.f32 %v4159_v6, %v16074_v39  ;;  %v4161_v16 = vpop.f32.mrb[169].mxu1  ;;  %v16078_v61 = vld [vmem:[#allocation44_spill] sm:$0xff] }
 0x25f   : > { %v12042_v33 = vmul.f32 0.00390625, %v2286_v62  ;;  %v4053_v27 = vadd.f32 %v4052_v34, %v16075_v23  ;;  %v2271_v13 = vsel %vm1136_vm2, %v16077_v30, %v2207_v17  ;;  %v4250_v29 = vmax.f32 %v4051_v49, 0.0  ;;  %v4163_v14 = vpop.f32.mrb[170].mxu1  ;;  %4339 = vadd.xlane.f32.xlu1 %v16078_v61  ;;  %v12056_v62 = vld [vmem:[%s15886_s2 + $0x28] sm:$0xff]  }
 0x260   : > { %3337 = vadd.xlane.f32.xlu0 %v11743_v45  ;;  %v4162_v59 = vadd.f32 %v4161_v16, %v16074_v39  ;;  %16079 = vst [vmem:[#allocation41_spill] sm:$0xff] %v12056_v62  ;;  %9929 = vmatmul.mubr.msk.bf16.gmra.mrb[20].mxu0 %vm513_vm1, %v12056_v62  ;;  %v2255_v45 = vpop.xlane.xlu0 %2254  ;;  %v12060_v6 = vadd.f32 %v4245_v38, %v4244_v31  ;;  %v4246_v2 = vmax.f32 %v4160_v56, 0.0  ;;  %v4165_v49 = vpop.f32.mrb[171].mxu1  ;;  %v16081_v31 = vld [vmem:[#allocation36_spill] sm:$0xff] }
 0x261   : > { %16076 = vst [vmem:[#allocation33_spill] sm:$0xff] %v12042_v33  ;;  %v4251_v60 = vmax.f32 %v4053_v27, 0.0  ;;  %v4164_v17 = vadd.f32 %v4163_v14, %v16075_v23  ;;  %v3215_v16 = vpop.xlane.xlu1 %3214  ;;  %6286 = vmatprep.mubr.bf16.mxu0 %v16031_v46  ;;  %v4166_v30 = vadd.f32 %v4165_v49, %v16075_v23  ;;  %v2287_v61 = vsel %vm1153_vm3, %v2271_v13, %v2255_v45 }
 0x262   : > { %16080 = vst [vmem:[#allocation42_spill] sm:$0xff] %v12060_v6  ;;  %v4247_v34 = vmax.f32 %v4162_v59, 0.0  ;;  %9938 = vmatmul.mubr.msk.bf16.gmra.mrb[20].mxu1 %vm513_vm1, %v12056_v62  ;;  %v2263_v56 = vsel %vm1136_vm2, %v16081_v31, %v11814_v55  ;;  %v12076_v43 = vmul.f32 0.00390625, %v2287_v61  ;;  %v4056_v59 = vpop.f32.mrb[172].mxu0  ;;  %v2294_v13 = vmul.f32 0.00390625, %v2278_v11  ;;  %v16084_v6 = vld [vmem:[#allocation15_spill] sm:$0xff] }
 0x263   : > { %v12074_v27 = vadd.f32 %v4251_v60, %v4250_v29  ;;  %v4252_v14 = vmax.f32 %v4164_v17, 0.0  ;;  %6399 = vmatprep.mubr.bf16.mxu1 %v16031_v46  ;;  %v4253_v49 = vmax.f32 %v4166_v30, 0.0  ;;  %v4057_v38 = vadd.f32 %v4056_v59, %v16084_v6  ;;  %2335 = vmax.xlane.f32.xlu1 %v2334_v5  ;;  %v4058_v62 = vpop.f32.mrb[173].mxu0  ;;  %v16086_v30 = vld [vmem:[#allocation16_spill] sm:$0xff] }
 0x264   : > { %4342 = vadd.xlane.f32.xlu0 %v11771_v1  ;;  %v12080_v45 = vadd.f32 %v4247_v34, %v4246_v2  ;;  %v3218_v33 = vpop.xlane.xlu0 %3217  ;;  %v2279_v55 = vsel %vm1153_vm3, %v2263_v56, %v11840_v25  ;;  %v4059_v29 = vadd.f32 %v4058_v62, %v16084_v6  ;;  %v4060_v17 = vpop.f32.mrb[174].mxu0  ;;  %v2337_v1 = vsel %vm1204_vm5, %v2311_v44, -inf }
 0x265   : > { %16082 = vst [vmem:[#allocation34_spill] sm:$0xff] %v12074_v27  ;;  %v3263_v60 = vpop.xlane.xlu1 %3262  ;;  %v12090_v2 = vadd.f32 %v4253_v49, %v4252_v14  ;;  %v4256_v34 = vmax.f32 %v4057_v38, 0.0  ;;  %v4061_v61 = vadd.f32 %v4060_v17, %v16086_v30  ;;  %v4169_v31 = vpop.f32.mrb[172].mxu1 }
 0x266   : > { %16083 = vst [vmem:[#allocation13_spill] sm:$0xff] %v12080_v45  ;;  %v12093_v5 = vsel %vm1136_vm2, %v3215_v16, %v3263_v60  ;;  %v4062_v25 = vpop.f32.mrb[175].mxu0  ;;  %v4257_v56 = vmax.f32 %v4059_v29, 0.0  ;;  %v4170_v62 = vadd.f32 %v4169_v31, %v16084_v6  ;;  %v4171_v44 = vpop.f32.mrb[173].mxu1  ;;  %v2295_v45 = vmul.f32 0.00390625, %v2279_v55  ;;  %v12103_v16 = vld [vmem:[%s15886_s2 + $0x30] sm:$0xff]  }
 0x267   : > { %16085 = vst [vmem:[#allocation14_spill] sm:$0xff] %v12093_v5  ;;  %v4063_v59 = vadd.f32 %v4062_v25, %v16086_v30  ;;  %v4262_v27 = vmax.f32 %v4061_v61, 0.0  ;;  %v4172_v14 = vadd.f32 %v4171_v44, %v16084_v6  ;;  %v4173_v49 = vpop.f32.mrb[174].mxu1  ;;  %3340 = vadd.xlane.f32.xlu1 %v11791_v20  ;;  %v16089_v44 = vld [vmem:[#allocation37_spill] sm:$0xff] }
 0x268   : > { %2338 = vmax.xlane.f32.xlu0 %v2337_v1  ;;  %9930 = vmatmul.mubr.msk.bf16.gmra.mrb[24].mxu0 %vm513_vm1, %v12103_v16  ;;  %v3266_v38 = vpop.xlane.xlu0 %3265  ;;  %v12107_v29 = vadd.f32 %v4257_v56, %v4256_v34  ;;  %v4258_v60 = vmax.f32 %v4170_v62, 0.0  ;;  %v4174_v55 = vadd.f32 %v4173_v49, %v16086_v30  ;;  %v4175_v1 = vpop.f32.mrb[175].mxu1  ;;  %v2312_v34 = vsel %vm11843_vm6, %v2294_v13, -3.4028235e+38 }
 0x269   : > { %v4263_v17 = vmax.f32 %v4063_v59, 0.0  ;;  %v3221_v61 = vpop.xlane.xlu1 %3220  ;;  %6296 = vmatprep.mubr.bf16.mxu0 %v16031_v46  ;;  %v4259_v20 = vmax.f32 %v4172_v14, 0.0  ;;  %v4176_v31 = vadd.f32 %v4175_v1, %v16086_v30  ;;  %v12113_v25 = vsel %vm1136_vm2, %v3218_v33, %v3266_v38  ;;  %v16091_v38 = vld [vmem:[#allocation17_spill] sm:$0xff] }
 0x26a   : > { %16087 = vst [vmem:[#allocation43_spill] sm:$0xff] %v12113_v25  ;;  %9939 = vmatmul.mubr.msk.bf16.gmra.mrb[24].mxu1 %vm513_vm1, %v12103_v16  ;;  %v4264_v62 = vmax.f32 %v4174_v55, 0.0  ;;  %v4066_v59 = vpop.f32.mrb[176].mxu0  ;;  %v2264_v14 = vsel %vm1136_vm2, %v16089_v44, %v11850_v10  ;;  %v2340_v25 = vsel %vm1204_vm5, %v2312_v34, -inf  ;;  %v2313_v10 = vsel %vm11843_vm6, %v2295_v45, -3.4028235e+38 }
 0x26b   : > { %v12119_v56 = vadd.f32 %v4263_v17, %v4262_v27  ;;  %6409 = vmatprep.mubr.bf16.mxu1 %v16031_v46  ;;  %v12126_v33 = vadd.f32 %v4259_v20, %v4258_v60  ;;  %v4265_v49 = vmax.f32 %v4176_v31, 0.0  ;;  %v4067_v1 = vadd.f32 %v4066_v59, %v16091_v38  ;;  %4345 = vadd.xlane.f32.xlu1 %v11810_v8  ;;  %v4068_v13 = vpop.f32.mrb[177].mxu0  ;;  %v16092_v17 = vld [vmem:[#allocation38_spill] sm:$0xff] }
 0x26c   : > { %3343 = vadd.xlane.f32.xlu0 %v11803_v36  ;;  %v3224_v27 = vpop.xlane.xlu0 %3223  ;;  %v2265_v55 = vsel %vm1136_vm2, %v16092_v17, %v11873_v52  ;;  %v4069_v36 = vadd.f32 %v4068_v13, %v16091_v38  ;;  %v4070_v5 = vpop.f32.mrb[178].mxu0  ;;  %v16095_v31 = vld [vmem:[#allocation18_spill] sm:$0xff]  ;;  %v2280_v52 = vsel %vm1153_vm3, %v2264_v14, %v11876_v4  ;;  %v2343_v14 = vsel %vm1204_vm5, %v2313_v10, -inf  ;;  %v16098_v10 = vld [vmem:[#allocation45_spill] sm:$0xff] }
 0x26d   : > { %16088 = vst [vmem:[#allocation44_spill] sm:$0xff] %v12119_v56  ;;  %16090 = vst [vmem:[#allocation36_spill] sm:$0xff] %v12126_v33  ;;  %v3269_v11 = vpop.xlane.xlu1 %3268  ;;  %v12137_v60 = vadd.f32 %v4265_v49, %v4264_v62  ;;  %v4268_v20 = vmax.f32 %v4067_v1, 0.0  ;;  %v4071_v59 = vadd.f32 %v4070_v5, %v16095_v31  ;;  %v4179_v44 = vpop.f32.mrb[176].mxu1  ;;  %v2281_v45 = vsel %vm1153_vm3, %v2265_v55, %v11897_v26  ;;  %v12154_v4 = vld [vmem:[%s15886_s2 + $0x38] sm:$0xff]  }
 0x26e   : > { %v12140_v8 = vsel %vm1136_vm2, %v3221_v61, %v3269_v11  ;;  %v4072_v33 = vpop.f32.mrb[179].mxu0  ;;  %v4269_v13 = vmax.f32 %v4069_v36, 0.0  ;;  %v4180_v17 = vadd.f32 %v4179_v44, %v16091_v38  ;;  %v4181_v56 = vpop.f32.mrb[177].mxu1 }
 0x26f   : > { %16093 = vst [vmem:[#allocation15_spill] sm:$0xff] %v12137_v60  ;;  %16094 = vst [vmem:[#allocation16_spill] sm:$0xff] %v12140_v8  ;;  %v4073_v34 = vadd.f32 %v4072_v33, %v16095_v31  ;;  %v4274_v11 = vmax.f32 %v4071_v59, 0.0  ;;  %v4182_v61 = vadd.f32 %v4181_v56, %v16091_v38  ;;  %v4183_v5 = vpop.f32.mrb[178].mxu1  ;;  %2341 = vmax.xlane.f32.xlu1 %v2340_v25  ;;  %v2296_v59 = vmul.f32 0.00390625, %v2280_v52  ;;  %v16102_v8 = vld [vmem:[#allocation11_spill] sm:$0xff] }
 0x270   : > { %4348 = vadd.xlane.f32.xlu0 %v11825_v42  ;;  %9931 = vmatmul.mubr.msk.bf16.gmra.mrb[28].mxu0 %vm513_vm1, %v12154_v4  ;;  %v3272_v62 = vpop.xlane.xlu0 %3271  ;;  %v12159_v42 = vadd.f32 %v4269_v13, %v4268_v20  ;;  %v4270_v33 = vmax.f32 %v4180_v17, 0.0  ;;  %v4184_v49 = vadd.f32 %v4183_v5, %v16095_v31  ;;  %v4185_v56 = vpop.f32.mrb[179].mxu1  ;;  %v8240_v20 = vcombine.high %v16098_v10, %v16098_v10  ;;  %v16101_v5 = vld [vmem:[#allocation19_spill] sm:$0xff] }
 0x271   : > { %v4275_v26 = vmax.f32 %v4073_v34, 0.0  ;;  %v3227_v1 = vpop.xlane.xlu1 %3226  ;;  %7214 = vmatprep.mubr.bf16.mxu0 %v16031_v46  ;;  %v4271_v25 = vmax.f32 %v4182_v61, 0.0  ;;  %v4186_v55 = vadd.f32 %v4185_v56, %v16095_v31  ;;  %v12165_v36 = vsel %vm1136_vm2, %v3224_v27, %v3272_v62 }
 0x272   : > { %16096 = vst [vmem:[#allocation37_spill] sm:$0xff] %v12159_v42  ;;  %16097 = vst [vmem:[#allocation38_spill] sm:$0xff] %v12165_v36  ;;  %9940 = vmatmul.mubr.msk.bf16.gmra.mrb[28].mxu1 %vm513_vm1, %v12154_v4  ;;  %v4276_v13 = vmax.f32 %v4184_v49, 0.0  ;;  %v4076_v17 = vpop.f32.mrb[180].mxu0  ;;  %v12179_v36 = vrot.slane %v8240_v20, %v16102_v8  ;;  %v12181_v52 = vmul.f32 0.00390625, %v2281_v45  ;;  %v16104_v49 = vld [vmem:[#allocation47_spill] sm:$0xff] }
 0x273   : > { %v12171_v44 = vadd.f32 %v4275_v26, %v4274_v11  ;;  %7327 = vmatprep.mubr.bf16.mxu1 %v16031_v46  ;;  %v12174_v34 = vadd.f32 %v4271_v25, %v4270_v33  ;;  %v4277_v61 = vmax.f32 %v4186_v55, 0.0  ;;  %v4077_v27 = vadd.f32 %v4076_v17, %v16101_v5  ;;  %3346 = vadd.xlane.f32.xlu1 %v11847_v41  ;;  %v4078_v62 = vpop.f32.mrb[181].mxu0  ;;  %v16105_v25 = vld [vmem:[#allocation46_spill] sm:$0xff]  ;;  %v16108_v8 = vld [vmem:[#allocation20_spill] sm:$0xff] }
 0x274   : > { %2344 = vmax.xlane.f32.xlu0 %v2343_v14  ;;  %v3230_v56 = vpop.xlane.xlu0 %3229  ;;  %16103 = vst [vmem:[#allocation19_spill] sm:$0xff] %v12179_v36  ;;  %v4079_v11 = vadd.f32 %v4078_v62, %v16101_v5  ;;  %v4080_v14 = vpop.f32.mrb[182].mxu0  ;;  %v7177_v33 = vsel %vm538_vm0, %v16104_v49, 0  ;;  %v8266_v55 = vsel %vm538_vm0, %v16105_v25, 0 }
 0x275   : > { %16099 = vst [vmem:[#allocation18_spill] sm:$0xff] %v12171_v44  ;;  %16100 = vst [vmem:[#allocation45_spill] sm:$0xff] %v12174_v34  ;;  %v3275_v26 = vpop.xlane.xlu1 %3274  ;;  %v12188_v10 = vadd.f32 %v4277_v61, %v4276_v13  ;;  %v4280_v41 = vmax.f32 %v4077_v27, 0.0  ;;  %v4081_v45 = vadd.f32 %v4080_v14, %v16108_v8  ;;  %v4189_v20 = vpop.f32.mrb[180].mxu1  ;;  %v8256_v13 = vcombine.high %v12179_v36, %v12179_v36 }
 0x276   : > { %v12191_v17 = vsel %vm1136_vm2, %v3227_v1, %v3275_v26  ;;  %v4082_v34 = vpop.f32.mrb[183].mxu0  ;;  %v4281_v62 = vmax.f32 %v4079_v11, 0.0  ;;  %v4190_v44 = vadd.f32 %v4189_v20, %v16101_v5  ;;  %v4191_v60 = vpop.f32.mrb[181].mxu1  ;;  %v12207_v11 = vld [vmem:[%s15886_s2] sm:$0xff]  }
 0x277   : > { %16106 = vst [vmem:[#allocation11_spill] sm:$0xff] %v12188_v10  ;;  %16107 = vst [vmem:[#allocation47_spill] sm:$0xff] %v12191_v17  ;;  %v4083_v42 = vadd.f32 %v4082_v34, %v16108_v8  ;;  %v12200_v61 = vld.sshfl [vmem:[%s10414_s26 + $0x5c] sm:$0x33 pattern:$0x76325410]  ;;  %v4192_v1 = vadd.f32 %v4191_v60, %v16101_v5  ;;  %4351 = vadd.xlane.f32.xlu1 %v11869_v32 }
 0x278   : > { %3349 = vadd.xlane.f32.xlu0 %v11866_v35  ;;  %v4286_v27 = vmax.f32 %v4081_v45, 0.0  ;;  %v4193_v26 = vpop.f32.mrb[182].mxu1  ;;  %9945 = vmatmul.mubr.msk.bf16.vlgmr.msra.gmra.mrb[32].mxu0 %vm513_vm1, %v12207_v11  ;;  %v3278_v35 = vpop.xlane.xlu0 %3277  ;;  %v2314_v34 = vsel %vm11843_vm6, %v2296_v59, -3.4028235e+38  ;;  %v8264_v14 = vcombine.high %v12200_v61, %v12200_v61  ;;  %v12215_v49 = vadd.f32 %v4281_v62, %v4280_v41  ;;  %v16110_v17 = vld [vmem:[#allocation39_spill] sm:$0xff]  ;;  %s3829_s26 = sadd.s32 3, %s10400_s21 }
 0x279   : > { %v4282_v60 = vmax.f32 %v4190_v44, 0.0  ;;  %v4287_v25 = vmax.f32 %v4083_v42, 0.0  ;;  %v4194_v32 = vadd.f32 %v4193_v26, %v16108_v8  ;;  %v4195_v45 = vpop.f32.mrb[183].mxu1  ;;  %v12218_v20 = vpop.xlane.xlu1 %1206  ;;  %7224 = vmatprep.mubr.bf16.mxu0 %v16031_v46  ;;  %7409 = vmatpush1.bf16.msra.mxu0 %v7177_v33  ;;  %v2266_v10 = vsel %vm1136_vm2, %v16110_v17, %v11904_v54  ;;  %s13300_s17 = sld [smem:[#allocation3 + %s3829_s26]]  ;;  %s15732_s26 = sand.u32 1, %s10285_s0  }
 0x27a   : > { %16109 = vst [vmem:[#allocation46_spill] sm:$0xff] %v12218_v20  ;;  %v4283_v59 = vmax.f32 %v4192_v1, 0.0  ;;  %v4196_v36 = vadd.f32 %v4195_v45, %v16108_v8  ;;  %v12226_v41 = vsel %vm1136_vm2, %v3230_v56, %v3278_v35  ;;  %9954 = vmatmul.mubr.msk.bf16.vlgmr.msra.gmra.mrb[32].mxu1 %vm513_vm1, %v12207_v11  ;;  %9983 = vmatprep.subr.msk.bf16.mxu0 %vm538_vm0, %v8256_v13  ;;  %v4086_v62 = vpop.f32.mrb[184].mxu0  ;;  %v2346_v33 = vsel %vm1204_vm5, %v2314_v34, -inf  ;;  %s14973_s21 = sld [smem:[#allocation3 + %s8233_s29]]  ;;  %s9597_s29 = scalar_lea.sflag [#allocation7], %s15732_s26 }
 0x27b   : > { %16111 = vst [vmem:[#allocation20_spill] sm:$0xff] %v12226_v41  ;;  %v12231_v42 = vadd.f32 %v4287_v25, %v4286_v27  ;;  %v4288_v44 = vmax.f32 %v4194_v32, 0.0  ;;  %v2315_v54 = vsel %vm11843_vm6, %v12181_v52, -3.4028235e+38  ;;  %7337 = vmatprep.mubr.bf16.mxu1 %v16031_v46  ;;  %v2282_v56 = vsel %vm1153_vm3, %v2266_v10, %v11932_v9  ;;  %v16112_v27 = vld [vmem:[#allocation21_spill] sm:$0xff]  ;;  %2347 = vmax.xlane.f32.xlu1 %v2346_v33  ;;  %v4088_v26 = vpop.f32.mrb[185].mxu0 }
 0x27c   : > { %4354 = vadd.xlane.f32.xlu0 %v11882_v18  ;;  %v12241_v17 = vadd.f32 %v4283_v59, %v4282_v60  ;;  %v4289_v13 = vmax.f32 %v4196_v36, 0.0  ;;  %v4087_v1 = vadd.f32 %v4086_v62, %v16112_v27  ;;  %v12244_v35 = vpop.xlane.xlu0 %1209  ;;  %8284 = vmatpush1.bf16.msra.mxu1 %v8266_v55  ;;  %v16114_v18 = vld [vmem:[#allocation40_spill] sm:$0xff]  ;;  %v4089_v52 = vadd.f32 %v4088_v26, %v16112_v27  ;;  %v4090_v32 = vpop.f32.mrb[186].mxu0  ;;  %v16115_v10 = vld [vmem:[#allocation22_spill] sm:$0xff] }
 0x27d   : > { %16113 = vst [vmem:[#allocation39_spill] sm:$0xff] %v12244_v35  ;;  %v2267_v34 = vsel %vm1136_vm2, %v16114_v18, %v11926_v22  ;;  %v3233_v25 = vpop.xlane.xlu1 %3232  ;;  %9992 = vmatprep.subr.msk.bf16.mxu1 %vm538_vm0, %v8264_v14  ;;  %v4091_v60 = vadd.f32 %v4090_v32, %v16115_v10  ;;  %v4199_v45 = vpop.f32.mrb[184].mxu1  ;;  %v2349_v62 = vsel %vm1204_vm5, %v2315_v54, -inf  ;;  %v2298_v55 = vmul.f32 0.00390625, %v2282_v56  ;;  %v12264_v54 = vld [vmem:[%s15886_s2 + $0x8] sm:$0xff]  }
 0x27e   : > { %v12251_v9 = vadd.f32 %v4289_v13, %v4288_v44  ;;  %v4292_v36 = vmax.f32 %v4087_v1, 0.0  ;;  %v4092_v59 = vpop.f32.mrb[187].mxu0  ;;  %v4293_v33 = vmax.f32 %v4089_v52, 0.0  ;;  %v4200_v41 = vadd.f32 %v4199_v45, %v16112_v27  ;;  %v4201_v26 = vpop.f32.mrb[185].mxu1 }
 0x27f   : > { %v4093_v22 = vadd.f32 %v4092_v59, %v16115_v10  ;;  %v2283_v14 = vsel %vm1153_vm3, %v2267_v34, %v11954_v47  ;;  %v4298_v44 = vmax.f32 %v4091_v60, 0.0  ;;  %v4202_v13 = vadd.f32 %v4201_v26, %v16112_v27  ;;  %v4203_v1 = vpop.f32.mrb[186].mxu1  ;;  %3352 = vadd.xlane.f32.xlu1 %v11901_v19 }
 0x280   : > { %2350 = vmax.xlane.f32.xlu0 %v2349_v62  ;;  %9946 = vmatmul.mubr.msk.bf16.gmra.mrb[36].mxu0 %vm513_vm1, %v12264_v54  ;;  %v3236_v56 = vpop.xlane.xlu0 %3235  ;;  %v12268_v18 = vadd.f32 %v4293_v33, %v4292_v36  ;;  %v4294_v52 = vmax.f32 %v4200_v41, 0.0  ;;  %v4204_v47 = vadd.f32 %v4203_v1, %v16115_v10  ;;  %v4205_v34 = vpop.f32.mrb[187].mxu1  ;;  %v2299_v62 = vmul.f32 0.00390625, %v2283_v14 }
 0x281   : > { %v4299_v32 = vmax.f32 %v4093_v22, 0.0  ;;  %v3281_v60 = vpop.xlane.xlu1 %3280  ;;  %7234 = vmatprep.mubr.bf16.mxu0 %v16031_v46  ;;  %v4295_v19 = vmax.f32 %v4202_v13, 0.0  ;;  %v4206_v45 = vadd.f32 %v4205_v34, %v16115_v10  ;;  %v2316_v22 = vsel %vm11843_vm6, %v2298_v55, -3.4028235e+38 }
 0x282   : > { %v12274_v59 = vsel %vm1136_vm2, %v3233_v25, %v3281_v60  ;;  %9955 = vmatmul.mubr.msk.bf16.gmra.mrb[36].mxu1 %vm513_vm1, %v12264_v54  ;;  %v4300_v41 = vmax.f32 %v4204_v47, 0.0  ;;  %v4096_v33 = vpop.f32.mrb[188].mxu0 }
 0x283   : > { %16116 = vst [vmem:[#allocation21_spill] sm:$0xff] %v12274_v59  ;;  %v12278_v36 = vadd.f32 %v4299_v32, %v4298_v44  ;;  %7347 = vmatprep.mubr.bf16.mxu1 %v16031_v46  ;;  %v12284_v26 = vadd.f32 %v4295_v19, %v4294_v52  ;;  %v4301_v13 = vmax.f32 %v4206_v45, 0.0  ;;  %v4097_v25 = vadd.f32 %v4096_v33, %v10864_v53  ;;  %v4098_v1 = vpop.f32.mrb[189].mxu0 }
 0x284   : > { %3355 = vadd.xlane.f32.xlu0 %v11919_v24  ;;  %4357 = vadd.xlane.f32.xlu1 %v11923_v7  ;;  %v3284_v14 = vpop.xlane.xlu0 %3283  ;;  %v4099_v44 = vadd.f32 %v4098_v1, %v10864_v53  ;;  %v4100_v47 = vpop.f32.mrb[190].mxu0  ;;  %v2352_v45 = vsel %vm1204_vm5, %v2316_v22, -inf  ;;  %v12307_v22 = vld [vmem:[%s15886_s2 + $0x10] sm:$0xff]  }
 0x285   : > { %16117 = vst [vmem:[#allocation40_spill] sm:$0xff] %v12284_v26  ;;  %v12290_v32 = vsel %vm1136_vm2, %v3236_v56, %v3284_v14  ;;  %v12292_v24 = vpop.xlane.xlu1 %1212  ;;  %v12294_v55 = vadd.f32 %v4301_v13, %v4300_v41  ;;  %v4304_v34 = vmax.f32 %v4097_v25, 0.0  ;;  %v4101_v52 = vadd.f32 %v4100_v47, %v10866_v57  ;;  %v4209_v60 = vpop.f32.mrb[188].mxu1 }
 0x286   : > { %16118 = vst [vmem:[#allocation22_spill] sm:$0xff] %v12290_v32  ;;  %16119 = vst [vmem:[#allocation48_spill] sm:$0xff] %v12292_v24  ;;  %v4102_v19 = vpop.f32.mrb[191].mxu0  ;;  %v4305_v7 = vmax.f32 %v4099_v44, 0.0  ;;  %v4210_v33 = vadd.f32 %v4209_v60, %v10864_v53  ;;  %v4211_v59 = vpop.f32.mrb[189].mxu1 }
 0x287   : > { %v4103_v1 = vadd.f32 %v4102_v19, %v10866_v57  ;;  %v2317_v56 = vsel %vm11843_vm6, %v2299_v62, -3.4028235e+38  ;;  %v4310_v41 = vmax.f32 %v4101_v52, 0.0  ;;  %v4212_v13 = vadd.f32 %v4211_v59, %v10864_v53  ;;  %v4213_v25 = vpop.f32.mrb[190].mxu1 }
 0x288   : > { %4360 = vadd.xlane.f32.xlu0 %v11936_v58  ;;  %2353 = vmax.xlane.f32.xlu1 %v2352_v45  ;;  %v12311_v14 = vpop.xlane.xlu0 %1215  ;;  %v12313_v44 = vadd.f32 %v4305_v7, %v4304_v34  ;;  %v4306_v58 = vmax.f32 %v4210_v33, 0.0  ;;  %v4214_v62 = vadd.f32 %v4213_v25, %v10866_v57  ;;  %v4215_v52 = vpop.f32.mrb[191].mxu1  ;;  %v2355_v45 = vsel %vm1204_vm5, %v2317_v56, -inf }
 0x289   : > { %9947 = vmatmul.mubr.msk.bf16.gmra.mrb[40].mxu0 %vm513_vm1, %v12307_v22  ;;  %16120 = vst [vmem:[#allocation49_spill] sm:$0xff] %v12311_v14  ;;  %v4311_v47 = vmax.f32 %v4103_v1, 0.0  ;;  %v3239_v59 = vpop.xlane.xlu1 %3238  ;;  %v4307_v60 = vmax.f32 %v4212_v13, 0.0  ;;  %v4216_v19 = vadd.f32 %v4215_v52, %v10866_v57 }
 0x28a   : > { %16121 = vst [vmem:[#allocation50_spill] sm:$0xff] %v12313_v44  ;;  %7244 = vmatprep.mubr.bf16.mxu0 %v16031_v46  ;;  %9956 = vmatmul.mubr.msk.bf16.gmra.mrb[40].mxu1 %vm513_vm1, %v12307_v22  ;;  %v4312_v34 = vmax.f32 %v4214_v62, 0.0  ;;  %v5014_v7 = vpop.f32.mrb[192].mxu0 }
 0x28b   : > { %v12321_v32 = vadd.f32 %v4311_v47, %v4310_v41  ;;  %7357 = vmatprep.mubr.bf16.mxu1 %v16031_v46  ;;  %v12324_v33 = vadd.f32 %v4307_v60, %v4306_v58  ;;  %v4313_v1 = vmax.f32 %v4216_v19, 0.0  ;;  %v5015_v25 = vadd.f32 %v5014_v7, %v10716_v12  ;;  %v5016_v13 = vpop.f32.mrb[193].mxu0 }
 0x28c   : > { %2356 = vmax.xlane.f32.xlu0 %v2355_v45  ;;  %4363 = vadd.xlane.f32.xlu1 %v11956_v40  ;;  %v3242_v52 = vpop.xlane.xlu0 %3241  ;;  %v5017_v44 = vadd.f32 %v5016_v13, %v10716_v12  ;;  %v5018_v56 = vpop.f32.mrb[194].mxu0 }
 0x28d   : > { %16122 = vst [vmem:[#allocation51_spill] sm:$0xff] %v12324_v33  ;;  %v3287_v26 = vpop.xlane.xlu1 %3286  ;;  %v12329_v41 = vadd.f32 %v4313_v1, %v4312_v34  ;;  %v5319_v47 = vmax.f32 %v5015_v25, 0.0  ;;  %v5019_v58 = vadd.f32 %v5018_v56, %v10726_v15  ;;  %v5127_v60 = vpop.f32.mrb[192].mxu1 }
 0x28e   : > { %v12332_v62 = vsel %vm1136_vm2, %v3239_v59, %v3287_v26  ;;  %v5020_v19 = vpop.f32.mrb[195].mxu0  ;;  %v5320_v45 = vmax.f32 %v5017_v44, 0.0  ;;  %v5128_v7 = vadd.f32 %v5127_v60, %v10716_v12  ;;  %v5129_v33 = vpop.f32.mrb[193].mxu1  ;;  %v12343_v26 = vld [vmem:[%s15886_s2 + $0x18] sm:$0xff]  }
 0x28f   : > { %16123 = vst [vmem:[#allocation52_spill] sm:$0xff] %v12332_v62  ;;  %v5021_v40 = vadd.f32 %v5020_v19, %v10726_v15  ;;  %v5325_v13 = vmax.f32 %v5019_v58, 0.0  ;;  %v5130_v34 = vadd.f32 %v5129_v33, %v10716_v12  ;;  %v5131_v1 = vpop.f32.mrb[194].mxu1 }
 0x290   : > { %4366 = vadd.xlane.f32.xlu0 %v11969_v28  ;;  %4411 = vadd.xlane.f32.xlu1 %v11977_v21  ;;  %v3290_v44 = vpop.xlane.xlu0 %3289  ;;  %v12347_v59 = vadd.f32 %v5320_v45, %v5319_v47  ;;  %v5321_v25 = vmax.f32 %v5128_v7, 0.0  ;;  %v5132_v28 = vadd.f32 %v5131_v1, %v10726_v15  ;;  %v5133_v58 = vpop.f32.mrb[195].mxu1 }
 0x291   : > { %9948 = vmatmul.mubr.msk.bf16.gmra.mrb[44].mxu0 %vm513_vm1, %v12343_v26  ;;  %v5326_v56 = vmax.f32 %v5021_v40, 0.0  ;;  %v12350_v33 = vpop.xlane.xlu1 %1218  ;;  %v5322_v21 = vmax.f32 %v5130_v34, 0.0  ;;  %v5134_v60 = vadd.f32 %v5133_v58, %v10726_v15  ;;  %v12355_v19 = vsel %vm1136_vm2, %v3242_v52, %v3290_v44  ;;  %v16129_v44 = vld [vmem:[#allocation12_spill] sm:$0xff] }
 0x292   : > { %16124 = vst [vmem:[#allocation53_spill] sm:$0xff] %v12347_v59  ;;  %16125 = vst [vmem:[#allocation54_spill] sm:$0xff] %v12350_v33  ;;  %7254 = vmatprep.mubr.bf16.mxu0 %v16031_v46  ;;  %9957 = vmatmul.mubr.msk.bf16.gmra.mrb[44].mxu1 %vm513_vm1, %v12343_v26  ;;  %v5327_v45 = vmax.f32 %v5132_v28, 0.0  ;;  %v5024_v7 = vpop.f32.mrb[196].mxu0  ;;  %v16127_v40 = vsel %vm11843_vm6, %v11992_v37, -3.4028235e+38 }
 0x293   : > { %16126 = vst [vmem:[#allocation55_spill] sm:$0xff] %v12355_v19  ;;  %v12359_v47 = vadd.f32 %v5326_v56, %v5325_v13  ;;  %v2358_v34 = vsel %vm1204_vm5, %v16127_v40, -inf  ;;  %7367 = vmatprep.mubr.bf16.mxu1 %v16031_v46  ;;  %v12368_v1 = vadd.f32 %v5322_v21, %v5321_v25  ;;  %v5328_v52 = vmax.f32 %v5134_v60, 0.0  ;;  %v5026_v13 = vpop.f32.mrb[197].mxu0 }
 0x294   : > { %4414 = vadd.xlane.f32.xlu0 %v11988_v48  ;;  %v5025_v58 = vadd.f32 %v5024_v7, %v16129_v44  ;;  %2359 = vmax.xlane.f32.xlu1 %v2358_v34  ;;  %v12371_v56 = vpop.xlane.xlu0 %1221  ;;  %v5027_v28 = vadd.f32 %v5026_v13, %v16129_v44  ;;  %v5028_v33 = vpop.f32.mrb[198].mxu0  ;;  %v16131_v25 = vsel %vm11843_vm6, %v12017_v50, -3.4028235e+38 }
 0x295   : > { %16128 = vst [vmem:[#allocation56_spill] sm:$0xff] %v12368_v1  ;;  %16130 = vst [vmem:[#allocation12_spill] sm:$0xff] %v12371_v56  ;;  %v3245_v48 = vpop.xlane.xlu1 %3244  ;;  %v12374_v19 = vadd.f32 %v5328_v52, %v5327_v45  ;;  %v5029_v40 = vadd.f32 %v5028_v33, %v10742_v51  ;;  %v5137_v62 = vpop.f32.mrb[196].mxu1  ;;  %v2361_v21 = vsel %vm1204_vm5, %v16131_v25, -inf  ;;  %v12389_v33 = vld [vmem:[%s15886_s2 + $0x20] sm:$0xff]  }
 0x296   : > { %v5331_v37 = vmax.f32 %v5025_v58, 0.0  ;;  %v5030_v59 = vpop.f32.mrb[199].mxu0  ;;  %v5332_v60 = vmax.f32 %v5027_v28, 0.0  ;;  %v5138_v7 = vadd.f32 %v5137_v62, %v16129_v44  ;;  %v5139_v13 = vpop.f32.mrb[197].mxu1 }
 0x297   : > { %v5031_v34 = vadd.f32 %v5030_v59, %v10742_v51  ;;  %v5337_v45 = vmax.f32 %v5029_v40, 0.0  ;;  %v5140_v52 = vadd.f32 %v5139_v13, %v16129_v44  ;;  %v5141_v58 = vpop.f32.mrb[198].mxu1 }
 0x298   : > { %2362 = vmax.xlane.f32.xlu0 %v2361_v21  ;;  %4369 = vadd.xlane.f32.xlu1 %v12005_v0  ;;  %v3248_v50 = vpop.xlane.xlu0 %3247  ;;  %v12393_v62 = vadd.f32 %v5332_v60, %v5331_v37  ;;  %v5333_v59 = vmax.f32 %v5138_v7, 0.0  ;;  %v5142_v40 = vadd.f32 %v5141_v58, %v10742_v51  ;;  %v5143_v25 = vpop.f32.mrb[199].mxu1  ;;  %v16135_v7 = vld [vmem:[#allocation29_spill] sm:$0xff] }
 0x299   : > { %9949 = vmatmul.mubr.msk.bf16.gmra.mrb[48].mxu0 %vm513_vm1, %v12389_v33  ;;  %v5338_v28 = vmax.f32 %v5031_v34, 0.0  ;;  %v3293_v21 = vpop.xlane.xlu1 %3292  ;;  %v5334_v0 = vmax.f32 %v5140_v52, 0.0  ;;  %v5144_v13 = vadd.f32 %v5143_v25, %v10742_v51  ;;  %v16137_v25 = vld [vmem:[#allocation31_spill] sm:$0xff] }
 0x29a   : > { %16132 = vst [vmem:[#allocation57_spill] sm:$0xff] %v12393_v62  ;;  %7264 = vmatprep.mubr.bf16.mxu0 %v16031_v46  ;;  %v12399_v56 = vsel %vm1136_vm2, %v3245_v48, %v3293_v21  ;;  %9958 = vmatmul.mubr.msk.bf16.gmra.mrb[48].mxu1 %vm513_vm1, %v12389_v33  ;;  %v5339_v37 = vmax.f32 %v5142_v40, 0.0  ;;  %v5034_v60 = vpop.f32.mrb[200].mxu0 }
 0x29b   : > { %16133 = vst [vmem:[#allocation58_spill] sm:$0xff] %v12399_v56  ;;  %v12403_v1 = vadd.f32 %v5338_v28, %v5337_v45  ;;  %7377 = vmatprep.mubr.bf16.mxu1 %v16031_v46  ;;  %v12407_v34 = vadd.f32 %v5334_v0, %v5333_v59  ;;  %v5340_v58 = vmax.f32 %v5144_v13, 0.0  ;;  %v5035_v52 = vadd.f32 %v5034_v60, %v16074_v39  ;;  %v5036_v48 = vpop.f32.mrb[201].mxu0 }
 0x29c   : > { %4372 = vadd.xlane.f32.xlu0 %v16135_v7  ;;  %4417 = vadd.xlane.f32.xlu1 %v16137_v25  ;;  %v3296_v21 = vpop.xlane.xlu0 %3295  ;;  %v5037_v56 = vadd.f32 %v5036_v48, %v16074_v39  ;;  %v5038_v40 = vpop.f32.mrb[202].mxu0 }
 0x29d   : > { %16134 = vst [vmem:[#allocation59_spill] sm:$0xff] %v12403_v1  ;;  %16136 = vst [vmem:[#allocation29_spill] sm:$0xff] %v12407_v34  ;;  %v12413_v45 = vsel %vm1136_vm2, %v3248_v50, %v3296_v21  ;;  %v12415_v28 = vpop.xlane.xlu1 %1224  ;;  %v12417_v7 = vadd.f32 %v5340_v58, %v5339_v37  ;;  %v5343_v62 = vmax.f32 %v5035_v52, 0.0  ;;  %v5039_v59 = vadd.f32 %v5038_v40, %v16075_v23  ;;  %v5147_v0 = vpop.f32.mrb[200].mxu1  ;;  %v16140_v50 = vld [vmem:[#allocation33_spill] sm:$0xff] }
 0x29e   : > { %16138 = vst [vmem:[#allocation31_spill] sm:$0xff] %v12413_v45  ;;  %16139 = vst [vmem:[#allocation60_spill] sm:$0xff] %v12415_v28  ;;  %v5040_v13 = vpop.f32.mrb[203].mxu0  ;;  %v5344_v60 = vmax.f32 %v5037_v56, 0.0  ;;  %v5148_v25 = vadd.f32 %v5147_v0, %v16074_v39  ;;  %v5149_v1 = vpop.f32.mrb[201].mxu1  ;;  %v16142_v40 = vld [vmem:[#allocation41_spill] sm:$0xff] }
 0x29f   : > { %v5041_v34 = vadd.f32 %v5040_v13, %v16075_v23  ;;  %v16141_v48 = vsel %vm11843_vm6, %v16140_v50, -3.4028235e+38  ;;  %v5349_v58 = vmax.f32 %v5039_v59, 0.0  ;;  %v5150_v52 = vadd.f32 %v5149_v1, %v16074_v39  ;;  %v5151_v21 = vpop.f32.mrb[202].mxu1 }
 0x2a0   : > { %4420 = vadd.xlane.f32.xlu0 %v12038_v63  ;;  %v2364_v37 = vsel %vm1204_vm5, %v16141_v48, -inf  ;;  %v12431_v56 = vpop.xlane.xlu0 %1227  ;;  %v12433_v0 = vadd.f32 %v5344_v60, %v5343_v62  ;;  %v5345_v13 = vmax.f32 %v5148_v25, 0.0  ;;  %v5152_v28 = vadd.f32 %v5151_v21, %v16075_v23  ;;  %v5153_v45 = vpop.f32.mrb[203].mxu1  ;;  %v16147_v21 = vld [vmem:[#allocation42_spill] sm:$0xff] }
 0x2a1   : > { %2365 = vmax.xlane.f32.xlu1 %v2364_v37  ;;  %9950 = vmatmul.mubr.msk.bf16.gmra.mrb[52].mxu0 %vm513_vm1, %v16142_v40  ;;  %16143 = vst [vmem:[#allocation33_spill] sm:$0xff] %v12431_v56  ;;  %v5350_v63 = vmax.f32 %v5041_v34, 0.0  ;;  %v3251_v50 = vpop.xlane.xlu1 %3250  ;;  %v5346_v59 = vmax.f32 %v5150_v52, 0.0  ;;  %v5154_v1 = vadd.f32 %v5153_v45, %v16075_v23  ;;  %v16145_v48 = vsel %vm11843_vm6, %v12076_v43, -3.4028235e+38 }
 0x2a2   : > { %16144 = vst [vmem:[#allocation41_spill] sm:$0xff] %v12433_v0  ;;  %7274 = vmatprep.mubr.bf16.mxu0 %v16031_v46  ;;  %9959 = vmatmul.mubr.msk.bf16.gmra.mrb[52].mxu1 %vm513_vm1, %v16142_v40  ;;  %v2367_v62 = vsel %vm1204_vm5, %v16145_v48, -inf  ;;  %v5351_v34 = vmax.f32 %v5152_v28, 0.0  ;;  %v5044_v25 = vpop.f32.mrb[204].mxu0  ;;  %v16149_v0 = vld [vmem:[#allocation34_spill] sm:$0xff] }
 0x2a3   : > { %v12445_v60 = vadd.f32 %v5350_v63, %v5349_v58  ;;  %7387 = vmatprep.mubr.bf16.mxu1 %v16031_v46  ;;  %v12448_v37 = vadd.f32 %v5346_v59, %v5345_v13  ;;  %v5352_v52 = vmax.f32 %v5154_v1, 0.0  ;;  %v5045_v45 = vadd.f32 %v5044_v25, %v16084_v6  ;;  %v5046_v40 = vpop.f32.mrb[205].mxu0 }
 0x2a4   : > { %2368 = vmax.xlane.f32.xlu0 %v2367_v62  ;;  %v3254_v3 = vpop.xlane.xlu0 %3253  ;;  %v5047_v43 = vadd.f32 %v5046_v40, %v16084_v6  ;;  %v5048_v48 = vpop.f32.mrb[206].mxu0 }
 0x2a5   : > { %16146 = vst [vmem:[#allocation61_spill] sm:$0xff] %v12448_v37  ;;  %4375 = vadd.xlane.f32.xlu1 %v16147_v21  ;;  %v3299_v56 = vpop.xlane.xlu1 %3298  ;;  %v12453_v58 = vadd.f32 %v5352_v52, %v5351_v34  ;;  %v5355_v28 = vmax.f32 %v5045_v45, 0.0  ;;  %v5049_v13 = vadd.f32 %v5048_v48, %v16086_v30  ;;  %v5157_v59 = vpop.f32.mrb[204].mxu1  ;;  %v16150_v45 = vld [vmem:[#allocation13_spill] sm:$0xff] }
 0x2a6   : > { %v12456_v63 = vsel %vm1136_vm2, %v3251_v50, %v3299_v56  ;;  %v5050_v1 = vpop.f32.mrb[207].mxu0  ;;  %v5356_v62 = vmax.f32 %v5047_v43, 0.0  ;;  %v5158_v25 = vadd.f32 %v5157_v59, %v16084_v6  ;;  %v5159_v37 = vpop.f32.mrb[205].mxu1 }
 0x2a7   : > { %16148 = vst [vmem:[#allocation42_spill] sm:$0xff] %v12456_v63  ;;  %v5051_v21 = vadd.f32 %v5050_v1, %v16086_v30  ;;  %v5361_v40 = vmax.f32 %v5049_v13, 0.0  ;;  %v5160_v34 = vadd.f32 %v5159_v37, %v16084_v6  ;;  %v5161_v52 = vpop.f32.mrb[206].mxu1 }
 0x2a8   : > { %4378 = vadd.xlane.f32.xlu0 %v16149_v0  ;;  %v3302_v56 = vpop.xlane.xlu0 %3301  ;;  %v12466_v50 = vadd.f32 %v5356_v62, %v5355_v28  ;;  %v5357_v43 = vmax.f32 %v5158_v25, 0.0  ;;  %v5162_v59 = vadd.f32 %v5161_v52, %v16086_v30  ;;  %v5163_v1 = vpop.f32.mrb[207].mxu1 }
 0x2a9   : > { %4423 = vadd.xlane.f32.xlu1 %v16150_v45  ;;  %9951 = vmatmul.mubr.msk.bf16.gmra.mrb[56].mxu0 %vm513_vm1, %v12103_v16  ;;  %v5362_v48 = vmax.f32 %v5051_v21, 0.0  ;;  %v12469_v63 = vpop.xlane.xlu1 %1230  ;;  %v5358_v0 = vmax.f32 %v5160_v34, 0.0  ;;  %v5164_v37 = vadd.f32 %v5163_v1, %v16086_v30  ;;  %v12474_v13 = vsel %vm1136_vm2, %v3254_v3, %v3302_v56 }
 0x2aa   : > { %16151 = vst [vmem:[#allocation34_spill] sm:$0xff] %v12466_v50  ;;  %16152 = vst [vmem:[#allocation13_spill] sm:$0xff] %v12469_v63  ;;  %7284 = vmatprep.mubr.bf16.mxu0 %v16031_v46  ;;  %9960 = vmatmul.mubr.msk.bf16.gmra.mrb[56].mxu1 %vm513_vm1, %v12103_v16  ;;  %v5363_v62 = vmax.f32 %v5162_v59, 0.0  ;;  %v5054_v25 = vpop.f32.mrb[208].mxu0  ;;  %v16156_v16 = vld [vmem:[#allocation26_spill] sm:$0xff] }
 0x2ab   : > { %16153 = vst [vmem:[#allocation62_spill] sm:$0xff] %v12474_v13  ;;  %v12478_v28 = vadd.f32 %v5362_v48, %v5361_v40  ;;  %7397 = vmatprep.mubr.bf16.mxu1 %v16031_v46  ;;  %v12482_v21 = vadd.f32 %v5358_v0, %v5357_v43  ;;  %v5364_v52 = vmax.f32 %v5164_v37, 0.0  ;;  %v5055_v34 = vadd.f32 %v5054_v25, %v16091_v38  ;;  %v5056_v3 = vpop.f32.mrb[209].mxu0 }
 0x2ac   : > { %4426 = vadd.xlane.f32.xlu0 %v12090_v2  ;;  %v12486_v45 = vpop.xlane.xlu0 %1233  ;;  %vm1253_vm7 = vcmp.eq.f32.partialorder %v16156_v16, %v12218_v20  ;;  %v5057_v40 = vadd.f32 %v5056_v3, %v16091_v38  ;;  %v5058_v48 = vpop.f32.mrb[210].mxu0  ;;  %v16158_v16 = vld [vmem:[#allocation23_spill] sm:$0xff] }
 0x2ad   : > { %16154 = vst [vmem:[#allocation63_spill] sm:$0xff] %v12482_v21  ;;  %4381 = vadd.xlane.f32.xlu1 %v12107_v29  ;;  %16155 = vst [vmem:[#allocation64_spill] sm:$0xff] %v12486_v45  ;;  %v3257_v56 = vpop.xlane.xlu1 %3256  ;;  %v12491_v2 = vadd.f32 %v5364_v52, %v5363_v62  ;;  %v5367_v59 = vmax.f32 %v5055_v34, 0.0  ;;  %v5059_v43 = vadd.f32 %v5058_v48, %v16095_v31  ;;  %v5167_v1 = vpop.f32.mrb[208].mxu1  ;;  %v16157_v45 = vld [vmem:[#allocation44_spill] sm:$0xff]  ;;  %v1269_v20 = vsel %vm1253_vm7, %v16158_v16, 3 }
 0x2ae   : > { %v5060_v0 = vpop.f32.mrb[211].mxu0  ;;  %v5368_v37 = vmax.f32 %v5057_v40, 0.0  ;;  %v5168_v29 = vadd.f32 %v5167_v1, %v16091_v38  ;;  %v5169_v63 = vpop.f32.mrb[209].mxu1  ;;  %v16159_v52 = vld [vmem:[#allocation36_spill] sm:$0xff] }
 0x2af   : > { %v5061_v25 = vadd.f32 %v5060_v0, %v16095_v31  ;;  %v5373_v3 = vmax.f32 %v5059_v43, 0.0  ;;  %v5170_v13 = vadd.f32 %v5169_v63, %v16091_v38  ;;  %v5171_v62 = vpop.f32.mrb[210].mxu1 }
 0x2b0   : > { %4384 = vadd.xlane.f32.xlu0 %v16157_v45  ;;  %v3260_v34 = vpop.xlane.xlu0 %3259  ;;  %v12502_v40 = vadd.f32 %v5368_v37, %v5367_v59  ;;  %v5369_v48 = vmax.f32 %v5168_v29, 0.0  ;;  %v5172_v0 = vadd.f32 %v5171_v62, %v16095_v31  ;;  %v5173_v21 = vpop.f32.mrb[211].mxu1  ;;  %v16163_v29 = vld [vmem:[#allocation15_spill] sm:$0xff]  ;;  %v16166_v62 = vld [vmem:[#allocation37_spill] sm:$0xff] }
 0x2b1   : > { %4429 = vadd.xlane.f32.xlu1 %v16159_v52  ;;  %9952 = vmatmul.mubr.msk.bf16.gmra.mrb[60].mxu0 %vm513_vm1, %v12154_v4  ;;  %v5374_v1 = vmax.f32 %v5061_v25, 0.0  ;;  %v3305_v45 = vpop.xlane.xlu1 %3304  ;;  %v5370_v43 = vmax.f32 %v5170_v13, 0.0  ;;  %v5174_v63 = vadd.f32 %v5173_v21, %v16095_v31  ;;  %v12517_v25 = vsel %vm1204_vm5, %v1269_v20, 2147483647 }
 0x2b2   : > { %16160 = vst [vmem:[#allocation26_spill] sm:$0xff] %v12502_v40  ;;  %7440 = vmatprep.mubr.bf16.mxu0 %v16031_v46  ;;  %v12508_v50 = vsel %vm1136_vm2, %v3257_v56, %v3305_v45  ;;  %9961 = vmatmul.mubr.msk.bf16.gmra.mrb[60].mxu1 %vm513_vm1, %v12154_v4  ;;  %v5375_v59 = vmax.f32 %v5172_v0, 0.0  ;;  %v5064_v37 = vpop.f32.mrb[212].mxu0  ;;  %16164 = vst [vmem:[#allocation15_spill] sm:$0xff] %v12517_v25  ;;  %v1287_v40 = vshra.s32 %v12517_v25, 16 }
 0x2b3   : > { %16161 = vst [vmem:[#allocation44_spill] sm:$0xff] %v12508_v50  ;;  %v12512_v52 = vadd.f32 %v5374_v1, %v5373_v3  ;;  %8315 = vmatprep.mubr.bf16.mxu1 %v16031_v46  ;;  %v12519_v13 = vadd.f32 %v5370_v43, %v5369_v48  ;;  %v5376_v21 = vmax.f32 %v5174_v63, 0.0  ;;  %v5065_v56 = vadd.f32 %v5064_v37, %v16101_v5  ;;  %v5066_v45 = vpop.f32.mrb[213].mxu0  ;;  %v16167_v3 = vld [vmem:[#allocation27_spill] sm:$0xff] }
 0x2b4   : > { %4432 = vadd.xlane.f32.xlu0 %v16163_v29  ;;  %v3308_v4 = vpop.xlane.xlu0 %3307  ;;  %vm1254_vm8 = vcmp.eq.f32.partialorder %v16167_v3, %v12244_v35  ;;  %v5067_v1 = vadd.f32 %v5066_v45, %v16101_v5  ;;  %v5068_v20 = vpop.f32.mrb[214].mxu0  ;;  %v16170_v48 = vld [vmem:[#allocation19_spill] sm:$0xff] }
 0x2b5   : > { %16162 = vst [vmem:[#allocation36_spill] sm:$0xff] %v12512_v52  ;;  %16165 = vst [vmem:[#allocation65_spill] sm:$0xff] %v12519_v13  ;;  %4387 = vadd.xlane.f32.xlu1 %v16166_v62  ;;  %v12527_v0 = vsel %vm1136_vm2, %v3260_v34, %v3308_v4  ;;  %v12529_v29 = vpop.xlane.xlu1 %1236  ;;  %v8272_v43 = vsel %vm538_vm0, %v16170_v48, 0  ;;  %v12533_v63 = vadd.f32 %v5376_v21, %v5375_v59  ;;  %v5379_v37 = vmax.f32 %v5065_v56, 0.0  ;;  %v5177_v13 = vpop.f32.mrb[212].mxu1  ;;  %v16172_v48 = vld [vmem:[#allocation45_spill] sm:$0xff] }
 0x2b6   : > { %16168 = vst [vmem:[#allocation37_spill] sm:$0xff] %v12527_v0  ;;  %16169 = vst [vmem:[#allocation27_spill] sm:$0xff] %v12529_v29  ;;  %v5069_v62 = vadd.f32 %v5068_v20, %v16108_v8  ;;  %v5070_v50 = vpop.f32.mrb[215].mxu0  ;;  %v5380_v52 = vmax.f32 %v5067_v1, 0.0  ;;  %v5178_v45 = vadd.f32 %v5177_v13, %v16101_v5  ;;  %v5179_v4 = vpop.f32.mrb[213].mxu1  ;;  %v16171_v29 = vld [vmem:[#allocation18_spill] sm:$0xff] }
 0x2b7   : > { %v5071_v34 = vadd.f32 %v5070_v50, %v16108_v8  ;;  %v1270_v59 = vsel %vm1254_vm8, %v16158_v16, 3  ;;  %v5180_v56 = vadd.f32 %v5179_v4, %v16101_v5  ;;  %v5181_v20 = vpop.f32.mrb[214].mxu1  ;;  %v8278_v50 = vsel %vm538_vm0, %v12200_v61, 0 }
 0x2b8   : > { %4390 = vadd.xlane.f32.xlu0 %v16171_v29  ;;  %v5385_v21 = vmax.f32 %v5069_v62, 0.0  ;;  %v12548_v13 = vpop.xlane.xlu0 %1239  ;;  %v12552_v1 = vadd.f32 %v5380_v52, %v5379_v37  ;;  %v5381_v29 = vmax.f32 %v5178_v45, 0.0  ;;  %v5182_v3 = vadd.f32 %v5181_v20, %v16108_v8  ;;  %v5183_v62 = vpop.f32.mrb[215].mxu1  ;;  %v16175_v45 = vld [vmem:[#allocation11_spill] sm:$0xff] }
 0x2b9   : > { %4435 = vadd.xlane.f32.xlu1 %v16172_v48  ;;  %9963 = vmatmul.mubr.msk.bf16.vlgmr.msra.gmra.mrb[64].mxu0 %vm513_vm1, %v12207_v11  ;;  %16173 = vst [vmem:[#allocation19_spill] sm:$0xff] %v12548_v13  ;;  %v5386_v25 = vmax.f32 %v5071_v34, 0.0  ;;  %v12555_v35 = vpop.xlane.xlu1 %3310  ;;  %v5382_v4 = vmax.f32 %v5180_v56, 0.0  ;;  %v5184_v48 = vadd.f32 %v5183_v62, %v16108_v8  ;;  %v12561_v13 = vcvt.s32.f32 %v1287_v40 }
 0x2ba   : > { %7450 = vmatprep.mubr.bf16.mxu0 %v16031_v46  ;;  %8397 = vmatpush1.bf16.msra.mxu0 %v8272_v43  ;;  %v5387_v52 = vmax.f32 %v5182_v3, 0.0  ;;  %v5074_v37 = vpop.f32.mrb[216].mxu0  ;;  %v12568_v34 = vsel %vm1204_vm5, %v1270_v59, 2147483647 }
 0x2bb   : > { %9975 = vmatmul.mubr.msk.bf16.vlgmr.msra.gmra.mrb[64].mxu1 %vm513_vm1, %v12207_v11  ;;  %16174 = vst [vmem:[#allocation18_spill] sm:$0xff] %v12561_v13  ;;  %v12563_v61 = vadd.f32 %v5386_v25, %v5385_v21  ;;  %16176 = vst [vmem:[#allocation45_spill] sm:$0xff] %v12568_v34  ;;  %v12570_v43 = vadd.f32 %v5382_v4, %v5381_v29  ;;  %v5388_v56 = vmax.f32 %v5184_v48, 0.0  ;;  %v5076_v11 = vpop.f32.mrb[217].mxu0  ;;  %v16177_v25 = vld [vmem:[#allocation30_spill] sm:$0xff] }
 0x2bc   : > { %4438 = vadd.xlane.f32.xlu0 %v16175_v45  ;;  %8325 = vmatprep.mubr.bf16.mxu1 %v16031_v46  ;;  %v5075_v20 = vadd.f32 %v5074_v37, %v16112_v27  ;;  %v12574_v40 = vpop.xlane.xlu0 %3313  ;;  %vm1255_vm9 = vcmp.eq.f32.partialorder %v16177_v25, %v12292_v24  ;;  %v5077_v21 = vadd.f32 %v5076_v11, %v16112_v27  ;;  %v5078_v59 = vpop.f32.mrb[218].mxu0  ;;  %v1302_v45 = vshra.s32 %v12568_v34, 16 }
 0x2bd   : > { %1290 = vmin.xlane.f32.xlu1 %v12561_v13  ;;  %8510 = vmatpush1.bf16.msra.mxu1 %v8278_v50  ;;  %v12579_v3 = vpop.xlane.xlu1 %4315  ;;  %v12581_v62 = vadd.f32 %v5388_v56, %v5387_v52  ;;  %v5079_v4 = vadd.f32 %v5078_v59, %v16115_v10  ;;  %v5187_v48 = vpop.f32.mrb[216].mxu1  ;;  %v1271_v11 = vsel %vm1255_vm9, %v16158_v16, 3 }
 0x2be   : > { %v5391_v29 = vmax.f32 %v5075_v20, 0.0  ;;  %v5080_v37 = vpop.f32.mrb[219].mxu0  ;;  %v5392_v13 = vmax.f32 %v5077_v21, 0.0  ;;  %v5188_v50 = vadd.f32 %v5187_v48, %v16112_v27  ;;  %v5189_v25 = vpop.f32.mrb[217].mxu1 }
 0x2bf   : > { %v5081_v0 = vadd.f32 %v5080_v37, %v16115_v10  ;;  %v5397_v24 = vmax.f32 %v5079_v4, 0.0  ;;  %v5190_v52 = vadd.f32 %v5189_v25, %v16112_v27  ;;  %v5191_v56 = vpop.f32.mrb[218].mxu1 }
 0x2c0   : > { %4396 = vadd.xlane.f32.xlu0 %v12231_v42  ;;  %v12593_v20 = vpop.xlane.xlu0 %4318  ;;  %v12595_v21 = vadd.f32 %v5392_v13, %v5391_v29  ;;  %v5393_v59 = vmax.f32 %v5188_v50, 0.0  ;;  %v5192_v37 = vadd.f32 %v5191_v56, %v16115_v10  ;;  %v5193_v42 = vpop.f32.mrb[219].mxu1 }
 0x2c1   : > { %4393 = vadd.xlane.f32.xlu1 %v12215_v49  ;;  %9964 = vmatmul.mubr.msk.bf16.gmra.mrb[68].mxu0 %vm513_vm1, %v12264_v54  ;;  %16178 = vst [vmem:[#allocation11_spill] sm:$0xff] %v12593_v20  ;;  %v5398_v48 = vmax.f32 %v5081_v0, 0.0  ;;  %v12598_v34 = vpop.xlane.xlu1 %1242  ;;  %v5394_v4 = vmax.f32 %v5190_v52, 0.0  ;;  %v5194_v25 = vadd.f32 %v5193_v42, %v16115_v10  ;;  %v12604_v49 = vcvt.s32.f32 %v1302_v45 }
 0x2c2   : > { %16179 = vst [vmem:[#allocation30_spill] sm:$0xff] %v12595_v21  ;;  %16180 = vst [vmem:[#allocation66_spill] sm:$0xff] %v12598_v34  ;;  %7460 = vmatprep.mubr.bf16.mxu0 %v16031_v46  ;;  %v5399_v13 = vmax.f32 %v5192_v37, 0.0  ;;  %v5084_v29 = vpop.f32.mrb[220].mxu0  ;;  %v12611_v0 = vsel %vm1204_vm5, %v1271_v11, 2147483647 }
 0x2c3   : > { %9976 = vmatmul.mubr.msk.bf16.gmra.mrb[68].mxu1 %vm513_vm1, %v12264_v54  ;;  %16181 = vst [vmem:[#allocation67_spill] sm:$0xff] %v12604_v49  ;;  %v12606_v20 = vadd.f32 %v5398_v48, %v5397_v24  ;;  %16182 = vst [vmem:[#allocation68_spill] sm:$0xff] %v12611_v0  ;;  %v12613_v50 = vadd.f32 %v5394_v4, %v5393_v59  ;;  %v5400_v52 = vmax.f32 %v5194_v25, 0.0  ;;  %v5086_v54 = vpop.f32.mrb[221].mxu0  ;;  %v16185_v24 = vld [vmem:[#allocation32_spill] sm:$0xff] }
 0x2c4   : > { %4444 = vadd.xlane.f32.xlu0 %v12251_v9  ;;  %8335 = vmatprep.mubr.bf16.mxu1 %v16031_v46  ;;  %v5085_v56 = vadd.f32 %v5084_v29, %v10864_v53  ;;  %v12617_v45 = vpop.xlane.xlu0 %1245  ;;  %vm1256_vm10 = vcmp.eq.f32.partialorder %v16185_v24, %v12311_v14  ;;  %v5087_v9 = vadd.f32 %v5086_v54, %v10864_v53  ;;  %v5088_v37 = vpop.f32.mrb[222].mxu0  ;;  %v1317_v29 = vshra.s32 %v12611_v0, 16 }
 0x2c5   : > { %16183 = vst [vmem:[#allocation69_spill] sm:$0xff] %v12613_v50  ;;  %1305 = vmin.xlane.f32.xlu1 %v12604_v49  ;;  %16184 = vst [vmem:[#allocation70_spill] sm:$0xff] %v12617_v45  ;;  %v12622_v48 = vpop.xlane.xlu1 %3316  ;;  %v12624_v11 = vadd.f32 %v5400_v52, %v5399_v13  ;;  %v5089_v42 = vadd.f32 %v5088_v37, %v10866_v57  ;;  %v5197_v4 = vpop.f32.mrb[220].mxu1  ;;  %v1272_v54 = vsel %vm1256_vm10, %v16158_v16, 3 }
 0x2c6   : > { %v5403_v59 = vmax.f32 %v5085_v56, 0.0  ;;  %v5090_v25 = vpop.f32.mrb[223].mxu0  ;;  %v5404_v34 = vmax.f32 %v5087_v9, 0.0  ;;  %v5198_v45 = vadd.f32 %v5197_v4, %v10864_v53  ;;  %v5199_v24 = vpop.f32.mrb[221].mxu1 }
 0x2c7   : > { %v5091_v49 = vadd.f32 %v5090_v25, %v10866_v57  ;;  %v5409_v14 = vmax.f32 %v5089_v42, 0.0  ;;  %v5200_v13 = vadd.f32 %v5199_v24, %v10864_v53  ;;  %v5201_v52 = vpop.f32.mrb[222].mxu1 }
 0x2c8   : > { %4402 = vadd.xlane.f32.xlu0 %v12278_v36  ;;  %v12636_v56 = vpop.xlane.xlu0 %3319  ;;  %v12638_v9 = vadd.f32 %v5404_v34, %v5403_v59  ;;  %v5405_v37 = vmax.f32 %v5198_v45, 0.0  ;;  %v5202_v25 = vadd.f32 %v5201_v52, %v10866_v57  ;;  %v5203_v36 = vpop.f32.mrb[223].mxu1 }
 0x2c9   : > { %4441 = vadd.xlane.f32.xlu1 %v12241_v17  ;;  %9965 = vmatmul.mubr.msk.bf16.gmra.mrb[72].mxu0 %vm513_vm1, %v12307_v22  ;;  %v5410_v4 = vmax.f32 %v5091_v49, 0.0  ;;  %v12641_v0 = vpop.xlane.xlu1 %4321  ;;  %v5406_v42 = vmax.f32 %v5200_v13, 0.0  ;;  %v5204_v24 = vadd.f32 %v5203_v36, %v10866_v57  ;;  %v12647_v17 = vcvt.s32.f32 %v1317_v29 }
 0x2ca   : > { %16186 = vst [vmem:[#allocation32_spill] sm:$0xff] %v12638_v9  ;;  %7470 = vmatprep.mubr.bf16.mxu0 %v16031_v46  ;;  %v5411_v34 = vmax.f32 %v5202_v25, 0.0  ;;  %v5240_v45 = vpop.f32.mrb[224].mxu0  ;;  %v12654_v49 = vsel %vm1204_vm5, %v1272_v54, 2147483647  ;;  %v16199_v9 = vld [vmem:[#allocation40_spill] sm:$0xff] }
 0x2cb   : > { %9977 = vmatmul.mubr.msk.bf16.gmra.mrb[72].mxu1 %vm513_vm1, %v12307_v22  ;;  %16187 = vst [vmem:[#allocation71_spill] sm:$0xff] %v12647_v17  ;;  %v12649_v50 = vadd.f32 %v5410_v4, %v5409_v14  ;;  %16188 = vst [vmem:[#allocation72_spill] sm:$0xff] %v12654_v49  ;;  %v12656_v59 = vadd.f32 %v5406_v42, %v5405_v37  ;;  %v5412_v13 = vmax.f32 %v5204_v24, 0.0  ;;  %v5242_v22 = vpop.f32.mrb[225].mxu0  ;;  %v1332_v24 = vshra.s32 %v12654_v49, 16 }
 0x2cc   : > { %4450 = vadd.xlane.f32.xlu0 %v12294_v55  ;;  %8345 = vmatprep.mubr.bf16.mxu1 %v16031_v46  ;;  %v5241_v52 = vadd.f32 %v5240_v45, %v10716_v12  ;;  %v12660_v29 = vpop.xlane.xlu0 %4324  ;;  %v5243_v14 = vadd.f32 %v5242_v22, %v10716_v12  ;;  %v5244_v55 = vpop.f32.mrb[226].mxu0 }
 0x2cd   : > { %16189 = vst [vmem:[#allocation73_spill] sm:$0xff] %v12656_v59  ;;  %1320 = vmin.xlane.f32.xlu1 %v12647_v17  ;;  %16190 = vst [vmem:[#allocation74_spill] sm:$0xff] %v12660_v29  ;;  %v12663_v4 = vpop.xlane.xlu1 %1248  ;;  %v12665_v25 = vadd.f32 %v5412_v13, %v5411_v34  ;;  %v5245_v54 = vadd.f32 %v5244_v55, %v10726_v15  ;;  %v6115_v37 = vpop.f32.mrb[224].mxu1 }
 0x2ce   : > { %16191 = vst [vmem:[#allocation75_spill] sm:$0xff] %v12663_v4  ;;  %v5323_v36 = vmax.f32 %v5241_v52, 0.0  ;;  %v5246_v42 = vpop.f32.mrb[227].mxu0  ;;  %v5324_v45 = vmax.f32 %v5243_v14, 0.0  ;;  %v6116_v17 = vadd.f32 %v6115_v37, %v10716_v12  ;;  %v6117_v29 = vpop.f32.mrb[225].mxu1 }
 0x2cf   : > { %v5247_v59 = vadd.f32 %v5246_v42, %v10726_v15  ;;  %v5329_v22 = vmax.f32 %v5245_v54, 0.0  ;;  %v6118_v4 = vadd.f32 %v6117_v29, %v10716_v12  ;;  %v6119_v34 = vpop.f32.mrb[226].mxu1 }
 0x2d0   : > { %4408 = vadd.xlane.f32.xlu0 %v12321_v32  ;;  %v12678_v52 = vadd.f32 %v5324_v45, %v5323_v36  ;;  %v6420_v14 = vmax.f32 %v6116_v17, 0.0  ;;  %v6120_v37 = vadd.f32 %v6119_v34, %v10726_v15  ;;  %v6121_v42 = vpop.f32.mrb[227].mxu1 }
 0x2d1   : > { %4399 = vadd.xlane.f32.xlu1 %v12268_v18  ;;  %9966 = vmatmul.mubr.msk.bf16.gmra.mrb[76].mxu0 %vm513_vm1, %v12343_v26  ;;  %v12676_v13 = vpop.xlane.xlu0 %1251  ;;  %v5330_v55 = vmax.f32 %v5247_v59, 0.0  ;;  %v12681_v49 = vpop.xlane.xlu1 %3322  ;;  %v6421_v32 = vmax.f32 %v6118_v4, 0.0  ;;  %v6122_v29 = vadd.f32 %v6121_v42, %v10726_v15  ;;  %v12687_v18 = vcvt.s32.f32 %v1332_v24 }
 0x2d2   : > { %16192 = vst [vmem:[#allocation76_spill] sm:$0xff] %v12676_v13  ;;  %16193 = vst [vmem:[#allocation77_spill] sm:$0xff] %v12678_v52  ;;  %7480 = vmatprep.mubr.bf16.mxu0 %v16031_v46  ;;  %v6426_v36 = vmax.f32 %v6120_v37, 0.0  ;;  %v5250_v17 = vpop.f32.mrb[228].mxu0 }
 0x2d3   : > { %9978 = vmatmul.mubr.msk.bf16.gmra.mrb[76].mxu1 %vm513_vm1, %v12343_v26  ;;  %16194 = vst [vmem:[#allocation78_spill] sm:$0xff] %v12687_v18  ;;  %v12689_v54 = vadd.f32 %v5330_v55, %v5329_v22  ;;  %v12693_v59 = vadd.f32 %v6421_v32, %v6420_v14  ;;  %v6427_v45 = vmax.f32 %v6122_v29, 0.0  ;;  %v5251_v4 = vadd.f32 %v5250_v17, %v16129_v44  ;;  %v5252_v34 = vpop.f32.mrb[229].mxu0 }
 0x2d4   : > { %4456 = vadd.xlane.f32.xlu0 %v12329_v41  ;;  %8355 = vmatprep.mubr.bf16.mxu1 %v16031_v46  ;;  %v5253_v26 = vadd.f32 %v5252_v34, %v16129_v44  ;;  %v5254_v22 = vpop.f32.mrb[230].mxu0  ;;  %v6125_v14 = vpop.f32.mrb[228].mxu1 }
 0x2d5   : > { %16195 = vst [vmem:[#allocation79_spill] sm:$0xff] %v12689_v54  ;;  %16196 = vst [vmem:[#allocation80_spill] sm:$0xff] %v12693_v59  ;;  %1335 = vmin.xlane.f32.xlu1 %v12687_v18  ;;  %v12697_v42 = vpop.xlane.xlu0 %3325  ;;  %v12700_v24 = vpop.xlane.xlu1 %4327  ;;  %v12702_v55 = vadd.f32 %v6427_v45, %v6426_v36  ;;  %v5335_v41 = vmax.f32 %v5251_v4, 0.0  ;;  %v5255_v37 = vadd.f32 %v5254_v22, %v10742_v51 }
 0x2d6   : > { %16197 = vst [vmem:[#allocation81_spill] sm:$0xff] %v12700_v24  ;;  %v5256_v32 = vpop.f32.mrb[231].mxu0  ;;  %v5336_v29 = vmax.f32 %v5253_v26, 0.0  ;;  %v6126_v17 = vadd.f32 %v6125_v14, %v16129_v44  ;;  %v6127_v18 = vpop.f32.mrb[229].mxu1 }
 0x2d7   : > { %16198 = vst [vmem:[#allocation82_spill] sm:$0xff] %v12702_v55  ;;  %v5257_v13 = vadd.f32 %v5256_v32, %v10742_v51  ;;  %v5341_v59 = vmax.f32 %v5255_v37, 0.0  ;;  %v6128_v34 = vadd.f32 %v6127_v18, %v16129_v44  ;;  %v6129_v52 = vpop.f32.mrb[230].mxu1  ;;  %v16212_v55 = vld [vmem:[#allocation43_spill] sm:$0xff] }
 0x2d8   : > { %5419 = vadd.xlane.f32.xlu0 %v12359_v47  ;;  %v12714_v45 = vadd.f32 %v5336_v29, %v5335_v41  ;;  %v6432_v4 = vmax.f32 %v6126_v17, 0.0  ;;  %v6130_v22 = vadd.f32 %v6129_v52, %v10742_v51  ;;  %v6131_v14 = vpop.f32.mrb[231].mxu1  ;;  %v16205_v17 = vld [vmem:[#allocation50_spill] sm:$0xff] }
 0x2d9   : > { %4447 = vadd.xlane.f32.xlu1 %v16199_v9  ;;  %9967 = vmatmul.mubr.msk.bf16.gmra.mrb[80].mxu0 %vm513_vm1, %v12389_v33  ;;  %v12712_v36 = vpop.xlane.xlu0 %4330  ;;  %v5342_v26 = vmax.f32 %v5257_v13, 0.0  ;;  %v12717_v47 = vpop.xlane.xlu1 %2323  ;;  %v6433_v18 = vmax.f32 %v6128_v34, 0.0  ;;  %v6132_v9 = vadd.f32 %v6131_v14, %v10742_v51 }
 0x2da   : > { %16200 = vst [vmem:[#allocation40_spill] sm:$0xff] %v12712_v36  ;;  %16201 = vst [vmem:[#allocation83_spill] sm:$0xff] %v12714_v45  ;;  %7490 = vmatprep.mubr.bf16.mxu0 %v16031_v46  ;;  %v6438_v32 = vmax.f32 %v6130_v22, 0.0  ;;  %v5260_v41 = vpop.f32.mrb[232].mxu0  ;;  %v16207_v36 = vld [vmem:[#allocation21_spill] sm:$0xff] }
 0x2db   : > { %16202 = vst [vmem:[#allocation84_spill] sm:$0xff] %v12717_v47  ;;  %9979 = vmatmul.mubr.msk.bf16.gmra.mrb[80].mxu1 %vm513_vm1, %v12389_v33  ;;  %v12723_v37 = vadd.f32 %v5342_v26, %v5341_v59  ;;  %v12728_v13 = vadd.f32 %v6433_v18, %v6432_v4  ;;  %v6439_v52 = vmax.f32 %v6132_v9, 0.0  ;;  %v5261_v29 = vadd.f32 %v5260_v41, %v16074_v39  ;;  %v5262_v34 = vpop.f32.mrb[233].mxu0 }
 0x2dc   : > { %5467 = vadd.xlane.f32.xlu0 %v12374_v19  ;;  %8365 = vmatprep.mubr.bf16.mxu1 %v16031_v46  ;;  %v5263_v33 = vadd.f32 %v5262_v34, %v16074_v39  ;;  %v5264_v26 = vpop.f32.mrb[234].mxu0  ;;  %v6135_v4 = vpop.f32.mrb[232].mxu1  ;;  %v16208_v34 = vld [vmem:[#allocation59_spill] sm:$0xff] }
 0x2dd   : > { %16203 = vst [vmem:[#allocation85_spill] sm:$0xff] %v12723_v37  ;;  %16204 = vst [vmem:[#allocation86_spill] sm:$0xff] %v12728_v13  ;;  %4405 = vadd.xlane.f32.xlu1 %v16205_v17  ;;  %v12732_v14 = vpop.xlane.xlu0 %2326  ;;  %v3329_v59 = vpop.xlane.xlu1 %3328  ;;  %v12735_v22 = vadd.f32 %v6439_v52, %v6438_v32  ;;  %v5347_v19 = vmax.f32 %v5261_v29, 0.0  ;;  %v5265_v41 = vadd.f32 %v5264_v26, %v16075_v23 }
 0x2de   : > { %v12739_v45 = vsel %vm1153_vm3, %v16207_v36, %v3329_v59  ;;  %v5266_v18 = vpop.f32.mrb[235].mxu0  ;;  %v5348_v9 = vmax.f32 %v5263_v33, 0.0  ;;  %v6136_v17 = vadd.f32 %v6135_v4, %v16074_v39  ;;  %v6137_v13 = vpop.f32.mrb[233].mxu1  ;;  %v12752_v36 = vld [vmem:[%s15886_s2 + $0x28] sm:$0xff]  }
 0x2df   : > { %16206 = vst [vmem:[#allocation50_spill] sm:$0xff] %v12735_v22  ;;  %v5267_v32 = vadd.f32 %v5266_v18, %v16075_v23  ;;  %v6138_v52 = vadd.f32 %v6137_v13, %v16074_v39  ;;  %v6139_v29 = vpop.f32.mrb[234].mxu1  ;;  %v16209_v22 = vld [vmem:[#allocation51_spill] sm:$0xff]  ;;  %v5353_v26 = vmax.f32 %v5265_v41, 0.0 }
 0x2e0   : > { %5425 = vadd.xlane.f32.xlu0 %v16208_v34  ;;  %v12758_v59 = vadd.f32 %v5348_v9, %v5347_v19  ;;  %v6444_v4 = vmax.f32 %v6136_v17, 0.0  ;;  %v6140_v18 = vadd.f32 %v6139_v29, %v16075_v23  ;;  %v6141_v13 = vpop.f32.mrb[235].mxu1  ;;  %v3374_v19 = vsel %vm1153_vm3, %v16212_v55, %v12574_v40 }
 0x2e1   : > { %4453 = vadd.xlane.f32.xlu1 %v16209_v22  ;;  %9968 = vmatmul.mubr.msk.bf16.gmra.mrb[84].mxu0 %vm513_vm1, %v12752_v36  ;;  %v12756_v33 = vpop.xlane.xlu0 %3331  ;;  %v12761_v34 = vpop.xlane.xlu1 %4333  ;;  %v5354_v22 = vmax.f32 %v5267_v32, 0.0  ;;  %v6445_v37 = vmax.f32 %v6138_v52, 0.0  ;;  %v6142_v24 = vadd.f32 %v6141_v13, %v16075_v23  ;;  %v16215_v13 = vld [vmem:[#allocation53_spill] sm:$0xff] }
 0x2e2   : > { %16210 = vst [vmem:[#allocation21_spill] sm:$0xff] %v12758_v59  ;;  %16211 = vst [vmem:[#allocation59_spill] sm:$0xff] %v12761_v34  ;;  %7500 = vmatprep.mubr.bf16.mxu0 %v16031_v46  ;;  %v6450_v9 = vmax.f32 %v6140_v18, 0.0  ;;  %v5270_v41 = vpop.f32.mrb[236].mxu0 }
 0x2e3   : > { %9980 = vmatmul.mubr.msk.bf16.gmra.mrb[84].mxu1 %vm513_vm1, %v12752_v36  ;;  %v12772_v17 = vadd.f32 %v5354_v22, %v5353_v26  ;;  %v12774_v32 = vadd.f32 %v6445_v37, %v6444_v4  ;;  %v6451_v52 = vmax.f32 %v6142_v24, 0.0  ;;  %v5271_v29 = vadd.f32 %v5270_v41, %v16084_v6  ;;  %v5272_v59 = vpop.f32.mrb[237].mxu0 }
 0x2e4   : > { %5473 = vadd.xlane.f32.xlu0 %v12417_v7  ;;  %8375 = vmatprep.mubr.bf16.mxu1 %v16031_v46  ;;  %v5273_v40 = vadd.f32 %v5272_v59, %v16084_v6  ;;  %v5274_v7 = vpop.f32.mrb[238].mxu0  ;;  %v6145_v26 = vpop.f32.mrb[236].mxu1  ;;  %v3405_v37 = vstv %s12741_s30  ;;  %v3390_v4 = vmul.f32 0.00390625, %v3374_v19  ;;  %s10301_s30 = smov [#allocation6]  }
 0x2e5   : > { %16213 = vst [vmem:[#allocation51_spill] sm:$0xff] %v12772_v17  ;;  %16214 = vst [vmem:[#allocation43_spill] sm:$0xff] %v12774_v32  ;;  %5416 = vadd.xlane.f32.xlu1 %v16215_v13  ;;  %v12778_v34 = vpop.xlane.xlu0 %4336  ;;  %v12781_v55 = vpop.xlane.xlu1 %2329  ;;  %v12783_v18 = vadd.f32 %v6451_v52, %v6450_v9  ;;  %v5359_v54 = vmax.f32 %v5271_v29, 0.0  ;;  %v5275_v41 = vadd.f32 %v5274_v7, %v16086_v30  ;;  %v16218_v9 = vld [vmem:[#allocation56_spill] sm:$0xff]  ;;  %v12795_v52 = vld [vmem:[%s15886_s2 + $0x30] sm:$0xff]   ;;  %s10201_s9 = sshll.u32 %s10301_s30, 4  ;;  %s10202_s9 = int_to_ptr.vmem [resolvable:$false] %s10201_s9 }
 0x2e6   : > { %16216 = vst [vmem:[#allocation53_spill] sm:$0xff] %v12778_v34  ;;  %v5276_v22 = vpop.f32.mrb[239].mxu0  ;;  %v5360_v24 = vmax.f32 %v5273_v40, 0.0  ;;  %v6146_v13 = vadd.f32 %v6145_v26, %v16084_v6  ;;  %v6147_v32 = vpop.f32.mrb[237].mxu1  ;;  %vm12809_vm11 = vcmp.lt.s32.totalorder %v16158_v16, %v3405_v37  ;;  %s10203_s14 = scalar_lea.vmem %s10202_s9, 256 }
 0x2e7   : > { %16217 = vst [vmem:[#allocation87_spill] sm:$0xff] %v12783_v18  ;;  %v5277_v59 = vadd.f32 %v5276_v22, %v16086_v30  ;;  %v6148_v34 = vadd.f32 %v6147_v32, %v16084_v6  ;;  %v6149_v17 = vpop.f32.mrb[238].mxu1 }
 0x2e8   : > { %5431 = vadd.xlane.f32.xlu0 %v12445_v60  ;;  %v12801_v29 = vadd.f32 %v5360_v24, %v5359_v54  ;;  %v5365_v60 = vmax.f32 %v5275_v41, 0.0  ;;  %v6456_v40 = vmax.f32 %v6146_v13, 0.0  ;;  %v6150_v7 = vadd.f32 %v6149_v17, %v16086_v30  ;;  %v6151_v32 = vpop.f32.mrb[239].mxu1  ;;  %v16222_v24 = vld [vmem:[#allocation52_spill] sm:$0xff] }
 0x2e9   : > { %5464 = vadd.xlane.f32.xlu1 %v16218_v9  ;;  %9969 = vmatmul.mubr.msk.bf16.gmra.mrb[88].mxu0 %vm513_vm1, %v12795_v52  ;;  %v12799_v19 = vpop.xlane.xlu0 %2332  ;;  %v3335_v26 = vpop.xlane.xlu1 %3334  ;;  %v5366_v22 = vmax.f32 %v5277_v59, 0.0  ;;  %v6457_v9 = vmax.f32 %v6148_v34, 0.0  ;;  %v6152_v18 = vadd.f32 %v6151_v32, %v16086_v30  ;;  %v12820_v34 = vsel %vm12809_vm11, %v3390_v4, -3.4028235e+38  ;;  %v16227_v32 = vld [vmem:[#allocation57_spill] sm:$0xff] }
 0x2ea   : > { %16219 = vst [vmem:[#allocation56_spill] sm:$0xff] %v12801_v29  ;;  %7510 = vmatprep.mubr.bf16.mxu0 %v16031_v46  ;;  %v6462_v54 = vmax.f32 %v6150_v7, 0.0  ;;  %v12815_v17 = vsel %vm1153_vm3, %v16222_v24, %v3335_v26  ;;  %v5280_v41 = vpop.f32.mrb[240].mxu0  ;;  %16224 = vst [vmem:[#allocation88_spill] sm:$0xff] %v12820_v34 }
 0x2eb   : > { %9981 = vmatmul.mubr.msk.bf16.gmra.mrb[88].mxu1 %vm513_vm1, %v12795_v52  ;;  %16223 = vst [vmem:[#allocation52_spill] sm:$0xff] %v12815_v17  ;;  %v12823_v13 = vadd.f32 %v5366_v22, %v5365_v60  ;;  %v12825_v37 = vadd.f32 %v6457_v9, %v6456_v40  ;;  %v6463_v59 = vmax.f32 %v6152_v18, 0.0  ;;  %v5282_v7 = vpop.f32.mrb[241].mxu0  ;;  %v5281_v26 = vadd.f32 %v5280_v41, %v16091_v38 }
 0x2ec   : > { %5479 = vadd.xlane.f32.xlu0 %v12453_v58  ;;  %8385 = vmatprep.mubr.bf16.mxu1 %v16031_v46  ;;  %v5283_v58 = vadd.f32 %v5282_v7, %v16091_v38  ;;  %v5284_v4 = vpop.f32.mrb[242].mxu0  ;;  %v6155_v22 = vpop.f32.mrb[240].mxu1  ;;  %v3426_v18 = vsel %vm1204_vm5, %v12820_v34, -inf  ;;  %v16230_v7 = vld [vmem:[#allocation14_spill] sm:$0xff] }
 0x2ed   : > { %16225 = vst [vmem:[#allocation89_spill] sm:$0xff] %v12823_v13  ;;  %16226 = vst [vmem:[#allocation90_spill] sm:$0xff] %v12825_v37  ;;  %5422 = vadd.xlane.f32.xlu1 %v16227_v32  ;;  %v12828_v29 = vpop.xlane.xlu0 %3337  ;;  %v12832_v24 = vpop.xlane.xlu1 %4339  ;;  %v12834_v17 = vadd.f32 %v6463_v59, %v6462_v54  ;;  %v5285_v60 = vadd.f32 %v5284_v4, %v16095_v31  ;;  %v5371_v9 = vmax.f32 %v5281_v26, 0.0  ;;  %v16231_v59 = vld [vmem:[#allocation38_spill] sm:$0xff]  ;;  %v16232_v26 = vld [vmem:[#allocation29_spill] sm:$0xff] }
 0x2ee   : > { %16228 = vst [vmem:[#allocation57_spill] sm:$0xff] %v12832_v24  ;;  %v5286_v40 = vpop.f32.mrb[243].mxu0  ;;  %v5372_v32 = vmax.f32 %v5283_v58, 0.0  ;;  %v6156_v37 = vadd.f32 %v6155_v22, %v16091_v38  ;;  %v6157_v13 = vpop.f32.mrb[241].mxu1  ;;  %v3373_v54 = vsel %vm1153_vm3, %v16230_v7, %v12555_v35  ;;  %v3376_v4 = vsel %vm1153_vm3, %v16231_v59, %v12636_v56  ;;  %v12852_v58 = vld [vmem:[%s15886_s2 + $0x38] sm:$0xff]  }
 0x2ef   : > { %16229 = vst [vmem:[#allocation91_spill] sm:$0xff] %v12834_v17  ;;  %v5287_v41 = vadd.f32 %v5286_v40, %v16095_v31  ;;  %v5377_v17 = vmax.f32 %v5285_v60, 0.0  ;;  %v6158_v24 = vadd.f32 %v6157_v13, %v16091_v38  ;;  %v6159_v34 = vpop.f32.mrb[242].mxu1 }
 0x2f0   : > { %3427 = vmax.xlane.f32.xlu0 %v3426_v18  ;;  %v12858_v35 = vadd.f32 %v5372_v32, %v5371_v9  ;;  %v6468_v40 = vmax.f32 %v6156_v37, 0.0  ;;  %v6160_v60 = vadd.f32 %v6159_v34, %v16095_v31  ;;  %v6161_v13 = vpop.f32.mrb[243].mxu1  ;;  %v3389_v34 = vmul.f32 0.00390625, %v3373_v54 }
 0x2f1   : > { %5470 = vadd.xlane.f32.xlu1 %v16232_v26  ;;  %9970 = vmatmul.mubr.msk.bf16.gmra.mrb[92].mxu0 %vm513_vm1, %v12852_v58  ;;  %v12856_v22 = vpop.xlane.xlu0 %4342  ;;  %v5378_v56 = vmax.f32 %v5287_v41, 0.0  ;;  %v12861_v18 = vpop.xlane.xlu1 %2335  ;;  %v6469_v7 = vmax.f32 %v6158_v24, 0.0  ;;  %v6162_v59 = vadd.f32 %v6161_v13, %v16095_v31  ;;  %v3392_v26 = vmul.f32 0.00390625, %v3376_v4 }
 0x2f2   : > { %16233 = vst [vmem:[#allocation14_spill] sm:$0xff] %v12856_v22  ;;  %16234 = vst [vmem:[#allocation38_spill] sm:$0xff] %v12858_v35  ;;  %8428 = vmatprep.mubr.bf16.mxu0 %v16031_v46  ;;  %v6474_v9 = vmax.f32 %v6160_v60, 0.0  ;;  %v5290_v32 = vpop.f32.mrb[244].mxu0  ;;  %v16241_v22 = vld [vmem:[#allocation58_spill] sm:$0xff] }
 0x2f3   : > { %16235 = vst [vmem:[#allocation29_spill] sm:$0xff] %v12861_v18  ;;  %9982 = vmatmul.mubr.msk.bf16.gmra.mrb[92].mxu1 %vm513_vm1, %v12852_v58  ;;  %v12867_v38 = vadd.f32 %v5378_v56, %v5377_v17  ;;  %v12871_v37 = vadd.f32 %v6469_v7, %v6468_v40  ;;  %v6475_v41 = vmax.f32 %v6162_v59, 0.0  ;;  %v5291_v24 = vadd.f32 %v5290_v32, %v16101_v5  ;;  %v16238_v18 = vld [vmem:[#allocation41_spill] sm:$0xff]  ;;  %v5292_v13 = vpop.f32.mrb[245].mxu0 }
 0x2f4   : > { %5437 = vadd.xlane.f32.xlu0 %v12478_v28  ;;  %8541 = vmatprep.mubr.bf16.mxu1 %v16031_v46  ;;  %v5293_v17 = vadd.f32 %v5292_v13, %v16101_v5  ;;  %v5294_v56 = vpop.f32.mrb[246].mxu0  ;;  %v6165_v7 = vpop.f32.mrb[244].mxu1  ;;  %v16243_v13 = vld [vmem:[#allocation61_spill] sm:$0xff] }
 0x2f5   : > { %16236 = vst [vmem:[#allocation92_spill] sm:$0xff] %v12867_v38  ;;  %16237 = vst [vmem:[#allocation93_spill] sm:$0xff] %v12871_v37  ;;  %5428 = vadd.xlane.f32.xlu1 %v16238_v18  ;;  %v12875_v35 = vpop.xlane.xlu0 %2338  ;;  %v3341_v4 = vpop.xlane.xlu1 %3340  ;;  %v12878_v60 = vadd.f32 %v6475_v41, %v6474_v9  ;;  %v5383_v28 = vmax.f32 %v5291_v24, 0.0  ;;  %v5295_v40 = vadd.f32 %v5294_v56, %v16108_v8  ;;  %v12890_v9 = vsel %vm12809_vm11, %v3392_v26, -3.4028235e+38 }
 0x2f6   : > { %16239 = vst [vmem:[#allocation41_spill] sm:$0xff] %v12875_v35  ;;  %v12882_v54 = vsel %vm1153_vm3, %v16241_v22, %v3341_v4  ;;  %v5296_v59 = vpop.f32.mrb[247].mxu0  ;;  %v5384_v32 = vmax.f32 %v5293_v17, 0.0  ;;  %v6166_v18 = vadd.f32 %v6165_v7, %v16101_v5  ;;  %v6167_v37 = vpop.f32.mrb[245].mxu1  ;;  %16242 = vst [vmem:[#allocation58_spill] sm:$0xff] %v12890_v9  ;;  %v10180_v17 = vld [vmem:[%s15886_s2] sm:$0xff]  }
 0x2f7   : > { %16240 = vst [vmem:[#allocation94_spill] sm:$0xff] %v12878_v60  ;;  %v5297_v35 = vadd.f32 %v5296_v59, %v16108_v8  ;;  %v5389_v41 = vmax.f32 %v5295_v40, 0.0  ;;  %v6168_v22 = vadd.f32 %v6167_v37, %v16101_v5  ;;  %v6169_v24 = vpop.f32.mrb[246].mxu1 }
 0x2f8   : > { %5485 = vadd.xlane.f32.xlu0 %v12491_v2  ;;  %v12902_v2 = vsel %vm12809_vm11, %v3389_v34, -3.4028235e+38  ;;  %v12904_v26 = vadd.f32 %v5384_v32, %v5383_v28  ;;  %v6480_v56 = vmax.f32 %v6166_v18, 0.0  ;;  %v6170_v37 = vadd.f32 %v6169_v24, %v16108_v8  ;;  %v6171_v7 = vpop.f32.mrb[247].mxu1  ;;  %v16247_v18 = vld [vmem:[#allocation20_spill] sm:$0xff] }
 0x2f9   : > { %5476 = vadd.xlane.f32.xlu1 %v16243_v13  ;;  %9984 = vmatmul.mubr.msk.bf16.vlgmr.msra.gmra.mrb[96].mxu0 %vm513_vm1, %v10180_v17  ;;  %v12898_v4 = vpop.xlane.xlu0 %3343  ;;  %16244 = vst [vmem:[#allocation61_spill] sm:$0xff] %v12902_v2  ;;  %v5390_v40 = vmax.f32 %v5297_v35, 0.0  ;;  %v12907_v59 = vpop.xlane.xlu1 %4345  ;;  %v6481_v13 = vmax.f32 %v6168_v22, 0.0  ;;  %v6172_v60 = vadd.f32 %v6171_v7, %v16108_v8  ;;  %v3432_v34 = vsel %vm1204_vm5, %v12890_v9, -inf }
 0x2fa   : > { %16245 = vst [vmem:[#allocation95_spill] sm:$0xff] %v12904_v26  ;;  %8438 = vmatprep.mubr.bf16.mxu0 %v16031_v46  ;;  %v6486_v28 = vmax.f32 %v6170_v37, 0.0  ;;  %v5300_v32 = vpop.f32.mrb[248].mxu0  ;;  %v3423_v35 = vsel %vm1204_vm5, %v12902_v2, -inf  ;;  %v3378_v22 = vsel %vm1153_vm3, %v16247_v18, %v12697_v42  ;;  %v16250_v37 = vld [vmem:[#allocation16_spill] sm:$0xff] }
 0x2fb   : > { %9993 = vmatmul.mubr.msk.bf16.vlgmr.msra.gmra.mrb[96].mxu1 %vm513_vm1, %v10180_v17  ;;  %v12914_v38 = vadd.f32 %v5390_v40, %v5389_v41  ;;  %v12922_v24 = vadd.f32 %v6481_v13, %v6480_v56  ;;  %v6487_v17 = vmax.f32 %v6172_v60, 0.0  ;;  %v5301_v7 = vadd.f32 %v5300_v32, %v16112_v27  ;;  %v5302_v41 = vpop.f32.mrb[249].mxu0 }
 0x2fc   : > { %3433 = vmax.xlane.f32.xlu0 %v3432_v34  ;;  %8551 = vmatprep.mubr.bf16.mxu1 %v16031_v46  ;;  %v3375_v34 = vsel %vm1153_vm3, %v16250_v37, %v12622_v48  ;;  %v5303_v9 = vadd.f32 %v5302_v41, %v16112_v27  ;;  %v5304_v26 = vpop.f32.mrb[250].mxu0  ;;  %v6175_v56 = vpop.f32.mrb[248].mxu1  ;;  %v3394_v32 = vmul.f32 0.00390625, %v3378_v22  ;;  %v16253_v48 = vld [vmem:[#allocation36_spill] sm:$0xff] }
 0x2fd   : > { %16246 = vst [vmem:[#allocation96_spill] sm:$0xff] %v12914_v38  ;;  %16248 = vst [vmem:[#allocation20_spill] sm:$0xff] %v12922_v24  ;;  %3424 = vmax.xlane.f32.xlu1 %v3423_v35  ;;  %v12925_v40 = vpop.xlane.xlu0 %4348  ;;  %v12931_v2 = vpop.xlane.xlu1 %2341  ;;  %v12933_v38 = vadd.f32 %v6487_v17, %v6486_v28  ;;  %v5395_v42 = vmax.f32 %v5301_v7, 0.0  ;;  %v5305_v60 = vadd.f32 %v5304_v26, %v16115_v10  ;;  %v3391_v41 = vmul.f32 0.00390625, %v3375_v34  ;;  %v16254_v17 = vld [vmem:[#allocation34_spill] sm:$0xff]  ;;  %v10181_v26 = vld [vmem:[%s15886_s2 + $0x8] sm:$0xff]  }
 0x2fe   : > { %16249 = vst [vmem:[#allocation97_spill] sm:$0xff] %v12925_v40  ;;  %16251 = vst [vmem:[#allocation16_spill] sm:$0xff] %v12931_v2  ;;  %v5306_v13 = vpop.f32.mrb[251].mxu0  ;;  %v5396_v35 = vmax.f32 %v5303_v9, 0.0  ;;  %v6176_v18 = vadd.f32 %v6175_v56, %v16112_v27  ;;  %v6177_v40 = vpop.f32.mrb[249].mxu1  ;;  %v16366_v21 = vld [vmem:[#allocation92_spill] sm:$0xff] }
 0x2ff   : > { %16252 = vst [vmem:[#allocation98_spill] sm:$0xff] %v12933_v38  ;;  %v5307_v24 = vadd.f32 %v5306_v13, %v16115_v10  ;;  %v5401_v37 = vmax.f32 %v5305_v60, 0.0  ;;  %v6178_v2 = vadd.f32 %v6177_v40, %v16112_v27  ;;  %v6179_v28 = vpop.f32.mrb[250].mxu1 }
 0x300   : > { %5443 = vadd.xlane.f32.xlu0 %v16253_v48  ;;  %v12947_v22 = vadd.f32 %v5396_v35, %v5395_v42  ;;  %v6492_v7 = vmax.f32 %v6176_v18, 0.0  ;;  %v6180_v34 = vadd.f32 %v6179_v28, %v16115_v10  ;;  %v6181_v60 = vpop.f32.mrb[251].mxu1 }
 0x301   : > { %5434 = vadd.xlane.f32.xlu1 %v16254_v17  ;;  %9985 = vmatmul.mubr.msk.bf16.gmra.mrb[100].mxu0 %vm513_vm1, %v10181_v26  ;;  %v12945_v9 = vpop.xlane.xlu0 %2344  ;;  %v5402_v56 = vmax.f32 %v5307_v24, 0.0  ;;  %v3347_v13 = vpop.xlane.xlu1 %3346  ;;  %v6493_v40 = vmax.f32 %v6178_v2, 0.0  ;;  %v6182_v48 = vadd.f32 %v6181_v60, %v16115_v10  ;;  %v16257_v17 = vld [vmem:[#allocation42_spill] sm:$0xff]  ;;  %v3412_v24 = vsel %vm12809_vm11, %v3394_v32, -3.4028235e+38  ;;  %v16260_v60 = vld [vmem:[#allocation63_spill] sm:$0xff] }
 0x302   : > { %16255 = vst [vmem:[#allocation36_spill] sm:$0xff] %v12945_v9  ;;  %16256 = vst [vmem:[#allocation34_spill] sm:$0xff] %v12947_v22  ;;  %8448 = vmatprep.mubr.bf16.mxu0 %v16031_v46  ;;  %v12954_v38 = vsel %vm1153_vm3, %v16257_v17, %v3347_v13  ;;  %v6498_v42 = vmax.f32 %v6180_v34, 0.0  ;;  %v5310_v35 = vpop.f32.mrb[252].mxu0 }
 0x303   : > { %9994 = vmatmul.mubr.msk.bf16.gmra.mrb[100].mxu1 %vm513_vm1, %v10181_v26  ;;  %v12957_v9 = vadd.f32 %v5402_v56, %v5401_v37  ;;  %v12963_v2 = vadd.f32 %v6493_v40, %v6492_v7  ;;  %v6499_v18 = vmax.f32 %v6182_v48, 0.0  ;;  %v5311_v28 = vadd.f32 %v5310_v35, %v10864_v53  ;;  %v5312_v13 = vpop.f32.mrb[253].mxu0 }
 0x304   : > { %5491 = vadd.xlane.f32.xlu0 %v12533_v63  ;;  %8561 = vmatprep.mubr.bf16.mxu1 %v16031_v46  ;;  %v12971_v37 = vsel %vm12809_vm11, %v3391_v41, -3.4028235e+38  ;;  %v5313_v63 = vadd.f32 %v5312_v13, %v10864_v53  ;;  %v5314_v32 = vpop.f32.mrb[254].mxu0  ;;  %v6185_v48 = vpop.f32.mrb[252].mxu1  ;;  %v3438_v35 = vsel %vm1204_vm5, %v3412_v24, -inf }
 0x305   : > { %16258 = vst [vmem:[#allocation42_spill] sm:$0xff] %v12957_v9  ;;  %16259 = vst [vmem:[#allocation99_spill] sm:$0xff] %v12963_v2  ;;  %5482 = vadd.xlane.f32.xlu1 %v16260_v60  ;;  %v12967_v26 = vpop.xlane.xlu0 %3349  ;;  %v12974_v56 = vpop.xlane.xlu1 %4351  ;;  %v12976_v34 = vadd.f32 %v6499_v18, %v6498_v42  ;;  %v5407_v7 = vmax.f32 %v5311_v28, 0.0  ;;  %v5315_v40 = vadd.f32 %v5314_v32, %v10866_v57  ;;  %v3429_v13 = vsel %vm1204_vm5, %v12971_v37, -inf  ;;  %v16264_v42 = vld [vmem:[#allocation47_spill] sm:$0xff]  ;;  %v16265_v28 = vld [vmem:[#allocation22_spill] sm:$0xff] }
 0x306   : > { %16261 = vst [vmem:[#allocation63_spill] sm:$0xff] %v12971_v37  ;;  %16262 = vst [vmem:[#allocation100_spill] sm:$0xff] %v12974_v56  ;;  %v5316_v17 = vpop.f32.mrb[255].mxu0  ;;  %v5408_v60 = vmax.f32 %v5313_v63, 0.0  ;;  %v6186_v2 = vadd.f32 %v6185_v48, %v10864_v53  ;;  %v6187_v22 = vpop.f32.mrb[253].mxu1  ;;  %v3377_v18 = vsel %vm1153_vm3, %v16264_v42, %v12681_v49  ;;  %v3380_v32 = vsel %vm1153_vm3, %v16265_v28, %v12756_v33  ;;  %v10182_v48 = vld [vmem:[%s15886_s2 + $0x10] sm:$0xff]  }
 0x307   : > { %16263 = vst [vmem:[#allocation101_spill] sm:$0xff] %v12976_v34  ;;  %v5317_v41 = vadd.f32 %v5316_v17, %v10866_v57  ;;  %v5413_v34 = vmax.f32 %v5315_v40, 0.0  ;;  %v6188_v24 = vadd.f32 %v6187_v22, %v10864_v53  ;;  %v6189_v63 = vpop.f32.mrb[254].mxu1  ;;  %v16268_v22 = vld [vmem:[#allocation24_spill] sm:$0xff]  ;;  %v3396_v9 = vmul.f32 0.00390625, %v3380_v32 }
 0x308   : > { %3439 = vmax.xlane.f32.xlu0 %v3438_v35  ;;  %v12997_v35 = vadd.f32 %v5408_v60, %v5407_v7  ;;  %v6504_v49 = vmax.f32 %v6186_v2, 0.0  ;;  %v6190_v37 = vadd.f32 %v6189_v63, %v10866_v57  ;;  %v6191_v33 = vpop.f32.mrb[255].mxu1  ;;  %vm2370_vm12 = vcmp.eq.f32.partialorder %v16268_v22, %v12717_v47 }
 0x309   : > { %3430 = vmax.xlane.f32.xlu1 %v3429_v13  ;;  %9986 = vmatmul.mubr.msk.bf16.gmra.mrb[104].mxu0 %vm513_vm1, %v10182_v48  ;;  %v12995_v17 = vpop.xlane.xlu0 %4354  ;;  %v5414_v42 = vmax.f32 %v5317_v41, 0.0  ;;  %v13000_v40 = vpop.xlane.xlu1 %2347  ;;  %v6505_v13 = vmax.f32 %v6188_v24, 0.0  ;;  %v6192_v28 = vadd.f32 %v6191_v33, %v10866_v57  ;;  %v3393_v41 = vmul.f32 0.00390625, %v3377_v18  ;;  %v16271_v24 = vld [vmem:[#allocation26_spill] sm:$0xff] }
 0x30a   : > { %16266 = vst [vmem:[#allocation47_spill] sm:$0xff] %v12997_v35  ;;  %16267 = vst [vmem:[#allocation22_spill] sm:$0xff] %v13000_v40  ;;  %8458 = vmatprep.mubr.bf16.mxu0 %v16031_v46  ;;  %v6510_v2 = vmax.f32 %v6190_v37, 0.0  ;;  %v6228_v60 = vpop.f32.mrb[0].mxu0  ;;  %v2386_v37 = vsel %vm2370_vm12, %v16158_v16, 3 }
 0x30b   : > { %9995 = vmatmul.mubr.msk.bf16.gmra.mrb[104].mxu1 %vm513_vm1, %v10182_v48  ;;  %v13007_v7 = vadd.f32 %v5414_v42, %v5413_v34  ;;  %v13011_v63 = vadd.f32 %v6505_v13, %v6504_v49  ;;  %v6511_v40 = vmax.f32 %v6192_v28, 0.0  ;;  %v6229_v35 = vadd.f32 %v6228_v60, %v10716_v12  ;;  %v6230_v33 = vpop.f32.mrb[1].mxu0  ;;  %v16274_v49 = vld [vmem:[#allocation44_spill] sm:$0xff] }
 0x30c   : > { %5449 = vadd.xlane.f32.xlu0 %v12563_v61  ;;  %8571 = vmatprep.mubr.bf16.mxu1 %v16031_v46  ;;  %v6231_v61 = vadd.f32 %v6230_v33, %v10716_v12  ;;  %v6232_v32 = vpop.f32.mrb[2].mxu0  ;;  %v6341_v28 = vpop.f32.mrb[0].mxu1 }
 0x30d   : > { %16269 = vst [vmem:[#allocation24_spill] sm:$0xff] %v13007_v7  ;;  %16270 = vst [vmem:[#allocation102_spill] sm:$0xff] %v13011_v63  ;;  %5440 = vadd.xlane.f32.xlu1 %v16271_v24  ;;  %v13015_v56 = vpop.xlane.xlu0 %2350  ;;  %v3353_v34 = vpop.xlane.xlu1 %3352  ;;  %v13022_v18 = vadd.f32 %v6511_v40, %v6510_v2  ;;  %v6422_v48 = vmax.f32 %v6229_v35, 0.0  ;;  %v6233_v13 = vadd.f32 %v6232_v32, %v10726_v15  ;;  %v3414_v40 = vsel %vm12809_vm11, %v3396_v9, -3.4028235e+38 }
 0x30e   : > { %16272 = vst [vmem:[#allocation26_spill] sm:$0xff] %v13015_v56  ;;  %v13026_v42 = vsel %vm1153_vm3, %v16274_v49, %v3353_v34  ;;  %v6234_v60 = vpop.f32.mrb[3].mxu0  ;;  %v6423_v24 = vmax.f32 %v6231_v61, 0.0  ;;  %v6342_v56 = vadd.f32 %v6341_v28, %v10716_v12  ;;  %v6343_v63 = vpop.f32.mrb[1].mxu1  ;;  %v16275_v34 = vld [vmem:[#allocation65_spill] sm:$0xff]  ;;  %v10183_v61 = vld [vmem:[%s15886_s2 + $0x18] sm:$0xff]  }
 0x30f   : > { %16273 = vst [vmem:[#allocation103_spill] sm:$0xff] %v13022_v18  ;;  %v6235_v22 = vadd.f32 %v6234_v60, %v10726_v15  ;;  %v6428_v35 = vmax.f32 %v6233_v13, 0.0  ;;  %v6344_v2 = vadd.f32 %v6343_v63, %v10716_v12  ;;  %v6345_v33 = vpop.f32.mrb[2].mxu1  ;;  %v3444_v7 = vsel %vm1204_vm5, %v3414_v40, -inf }
 0x310   : > { %5497 = vadd.xlane.f32.xlu0 %v12581_v62  ;;  %v3411_v62 = vsel %vm12809_vm11, %v3393_v41, -3.4028235e+38  ;;  %v13044_v49 = vadd.f32 %v6423_v24, %v6422_v48  ;;  %v6424_v9 = vmax.f32 %v6342_v56, 0.0  ;;  %v6346_v63 = vadd.f32 %v6345_v33, %v10726_v15  ;;  %v6347_v28 = vpop.f32.mrb[3].mxu1  ;;  %v16278_v56 = vld [vmem:[#allocation55_spill] sm:$0xff] }
 0x311   : > { %5488 = vadd.xlane.f32.xlu1 %v16275_v34  ;;  %9987 = vmatmul.mubr.msk.bf16.gmra.mrb[108].mxu0 %vm513_vm1, %v10183_v61  ;;  %v13040_v32 = vpop.xlane.xlu0 %3355  ;;  %v6429_v13 = vmax.f32 %v6235_v22, 0.0  ;;  %v13047_v60 = vpop.xlane.xlu1 %4357  ;;  %v6425_v34 = vmax.f32 %v6344_v2, 0.0  ;;  %v6348_v18 = vadd.f32 %v6347_v28, %v10726_v15  ;;  %v13054_v41 = vsel %vm1204_vm5, %v2386_v37, 2147483647 }
 0x312   : > { %16276 = vst [vmem:[#allocation44_spill] sm:$0xff] %v13044_v49  ;;  %8468 = vmatprep.mubr.bf16.mxu0 %v16031_v46  ;;  %16277 = vst [vmem:[#allocation65_spill] sm:$0xff] %v13054_v41  ;;  %v3382_v48 = vsel %vm1153_vm3, %v16278_v56, %v12828_v29  ;;  %v6430_v22 = vmax.f32 %v6346_v63, 0.0  ;;  %v6238_v33 = vpop.f32.mrb[4].mxu0  ;;  %v3435_v2 = vsel %vm1204_vm5, %v3411_v62, -inf  ;;  %v16281_v29 = vld [vmem:[#allocation35_spill] sm:$0xff] }
 0x313   : > { %9996 = vmatmul.mubr.msk.bf16.gmra.mrb[108].mxu1 %vm513_vm1, %v10183_v61  ;;  %v13059_v24 = vadd.f32 %v6429_v13, %v6428_v35  ;;  %v13063_v28 = vadd.f32 %v6425_v34, %v6424_v9  ;;  %v6431_v61 = vmax.f32 %v6348_v18, 0.0  ;;  %v6239_v40 = vadd.f32 %v6238_v33, %v16129_v44  ;;  %v6240_v37 = vpop.f32.mrb[5].mxu0 }
 0x314   : > { %3445 = vmax.xlane.f32.xlu0 %v3444_v7  ;;  %8581 = vmatprep.mubr.bf16.mxu1 %v16031_v46  ;;  %vm2371_vm13 = vcmp.eq.f32.partialorder %v16281_v29, %v12732_v14  ;;  %v6241_v35 = vadd.f32 %v6240_v37, %v16129_v44  ;;  %v6242_v7 = vpop.f32.mrb[6].mxu0  ;;  %v2404_v62 = vshra.s32 %v13054_v41, 16  ;;  %v3398_v63 = vmul.f32 0.00390625, %v3382_v48  ;;  %v6351_v56 = vpop.f32.mrb[4].mxu1 }
 0x315   : > { %16279 = vst [vmem:[#allocation55_spill] sm:$0xff] %v13059_v24  ;;  %16280 = vst [vmem:[#allocation104_spill] sm:$0xff] %v13063_v28  ;;  %3436 = vmax.xlane.f32.xlu1 %v3435_v2  ;;  %v13066_v49 = vpop.xlane.xlu0 %4360  ;;  %v13071_v13 = vpop.xlane.xlu1 %2353  ;;  %v13074_v9 = vadd.f32 %v6431_v61, %v6430_v22  ;;  %v6434_v18 = vmax.f32 %v6239_v40, 0.0  ;;  %v6243_v34 = vadd.f32 %v6242_v7, %v10742_v51  ;;  %v2387_v48 = vsel %vm2371_vm13, %v16158_v16, 3 }
 0x316   : > { %16282 = vst [vmem:[#allocation35_spill] sm:$0xff] %v13071_v13  ;;  %v6244_v33 = vpop.f32.mrb[7].mxu0  ;;  %v6435_v2 = vmax.f32 %v6241_v35, 0.0  ;;  %v6352_v28 = vadd.f32 %v6351_v56, %v16129_v44  ;;  %v6353_v47 = vpop.f32.mrb[5].mxu1  ;;  %v13085_v22 = vmul.f32 0.00390625, %v12739_v45  ;;  %v10184_v35 = vld [vmem:[%s15886_s2 + $0x20] sm:$0xff]   ;;  %v13101_v13 = vcvt.s32.f32 %v2404_v62 }
 0x317   : > { %v6245_v24 = vadd.f32 %v6244_v33, %v10742_v51  ;;  %v6440_v61 = vmax.f32 %v6243_v34, 0.0  ;;  %v6354_v40 = vadd.f32 %v6353_v47, %v16129_v44  ;;  %v6355_v37 = vpop.f32.mrb[6].mxu1  ;;  %v3416_v41 = vsel %vm12809_vm11, %v3398_v63, -3.4028235e+38 }
 0x318   : > { %5455 = vadd.xlane.f32.xlu0 %v12606_v20  ;;  %v13095_v7 = vadd.f32 %v6435_v2, %v6434_v18  ;;  %v6436_v29 = vmax.f32 %v6352_v28, 0.0  ;;  %v6356_v45 = vadd.f32 %v6355_v37, %v10742_v51  ;;  %v6357_v34 = vpop.f32.mrb[7].mxu1  ;;  %16285 = vst [vmem:[#allocation107_spill] sm:$0xff] %v13101_v13  ;;  %v13116_v63 = vsel %vm1204_vm5, %v2387_v48, 2147483647 }
 0x319   : > { %5446 = vadd.xlane.f32.xlu1 %v12552_v1  ;;  %9988 = vmatmul.mubr.msk.bf16.gmra.mrb[112].mxu0 %vm513_vm1, %v10184_v35  ;;  %v13093_v20 = vpop.xlane.xlu0 %2356  ;;  %v6441_v56 = vmax.f32 %v6245_v24, 0.0  ;;  %v4364_v33 = vpop.xlane.xlu1 %4363  ;;  %v6437_v47 = vmax.f32 %v6354_v40, 0.0  ;;  %v6358_v1 = vadd.f32 %v6357_v34, %v10742_v51  ;;  %16288 = vst [vmem:[#allocation110_spill] sm:$0xff] %v13116_v63  ;;  %v3413_v34 = vsel %vm12809_vm11, %v13085_v22, -3.4028235e+38  ;;  %v16291_v22 = vld [vmem:[#allocation31_spill] sm:$0xff] }
 0x31a   : > { %16283 = vst [vmem:[#allocation105_spill] sm:$0xff] %v13093_v20  ;;  %16284 = vst [vmem:[#allocation106_spill] sm:$0xff] %v13095_v7  ;;  %8478 = vmatprep.mubr.bf16.mxu0 %v16031_v46  ;;  %v6442_v28 = vmax.f32 %v6356_v45, 0.0  ;;  %v6248_v24 = vpop.f32.mrb[8].mxu0  ;;  %v16338_v7 = vld [vmem:[#allocation51_spill] sm:$0xff] }
 0x31b   : > { %9997 = vmatmul.mubr.msk.bf16.gmra.mrb[112].mxu1 %vm513_vm1, %v10184_v35  ;;  %v13105_v18 = vadd.f32 %v6441_v56, %v6440_v61  ;;  %v13109_v2 = vadd.f32 %v6437_v47, %v6436_v29  ;;  %v6443_v40 = vmax.f32 %v6358_v1, 0.0  ;;  %v6249_v37 = vadd.f32 %v6248_v24, %v16074_v39  ;;  %v6250_v62 = vpop.f32.mrb[9].mxu0 }
 0x31c   : > { %5503 = vadd.xlane.f32.xlu0 %v12624_v11  ;;  %8591 = vmatprep.mubr.bf16.mxu1 %v16031_v46  ;;  %v4458_v61 = vsel %vm1136_vm2, %v12579_v3, %v4364_v33  ;;  %v6251_v11 = vadd.f32 %v6250_v62, %v16074_v39  ;;  %v6252_v45 = vpop.f32.mrb[10].mxu0  ;;  %v3450_v29 = vsel %vm1204_vm5, %v3416_v41, -inf  ;;  %v16290_v33 = vld [vmem:[#allocation25_spill] sm:$0xff] }
 0x31d   : > { %16286 = vst [vmem:[#allocation108_spill] sm:$0xff] %v13105_v18  ;;  %16287 = vst [vmem:[#allocation109_spill] sm:$0xff] %v13109_v2  ;;  %2407 = vmin.xlane.f32.xlu1 %v13101_v13  ;;  %v13113_v35 = vpop.xlane.xlu0 %4366  ;;  %v4412_v56 = vpop.xlane.xlu1 %4411  ;;  %v13125_v47 = vadd.f32 %v6443_v40, %v6442_v28  ;;  %v6446_v1 = vmax.f32 %v6249_v37, 0.0  ;;  %v6253_v48 = vadd.f32 %v6252_v45, %v16075_v23  ;;  %v16354_v18 = vld [vmem:[#allocation89_spill] sm:$0xff] }
 0x31e   : > { %v13128_v24 = vsel %vm1153_vm3, %v4458_v61, %v4412_v56  ;;  %v6361_v13 = vpop.f32.mrb[8].mxu1  ;;  %v6254_v3 = vpop.f32.mrb[11].mxu0  ;;  %vm2372_vm14 = vcmp.eq.f32.partialorder %v16290_v33, %v12781_v55  ;;  %v6447_v62 = vmax.f32 %v6251_v11, 0.0  ;;  %v3384_v28 = vsel %vm1153_vm3, %v16291_v22, %v12898_v4 }
 0x31f   : > { %16289 = vst [vmem:[#allocation111_spill] sm:$0xff] %v13125_v47  ;;  %v6362_v41 = vadd.f32 %v6361_v13, %v16074_v39  ;;  %v6255_v2 = vadd.f32 %v6254_v3, %v16075_v23  ;;  %v6363_v20 = vpop.f32.mrb[9].mxu1  ;;  %v6452_v40 = vmax.f32 %v6253_v48, 0.0  ;;  %v2419_v13 = vshra.s32 %v13116_v63, 16 }
 0x320   : > { %3451 = vmax.xlane.f32.xlu0 %v3450_v29  ;;  %v6364_v37 = vadd.f32 %v6363_v20, %v16074_v39  ;;  %v6365_v61 = vpop.f32.mrb[10].mxu1  ;;  %v13145_v56 = vadd.f32 %v6447_v62, %v6446_v1  ;;  %v3400_v1 = vmul.f32 0.00390625, %v3384_v28 }
 0x321   : > { %5494 = vadd.xlane.f32.xlu1 %v12570_v43  ;;  %9989 = vmatmul.mubr.msk.bf16.gmra.mrb[116].mxu0 %vm513_vm1, %v12752_v36  ;;  %v13142_v11 = vpop.xlane.xlu0 %4414  ;;  %v6448_v45 = vmax.f32 %v6362_v41, 0.0  ;;  %v6453_v29 = vmax.f32 %v6255_v2, 0.0  ;;  %v6366_v3 = vadd.f32 %v6365_v61, %v16075_v23  ;;  %v6367_v4 = vpop.f32.mrb[11].mxu1  ;;  %v2388_v43 = vsel %vm2372_vm14, %v16158_v16, 3 }
 0x322   : > { %16292 = vst [vmem:[#allocation25_spill] sm:$0xff] %v13145_v56  ;;  %v13148_v48 = vpop.xlane.xlu1 %2359  ;;  %8488 = vmatprep.mubr.bf16.mxu0 %v16031_v46  ;;  %v6449_v20 = vmax.f32 %v6364_v37, 0.0  ;;  %v6368_v22 = vadd.f32 %v6367_v4, %v16075_v23  ;;  %v6258_v41 = vpop.f32.mrb[12].mxu0  ;;  %v3441_v61 = vsel %vm1204_vm5, %v3413_v34, -inf  ;;  %v16299_v34 = vld [vmem:[#allocation28_spill] sm:$0xff] }
 0x323   : > { %16293 = vst [vmem:[#allocation31_spill] sm:$0xff] %v13148_v48  ;;  %9998 = vmatmul.mubr.msk.bf16.gmra.mrb[116].mxu1 %vm513_vm1, %v12752_v36  ;;  %v13158_v2 = vadd.f32 %v6453_v29, %v6452_v40  ;;  %v6454_v62 = vmax.f32 %v6366_v3, 0.0  ;;  %v6259_v37 = vadd.f32 %v6258_v41, %v16084_v6  ;;  %v6260_v4 = vpop.f32.mrb[13].mxu0  ;;  %v13169_v29 = vcvt.s32.f32 %v2419_v13 }
 0x324   : > { %5461 = vadd.xlane.f32.xlu0 %v12649_v50  ;;  %8601 = vmatprep.mubr.bf16.mxu1 %v16031_v46  ;;  %v13163_v48 = vadd.f32 %v6449_v20, %v6448_v45  ;;  %v6455_v33 = vmax.f32 %v6368_v22, 0.0  ;;  %v6261_v36 = vadd.f32 %v6260_v4, %v16084_v6  ;;  %v6262_v40 = vpop.f32.mrb[14].mxu0  ;;  %v13172_v50 = vsel %vm1204_vm5, %v2388_v43, 2147483647  ;;  %v6371_v22 = vpop.f32.mrb[12].mxu1 }
 0x325   : > { %16294 = vst [vmem:[#allocation112_spill] sm:$0xff] %v13158_v2  ;;  %3442 = vmax.xlane.f32.xlu1 %v3441_v61  ;;  %v13166_v63 = vpop.xlane.xlu0 %2362  ;;  %16297 = vst [vmem:[#allocation115_spill] sm:$0xff] %v13169_v29  ;;  %vm2373_vm15 = vcmp.eq.f32.partialorder %v16299_v34, %v12799_v19  ;;  %v6458_v3 = vmax.f32 %v6259_v37, 0.0  ;;  %v6263_v20 = vadd.f32 %v6262_v40, %v16086_v30  ;;  %v6264_v41 = vpop.f32.mrb[15].mxu0  ;;  %v3418_v43 = vsel %vm12809_vm11, %v3400_v1, -3.4028235e+38 }
 0x326   : > { %16295 = vst [vmem:[#allocation113_spill] sm:$0xff] %v13163_v48  ;;  %16296 = vst [vmem:[#allocation114_spill] sm:$0xff] %v13166_v63  ;;  %v4370_v28 = vpop.xlane.xlu1 %4369  ;;  %v13176_v45 = vadd.f32 %v6455_v33, %v6454_v62  ;;  %v6459_v61 = vmax.f32 %v6261_v36, 0.0  ;;  %v6372_v4 = vadd.f32 %v6371_v22, %v16084_v6  ;;  %v6265_v48 = vadd.f32 %v6264_v41, %v16086_v30  ;;  %v6373_v13 = vpop.f32.mrb[13].mxu1 }
 0x327   : > { %16298 = vst [vmem:[#allocation116_spill] sm:$0xff] %v13172_v50  ;;  %v4460_v62 = vsel %vm1136_vm2, %v12641_v0, %v4370_v28  ;;  %v6464_v33 = vmax.f32 %v6263_v20, 0.0  ;;  %v6374_v37 = vadd.f32 %v6373_v13, %v16084_v6  ;;  %v6375_v40 = vpop.f32.mrb[14].mxu1  ;;  %v2434_v22 = vshra.s32 %v13172_v50, 16 }
 0x328   : > { %16300 = vst [vmem:[#allocation28_spill] sm:$0xff] %v13176_v45  ;;  %5509 = vadd.xlane.f32.xlu0 %v12665_v25  ;;  %v13193_v25 = vadd.f32 %v6459_v61, %v6458_v3  ;;  %v6460_v41 = vmax.f32 %v6372_v4, 0.0  ;;  %v6465_v1 = vmax.f32 %v6265_v48, 0.0  ;;  %v6376_v63 = vadd.f32 %v6375_v40, %v16086_v30  ;;  %v6377_v0 = vpop.f32.mrb[15].mxu1  ;;  %v16302_v61 = vld [vmem:[#allocation62_spill] sm:$0xff] }
 0x329   : > { %2422 = vmin.xlane.f32.xlu1 %v13169_v29  ;;  %9990 = vmatmul.mubr.msk.bf16.gmra.mrb[120].mxu0 %vm513_vm1, %v12795_v52  ;;  %v13190_v36 = vpop.xlane.xlu0 %4372  ;;  %v6461_v20 = vmax.f32 %v6374_v37, 0.0  ;;  %v6378_v13 = vadd.f32 %v6377_v0, %v16086_v30  ;;  %v3456_v3 = vsel %vm1204_vm5, %v3418_v43, -inf  ;;  %v3386_v48 = vsel %vm1153_vm3, %v16302_v61, %v12967_v26  ;;  %v16305_v0 = vld [vmem:[#allocation17_spill] sm:$0xff] }
 0x32a   : > { %16301 = vst [vmem:[#allocation117_spill] sm:$0xff] %v13193_v25  ;;  %v4418_v28 = vpop.xlane.xlu1 %4417  ;;  %8498 = vmatprep.mubr.bf16.mxu0 %v16031_v46  ;;  %v13207_v4 = vadd.f32 %v6465_v1, %v6464_v33  ;;  %v6466_v40 = vmax.f32 %v6376_v63, 0.0  ;;  %v6268_v50 = vpop.f32.mrb[16].mxu0  ;;  %v16306_v25 = vld [vmem:[#allocation30_spill] sm:$0xff]  ;;  %v2389_v26 = vsel %vm2373_vm15, %v16158_v16, 3  ;;  %v16307_v63 = vld [vmem:[#allocation52_spill] sm:$0xff]  ;;  %v13226_v61 = vcvt.s32.f32 %v2434_v22 }
 0x32b   : > { %v13199_v29 = vsel %vm1153_vm3, %v4460_v62, %v4418_v28  ;;  %9999 = vmatmul.mubr.msk.bf16.gmra.mrb[120].mxu1 %vm513_vm1, %v12795_v52  ;;  %v13210_v37 = vadd.f32 %v6461_v20, %v6460_v41  ;;  %v6467_v62 = vmax.f32 %v6378_v13, 0.0  ;;  %v6269_v28 = vadd.f32 %v6268_v50, %v16305_v0  ;;  %v6270_v52 = vpop.f32.mrb[17].mxu0 }
 0x32c   : > { %16303 = vst [vmem:[#allocation62_spill] sm:$0xff] %v13207_v4  ;;  %3457 = vmax.xlane.f32.xlu0 %v3456_v3  ;;  %8611 = vmatprep.mubr.bf16.mxu1 %v16031_v46  ;;  %v3397_v33 = vmul.f32 0.00390625, %v16307_v63  ;;  %v6271_v1 = vadd.f32 %v6270_v52, %v16305_v0  ;;  %v6272_v41 = vpop.f32.mrb[18].mxu0  ;;  %v3402_v20 = vmul.f32 0.00390625, %v3386_v48  ;;  %16310 = vst [vmem:[#allocation52_spill] sm:$0xff] %v13226_v61  ;;  %v16311_v52 = vld [vmem:[#allocation79_spill] sm:$0xff] }
 0x32d   : > { %16304 = vst [vmem:[#allocation118_spill] sm:$0xff] %v13210_v37  ;;  %5452 = vadd.xlane.f32.xlu1 %v16306_v25  ;;  %v13214_v43 = vpop.xlane.xlu0 %4420  ;;  %v13224_v13 = vadd.f32 %v6467_v62, %v6466_v40  ;;  %v6470_v50 = vmax.f32 %v6269_v28, 0.0  ;;  %v6381_v25 = vpop.f32.mrb[16].mxu1  ;;  %v6273_v4 = vadd.f32 %v6272_v41, %v16095_v31  ;;  %v13239_v40 = vsel %vm1204_vm5, %v2389_v26, 2147483647 }
 0x32e   : > { %v13222_v46 = vpop.xlane.xlu1 %2365  ;;  %v6274_v3 = vpop.f32.mrb[19].mxu0  ;;  %v6471_v37 = vmax.f32 %v6271_v1, 0.0  ;;  %v6382_v34 = vadd.f32 %v6381_v25, %v16305_v0  ;;  %16313 = vst [vmem:[#allocation119_spill] sm:$0xff] %v13239_v40 }
 0x32f   : > { %16308 = vst [vmem:[#allocation17_spill] sm:$0xff] %v13222_v46  ;;  %16309 = vst [vmem:[#allocation30_spill] sm:$0xff] %v13224_v13  ;;  %v6275_v63 = vadd.f32 %v6274_v3, %v16095_v31  ;;  %v6383_v56 = vpop.f32.mrb[17].mxu1  ;;  %v6476_v28 = vmax.f32 %v6273_v4, 0.0  ;;  %v3415_v4 = vsel %vm12809_vm11, %v3397_v33, -3.4028235e+38 }
 0x330   : > { %5515 = vadd.xlane.f32.xlu0 %v16311_v52  ;;  %v6384_v46 = vadd.f32 %v6383_v56, %v16305_v0  ;;  %v6385_v48 = vpop.f32.mrb[18].mxu1  ;;  %v13241_v62 = vadd.f32 %v6471_v37, %v6470_v50  ;;  %v6472_v1 = vmax.f32 %v6382_v34, 0.0  ;;  %v16316_v50 = vld [vmem:[#allocation82_spill] sm:$0xff] }
 0x331   : > { %2437 = vmin.xlane.f32.xlu1 %v13226_v61  ;;  %9991 = vmatmul.mubr.msk.bf16.gmra.mrb[124].mxu0 %vm513_vm1, %v12852_v58  ;;  %v13236_v22 = vpop.xlane.xlu0 %2368  ;;  %v6477_v41 = vmax.f32 %v6275_v63, 0.0  ;;  %v6387_v25 = vpop.f32.mrb[19].mxu1  ;;  %v6386_v56 = vadd.f32 %v6385_v48, %v16095_v31 }
 0x332   : > { %16312 = vst [vmem:[#allocation79_spill] sm:$0xff] %v13236_v22  ;;  %16314 = vst [vmem:[#allocation120_spill] sm:$0xff] %v13241_v62  ;;  %v4376_v3 = vpop.xlane.xlu1 %4375  ;;  %v6473_v52 = vmax.f32 %v6384_v46, 0.0  ;;  %v6388_v61 = vadd.f32 %v6387_v25, %v16095_v31  ;;  %v3420_v22 = vsel %vm12809_vm11, %v3402_v20, -3.4028235e+38  ;;  %v16318_v25 = vld [vmem:[#allocation69_spill] sm:$0xff] }
 0x333   : > { %10000 = vmatmul.mubr.msk.bf16.gmra.mrb[124].mxu1 %vm513_vm1, %v12852_v58  ;;  %v13249_v26 = vadd.f32 %v6477_v41, %v6476_v28  ;;  %v6278_v37 = vpop.f32.mrb[20].mxu0  ;;  %v6478_v46 = vmax.f32 %v6386_v56, 0.0  ;;  %v16319_v20 = vld [vmem:[#allocation81_spill] sm:$0xff]  ;;  %v3462_v33 = vsel %vm1204_vm5, %v3420_v22, -inf  ;;  %v3447_v22 = vsel %vm1204_vm5, %v3415_v4, -inf }
 0x334   : > { %6520 = vadd.xlane.f32.xlu0 %v16316_v50  ;;  %v13254_v34 = vadd.f32 %v6473_v52, %v6472_v1  ;;  %v6479_v63 = vmax.f32 %v6388_v61, 0.0  ;;  %v6279_v48 = vadd.f32 %v6278_v37, %v16101_v5  ;;  %v6280_v58 = vpop.f32.mrb[21].mxu0  ;;  %v4462_v28 = vsel %vm1136_vm2, %v16319_v20, %v4376_v3 }
 0x335   : > { %16315 = vst [vmem:[#allocation121_spill] sm:$0xff] %v13249_v26  ;;  %5500 = vadd.xlane.f32.xlu1 %v16318_v25  ;;  %v13258_v62 = vpop.xlane.xlu0 %4378  ;;  %v6281_v41 = vadd.f32 %v6280_v58, %v16101_v5  ;;  %v6282_v26 = vpop.f32.mrb[22].mxu0  ;;  %v2449_v1 = vshra.s32 %v13239_v40, 16 }
 0x336   : > { %16317 = vst [vmem:[#allocation82_spill] sm:$0xff] %v13254_v34  ;;  %v4424_v50 = vpop.xlane.xlu1 %4423  ;;  %v13265_v52 = vadd.f32 %v6479_v63, %v6478_v46  ;;  %v6482_v61 = vmax.f32 %v6279_v48, 0.0  ;;  %v6283_v37 = vadd.f32 %v6282_v26, %v16108_v8  ;;  %v6391_v25 = vpop.f32.mrb[20].mxu1  ;;  %v16321_v46 = vld [vmem:[#allocation37_spill] sm:$0xff] }
 0x337   : > { %v13268_v56 = vsel %vm1153_vm3, %v4462_v28, %v4424_v50  ;;  %v6284_v34 = vpop.f32.mrb[23].mxu0  ;;  %v6483_v13 = vmax.f32 %v6281_v41, 0.0  ;;  %v6392_v3 = vadd.f32 %v6391_v25, %v16101_v5  ;;  %v6393_v20 = vpop.f32.mrb[21].mxu1  ;;  %v3388_v63 = vsel %vm1153_vm3, %v16321_v46, %v13040_v32  ;;  %v16325_v46 = vld [vmem:[#allocation85_spill] sm:$0xff] }
 0x338   : > { %16320 = vst [vmem:[#allocation69_spill] sm:$0xff] %v13265_v52  ;;  %v6285_v58 = vadd.f32 %v6284_v34, %v16108_v8  ;;  %3463 = vmax.xlane.f32.xlu0 %v3462_v33  ;;  %v6488_v48 = vmax.f32 %v6283_v37, 0.0  ;;  %v6394_v28 = vadd.f32 %v6393_v20, %v16101_v5  ;;  %v6395_v26 = vpop.f32.mrb[22].mxu1  ;;  %v13284_v2 = vcvt.s32.f32 %v2449_v1 }
 0x339   : > { %3448 = vmax.xlane.f32.xlu1 %v3447_v22  ;;  %v13278_v50 = vpop.xlane.xlu0 %4426  ;;  %v13280_v41 = vadd.f32 %v6483_v13, %v6482_v61  ;;  %v6484_v25 = vmax.f32 %v6392_v3, 0.0  ;;  %v6396_v33 = vadd.f32 %v6395_v26, %v16108_v8  ;;  %v6397_v52 = vpop.f32.mrb[23].mxu1  ;;  %v3404_v32 = vmul.f32 0.00390625, %v3388_v63 }
 0x33a   : > { %v6489_v34 = vmax.f32 %v6285_v58, 0.0  ;;  %v4382_v4 = vpop.xlane.xlu1 %4381  ;;  %v6485_v40 = vmax.f32 %v6394_v28, 0.0  ;;  %v6398_v45 = vadd.f32 %v6397_v52, %v16108_v8  ;;  %16323 = vst [vmem:[#allocation37_spill] sm:$0xff] %v13284_v2  ;;  %v3399_v1 = vmul.f32 0.00390625, %v12882_v54  ;;  %v16327_v52 = vld [vmem:[#allocation59_spill] sm:$0xff] }
 0x33b   : > { %16322 = vst [vmem:[#allocation81_spill] sm:$0xff] %v13280_v41  ;;  %v6490_v20 = vmax.f32 %v6396_v33, 0.0  ;;  %v6288_v22 = vpop.f32.mrb[24].mxu0  ;;  %v4464_v63 = vsel %vm1136_vm2, %v16327_v52, %v4382_v4  ;;  %v16329_v52 = vld [vmem:[#allocation50_spill] sm:$0xff] }
 0x33c   : > { %v13287_v37 = vadd.f32 %v6489_v34, %v6488_v48  ;;  %5521 = vadd.xlane.f32.xlu0 %v16325_v46  ;;  %v13290_v13 = vadd.f32 %v6485_v40, %v6484_v25  ;;  %v6491_v61 = vmax.f32 %v6398_v45, 0.0  ;;  %v6289_v3 = vadd.f32 %v6288_v22, %v16112_v27  ;;  %v6290_v58 = vpop.f32.mrb[25].mxu0 }
 0x33d   : > { %2452 = vmin.xlane.f32.xlu1 %v13284_v2  ;;  %v13294_v28 = vpop.xlane.xlu0 %4384  ;;  %v6291_v48 = vadd.f32 %v6290_v58, %v16112_v27  ;;  %v6292_v34 = vpop.f32.mrb[26].mxu0 }
 0x33e   : > { %16324 = vst [vmem:[#allocation122_spill] sm:$0xff] %v13287_v37  ;;  %16326 = vst [vmem:[#allocation85_spill] sm:$0xff] %v13290_v13  ;;  %v4430_v26 = vpop.xlane.xlu1 %4429  ;;  %v13302_v40 = vadd.f32 %v6491_v61, %v6490_v20  ;;  %v6494_v45 = vmax.f32 %v6289_v3, 0.0  ;;  %v6293_v33 = vadd.f32 %v6292_v34, %v16115_v10  ;;  %v6401_v22 = vpop.f32.mrb[24].mxu1  ;;  %v3422_v20 = vsel %vm12809_vm11, %v3404_v32, -3.4028235e+38 }
 0x33f   : > { %v13305_v25 = vsel %vm1153_vm3, %v4464_v63, %v4430_v26  ;;  %v6294_v46 = vpop.f32.mrb[27].mxu0  ;;  %v6495_v54 = vmax.f32 %v6291_v48, 0.0  ;;  %v6402_v37 = vadd.f32 %v6401_v22, %v16112_v27  ;;  %v6403_v58 = vpop.f32.mrb[25].mxu1  ;;  %v16330_v26 = vld [vmem:[#allocation32_spill] sm:$0xff]  ;;  %v3468_v32 = vsel %vm1204_vm5, %v3422_v20, -inf }
 0x340   : > { %16328 = vst [vmem:[#allocation59_spill] sm:$0xff] %v13302_v40  ;;  %v6295_v4 = vadd.f32 %v6294_v46, %v16115_v10  ;;  %6526 = vadd.xlane.f32.xlu0 %v16329_v52  ;;  %v6500_v61 = vmax.f32 %v6293_v33, 0.0  ;;  %v6404_v3 = vadd.f32 %v6403_v58, %v16112_v27  ;;  %v6405_v63 = vpop.f32.mrb[26].mxu1  ;;  %v3417_v33 = vsel %vm12809_vm11, %v3399_v1, -3.4028235e+38  ;;  %v16332_v58 = vld [vmem:[#allocation11_spill] sm:$0xff] }
 0x341   : > { %5458 = vadd.xlane.f32.xlu1 %v16330_v26  ;;  %v13315_v34 = vpop.xlane.xlu0 %4432  ;;  %v13317_v40 = vadd.f32 %v6495_v54, %v6494_v45  ;;  %v6496_v48 = vmax.f32 %v6402_v37, 0.0  ;;  %v6406_v46 = vadd.f32 %v6405_v63, %v16115_v10  ;;  %v6407_v13 = vpop.f32.mrb[27].mxu1  ;;  %v4459_v26 = vsel %vm1136_vm2, %v16332_v58, %v13113_v35  ;;  %v16335_v63 = vld [vmem:[#allocation73_spill] sm:$0xff] }
 0x342   : > { %v6501_v22 = vmax.f32 %v6295_v4, 0.0  ;;  %v4388_v2 = vpop.xlane.xlu1 %4387  ;;  %v6497_v52 = vmax.f32 %v6404_v3, 0.0  ;;  %v6408_v41 = vadd.f32 %v6407_v13, %v16115_v10  ;;  %v4475_v4 = vsel %vm1153_vm3, %v4459_v26, %v13142_v11  ;;  %v16336_v35 = vld [vmem:[#allocation57_spill] sm:$0xff] }
 0x343   : > { %16331 = vst [vmem:[#allocation50_spill] sm:$0xff] %v13317_v40  ;;  %v6502_v37 = vmax.f32 %v6406_v46, 0.0  ;;  %v6298_v54 = vpop.f32.mrb[28].mxu0  ;;  %v3453_v58 = vsel %vm1204_vm5, %v3417_v33, -inf  ;;  %v4506_v11 = vstv %s13300_s17  ;;  %s9749_s17 = sshll.u32 %s15732_s26, 3 }
 0x344   : > { %v13327_v45 = vadd.f32 %v6501_v22, %v6500_v61  ;;  %3469 = vmax.xlane.f32.xlu0 %v3468_v32  ;;  %v13331_v3 = vadd.f32 %v6497_v52, %v6496_v48  ;;  %v6503_v13 = vmax.f32 %v6408_v41, 0.0  ;;  %v6299_v20 = vadd.f32 %v6298_v54, %v10864_v53  ;;  %v6300_v1 = vpop.f32.mrb[29].mxu0  ;;  %s292_s22 = scalar_lea.vmem [#allocation6], %s9749_s17 }
 0x345   : > { %5506 = vadd.xlane.f32.xlu1 %v16335_v63  ;;  %v13335_v40 = vpop.xlane.xlu0 %4390  ;;  %v4466_v61 = vsel %vm1136_vm2, %v16336_v35, %v4388_v2  ;;  %v6301_v22 = vadd.f32 %v6300_v1, %v10864_v53  ;;  %v6302_v32 = vpop.f32.mrb[30].mxu0  ;;  %vm13361_vm4 = vcmp.lt.s32.totalorder %v16158_v16, %v4506_v11 }
 0x346   : > { %16333 = vst [vmem:[#allocation32_spill] sm:$0xff] %v13327_v45  ;;  %16334 = vst [vmem:[#allocation11_spill] sm:$0xff] %v13331_v3  ;;  %v4436_v46 = vpop.xlane.xlu1 %4435  ;;  %v13342_v48 = vadd.f32 %v6503_v13, %v6502_v37  ;;  %v6506_v41 = vmax.f32 %v6299_v20, 0.0  ;;  %v6303_v26 = vadd.f32 %v6302_v32, %v10866_v57  ;;  %v6411_v54 = vpop.f32.mrb[28].mxu1  ;;  %v4491_v45 = vmul.f32 0.00390625, %v4475_v4 }
 0x347   : > { %v13345_v52 = vsel %vm1153_vm3, %v4466_v61, %v4436_v46  ;;  %v6304_v63 = vpop.f32.mrb[31].mxu0  ;;  %v6507_v3 = vmax.f32 %v6301_v22, 0.0  ;;  %v6412_v2 = vadd.f32 %v6411_v54, %v10864_v53  ;;  %v6413_v35 = vpop.f32.mrb[29].mxu1 }
 0x348   : > { %16337 = vst [vmem:[#allocation73_spill] sm:$0xff] %v13342_v48  ;;  %v6305_v1 = vadd.f32 %v6304_v63, %v10866_v57  ;;  %5527 = vadd.xlane.f32.xlu0 %v16338_v7  ;;  %v6512_v33 = vmax.f32 %v6303_v26, 0.0  ;;  %v6414_v37 = vadd.f32 %v6413_v35, %v10864_v53  ;;  %v6415_v13 = vpop.f32.mrb[30].mxu1  ;;  %v16346_v35 = vld [vmem:[#allocation74_spill] sm:$0xff]  ;;  %v16486_v7 = vld [vmem:[#allocation112_spill] sm:$0xff] }
 0x349   : > { %3454 = vmax.xlane.f32.xlu1 %v3453_v58  ;;  %v13352_v20 = vpop.xlane.xlu0 %4438  ;;  %v13354_v61 = vadd.f32 %v6507_v3, %v6506_v41  ;;  %v6508_v46 = vmax.f32 %v6412_v2, 0.0  ;;  %v6416_v4 = vadd.f32 %v6415_v13, %v10866_v57  ;;  %v6417_v22 = vpop.f32.mrb[31].mxu1  ;;  %v3401_v58 = vmul.f32 0.00390625, %v12954_v38  ;;  %v16344_v2 = vld [vmem:[#allocation87_spill] sm:$0xff]  ;;  %v16348_v38 = vld [vmem:[#allocation77_spill] sm:$0xff] }
 0x34a   : > { %v6513_v32 = vmax.f32 %v6305_v1, 0.0  ;;  %v13357_v54 = vpop.xlane.xlu1 %1290  ;;  %v6509_v63 = vmax.f32 %v6414_v37, 0.0  ;;  %v6418_v48 = vadd.f32 %v6417_v22, %v10866_v57  ;;  %v13371_v1 = vsel %vm13361_vm4, %v4491_v45, -3.4028235e+38 }
 0x34b   : > { %16339 = vst [vmem:[#allocation57_spill] sm:$0xff] %v13354_v61  ;;  %16340 = vst [vmem:[#allocation51_spill] sm:$0xff] %v13357_v54  ;;  %v6514_v3 = vmax.f32 %v6416_v4, 0.0  ;;  %v7216_v41 = vpop.f32.mrb[32].mxu0  ;;  %v4461_v37 = vsel %vm1136_vm2, %v16346_v35, %v13190_v36 }
 0x34c   : > { %v13366_v26 = vadd.f32 %v6513_v32, %v6512_v33  ;;  %6532 = vadd.xlane.f32.xlu0 %v16344_v2  ;;  %16345 = vst [vmem:[#allocation87_spill] sm:$0xff] %v13371_v1  ;;  %v13376_v11 = vadd.f32 %v6509_v63, %v6508_v46  ;;  %v6515_v13 = vmax.f32 %v6418_v48, 0.0  ;;  %v7217_v22 = vadd.f32 %v7216_v41, %v10716_v12  ;;  %v7218_v33 = vpop.f32.mrb[33].mxu0 }
 0x34d   : > { %5512 = vadd.xlane.f32.xlu1 %v16348_v38  ;;  %v13380_v32 = vpop.xlane.xlu0 %4396  ;;  %v4477_v4 = vsel %vm1153_vm3, %v4461_v37, %v13214_v43  ;;  %v7219_v45 = vadd.f32 %v7218_v33, %v10716_v12  ;;  %v7329_v48 = vpop.f32.mrb[32].mxu1  ;;  %v4527_v41 = vsel %vm1204_vm5, %v13371_v1, -inf }
 0x34e   : > { %16343 = vst [vmem:[#allocation123_spill] sm:$0xff] %v13366_v26  ;;  %16347 = vst [vmem:[#allocation74_spill] sm:$0xff] %v13376_v11  ;;  %v4394_v2 = vpop.xlane.xlu1 %4393  ;;  %v7220_v26 = vpop.f32.mrb[34].mxu0  ;;  %v13385_v61 = vadd.f32 %v6515_v13, %v6514_v3  ;;  %v7521_v36 = vmax.f32 %v7217_v22, 0.0  ;;  %v7330_v38 = vadd.f32 %v7329_v48, %v10716_v12  ;;  %v4493_v37 = vmul.f32 0.00390625, %v4477_v4  ;;  %v16350_v22 = vld [vmem:[#allocation80_spill] sm:$0xff] }
 0x34f   : > { %v7221_v46 = vadd.f32 %v7220_v26, %v10726_v15  ;;  %v7222_v63 = vpop.f32.mrb[35].mxu0  ;;  %v7522_v35 = vmax.f32 %v7219_v45, 0.0  ;;  %v7331_v43 = vpop.f32.mrb[33].mxu1 }
 0x350   : > { %16349 = vst [vmem:[#allocation77_spill] sm:$0xff] %v13385_v61  ;;  %v7223_v11 = vadd.f32 %v7222_v63, %v10726_v15  ;;  %4528 = vmax.xlane.f32.xlu0 %v4527_v41  ;;  %v7332_v3 = vadd.f32 %v7331_v43, %v10716_v12  ;;  %v7333_v13 = vpop.f32.mrb[34].mxu1  ;;  %v3419_v61 = vsel %vm12809_vm11, %v3401_v58, -3.4028235e+38  ;;  %v7523_v45 = vmax.f32 %v7330_v38, 0.0 }
 0x351   : > { %v7527_v33 = vmax.f32 %v7221_v46, 0.0  ;;  %6517 = vadd.xlane.f32.xlu1 %v16350_v22  ;;  %v13394_v26 = vpop.xlane.xlu0 %4444  ;;  %v13398_v1 = vadd.f32 %v7522_v35, %v7521_v36  ;;  %v7334_v63 = vadd.f32 %v7333_v13, %v10726_v15  ;;  %v7335_v16 = vpop.f32.mrb[35].mxu1  ;;  %v3459_v58 = vsel %vm1204_vm5, %v3419_v61, -inf }
 0x352   : > { %v7528_v48 = vmax.f32 %v7223_v11, 0.0  ;;  %v13401_v41 = vpop.xlane.xlu1 %1305  ;;  %v7524_v4 = vmax.f32 %v7332_v3, 0.0  ;;  %v7336_v46 = vadd.f32 %v7335_v16, %v10726_v15  ;;  %v4468_v3 = vsel %vm1136_vm2, %v12907_v59, %v4394_v2 }
 0x353   : > { %16351 = vst [vmem:[#allocation80_spill] sm:$0xff] %v13398_v1  ;;  %16352 = vst [vmem:[#allocation124_spill] sm:$0xff] %v13401_v41  ;;  %v7529_v22 = vmax.f32 %v7334_v63, 0.0  ;;  %v7226_v47 = vpop.f32.mrb[36].mxu0  ;;  %v3403_v59 = vmul.f32 0.00390625, %v13026_v42 }
 0x354   : > { %v13404_v43 = vadd.f32 %v7528_v48, %v7527_v33  ;;  %5533 = vadd.xlane.f32.xlu0 %v16354_v18  ;;  %v13408_v36 = vadd.f32 %v7524_v4, %v7523_v45  ;;  %v7530_v35 = vmax.f32 %v7336_v46, 0.0  ;;  %v7227_v11 = vadd.f32 %v7226_v47, %v16129_v44  ;;  %v7228_v38 = vpop.f32.mrb[37].mxu0 }
 0x355   : > { %3460 = vmax.xlane.f32.xlu1 %v3459_v58  ;;  %v4403_v13 = vpop.xlane.xlu0 %4402  ;;  %v7229_v16 = vadd.f32 %v7228_v38, %v16129_v44  ;;  %v7230_v48 = vpop.f32.mrb[38].mxu0  ;;  %v13416_v18 = vsel %vm13361_vm4, %v4493_v37, -3.4028235e+38  ;;  %v16357_v37 = vld [vmem:[#allocation91_spill] sm:$0xff] }
 0x356   : > { %16353 = vst [vmem:[#allocation125_spill] sm:$0xff] %v13404_v43  ;;  %v4442_v33 = vpop.xlane.xlu1 %4441  ;;  %16355 = vst [vmem:[#allocation89_spill] sm:$0xff] %v13416_v18  ;;  %v13418_v61 = vadd.f32 %v7530_v35, %v7529_v22  ;;  %v7533_v45 = vmax.f32 %v7227_v11, 0.0  ;;  %v7231_v47 = vadd.f32 %v7230_v48, %v10742_v51  ;;  %v7339_v4 = vpop.f32.mrb[36].mxu1  ;;  %v4471_v22 = vsel %vm1136_vm2, %v12995_v17, %v4403_v13  ;;  %v16361_v17 = vld [vmem:[#allocation40_spill] sm:$0xff] }
 0x357   : > { %v13421_v63 = vsel %vm1153_vm3, %v4468_v3, %v4442_v33  ;;  %v7232_v46 = vpop.f32.mrb[39].mxu0  ;;  %v7534_v2 = vmax.f32 %v7229_v16, 0.0  ;;  %v7340_v58 = vadd.f32 %v7339_v4, %v16129_v44  ;;  %v7341_v43 = vpop.f32.mrb[37].mxu1  ;;  %v16358_v33 = vld [vmem:[#allocation83_spill] sm:$0xff]  ;;  %v4533_v42 = vsel %vm1204_vm5, %v13416_v18, -inf }
 0x358   : > { %16356 = vst [vmem:[#allocation126_spill] sm:$0xff] %v13418_v61  ;;  %v7233_v38 = vadd.f32 %v7232_v46, %v10742_v51  ;;  %6538 = vadd.xlane.f32.xlu0 %v16357_v37  ;;  %v7539_v35 = vmax.f32 %v7231_v47, 0.0  ;;  %v7342_v11 = vadd.f32 %v7341_v43, %v16129_v44  ;;  %v7343_v3 = vpop.f32.mrb[38].mxu1  ;;  %v4463_v43 = vsel %vm1136_vm2, %v16361_v17, %v13258_v62  ;;  %v16364_v62 = vld [vmem:[#allocation86_spill] sm:$0xff] }
 0x359   : > { %5518 = vadd.xlane.f32.xlu1 %v16358_v33  ;;  %v4451_v48 = vpop.xlane.xlu0 %4450  ;;  %v13434_v16 = vadd.f32 %v7534_v2, %v7533_v45  ;;  %v7535_v4 = vmax.f32 %v7340_v58, 0.0  ;;  %v7344_v1 = vadd.f32 %v7343_v3, %v10742_v51  ;;  %v7345_v37 = vpop.f32.mrb[39].mxu1  ;;  %v4479_v45 = vsel %vm1153_vm3, %v4463_v43, %v13278_v50 }
 0x35a   : > { %v7540_v46 = vmax.f32 %v7233_v38, 0.0  ;;  %v13437_v61 = vpop.xlane.xlu1 %1320  ;;  %v7536_v13 = vmax.f32 %v7342_v11, 0.0  ;;  %v7346_v47 = vadd.f32 %v7345_v37, %v10742_v51  ;;  %v13444_v33 = vsel %vm1153_vm3, %v4471_v22, %v4451_v48 }
 0x35b   : > { %16359 = vst [vmem:[#allocation91_spill] sm:$0xff] %v13434_v16  ;;  %16360 = vst [vmem:[#allocation83_spill] sm:$0xff] %v13437_v61  ;;  %v7541_v58 = vmax.f32 %v7344_v1, 0.0  ;;  %v3421_v22 = vsel %vm12809_vm11, %v3403_v59, -3.4028235e+38 }
 0x35c   : > { %v13448_v2 = vadd.f32 %v7540_v46, %v7539_v35  ;;  %v7236_v38 = vpop.f32.mrb[40].mxu0  ;;  %4534 = vmax.xlane.f32.xlu0 %v4533_v42  ;;  %v13450_v3 = vadd.f32 %v7536_v13, %v7535_v4  ;;  %v7542_v18 = vmax.f32 %v7346_v47, 0.0  ;;  %v4495_v46 = vmul.f32 0.00390625, %v4479_v45 }
 0x35d   : > { %v7237_v16 = vadd.f32 %v7236_v38, %v16074_v39  ;;  %6523 = vadd.xlane.f32.xlu1 %v16364_v62  ;;  %v7238_v11 = vpop.f32.mrb[41].mxu0  ;;  %v4409_v37 = vpop.xlane.xlu0 %4408  ;;  %v3465_v59 = vsel %vm1204_vm5, %v3421_v22, -inf }
 0x35e   : > { %16362 = vst [vmem:[#allocation40_spill] sm:$0xff] %v13448_v2  ;;  %16363 = vst [vmem:[#allocation127_spill] sm:$0xff] %v13450_v3  ;;  %v7239_v48 = vadd.f32 %v7238_v11, %v16074_v39  ;;  %v4400_v50 = vpop.xlane.xlu1 %4399  ;;  %v7240_v35 = vpop.f32.mrb[42].mxu0  ;;  %v13457_v1 = vadd.f32 %v7542_v18, %v7541_v58  ;;  %v4473_v45 = vsel %vm1136_vm2, %v13066_v49, %v4409_v37  ;;  %v4513_v37 = vsel %vm13361_vm4, %v4495_v46, -3.4028235e+38 }
 0x35f   : > { %v7545_v42 = vmax.f32 %v7237_v16, 0.0  ;;  %v7241_v4 = vadd.f32 %v7240_v35, %v16075_v23  ;;  %v7349_v17 = vpop.f32.mrb[40].mxu1  ;;  %v7242_v43 = vpop.f32.mrb[43].mxu0 }
 0x360   : > { %16365 = vst [vmem:[#allocation86_spill] sm:$0xff] %v13457_v1  ;;  %v7546_v13 = vmax.f32 %v7239_v48, 0.0  ;;  %v7350_v47 = vadd.f32 %v7349_v17, %v16074_v39  ;;  %v7243_v38 = vadd.f32 %v7242_v43, %v16075_v23  ;;  %v7351_v62 = vpop.f32.mrb[41].mxu1  ;;  %5539 = vadd.xlane.f32.xlu0 %v16366_v21  ;;  %v16379_v1 = vld [vmem:[#allocation96_spill] sm:$0xff] }
 0x361   : > { %v7551_v18 = vmax.f32 %v7241_v4, 0.0  ;;  %v7352_v16 = vadd.f32 %v7351_v62, %v16074_v39  ;;  %v7353_v58 = vpop.f32.mrb[42].mxu1  ;;  %3466 = vmax.xlane.f32.xlu1 %v3465_v59  ;;  %v4457_v11 = vpop.xlane.xlu0 %4456 }
 0x362   : > { %v13467_v35 = vadd.f32 %v7546_v13, %v7545_v42  ;;  %v7547_v48 = vmax.f32 %v7350_v47, 0.0  ;;  %v7552_v17 = vmax.f32 %v7243_v38, 0.0  ;;  %v7354_v43 = vadd.f32 %v7353_v58, %v16075_v23  ;;  %v7355_v2 = vpop.f32.mrb[43].mxu1  ;;  %v13470_v3 = vpop.xlane.xlu1 %1335  ;;  %v16370_v47 = vld [vmem:[#allocation94_spill] sm:$0xff] }
 0x363   : > { %16368 = vst [vmem:[#allocation128_spill] sm:$0xff] %v13470_v3  ;;  %v7548_v21 = vmax.f32 %v7352_v16, 0.0  ;;  %v7356_v22 = vadd.f32 %v7355_v2, %v16075_v23  ;;  %v13474_v49 = vsel %vm1153_vm3, %v4473_v45, %v4457_v11  ;;  %v4490_v38 = vmul.f32 0.00390625, %v13128_v24  ;;  %v16372_v2 = vld [vmem:[#allocation21_spill] sm:$0xff]  ;;  %v16373_v11 = vld [vmem:[#allocation100_spill] sm:$0xff] }
 0x364   : > { %16367 = vst [vmem:[#allocation92_spill] sm:$0xff] %v13467_v35  ;;  %v13478_v4 = vadd.f32 %v7552_v17, %v7551_v18  ;;  %v7553_v42 = vmax.f32 %v7354_v43, 0.0  ;;  %v7246_v13 = vpop.f32.mrb[44].mxu0  ;;  %6544 = vadd.xlane.f32.xlu0 %v16370_v47  ;;  %v4470_v46 = vsel %vm1136_vm2, %v16373_v11, %v4400_v50  ;;  %v4539_v47 = vsel %vm1204_vm5, %v4513_v37, -inf }
 0x365   : > { %v13482_v62 = vadd.f32 %v7548_v21, %v7547_v48  ;;  %v7554_v59 = vmax.f32 %v7356_v22, 0.0  ;;  %v7247_v16 = vadd.f32 %v7246_v13, %v16084_v6  ;;  %5524 = vadd.xlane.f32.xlu1 %v16372_v2  ;;  %v7248_v45 = vpop.f32.mrb[45].mxu0  ;;  %v5420_v58 = vpop.xlane.xlu0 %5419  ;;  %v16375_v2 = vld [vmem:[#allocation53_spill] sm:$0xff] }
 0x366   : > { %16369 = vst [vmem:[#allocation129_spill] sm:$0xff] %v13478_v4  ;;  %v7249_v18 = vadd.f32 %v7248_v45, %v16084_v6  ;;  %v4448_v17 = vpop.xlane.xlu1 %4447  ;;  %v7250_v43 = vpop.f32.mrb[46].mxu0  ;;  %v4465_v50 = vsel %vm1136_vm2, %v16375_v2, %v13294_v28  ;;  %v13507_v28 = vsel %vm13361_vm4, %v4490_v38, -3.4028235e+38 }
 0x367   : > { %16371 = vst [vmem:[#allocation94_spill] sm:$0xff] %v13482_v62  ;;  %v13490_v4 = vadd.f32 %v7554_v59, %v7553_v42  ;;  %v7557_v24 = vmax.f32 %v7247_v16, 0.0  ;;  %v13493_v48 = vsel %vm1153_vm3, %v4470_v46, %v4448_v17  ;;  %v7251_v21 = vadd.f32 %v7250_v43, %v16086_v30  ;;  %v7359_v22 = vpop.f32.mrb[44].mxu1  ;;  %v7252_v13 = vpop.f32.mrb[47].mxu0  ;;  %v16376_v17 = vld [vmem:[#allocation43_spill] sm:$0xff]  ;;  %16377 = vst [vmem:[#allocation100_spill] sm:$0xff] %v13507_v28 }
 0x368   : > { %v7558_v11 = vmax.f32 %v7249_v18, 0.0  ;;  %v7360_v45 = vadd.f32 %v7359_v22, %v16084_v6  ;;  %v7253_v62 = vadd.f32 %v7252_v13, %v16086_v30  ;;  %v7361_v37 = vpop.f32.mrb[45].mxu1  ;;  %4540 = vmax.xlane.f32.xlu0 %v4539_v47  ;;  %v4481_v42 = vsel %vm1153_vm3, %v4465_v50, %v13315_v34 }
 0x369   : > { %16374 = vst [vmem:[#allocation21_spill] sm:$0xff] %v13490_v4  ;;  %v7563_v59 = vmax.f32 %v7251_v21, 0.0  ;;  %v7362_v16 = vadd.f32 %v7361_v37, %v16084_v6  ;;  %v7363_v46 = vpop.f32.mrb[46].mxu1  ;;  %6529 = vadd.xlane.f32.xlu1 %v16376_v17  ;;  %v5468_v43 = vpop.xlane.xlu0 %5467  ;;  %v4497_v37 = vmul.f32 0.00390625, %v4481_v42 }
 0x36a   : > { %v13509_v18 = vadd.f32 %v7558_v11, %v7557_v24  ;;  %v7559_v22 = vmax.f32 %v7360_v45, 0.0  ;;  %v7564_v13 = vmax.f32 %v7253_v62, 0.0  ;;  %v7364_v47 = vadd.f32 %v7363_v46, %v16086_v30  ;;  %v7365_v2 = vpop.f32.mrb[47].mxu1  ;;  %v4406_v4 = vpop.xlane.xlu1 %4405 }
 0x36b   : > { %v7560_v34 = vmax.f32 %v7362_v16, 0.0  ;;  %v7366_v21 = vadd.f32 %v7365_v2, %v16086_v30  ;;  %v13514_v50 = vsel %vm1136_vm2, %v5420_v58, %v5468_v43  ;;  %v4524_v62 = vsel %vm1204_vm5, %v13507_v28, -inf }
 0x36c   : > { %v13516_v17 = vadd.f32 %v7564_v13, %v7563_v59  ;;  %v7565_v35 = vmax.f32 %v7364_v47, 0.0  ;;  %v7256_v38 = vpop.f32.mrb[48].mxu0  ;;  %5545 = vadd.xlane.f32.xlu0 %v16379_v1  ;;  %v4492_v24 = vmul.f32 0.00390625, %v13199_v29  ;;  %v4472_v42 = vsel %vm1136_vm2, %v13047_v60, %v4406_v4  ;;  %v16382_v4 = vld [vmem:[#allocation98_spill] sm:$0xff] }
 0x36d   : > { %v13522_v11 = vadd.f32 %v7560_v34, %v7559_v22  ;;  %v7566_v45 = vmax.f32 %v7366_v21, 0.0  ;;  %v7257_v16 = vadd.f32 %v7256_v38, %v16305_v0  ;;  %4525 = vmax.xlane.f32.xlu1 %v4524_v62  ;;  %v7258_v58 = vpop.f32.mrb[49].mxu0  ;;  %v5426_v46 = vpop.xlane.xlu0 %5425 }
 0x36e   : > { %16378 = vst [vmem:[#allocation53_spill] sm:$0xff] %v13516_v17  ;;  %v7259_v59 = vadd.f32 %v7258_v58, %v16305_v0  ;;  %v4454_v43 = vpop.xlane.xlu1 %4453  ;;  %v7260_v1 = vpop.f32.mrb[50].mxu0 }
 0x36f   : > { %16380 = vst [vmem:[#allocation43_spill] sm:$0xff] %v13522_v11  ;;  %v13528_v13 = vadd.f32 %v7566_v45, %v7565_v35  ;;  %v7569_v47 = vmax.f32 %v7257_v16, 0.0  ;;  %v13531_v29 = vsel %vm1153_vm3, %v4472_v42, %v4454_v43  ;;  %v7261_v22 = vadd.f32 %v7260_v1, %v16095_v31  ;;  %v7369_v2 = vpop.f32.mrb[48].mxu1  ;;  %v7262_v34 = vpop.f32.mrb[51].mxu0  ;;  %v16383_v42 = vld [vmem:[#allocation56_spill] sm:$0xff]  ;;  %v16386_v11 = vld [vmem:[#allocation14_spill] sm:$0xff] }
 0x370   : > { %v7570_v21 = vmax.f32 %v7259_v59, 0.0  ;;  %v7370_v38 = vadd.f32 %v7369_v2, %v16305_v0  ;;  %v7263_v62 = vadd.f32 %v7262_v34, %v16095_v31  ;;  %v7371_v60 = vpop.f32.mrb[49].mxu1  ;;  %6550 = vadd.xlane.f32.xlu0 %v16382_v4  ;;  %v4515_v35 = vsel %vm13361_vm4, %v4497_v37, -3.4028235e+38 }
 0x371   : > { %16381 = vst [vmem:[#allocation96_spill] sm:$0xff] %v13528_v13  ;;  %v7575_v45 = vmax.f32 %v7261_v22, 0.0  ;;  %v7372_v16 = vadd.f32 %v7371_v60, %v16305_v0  ;;  %v7373_v58 = vpop.f32.mrb[50].mxu1  ;;  %5530 = vadd.xlane.f32.xlu1 %v16383_v42  ;;  %v5474_v43 = vpop.xlane.xlu0 %5473  ;;  %v13543_v59 = vsel %vm13361_vm4, %v4492_v24, -3.4028235e+38  ;;  %v4545_v42 = vsel %vm1204_vm5, %v4515_v35, -inf }
 0x372   : > { %16384 = vst [vmem:[#allocation98_spill] sm:$0xff] %v13543_v59  ;;  %v13545_v1 = vadd.f32 %v7570_v21, %v7569_v47  ;;  %v7571_v2 = vmax.f32 %v7370_v38, 0.0  ;;  %v7576_v34 = vmax.f32 %v7263_v62, 0.0  ;;  %v7374_v4 = vadd.f32 %v7373_v58, %v16095_v31  ;;  %v7375_v28 = vpop.f32.mrb[51].mxu1  ;;  %v5417_v17 = vpop.xlane.xlu1 %5416  ;;  %v16389_v58 = vld [vmem:[#allocation90_spill] sm:$0xff] }
 0x373   : > { %v7572_v37 = vmax.f32 %v7372_v16, 0.0  ;;  %v7376_v22 = vadd.f32 %v7375_v28, %v16095_v31  ;;  %v13550_v60 = vsel %vm1136_vm2, %v5426_v46, %v5474_v43  ;;  %v4467_v24 = vsel %vm1136_vm2, %v16386_v11, %v13335_v40 }
 0x374   : > { %16385 = vst [vmem:[#allocation56_spill] sm:$0xff] %v13545_v1  ;;  %v13556_v47 = vadd.f32 %v7576_v34, %v7575_v45  ;;  %v7577_v21 = vmax.f32 %v7374_v4, 0.0  ;;  %v7266_v38 = vpop.f32.mrb[52].mxu0  ;;  %4546 = vmax.xlane.f32.xlu0 %v4545_v42  ;;  %v4483_v62 = vsel %vm1153_vm3, %v4467_v24, %v13352_v20  ;;  %v4530_v45 = vsel %vm1204_vm5, %v13543_v59, -inf  ;;  %v16390_v34 = vld [vmem:[#allocation15_spill] sm:$0xff]  ;;  %v16392_v59 = vld [vmem:[#allocation42_spill] sm:$0xff] }
 0x375   : > { %v13560_v16 = vadd.f32 %v7572_v37, %v7571_v2  ;;  %v7578_v28 = vmax.f32 %v7376_v22, 0.0  ;;  %v7267_v46 = vadd.f32 %v7266_v38, %v16101_v5  ;;  %6535 = vadd.xlane.f32.xlu1 %v16389_v58  ;;  %v7268_v35 = vpop.f32.mrb[53].mxu0  ;;  %v5432_v43 = vpop.xlane.xlu0 %5431  ;;  %v1286_v4 = vand.u32 65535, %v16390_v34 }
 0x376   : > { %16387 = vst [vmem:[#allocation14_spill] sm:$0xff] %v13556_v47  ;;  %v7269_v1 = vadd.f32 %v7268_v35, %v16101_v5  ;;  %v5465_v40 = vpop.xlane.xlu1 %5464  ;;  %v7270_v11 = vpop.f32.mrb[54].mxu0  ;;  %v4499_v38 = vmul.f32 0.00390625, %v4483_v62 }
 0x377   : > { %16388 = vst [vmem:[#allocation130_spill] sm:$0xff] %v13560_v16  ;;  %v13568_v42 = vadd.f32 %v7578_v28, %v7577_v21  ;;  %v7581_v20 = vmax.f32 %v7267_v46, 0.0  ;;  %v13571_v2 = vsel %vm1136_vm2, %v5417_v17, %v5465_v40  ;;  %v7271_v37 = vadd.f32 %v7270_v11, %v16108_v8  ;;  %v7379_v22 = vpop.f32.mrb[52].mxu1  ;;  %v7272_v24 = vpop.f32.mrb[55].mxu0 }
 0x378   : > { %v7582_v58 = vmax.f32 %v7269_v1, 0.0  ;;  %v7380_v35 = vadd.f32 %v7379_v22, %v16101_v5  ;;  %v7273_v47 = vadd.f32 %v7272_v24, %v16108_v8  ;;  %v7381_v16 = vpop.f32.mrb[53].mxu1  ;;  %5551 = vadd.xlane.f32.xlu0 %v16392_v59  ;;  %v1288_v59 = vcvt.s32.f32 %v1286_v4 }
 0x379   : > { %16391 = vst [vmem:[#allocation90_spill] sm:$0xff] %v13568_v42  ;;  %v7587_v34 = vmax.f32 %v7271_v37, 0.0  ;;  %v7382_v21 = vadd.f32 %v7381_v16, %v16101_v5  ;;  %v7383_v28 = vpop.f32.mrb[54].mxu1  ;;  %4531 = vmax.xlane.f32.xlu1 %v4530_v45  ;;  %v5480_v17 = vpop.xlane.xlu0 %5479  ;;  %v16395_v16 = vld [vmem:[#allocation39_spill] sm:$0xff] }
 0x37a   : > { %v13578_v46 = vadd.f32 %v7582_v58, %v7581_v20  ;;  %v7583_v40 = vmax.f32 %v7380_v35, 0.0  ;;  %v7588_v11 = vmax.f32 %v7273_v47, 0.0  ;;  %v7384_v62 = vadd.f32 %v7383_v28, %v16108_v8  ;;  %v7385_v1 = vpop.f32.mrb[55].mxu1  ;;  %v5423_v42 = vpop.xlane.xlu1 %5422  ;;  %v16397_v47 = vld [vmem:[#allocation101_spill] sm:$0xff] }
 0x37b   : > { %v7584_v22 = vmax.f32 %v7382_v21, 0.0  ;;  %v7386_v24 = vadd.f32 %v7385_v1, %v16108_v8  ;;  %v13583_v13 = vsel %vm1136_vm2, %v5432_v43, %v5480_v17  ;;  %v9335_v45 = vsel %vm1136_vm2, %v16395_v16, %v12732_v14  ;;  %v16399_v17 = vld [vmem:[#allocation38_spill] sm:$0xff] }
 0x37c   : > { %16393 = vst [vmem:[#allocation15_spill] sm:$0xff] %v13578_v46  ;;  %16394 = vst [vmem:[#allocation42_spill] sm:$0xff] %v13583_v13  ;;  %v13588_v37 = vadd.f32 %v7588_v11, %v7587_v34  ;;  %v7589_v20 = vmax.f32 %v7384_v62, 0.0  ;;  %v7276_v58 = vpop.f32.mrb[56].mxu0  ;;  %6556 = vadd.xlane.f32.xlu0 %v16397_v47  ;;  %v4517_v35 = vsel %vm13361_vm4, %v4499_v38, -3.4028235e+38 }
 0x37d   : > { %v4494_v21 = vmul.f32 0.00390625, %v13268_v56  ;;  %v13594_v28 = vadd.f32 %v7584_v22, %v7583_v40  ;;  %v7590_v43 = vmax.f32 %v7386_v24, 0.0  ;;  %v7277_v4 = vadd.f32 %v7276_v58, %v16112_v27  ;;  %5536 = vadd.xlane.f32.xlu1 %v16399_v17  ;;  %v7278_v1 = vpop.f32.mrb[57].mxu0  ;;  %v13598_v14 = vpop.xlane.xlu0 %3427  ;;  %v16400_v56 = vld [vmem:[#allocation18_spill] sm:$0xff]  ;;  %v16401_v40 = vld [vmem:[#allocation45_spill] sm:$0xff] }
 0x37e   : > { %16396 = vst [vmem:[#allocation39_spill] sm:$0xff] %v13588_v37  ;;  %v7279_v34 = vadd.f32 %v7278_v1, %v16112_v27  ;;  %v13603_v11 = vsel %vm1153_vm3, %v9335_v45, %v13598_v14  ;;  %v5471_v62 = vpop.xlane.xlu1 %5470  ;;  %v7280_v38 = vpop.f32.mrb[58].mxu0  ;;  %vm1292_vm6 = vcmp.eq.f32.partialorder %v16400_v56, %v13357_v54  ;;  %v1301_v22 = vand.u32 65535, %v16401_v40 }
 0x37f   : > { %16398 = vst [vmem:[#allocation101_spill] sm:$0xff] %v13594_v28  ;;  %v13608_v24 = vadd.f32 %v7590_v43, %v7589_v20  ;;  %v7593_v16 = vmax.f32 %v7277_v4, 0.0  ;;  %v13611_v58 = vsel %vm1136_vm2, %v5423_v42, %v5471_v62  ;;  %v7389_v47 = vpop.f32.mrb[56].mxu1  ;;  %v7282_v17 = vpop.f32.mrb[59].mxu0  ;;  %v4551_v1 = vsel %vm1204_vm5, %v4517_v35, -inf  ;;  %v16404_v4 = vld [vmem:[#allocation93_spill] sm:$0xff] }
 0x380   : > { %16403 = vst [vmem:[#allocation18_spill] sm:$0xff] %v13611_v58  ;;  %v7594_v28 = vmax.f32 %v7279_v34, 0.0  ;;  %v7281_v45 = vadd.f32 %v7280_v38, %v16115_v10  ;;  %v7390_v37 = vadd.f32 %v7389_v47, %v16112_v27  ;;  %v7283_v46 = vadd.f32 %v7282_v17, %v16115_v10  ;;  %v7391_v13 = vpop.f32.mrb[57].mxu1  ;;  %4552 = vmax.xlane.f32.xlu0 %v4551_v1  ;;  %v16406_v58 = vld [vmem:[#allocation67_spill] sm:$0xff] }
 0x381   : > { %16402 = vst [vmem:[#allocation38_spill] sm:$0xff] %v13608_v24  ;;  %v7392_v20 = vadd.f32 %v7391_v13, %v16112_v27  ;;  %v7393_v43 = vpop.f32.mrb[58].mxu1  ;;  %6541 = vadd.xlane.f32.xlu1 %v16404_v4  ;;  %v5438_v42 = vpop.xlane.xlu0 %5437  ;;  %v1293_v62 = vsel %vm1292_vm6, %v1288_v59, inf  ;;  %v4512_v35 = vsel %vm13361_vm4, %v4494_v21, -3.4028235e+38  ;;  %vm1307_vm7 = vcmp.eq.f32.partialorder %v16406_v58, %v13401_v41  ;;  %v16407_v59 = vld [vmem:[#allocation97_spill] sm:$0xff] }
 0x382   : > { %v13624_v34 = vadd.f32 %v7594_v28, %v7593_v16  ;;  %v7599_v38 = vmax.f32 %v7281_v45, 0.0  ;;  %v7595_v40 = vmax.f32 %v7390_v37, 0.0  ;;  %v7600_v47 = vmax.f32 %v7283_v46, 0.0  ;;  %v7395_v17 = vpop.f32.mrb[59].mxu1  ;;  %v5429_v1 = vpop.xlane.xlu1 %5428  ;;  %v16413_v58 = vld [vmem:[#allocation49_spill] sm:$0xff] }
 0x383   : > { %v7596_v24 = vmax.f32 %v7392_v20, 0.0  ;;  %v7394_v13 = vadd.f32 %v7393_v43, %v16115_v10  ;;  %v7396_v4 = vadd.f32 %v7395_v17, %v16115_v10  ;;  %v4469_v56 = vsel %vm1136_vm2, %v16407_v59, %v13380_v32 }
 0x384   : > { %16405 = vst [vmem:[#allocation45_spill] sm:$0xff] %v13624_v34  ;;  %v13633_v21 = vadd.f32 %v7600_v47, %v7599_v38  ;;  %v7286_v28 = vpop.f32.mrb[60].mxu0  ;;  %1294 = vmin.xlane.f32.xlu0 %v1293_v62  ;;  %v4536_v46 = vsel %vm1204_vm5, %v4512_v35, -inf  ;;  %v1303_v37 = vcvt.s32.f32 %v1301_v22  ;;  %v4485_v54 = vsel %vm1153_vm3, %v4469_v56, %v13394_v26 }
 0x385   : > { %v13636_v16 = vadd.f32 %v7596_v24, %v7595_v40  ;;  %v7601_v45 = vmax.f32 %v7394_v13, 0.0  ;;  %v7602_v20 = vmax.f32 %v7396_v4, 0.0  ;;  %v7287_v43 = vadd.f32 %v7286_v28, %v10864_v53  ;;  %4537 = vmax.xlane.f32.xlu1 %v4536_v46  ;;  %v7288_v17 = vpop.f32.mrb[61].mxu0  ;;  %v5486_v34 = vpop.xlane.xlu0 %5485 }
 0x386   : > { %16408 = vst [vmem:[#allocation93_spill] sm:$0xff] %v13633_v21  ;;  %v7289_v32 = vadd.f32 %v7288_v17, %v10864_v53  ;;  %v13643_v38 = vsel %vm1136_vm2, %v5438_v42, %v5486_v34  ;;  %v5477_v62 = vpop.xlane.xlu1 %5476  ;;  %v7290_v35 = vpop.f32.mrb[62].mxu0  ;;  %v1308_v22 = vsel %vm1307_vm7, %v1303_v37, inf  ;;  %v4496_v59 = vmul.f32 0.00390625, %v13305_v25  ;;  %v16424_v21 = vld [vmem:[#allocation103_spill] sm:$0xff] }
 0x387   : > { %16409 = vst [vmem:[#allocation67_spill] sm:$0xff] %v13636_v16  ;;  %16410 = vst [vmem:[#allocation97_spill] sm:$0xff] %v13643_v38  ;;  %v13648_v24 = vadd.f32 %v7602_v20, %v7601_v45  ;;  %v7605_v40 = vmax.f32 %v7287_v43, 0.0  ;;  %v13651_v47 = vsel %vm1136_vm2, %v5429_v1, %v5477_v62  ;;  %v7291_v13 = vadd.f32 %v7290_v35, %v10866_v57  ;;  %v7399_v26 = vpop.f32.mrb[60].mxu1  ;;  %v7292_v4 = vpop.f32.mrb[63].mxu0  ;;  %v16414_v43 = vld [vmem:[#allocation95_spill] sm:$0xff] }
 0x388   : > { %16412 = vst [vmem:[#allocation132_spill] sm:$0xff] %v13651_v47  ;;  %v7606_v42 = vmax.f32 %v7289_v32, 0.0  ;;  %v7400_v34 = vadd.f32 %v7399_v26, %v10864_v53  ;;  %v7293_v56 = vadd.f32 %v7292_v4, %v10866_v57  ;;  %v7401_v28 = vpop.f32.mrb[61].mxu1  ;;  %1309 = vmin.xlane.f32.xlu0 %v1308_v22  ;;  %v9337_v46 = vsel %vm1136_vm2, %v16413_v58, %v12799_v19  ;;  %v16417_v58 = vld [vmem:[#allocation84_spill] sm:$0xff] }
 0x389   : > { %16411 = vst [vmem:[#allocation131_spill] sm:$0xff] %v13648_v24  ;;  %v4501_v37 = vmul.f32 0.00390625, %v4485_v54  ;;  %v7611_v1 = vmax.f32 %v7291_v13, 0.0  ;;  %v7402_v45 = vadd.f32 %v7401_v28, %v10864_v53  ;;  %v7403_v20 = vpop.f32.mrb[62].mxu1  ;;  %5542 = vadd.xlane.f32.xlu1 %v16414_v43  ;;  %v13662_v17 = vpop.xlane.xlu0 %3433  ;;  %v16416_v13 = vld [vmem:[#allocation68_spill] sm:$0xff]  ;;  %v16418_v43 = vld [vmem:[#allocation46_spill] sm:$0xff] }
 0x38a   : > { %v13664_v25 = vadd.f32 %v7606_v42, %v7605_v40  ;;  %v7607_v32 = vmax.f32 %v7400_v34, 0.0  ;;  %v7612_v62 = vmax.f32 %v7293_v56, 0.0  ;;  %v7404_v35 = vadd.f32 %v7403_v20, %v10866_v57  ;;  %v7405_v22 = vpop.f32.mrb[63].mxu1  ;;  %v13667_v26 = vpop.xlane.xlu1 %3424  ;;  %v16420_v20 = vld [vmem:[#allocation24_spill] sm:$0xff] }
 0x38b   : > { %v7608_v4 = vmax.f32 %v7402_v45, 0.0  ;;  %v7406_v19 = vadd.f32 %v7405_v22, %v10866_v57  ;;  %v13672_v54 = vsel %vm1153_vm3, %v9337_v46, %v13662_v17  ;;  %v1316_v28 = vand.u32 65535, %v16416_v13  ;;  %v16422_v13 = vld [vmem:[#allocation20_spill] sm:$0xff] }
 0x38c   : > { %16415 = vst [vmem:[#allocation49_spill] sm:$0xff] %v13664_v25  ;;  %v9334_v40 = vsel %vm1136_vm2, %v16418_v43, %v16417_v58  ;;  %v13678_v42 = vadd.f32 %v7612_v62, %v7611_v1  ;;  %v7613_v34 = vmax.f32 %v7404_v35, 0.0  ;;  %v7442_v56 = vpop.f32.mrb[64].mxu0  ;;  %5557 = vadd.xlane.f32.xlu0 %v16420_v20  ;;  %v4514_v45 = vsel %vm13361_vm4, %v4496_v59, -3.4028235e+38 }
 0x38d   : > { %v13683_v22 = vadd.f32 %v7608_v4, %v7607_v32  ;;  %v7614_v25 = vmax.f32 %v7406_v19, 0.0  ;;  %v13687_v46 = vsel %vm1153_vm3, %v9334_v40, %v13667_v26  ;;  %6547 = vadd.xlane.f32.xlu1 %v16422_v13  ;;  %v7444_v24 = vpop.f32.mrb[65].mxu0  ;;  %v5444_v58 = vpop.xlane.xlu0 %5443  ;;  %v7443_v1 = vadd.f32 %v7442_v56, %v10716_v12 }
 0x38e   : > { %16419 = vst [vmem:[#allocation95_spill] sm:$0xff] %v13678_v42  ;;  %v7445_v62 = vadd.f32 %v7444_v24, %v10716_v12  ;;  %v5435_v35 = vpop.xlane.xlu1 %5434  ;;  %v7446_v43 = vpop.f32.mrb[66].mxu0  ;;  %v4519_v59 = vsel %vm13361_vm4, %v4501_v37, -3.4028235e+38  ;;  %v4542_v20 = vsel %vm1204_vm5, %v4514_v45, -inf  ;;  %v1318_v13 = vcvt.s32.f32 %v1316_v28 }
 0x38f   : > { %16421 = vst [vmem:[#allocation68_spill] sm:$0xff] %v13683_v22  ;;  %v13694_v32 = vadd.f32 %v7614_v25, %v7613_v34  ;;  %v7447_v4 = vadd.f32 %v7446_v43, %v10726_v15  ;;  %v8317_v19 = vpop.f32.mrb[64].mxu1  ;;  %v7448_v40 = vpop.f32.mrb[67].mxu0  ;;  %v7525_v42 = vmax.f32 %v7443_v1, 0.0  ;;  %v4557_v43 = vsel %vm1204_vm5, %v4519_v59, -inf  ;;  %v16429_v59 = vld [vmem:[#allocation41_spill] sm:$0xff] }
 0x390   : > { %v7526_v22 = vmax.f32 %v7445_v62, 0.0  ;;  %v8318_v56 = vadd.f32 %v8317_v19, %v10716_v12  ;;  %v7449_v24 = vadd.f32 %v7448_v40, %v10726_v15  ;;  %v8319_v16 = vpop.f32.mrb[65].mxu1  ;;  %6562 = vadd.xlane.f32.xlu0 %v16424_v21 }
 0x391   : > { %16423 = vst [vmem:[#allocation84_spill] sm:$0xff] %v13694_v32  ;;  %v7531_v47 = vmax.f32 %v7447_v4, 0.0  ;;  %v8320_v37 = vadd.f32 %v8319_v16, %v10716_v12  ;;  %v8321_v25 = vpop.f32.mrb[66].mxu1  ;;  %4543 = vmax.xlane.f32.xlu1 %v4542_v20  ;;  %v5492_v34 = vpop.xlane.xlu0 %5491  ;;  %v16425_v32 = vld [vmem:[#allocation72_spill] sm:$0xff] }
 0x392   : > { %v1331_v45 = vand.u32 65535, %v16425_v32  ;;  %v13704_v28 = vadd.f32 %v7526_v22, %v7525_v42  ;;  %v8622_v1 = vmax.f32 %v8318_v56, 0.0  ;;  %v7532_v62 = vmax.f32 %v7449_v24, 0.0  ;;  %v8323_v40 = vpop.f32.mrb[67].mxu1  ;;  %v5483_v41 = vpop.xlane.xlu1 %5482  ;;  %v16430_v20 = vld [vmem:[#allocation12_spill] sm:$0xff]  ;;  %v16432_v24 = vld [vmem:[#allocation71_spill] sm:$0xff] }
 0x393   : > { %v8322_v19 = vadd.f32 %v8321_v25, %v10726_v15  ;;  %v8623_v38 = vmax.f32 %v8320_v37, 0.0  ;;  %v8324_v21 = vadd.f32 %v8323_v40, %v10726_v15  ;;  %v13709_v16 = vsel %vm1136_vm2, %v5444_v58, %v5492_v34 }
 0x394   : > { %16426 = vst [vmem:[#allocation46_spill] sm:$0xff] %v13704_v28  ;;  %16427 = vst [vmem:[#allocation24_spill] sm:$0xff] %v13709_v16  ;;  %v13712_v4 = vsel %vm1136_vm2, %v5435_v35, %v5483_v41  ;;  %v9339_v42 = vsel %vm1136_vm2, %v16430_v20, %v16429_v59  ;;  %v13717_v22 = vadd.f32 %v7532_v62, %v7531_v47  ;;  %v7452_v56 = vpop.f32.mrb[68].mxu0  ;;  %4558 = vmax.xlane.f32.xlu0 %v4557_v43  ;;  %v16434_v35 = vld [vmem:[#allocation34_spill] sm:$0xff]  ;;  %v16435_v47 = vld [vmem:[#allocation48_spill] sm:$0xff] }
 0x395   : > { %16428 = vst [vmem:[#allocation20_spill] sm:$0xff] %v13712_v4  ;;  %v8628_v32 = vmax.f32 %v8322_v19, 0.0  ;;  %vm1322_vm8 = vcmp.eq.f32.partialorder %v16432_v24, %v13437_v61  ;;  %v4498_v37 = vmul.f32 0.00390625, %v13345_v52  ;;  %v13722_v25 = vadd.f32 %v8623_v38, %v8622_v1  ;;  %5548 = vadd.xlane.f32.xlu1 %v16434_v35  ;;  %v7454_v34 = vpop.f32.mrb[69].mxu0  ;;  %v3440_v40 = vpop.xlane.xlu0 %3439 }
 0x396   : > { %16431 = vst [vmem:[#allocation103_spill] sm:$0xff] %v13717_v22  ;;  %v8629_v58 = vmax.f32 %v8324_v21, 0.0  ;;  %v7453_v41 = vadd.f32 %v7452_v56, %v16129_v44  ;;  %v9336_v62 = vsel %vm1136_vm2, %v16435_v47, %v12781_v55  ;;  %v7455_v43 = vadd.f32 %v7454_v34, %v16129_v44  ;;  %v13733_v59 = vpop.xlane.xlu1 %3430  ;;  %v7456_v52 = vpop.f32.mrb[70].mxu0 }
 0x397   : > { %16433 = vst [vmem:[#allocation72_spill] sm:$0xff] %v13722_v25  ;;  %v13731_v19 = vsel %vm1153_vm3, %v9339_v42, %v3440_v40  ;;  %v13739_v21 = vsel %vm1153_vm3, %v9336_v62, %v13733_v59  ;;  %v8327_v20 = vpop.f32.mrb[68].mxu1  ;;  %v7458_v56 = vpop.f32.mrb[71].mxu0  ;;  %v1323_v55 = vsel %vm1322_vm8, %v1318_v13, inf  ;;  %v7457_v42 = vadd.f32 %v7456_v52, %v10742_v51  ;;  %v16438_v62 = vld [vmem:[#allocation99_spill] sm:$0xff] }
 0x398   : > { %v13735_v38 = vadd.f32 %v8629_v58, %v8628_v32  ;;  %v7537_v1 = vmax.f32 %v7453_v41, 0.0  ;;  %v7538_v35 = vmax.f32 %v7455_v43, 0.0  ;;  %v8328_v34 = vadd.f32 %v8327_v20, %v16129_v44  ;;  %v8329_v40 = vpop.f32.mrb[69].mxu1  ;;  %1324 = vmin.xlane.f32.xlu0 %v1323_v55  ;;  %v16437_v32 = vld [vmem:[#allocation78_spill] sm:$0xff] }
 0x399   : > { %vm1337_vm9 = vcmp.eq.f32.partialorder %v16437_v32, %v13470_v3  ;;  %v7459_v58 = vadd.f32 %v7458_v56, %v10742_v51  ;;  %v8330_v41 = vadd.f32 %v8329_v40, %v16129_v44  ;;  %v8331_v47 = vpop.f32.mrb[70].mxu1  ;;  %6553 = vadd.xlane.f32.xlu1 %v16438_v62  ;;  %v1333_v24 = vcvt.s32.f32 %v1331_v45 }
 0x39a   : > { %16436 = vst [vmem:[#allocation41_spill] sm:$0xff] %v13735_v38  ;;  %v5450_v38 = vpop.xlane.xlu0 %5449  ;;  %v4516_v13 = vsel %vm13361_vm4, %v4498_v37, -3.4028235e+38  ;;  %v13753_v43 = vadd.f32 %v7538_v35, %v7537_v1  ;;  %v7543_v52 = vmax.f32 %v7457_v42, 0.0  ;;  %v8634_v20 = vmax.f32 %v8328_v34, 0.0  ;;  %v8333_v28 = vpop.f32.mrb[71].mxu1 }
 0x39b   : > { %v8332_v55 = vadd.f32 %v8331_v47, %v10742_v51  ;;  %v5441_v22 = vpop.xlane.xlu1 %5440  ;;  %v7544_v25 = vmax.f32 %v7459_v58, 0.0  ;;  %v8635_v56 = vmax.f32 %v8330_v41, 0.0  ;;  %v8334_v40 = vadd.f32 %v8333_v28, %v10742_v51 }
 0x39c   : > { %16439 = vst [vmem:[#allocation12_spill] sm:$0xff] %v13753_v43  ;;  %v1338_v62 = vsel %vm1337_vm9, %v1333_v24, inf  ;;  %v7462_v61 = vpop.f32.mrb[72].mxu0  ;;  %v4548_v37 = vsel %vm1204_vm5, %v4516_v13, -inf }
 0x39d   : > { %v8640_v45 = vmax.f32 %v8332_v55, 0.0  ;;  %1339 = vmin.xlane.f32.xlu0 %v1338_v62  ;;  %v13761_v1 = vadd.f32 %v7544_v25, %v7543_v52  ;;  %v13763_v35 = vadd.f32 %v8635_v56, %v8634_v20  ;;  %v8641_v42 = vmax.f32 %v8334_v40, 0.0  ;;  %4549 = vmax.xlane.f32.xlu1 %v4548_v37  ;;  %v7464_v58 = vpop.f32.mrb[73].mxu0 }
 0x39e   : > { %v7463_v34 = vadd.f32 %v7462_v61, %v16074_v39  ;;  %v5498_v41 = vpop.xlane.xlu0 %5497  ;;  %v7465_v28 = vadd.f32 %v7464_v58, %v16074_v39  ;;  %v7466_v24 = vpop.f32.mrb[74].mxu0  ;;  %v4500_v56 = vmul.f32 0.00390625, %v13421_v63  ;;  %v16445_v58 = vld [vmem:[#allocation55_spill] sm:$0xff] }
 0x39f   : > { %16440 = vst [vmem:[#allocation71_spill] sm:$0xff] %v13761_v1  ;;  %16441 = vst [vmem:[#allocation34_spill] sm:$0xff] %v13763_v35  ;;  %v13768_v32 = vsel %vm1136_vm2, %v5450_v38, %v5498_v41  ;;  %v5489_v47 = vpop.xlane.xlu1 %5488  ;;  %v13770_v55 = vadd.f32 %v8641_v42, %v8640_v45  ;;  %v7467_v52 = vadd.f32 %v7466_v24, %v16075_v23  ;;  %v8337_v20 = vpop.f32.mrb[72].mxu1  ;;  %v16446_v45 = vld [vmem:[#allocation29_spill] sm:$0xff]  ;;  %v16447_v42 = vld [vmem:[#allocation54_spill] sm:$0xff] }
 0x3a0   : > { %16442 = vst [vmem:[#allocation48_spill] sm:$0xff] %v13768_v32  ;;  %v7549_v13 = vmax.f32 %v7463_v34, 0.0  ;;  %v13773_v25 = vsel %vm1136_vm2, %v5441_v22, %v5489_v47  ;;  %v7468_v61 = vpop.f32.mrb[75].mxu0  ;;  %v7550_v40 = vmax.f32 %v7465_v28, 0.0  ;;  %v8338_v62 = vadd.f32 %v8337_v20, %v16074_v39  ;;  %v8339_v37 = vpop.f32.mrb[73].mxu1  ;;  %v16448_v22 = vld [vmem:[#allocation36_spill] sm:$0xff] }
 0x3a1   : > { %16443 = vst [vmem:[#allocation78_spill] sm:$0xff] %v13770_v55  ;;  %16444 = vst [vmem:[#allocation99_spill] sm:$0xff] %v13773_v25  ;;  %v7469_v38 = vadd.f32 %v7468_v61, %v16075_v23  ;;  %6568 = vadd.xlane.f32.xlu0 %v16445_v58  ;;  %v9338_v34 = vsel %vm1136_vm2, %v16447_v42, %v16446_v45  ;;  %v16449_v41 = vld [vmem:[#allocation33_spill] sm:$0xff]  ;;  %v7555_v24 = vmax.f32 %v7467_v52, 0.0  ;;  %v8341_v63 = vpop.f32.mrb[74].mxu1  ;;  %v16450_v28 = vld [vmem:[#allocation47_spill] sm:$0xff] }
 0x3a2   : > { %v9341_v47 = vsel %vm1136_vm2, %v16449_v41, %v16448_v22  ;;  %v8340_v55 = vadd.f32 %v8339_v37, %v16074_v39  ;;  %5554 = vadd.xlane.f32.xlu1 %v16450_v28  ;;  %v3446_v20 = vpop.xlane.xlu0 %3445  ;;  %v13788_v43 = vadd.f32 %v7550_v40, %v7549_v13  ;;  %v8646_v61 = vmax.f32 %v8338_v62, 0.0  ;;  %v8343_v35 = vpop.f32.mrb[75].mxu1  ;;  %v16454_v62 = vld [vmem:[#allocation104_spill] sm:$0xff]  ;;  %v16519_v32 = vld [vmem:[#allocation118_spill] sm:$0xff] }
 0x3a3   : > { %v7556_v1 = vmax.f32 %v7469_v38, 0.0  ;;  %v8342_v58 = vadd.f32 %v8341_v63, %v16075_v23  ;;  %v3437_v25 = vpop.xlane.xlu1 %3436  ;;  %v8344_v42 = vadd.f32 %v8343_v35, %v16075_v23  ;;  %v13793_v22 = vsel %vm1153_vm3, %v9341_v47, %v3446_v20  ;;  %v16456_v63 = vld [vmem:[#allocation102_spill] sm:$0xff] }
 0x3a4   : > { %16451 = vst [vmem:[#allocation55_spill] sm:$0xff] %v13788_v43  ;;  %v8647_v45 = vmax.f32 %v8340_v55, 0.0  ;;  %v13796_v52 = vsel %vm1153_vm3, %v9338_v34, %v3437_v25  ;;  %v4503_v37 = vmul.f32 0.00390625, %v13444_v33  ;;  %v7472_v40 = vpop.f32.mrb[76].mxu0  ;;  %v4518_v38 = vsel %vm13361_vm4, %v4500_v56, -3.4028235e+38 }
 0x3a5   : > { %16452 = vst [vmem:[#allocation29_spill] sm:$0xff] %v13796_v52  ;;  %v13799_v41 = vadd.f32 %v7556_v1, %v7555_v24  ;;  %v8652_v13 = vmax.f32 %v8342_v58, 0.0  ;;  %6613 = vadd.xlane.f32.xlu0 %v16454_v62  ;;  %v8653_v35 = vmax.f32 %v8344_v42, 0.0  ;;  %v7473_v47 = vadd.f32 %v7472_v40, %v16084_v6  ;;  %v7474_v25 = vpop.f32.mrb[77].mxu0  ;;  %v16526_v52 = vld [vmem:[#allocation69_spill] sm:$0xff] }
 0x3a6   : > { %v13804_v55 = vadd.f32 %v8647_v45, %v8646_v61  ;;  %6559 = vadd.xlane.f32.xlu1 %v16456_v63  ;;  %v5456_v34 = vpop.xlane.xlu0 %5455  ;;  %v7475_v33 = vadd.f32 %v7474_v25, %v16084_v6  ;;  %v7476_v24 = vpop.f32.mrb[78].mxu0  ;;  %v4554_v61 = vsel %vm1204_vm5, %v4518_v38, -inf  ;;  %v4521_v25 = vsel %vm13361_vm4, %v4503_v37, -3.4028235e+38 }
 0x3a7   : > { %16453 = vst [vmem:[#allocation54_spill] sm:$0xff] %v13799_v41  ;;  %v5447_v1 = vpop.xlane.xlu1 %5446  ;;  %v13809_v28 = vadd.f32 %v8653_v35, %v8652_v13  ;;  %v7561_v20 = vmax.f32 %v7473_v47, 0.0  ;;  %v7477_v58 = vadd.f32 %v7476_v24, %v16086_v30  ;;  %v8347_v62 = vpop.f32.mrb[76].mxu1  ;;  %v4502_v13 = vmul.f32 0.00390625, %v13493_v48 }
 0x3a8   : > { %16455 = vst [vmem:[#allocation36_spill] sm:$0xff] %v13804_v55  ;;  %v7478_v56 = vpop.f32.mrb[79].mxu0  ;;  %v7562_v45 = vmax.f32 %v7475_v33, 0.0  ;;  %v8348_v42 = vadd.f32 %v8347_v62, %v16084_v6  ;;  %v8349_v63 = vpop.f32.mrb[77].mxu1  ;;  %v4505_v55 = vmul.f32 0.00390625, %v13474_v49 }
 0x3a9   : > { %16457 = vst [vmem:[#allocation33_spill] sm:$0xff] %v13809_v28  ;;  %v7479_v40 = vadd.f32 %v7478_v56, %v16086_v30  ;;  %6616 = vadd.xlane.f32.xlu0 %v13074_v9  ;;  %v7567_v35 = vmax.f32 %v7477_v58, 0.0  ;;  %v8350_v47 = vadd.f32 %v8349_v63, %v16084_v6  ;;  %v8351_v24 = vpop.f32.mrb[78].mxu1  ;;  %v4563_v58 = vsel %vm1204_vm5, %v4521_v25, -inf  ;;  %v16461_v63 = vld [vmem:[#allocation26_spill] sm:$0xff] }
 0x3aa   : > { %4555 = vmax.xlane.f32.xlu1 %v4554_v61  ;;  %v5504_v28 = vpop.xlane.xlu0 %5503  ;;  %v13820_v38 = vadd.f32 %v7562_v45, %v7561_v20  ;;  %v8658_v33 = vmax.f32 %v8348_v42, 0.0  ;;  %v8352_v56 = vadd.f32 %v8351_v24, %v16086_v30  ;;  %v8353_v43 = vpop.f32.mrb[79].mxu1  ;;  %v16462_v61 = vld [vmem:[#allocation64_spill] sm:$0xff]  ;;  %v4520_v25 = vsel %vm13361_vm4, %v4502_v13, -3.4028235e+38 }
 0x3ab   : > { %v7568_v62 = vmax.f32 %v7479_v40, 0.0  ;;  %v13823_v41 = vpop.xlane.xlu1 %2407  ;;  %v8659_v9 = vmax.f32 %v8350_v47, 0.0  ;;  %v8354_v37 = vadd.f32 %v8353_v43, %v16086_v30  ;;  %v13827_v48 = vsel %vm1136_vm2, %v5456_v34, %v5504_v28  ;;  %v16465_v43 = vld [vmem:[#allocation44_spill] sm:$0xff] }
 0x3ac   : > { %16458 = vst [vmem:[#allocation47_spill] sm:$0xff] %v13820_v38  ;;  %16459 = vst [vmem:[#allocation104_spill] sm:$0xff] %v13823_v41  ;;  %v9343_v20 = vsel %vm1136_vm2, %v16462_v61, %v16461_v63  ;;  %v8664_v42 = vmax.f32 %v8352_v56, 0.0  ;;  %v7482_v40 = vpop.f32.mrb[80].mxu0 }
 0x3ad   : > { %16460 = vst [vmem:[#allocation102_spill] sm:$0xff] %v13827_v48  ;;  %v13833_v45 = vadd.f32 %v7568_v62, %v7567_v35  ;;  %4564 = vmax.xlane.f32.xlu0 %v4563_v58  ;;  %v13835_v24 = vadd.f32 %v8659_v9, %v8658_v33  ;;  %v8665_v38 = vmax.f32 %v8354_v37, 0.0  ;;  %v7483_v47 = vadd.f32 %v7482_v40, %v16305_v0  ;;  %v7484_v34 = vpop.f32.mrb[81].mxu0 }
 0x3ae   : > { %6565 = vadd.xlane.f32.xlu1 %v16465_v43  ;;  %v3452_v28 = vpop.xlane.xlu0 %3451  ;;  %v7485_v35 = vadd.f32 %v7484_v34, %v16305_v0  ;;  %v7486_v33 = vpop.f32.mrb[82].mxu0 }
 0x3af   : > { %16463 = vst [vmem:[#allocation26_spill] sm:$0xff] %v13833_v45  ;;  %16464 = vst [vmem:[#allocation64_spill] sm:$0xff] %v13835_v24  ;;  %v13844_v62 = vsel %vm1153_vm3, %v9343_v20, %v3452_v28  ;;  %v5495_v56 = vpop.xlane.xlu1 %5494  ;;  %v13846_v9 = vadd.f32 %v8665_v38, %v8664_v42  ;;  %v7573_v37 = vmax.f32 %v7483_v47, 0.0  ;;  %v7487_v63 = vadd.f32 %v7486_v33, %v16095_v31  ;;  %v8357_v61 = vpop.f32.mrb[80].mxu1  ;;  %v16469_v20 = vld [vmem:[#allocation108_spill] sm:$0xff] }
 0x3b0   : > { %16466 = vst [vmem:[#allocation44_spill] sm:$0xff] %v13844_v62  ;;  %v13849_v58 = vsel %vm1136_vm2, %v5447_v1, %v5495_v56  ;;  %v7488_v40 = vpop.f32.mrb[83].mxu0  ;;  %v7574_v13 = vmax.f32 %v7485_v35, 0.0  ;;  %v8358_v49 = vadd.f32 %v8357_v61, %v16305_v0  ;;  %v8359_v34 = vpop.f32.mrb[81].mxu1  ;;  %v4560_v28 = vsel %vm1204_vm5, %v4520_v25, -inf  ;;  %v16470_v38 = vld [vmem:[#allocation16_spill] sm:$0xff] }
 0x3b1   : > { %16467 = vst [vmem:[#allocation133_spill] sm:$0xff] %v13846_v9  ;;  %16468 = vst [vmem:[#allocation134_spill] sm:$0xff] %v13849_v58  ;;  %v7489_v43 = vadd.f32 %v7488_v40, %v16095_v31  ;;  %6574 = vadd.xlane.f32.xlu0 %v16469_v20  ;;  %v16471_v42 = vld [vmem:[#allocation60_spill] sm:$0xff]  ;;  %v7579_v1 = vmax.f32 %v7487_v63, 0.0  ;;  %v8360_v56 = vadd.f32 %v8359_v34, %v16305_v0  ;;  %v8361_v33 = vpop.f32.mrb[82].mxu1 }
 0x3b2   : > { %v9340_v47 = vsel %vm1136_vm2, %v16471_v42, %v16470_v38  ;;  %4561 = vmax.xlane.f32.xlu1 %v4560_v28  ;;  %v5462_v9 = vpop.xlane.xlu0 %5461  ;;  %v13860_v35 = vadd.f32 %v7574_v13, %v7573_v37  ;;  %v8670_v61 = vmax.f32 %v8358_v49, 0.0  ;;  %v8362_v40 = vadd.f32 %v8361_v33, %v16095_v31  ;;  %v8363_v24 = vpop.f32.mrb[83].mxu1  ;;  %v16475_v28 = vld [vmem:[#allocation111_spill] sm:$0xff] }
 0x3b3   : > { %v7580_v45 = vmax.f32 %v7489_v43, 0.0  ;;  %v3443_v20 = vpop.xlane.xlu1 %3442  ;;  %v8671_v58 = vmax.f32 %v8360_v56, 0.0  ;;  %v8364_v25 = vadd.f32 %v8363_v24, %v16095_v31  ;;  %v4523_v37 = vsel %vm13361_vm4, %v4505_v55, -3.4028235e+38  ;;  %v16477_v24 = vld [vmem:[#allocation106_spill] sm:$0xff] }
 0x3b4   : > { %16472 = vst [vmem:[#allocation108_spill] sm:$0xff] %v13860_v35  ;;  %v13865_v3 = vsel %vm1153_vm3, %v9340_v47, %v3443_v20  ;;  %v8676_v34 = vmax.f32 %v8362_v40, 0.0  ;;  %v7492_v38 = vpop.f32.mrb[84].mxu0  ;;  %v4504_v13 = vmul.f32 0.00390625, %v13531_v29 }
 0x3b5   : > { %16473 = vst [vmem:[#allocation16_spill] sm:$0xff] %v13865_v3  ;;  %v13867_v63 = vadd.f32 %v7580_v45, %v7579_v1  ;;  %6622 = vadd.xlane.f32.xlu0 %v16475_v28  ;;  %v13873_v49 = vadd.f32 %v8671_v58, %v8670_v61  ;;  %v8677_v43 = vmax.f32 %v8364_v25, 0.0  ;;  %v7493_v42 = vadd.f32 %v7492_v38, %v16101_v5  ;;  %v7494_v47 = vpop.f32.mrb[85].mxu0 }
 0x3b6   : > { %6571 = vadd.xlane.f32.xlu1 %v16477_v24  ;;  %v5510_v56 = vpop.xlane.xlu0 %5509  ;;  %v7495_v45 = vadd.f32 %v7494_v47, %v16101_v5  ;;  %v7496_v40 = vpop.f32.mrb[86].mxu0  ;;  %v4569_v25 = vsel %vm1204_vm5, %v4523_v37, -inf  ;;  %v4522_v37 = vsel %vm13361_vm4, %v4504_v13, -3.4028235e+38 }
 0x3b7   : > { %16474 = vst [vmem:[#allocation60_spill] sm:$0xff] %v13867_v63  ;;  %16476 = vst [vmem:[#allocation111_spill] sm:$0xff] %v13873_v49  ;;  %v13879_v1 = vsel %vm1136_vm2, %v5462_v9, %v5510_v56  ;;  %v13881_v33 = vpop.xlane.xlu1 %2422  ;;  %v13883_v55 = vadd.f32 %v8677_v43, %v8676_v34  ;;  %v7585_v29 = vmax.f32 %v7493_v42, 0.0  ;;  %v7497_v58 = vadd.f32 %v7496_v40, %v16108_v8  ;;  %v8367_v61 = vpop.f32.mrb[84].mxu1  ;;  %v16480_v9 = vld [vmem:[#allocation105_spill] sm:$0xff]  ;;  %v16481_v56 = vld [vmem:[#allocation19_spill] sm:$0xff] }
 0x3b8   : > { %16478 = vst [vmem:[#allocation106_spill] sm:$0xff] %v13879_v1  ;;  %v7498_v20 = vpop.f32.mrb[87].mxu0  ;;  %v7586_v38 = vmax.f32 %v7495_v45, 0.0  ;;  %v8368_v28 = vadd.f32 %v8367_v61, %v16101_v5  ;;  %v8369_v47 = vpop.f32.mrb[85].mxu1  ;;  %v9345_v35 = vsel %vm1136_vm2, %v16481_v56, %v16480_v9  ;;  %v16482_v40 = vld [vmem:[#allocation109_spill] sm:$0xff]  ;;  %v4566_v13 = vsel %vm1204_vm5, %v4522_v37, -inf }
 0x3b9   : > { %16479 = vst [vmem:[#allocation135_spill] sm:$0xff] %v13883_v55  ;;  %v7499_v24 = vadd.f32 %v7498_v20, %v16108_v8  ;;  %4570 = vmax.xlane.f32.xlu0 %v4569_v25  ;;  %v7591_v34 = vmax.f32 %v7497_v58, 0.0  ;;  %v8370_v43 = vadd.f32 %v8369_v47, %v16101_v5  ;;  %v8371_v42 = vpop.f32.mrb[86].mxu1 }
 0x3ba   : > { %6619 = vadd.xlane.f32.xlu1 %v16482_v40  ;;  %v3458_v55 = vpop.xlane.xlu0 %3457  ;;  %v13896_v45 = vadd.f32 %v7586_v38, %v7585_v29  ;;  %v8682_v61 = vmax.f32 %v8368_v28, 0.0  ;;  %v8372_v25 = vadd.f32 %v8371_v42, %v16108_v8  ;;  %v8373_v63 = vpop.f32.mrb[87].mxu1 }
 0x3bb   : > { %v7592_v20 = vmax.f32 %v7499_v24, 0.0  ;;  %v5453_v49 = vpop.xlane.xlu1 %5452  ;;  %v8683_v1 = vmax.f32 %v8370_v43, 0.0  ;;  %v8374_v58 = vadd.f32 %v8373_v63, %v16108_v8  ;;  %v13901_v47 = vsel %vm1153_vm3, %v9345_v35, %v3458_v55 }
 0x3bc   : > { %16483 = vst [vmem:[#allocation105_spill] sm:$0xff] %v13896_v45  ;;  %16484 = vst [vmem:[#allocation19_spill] sm:$0xff] %v13901_v47  ;;  %v8688_v56 = vmax.f32 %v8372_v25, 0.0  ;;  %v7502_v40 = vpop.f32.mrb[88].mxu0  ;;  %v16495_v47 = vld [vmem:[#allocation70_spill] sm:$0xff] }
 0x3bd   : > { %v13903_v9 = vadd.f32 %v7592_v20, %v7591_v34  ;;  %6580 = vadd.xlane.f32.xlu0 %v16486_v7  ;;  %v13907_v29 = vadd.f32 %v8683_v1, %v8682_v61  ;;  %v8689_v38 = vmax.f32 %v8374_v58, 0.0  ;;  %v7503_v28 = vadd.f32 %v7502_v40, %v16112_v27  ;;  %v7504_v24 = vpop.f32.mrb[89].mxu0  ;;  %v16489_v7 = vld [vmem:[#allocation28_spill] sm:$0xff] }
 0x3be   : > { %4567 = vmax.xlane.f32.xlu1 %v4566_v13  ;;  %v13910_v43 = vpop.xlane.xlu0 %5515  ;;  %v7505_v35 = vadd.f32 %v7504_v24, %v16112_v27  ;;  %v7506_v55 = vpop.f32.mrb[90].mxu0 }
 0x3bf   : > { %16485 = vst [vmem:[#allocation109_spill] sm:$0xff] %v13903_v9  ;;  %16487 = vst [vmem:[#allocation112_spill] sm:$0xff] %v13907_v29  ;;  %v13913_v63 = vpop.xlane.xlu1 %2437  ;;  %v13915_v34 = vadd.f32 %v8689_v38, %v8688_v56  ;;  %v7597_v42 = vmax.f32 %v7503_v28, 0.0  ;;  %v8377_v20 = vpop.f32.mrb[88].mxu1  ;;  %v7507_v1 = vadd.f32 %v7506_v55, %v16115_v10  ;;  %v16490_v9 = vld [vmem:[#allocation25_spill] sm:$0xff] }
 0x3c0   : > { %v7508_v25 = vpop.f32.mrb[91].mxu0  ;;  %v7598_v37 = vmax.f32 %v7505_v35, 0.0  ;;  %v8378_v61 = vadd.f32 %v8377_v20, %v16112_v27  ;;  %v8379_v40 = vpop.f32.mrb[89].mxu1 }
 0x3c1   : > { %16488 = vst [vmem:[#allocation136_spill] sm:$0xff] %v13915_v34  ;;  %v7509_v58 = vadd.f32 %v7508_v25, %v16115_v10  ;;  %6628 = vadd.xlane.f32.xlu0 %v16489_v7  ;;  %v8380_v13 = vadd.f32 %v8379_v40, %v16112_v27  ;;  %v8381_v24 = vpop.f32.mrb[90].mxu1  ;;  %v7603_v28 = vmax.f32 %v7507_v1, 0.0  ;;  %v16494_v40 = vld [vmem:[#allocation114_spill] sm:$0xff]  ;;  %v16498_v1 = vld [vmem:[#allocation65_spill] sm:$0xff] }
 0x3c2   : > { %6577 = vadd.xlane.f32.xlu1 %v16490_v9  ;;  %v13923_v56 = vpop.xlane.xlu0 %6520  ;;  %v13925_v38 = vadd.f32 %v7598_v37, %v7597_v42  ;;  %v8694_v35 = vmax.f32 %v8378_v61, 0.0  ;;  %v8383_v55 = vpop.f32.mrb[91].mxu1  ;;  %v8382_v25 = vadd.f32 %v8381_v24, %v16115_v10  ;;  %v9347_v9 = vsel %vm1136_vm2, %v16495_v47, %v16494_v40  ;;  %v16497_v37 = vld [vmem:[#allocation62_spill] sm:$0xff]  ;;  %v16504_v40 = vld [vmem:[#allocation61_spill] sm:$0xff] }
 0x3c3   : > { %16491 = vst [vmem:[#allocation28_spill] sm:$0xff] %v13923_v56  ;;  %v7604_v34 = vmax.f32 %v7509_v58, 0.0  ;;  %v5501_v29 = vpop.xlane.xlu1 %5500  ;;  %v8695_v20 = vmax.f32 %v8380_v13, 0.0  ;;  %v8384_v45 = vadd.f32 %v8383_v55, %v16115_v10  ;;  %v2403_v61 = vand.u32 65535, %v16498_v1  ;;  %v16499_v58 = vld [vmem:[#allocation110_spill] sm:$0xff] }
 0x3c4   : > { %16492 = vst [vmem:[#allocation25_spill] sm:$0xff] %v13925_v38  ;;  %v13930_v7 = vsel %vm1136_vm2, %v5453_v49, %v5501_v29  ;;  %v7512_v42 = vpop.f32.mrb[92].mxu0  ;;  %v2418_v13 = vand.u32 65535, %v16499_v58  ;;  %v8700_v24 = vmax.f32 %v8382_v25, 0.0  ;;  %v16501_v29 = vld [vmem:[#allocation113_spill] sm:$0xff]  ;;  %v16502_v47 = vld [vmem:[#allocation22_spill] sm:$0xff]  ;;  %vm3471_vm10 = vcmp.eq.f32.partialorder %v16504_v40, %v13667_v26 }
 0x3c5   : > { %16493 = vst [vmem:[#allocation137_spill] sm:$0xff] %v13930_v7  ;;  %v13935_v56 = vadd.f32 %v7604_v34, %v7603_v28  ;;  %6586 = vadd.xlane.f32.xlu0 %v16497_v37  ;;  %v13940_v38 = vadd.f32 %v8695_v20, %v8694_v35  ;;  %v8701_v55 = vmax.f32 %v8384_v45, 0.0  ;;  %v7513_v49 = vadd.f32 %v7512_v42, %v10864_v53  ;;  %v7514_v7 = vpop.f32.mrb[93].mxu0  ;;  %v16503_v34 = vld [vmem:[#allocation13_spill] sm:$0xff]  ;;  %v16513_v26 = vld [vmem:[#allocation88_spill] sm:$0xff] }
 0x3c6   : > { %6625 = vadd.xlane.f32.xlu1 %v16501_v29  ;;  %v3464_v48 = vpop.xlane.xlu0 %3463  ;;  %v9342_v28 = vsel %vm1136_vm2, %v16503_v34, %v16502_v47  ;;  %v7515_v37 = vadd.f32 %v7514_v7, %v10864_v53  ;;  %v7516_v45 = vpop.f32.mrb[94].mxu0  ;;  %vm3472_vm11 = vcmp.eq.f32.partialorder %v16513_v26, %v13598_v14 }
 0x3c7   : > { %16496 = vst [vmem:[#allocation114_spill] sm:$0xff] %v13935_v56  ;;  %16500 = vst [vmem:[#allocation70_spill] sm:$0xff] %v13940_v38  ;;  %v13951_v35 = vsel %vm1153_vm3, %v9347_v9, %v3464_v48  ;;  %v3449_v20 = vpop.xlane.xlu1 %3448  ;;  %v13953_v25 = vadd.f32 %v8701_v55, %v8700_v24  ;;  %v7609_v42 = vmax.f32 %v7513_v49, 0.0  ;;  %v7517_v58 = vadd.f32 %v7516_v45, %v10866_v57  ;;  %v8387_v29 = vpop.f32.mrb[92].mxu1  ;;  %v16508_v48 = vld [vmem:[#allocation30_spill] sm:$0xff]  ;;  %v16511_v45 = vld [vmem:[#allocation116_spill] sm:$0xff] }
 0x3c8   : > { %16505 = vst [vmem:[#allocation62_spill] sm:$0xff] %v13951_v35  ;;  %v13956_v1 = vsel %vm1153_vm3, %v9342_v28, %v3449_v20  ;;  %v7518_v47 = vpop.f32.mrb[95].mxu0  ;;  %v7610_v34 = vmax.f32 %v7515_v37, 0.0  ;;  %v8388_v56 = vadd.f32 %v8387_v29, %v10864_v53  ;;  %v8389_v38 = vpop.f32.mrb[93].mxu1  ;;  %v2405_v9 = vcvt.s32.f32 %v2403_v61  ;;  %v16509_v35 = vld [vmem:[#allocation23_spill] sm:$0xff]  ;;  %v16510_v20 = vld [vmem:[#allocation117_spill] sm:$0xff] }
 0x3c9   : > { %16506 = vst [vmem:[#allocation65_spill] sm:$0xff] %v13953_v25  ;;  %16507 = vst [vmem:[#allocation110_spill] sm:$0xff] %v13956_v1  ;;  %v7519_v7 = vadd.f32 %v7518_v47, %v10866_v57  ;;  %6634 = vadd.xlane.f32.xlu0 %v16508_v48  ;;  %v3487_v24 = vsel %vm3471_vm10, %v16509_v35, 3  ;;  %v7615_v55 = vmax.f32 %v7517_v58, 0.0  ;;  %v8390_v49 = vadd.f32 %v8389_v38, %v10864_v53  ;;  %v8391_v28 = vpop.f32.mrb[94].mxu1 }
 0x3ca   : > { %6583 = vadd.xlane.f32.xlu1 %v16510_v20  ;;  %v13968_v37 = vpop.xlane.xlu0 %5521  ;;  %v2433_v29 = vand.u32 65535, %v16511_v45  ;;  %v13971_v47 = vadd.f32 %v7610_v34, %v7609_v42  ;;  %v8706_v25 = vmax.f32 %v8388_v56, 0.0  ;;  %v8392_v61 = vadd.f32 %v8391_v28, %v10866_v57  ;;  %v8393_v1 = vpop.f32.mrb[95].mxu1  ;;  %v16515_v34 = vld [vmem:[#allocation121_spill] sm:$0xff] }
 0x3cb   : > { %v7616_v48 = vmax.f32 %v7519_v7, 0.0  ;;  %v13974_v3 = vpop.xlane.xlu1 %2452  ;;  %v8707_v38 = vmax.f32 %v8390_v49, 0.0  ;;  %v8394_v40 = vadd.f32 %v8393_v1, %v10866_v57  ;;  %v13979_v58 = vcvt.s32.f32 %v2418_v13  ;;  %v16517_v7 = vld [vmem:[#allocation119_spill] sm:$0xff] }
 0x3cc   : > { %16512 = vst [vmem:[#allocation113_spill] sm:$0xff] %v13971_v47  ;;  %v8712_v45 = vmax.f32 %v8392_v61, 0.0  ;;  %v8430_v42 = vpop.f32.mrb[96].mxu0  ;;  %v13985_v56 = vsel %vm1204_vm5, %v3487_v24, 2147483647  ;;  %v16522_v61 = vld [vmem:[#allocation76_spill] sm:$0xff] }
 0x3cd   : > { %v13981_v20 = vadd.f32 %v7616_v48, %v7615_v55  ;;  %6592 = vadd.xlane.f32.xlu0 %v16515_v34  ;;  %16516 = vst [vmem:[#allocation13_spill] sm:$0xff] %v13985_v56  ;;  %v13988_v47 = vadd.f32 %v8707_v38, %v8706_v25  ;;  %v8713_v4 = vmax.f32 %v8394_v40, 0.0  ;;  %v8431_v49 = vadd.f32 %v8430_v42, %v10716_v12  ;;  %v8432_v13 = vpop.f32.mrb[97].mxu0  ;;  %v16521_v48 = vld [vmem:[#allocation79_spill] sm:$0xff] }
 0x3ce   : > { %6631 = vadd.xlane.f32.xlu1 %v16519_v32  ;;  %v13992_v1 = vpop.xlane.xlu0 %6526  ;;  %v13994_v55 = vcvt.s32.f32 %v2433_v29  ;;  %v9349_v34 = vsel %vm1136_vm2, %v16522_v61, %v16521_v48  ;;  %v3488_v25 = vsel %vm3472_vm11, %v16509_v35, 3  ;;  %v8433_v24 = vadd.f32 %v8432_v13, %v10716_v12  ;;  %v8434_v40 = vpop.f32.mrb[98].mxu0  ;;  %v16523_v32 = vld [vmem:[#allocation107_spill] sm:$0xff] }
 0x3cf   : > { %16514 = vst [vmem:[#allocation22_spill] sm:$0xff] %v13981_v20  ;;  %16518 = vst [vmem:[#allocation61_spill] sm:$0xff] %v13988_v47  ;;  %v5459_v38 = vpop.xlane.xlu1 %5458  ;;  %vm2409_vm12 = vcmp.eq.f32.partialorder %v16523_v32, %v13823_v41  ;;  %v14006_v42 = vadd.f32 %v8713_v4, %v8712_v45  ;;  %v8624_v29 = vmax.f32 %v8431_v49, 0.0  ;;  %v8435_v28 = vadd.f32 %v8434_v40, %v10726_v15  ;;  %v8436_v20 = vpop.f32.mrb[99].mxu0  ;;  %v16525_v61 = vld [vmem:[#allocation63_spill] sm:$0xff]  ;;  %v16527_v40 = vld [vmem:[#allocation120_spill] sm:$0xff] }
 0x3d0   : > { %16520 = vst [vmem:[#allocation30_spill] sm:$0xff] %v13992_v1  ;;  %v8543_v1 = vpop.f32.mrb[96].mxu1  ;;  %v3505_v48 = vshra.s32 %v13985_v56, 16  ;;  %vm3473_vm13 = vcmp.eq.f32.partialorder %v16525_v61, %v13733_v59  ;;  %v8625_v14 = vmax.f32 %v8433_v24, 0.0  ;;  %v8437_v13 = vadd.f32 %v8436_v20, %v10726_v15  ;;  %v16528_v24 = vld [vmem:[#allocation115_spill] sm:$0xff]  ;;  %v16536_v61 = vld [vmem:[#allocation52_spill] sm:$0xff] }
 0x3d1   : > { %16524 = vst [vmem:[#allocation23_spill] sm:$0xff] %v14006_v42  ;;  %v8544_v26 = vadd.f32 %v8543_v1, %v10716_v12  ;;  %v8545_v47 = vpop.f32.mrb[97].mxu1  ;;  %6640 = vadd.xlane.f32.xlu0 %v16526_v52  ;;  %v8630_v4 = vmax.f32 %v8435_v28, 0.0  ;;  %v2410_v56 = vsel %vm2409_vm12, %v2405_v9, inf  ;;  %vm2424_vm14 = vcmp.eq.f32.partialorder %v16528_v24, %v13881_v33  ;;  %v16530_v9 = vld [vmem:[#allocation35_spill] sm:$0xff] }
 0x3d2   : > { %v8546_v45 = vadd.f32 %v8545_v47, %v10716_v12  ;;  %v8547_v49 = vpop.f32.mrb[98].mxu1  ;;  %6589 = vadd.xlane.f32.xlu1 %v16527_v40  ;;  %v3470_v42 = vpop.xlane.xlu0 %3469  ;;  %v14022_v1 = vadd.f32 %v8625_v14, %v8624_v29  ;;  %v8631_v16 = vmax.f32 %v8437_v13, 0.0  ;;  %v16531_v41 = vld [vmem:[#allocation27_spill] sm:$0xff]  ;;  %vm2439_vm4 = vcmp.eq.f32.partialorder %v16536_v61, %v13913_v63 }
 0x3d3   : > { %v8626_v20 = vmax.f32 %v8544_v26, 0.0  ;;  %v8548_v52 = vadd.f32 %v8547_v49, %v10726_v15  ;;  %v8549_v28 = vpop.f32.mrb[99].mxu1  ;;  %v5507_v62 = vpop.xlane.xlu1 %5506  ;;  %v14027_v40 = vsel %vm1153_vm3, %v9349_v34, %v3470_v42  ;;  %v9344_v29 = vsel %vm1136_vm2, %v16531_v41, %v16530_v9 }
 0x3d4   : > { %v8627_v12 = vmax.f32 %v8546_v45, 0.0  ;;  %v8550_v47 = vadd.f32 %v8549_v28, %v10726_v15  ;;  %16529 = vst [vmem:[#allocation117_spill] sm:$0xff] %v14027_v40  ;;  %v14030_v32 = vsel %vm1136_vm2, %v5459_v38, %v5507_v62  ;;  %v14035_v14 = vadd.f32 %v8631_v16, %v8630_v4  ;;  %v8440_v13 = vpop.f32.mrb[100].mxu0  ;;  %v16532_v15 = vld [vmem:[#allocation58_spill] sm:$0xff] }
 0x3d5   : > { %v8632_v26 = vmax.f32 %v8548_v52, 0.0  ;;  %2411 = vmin.xlane.f32.xlu0 %v2410_v56  ;;  %v14038_v49 = vsel %vm1204_vm5, %v3488_v25, 2147483647  ;;  %vm3474_vm15 = vcmp.eq.f32.partialorder %v16532_v15, %v13662_v17  ;;  %v8441_v62 = vadd.f32 %v8440_v13, %v16129_v44  ;;  %v16534_v38 = vld [vmem:[#allocation82_spill] sm:$0xff]  ;;  %v8442_v45 = vpop.f32.mrb[101].mxu0 }
 0x3d6   : > { %v14042_v34 = vadd.f32 %v8627_v12, %v8626_v20  ;;  %v8633_v42 = vmax.f32 %v8550_v47, 0.0  ;;  %6637 = vadd.xlane.f32.xlu1 %v16534_v38  ;;  %v14046_v41 = vpop.xlane.xlu0 %5527  ;;  %v3489_v16 = vsel %vm3473_vm13, %v16509_v35, 3  ;;  %v8443_v56 = vadd.f32 %v8442_v45, %v16129_v44  ;;  %v8444_v4 = vpop.f32.mrb[102].mxu0 }
 0x3d7   : > { %v3455_v25 = vpop.xlane.xlu1 %3454  ;;  %v14053_v52 = vcvt.s32.f32 %v3505_v48  ;;  %v2425_v20 = vsel %vm2424_vm14, %v13979_v58, inf  ;;  %v8636_v12 = vmax.f32 %v8441_v62, 0.0  ;;  %v8553_v9 = vpop.f32.mrb[100].mxu1  ;;  %v8445_v48 = vadd.f32 %v8444_v4, %v10742_v51 }
 0x3d8   : > { %16533 = vst [vmem:[#allocation116_spill] sm:$0xff] %v14042_v34  ;;  %v14059_v28 = vadd.f32 %v8633_v42, %v8632_v26  ;;  %v14062_v47 = vsel %vm1153_vm3, %v9344_v29, %v3455_v25  ;;  %v8446_v59 = vpop.f32.mrb[103].mxu0  ;;  %v8637_v13 = vmax.f32 %v8443_v56, 0.0  ;;  %v8554_v38 = vadd.f32 %v8553_v9, %v16129_v44  ;;  %v8555_v24 = vpop.f32.mrb[101].mxu1 }
 0x3d9   : > { %v8447_v45 = vadd.f32 %v8446_v59, %v10742_v51  ;;  %2426 = vmin.xlane.f32.xlu0 %v2425_v20  ;;  %v3490_v58 = vsel %vm3474_vm15, %v16509_v35, 3  ;;  %v8556_v29 = vadd.f32 %v8555_v24, %v16129_v44  ;;  %v8557_v26 = vpop.f32.mrb[102].mxu1  ;;  %v3520_v62 = vshra.s32 %v14038_v49, 16 }
 0x3da   : > { %16535 = vst [vmem:[#allocation88_spill] sm:$0xff] %v14059_v28  ;;  %3508 = vmin.xlane.f32.xlu1 %v14053_v52  ;;  %v14075_v42 = vpop.xlane.xlu0 %6532  ;;  %v14079_v56 = vsel %vm1204_vm5, %v3489_v16, 2147483647  ;;  %v14081_v25 = vadd.f32 %v8637_v13, %v8636_v12  ;;  %v8642_v4 = vmax.f32 %v8445_v48, 0.0  ;;  %v8638_v20 = vmax.f32 %v8554_v38, 0.0  ;;  %v8559_v59 = vpop.f32.mrb[103].mxu1 }
 0x3db   : > { %16537 = vst [vmem:[#allocation121_spill] sm:$0xff] %v14075_v42  ;;  %v8643_v9 = vmax.f32 %v8447_v45, 0.0  ;;  %v14083_v17 = vpop.xlane.xlu1 %5512  ;;  %v8639_v15 = vmax.f32 %v8556_v29, 0.0  ;;  %v8558_v44 = vadd.f32 %v8557_v26, %v10742_v51  ;;  %v8560_v24 = vadd.f32 %v8559_v59, %v10742_v51  ;;  %v16542_v59 = vld [vmem:[#allocation81_spill] sm:$0xff] }
 0x3dc   : > { %16538 = vst [vmem:[#allocation119_spill] sm:$0xff] %v14081_v25  ;;  %v2440_v40 = vsel %vm2439_vm4, %v13994_v55, inf  ;;  %v8450_v12 = vpop.f32.mrb[104].mxu0  ;;  %v3535_v13 = vshra.s32 %v14079_v56, 16  ;;  %v16540_v48 = vand.u32 65535, %v16517_v7  ;;  %v16543_v55 = vld [vmem:[#allocation31_spill] sm:$0xff] }
 0x3dd   : > { %v14091_v16 = vadd.f32 %v8643_v9, %v8642_v4  ;;  %2441 = vmin.xlane.f32.xlu0 %v2440_v40  ;;  %v14096_v45 = vadd.f32 %v8639_v15, %v8638_v20  ;;  %v8644_v29 = vmax.f32 %v8558_v44, 0.0  ;;  %v8645_v26 = vmax.f32 %v8560_v24, 0.0  ;;  %v8452_v42 = vpop.f32.mrb[105].mxu0  ;;  %v16544_v4 = vld [vmem:[#allocation66_spill] sm:$0xff] }
 0x3de   : > { %v2450_v38 = vcvt.s32.f32 %v16540_v48  ;;  %v8451_v51 = vadd.f32 %v8450_v12, %v16074_v39  ;;  %6595 = vadd.xlane.f32.xlu1 %v16542_v59  ;;  %v14100_v61 = vpop.xlane.xlu0 %4528  ;;  %v9346_v40 = vsel %vm1136_vm2, %v16544_v4, %v16543_v55  ;;  %v8453_v9 = vadd.f32 %v8452_v42, %v16074_v39  ;;  %v8454_v15 = vpop.f32.mrb[106].mxu0 }
 0x3df   : > { %16539 = vst [vmem:[#allocation118_spill] sm:$0xff] %v14091_v16  ;;  %16541 = vst [vmem:[#allocation79_spill] sm:$0xff] %v14096_v45  ;;  %v14109_v7 = vsel %vm1204_vm5, %v13603_v11, %v14100_v61  ;;  %v14111_v20 = vpop.xlane.xlu1 %6517  ;;  %v14114_v44 = vsel %vm1204_vm5, %v3490_v58, 2147483647  ;;  %v14116_v24 = vadd.f32 %v8645_v26, %v8644_v29  ;;  %v8455_v48 = vadd.f32 %v8454_v15, %v16075_v23  ;;  %v8563_v59 = vpop.f32.mrb[104].mxu1  ;;  %v16547_v58 = vld [vmem:[#allocation37_spill] sm:$0xff] }
 0x3e0   : > { %16545 = vst [vmem:[#allocation76_spill] sm:$0xff] %v14109_v7  ;;  %v8648_v12 = vmax.f32 %v8451_v51, 0.0  ;;  %v8456_v55 = vpop.f32.mrb[107].mxu0  ;;  %v14119_v4 = vcvt.s32.f32 %v3520_v62  ;;  %v8649_v42 = vmax.f32 %v8453_v9, 0.0  ;;  %v8564_v45 = vadd.f32 %v8563_v59, %v16074_v39  ;;  %v8565_v7 = vpop.f32.mrb[105].mxu1 }
 0x3e1   : > { %16546 = vst [vmem:[#allocation107_spill] sm:$0xff] %v14116_v24  ;;  %v8457_v11 = vadd.f32 %v8456_v55, %v16075_v23  ;;  %7666 = vadd.xlane.f32.xlu0 %v13408_v36  ;;  %vm2454_vm6 = vcmp.eq.f32.partialorder %v16547_v58, %v13974_v3  ;;  %v8654_v29 = vmax.f32 %v8455_v48, 0.0  ;;  %v8566_v26 = vadd.f32 %v8565_v7, %v16074_v39  ;;  %v8567_v51 = vpop.f32.mrb[106].mxu1 }
 0x3e2   : > { %3523 = vmin.xlane.f32.xlu1 %v14119_v4  ;;  %v14128_v15 = vpop.xlane.xlu0 %5533  ;;  %v14130_v62 = vcvt.s32.f32 %v3535_v13  ;;  %v3550_v9 = vshra.s32 %v14114_v44, 16  ;;  %v14133_v59 = vadd.f32 %v8649_v42, %v8648_v12  ;;  %v8650_v55 = vmax.f32 %v8564_v45, 0.0  ;;  %v8569_v25 = vpop.f32.mrb[107].mxu1 }
 0x3e3   : > { %v8655_v24 = vmax.f32 %v8457_v11, 0.0  ;;  %v8568_v36 = vadd.f32 %v8567_v51, %v16075_v23  ;;  %v3461_v16 = vpop.xlane.xlu1 %3460  ;;  %v8651_v48 = vmax.f32 %v8566_v26, 0.0  ;;  %v8570_v39 = vadd.f32 %v8569_v25, %v16075_v23 }
 0x3e4   : > { %16548 = vst [vmem:[#allocation63_spill] sm:$0xff] %v14133_v59  ;;  %v14138_v7 = vsel %vm1153_vm3, %v9346_v40, %v3461_v16  ;;  %v2455_v13 = vsel %vm2454_vm6, %v2450_v38, inf  ;;  %v8460_v45 = vpop.f32.mrb[108].mxu0  ;;  %v16561_v59 = vld [vmem:[#allocation75_spill] sm:$0xff] }
 0x3e5   : > { %v14143_v34 = vadd.f32 %v8655_v24, %v8654_v29  ;;  %v8656_v12 = vmax.f32 %v8568_v36, 0.0  ;;  %2456 = vmin.xlane.f32.xlu0 %v2455_v13  ;;  %v14145_v42 = vadd.f32 %v8651_v48, %v8650_v55  ;;  %v8657_v11 = vmax.f32 %v8570_v39, 0.0  ;;  %v8462_v23 = vpop.f32.mrb[109].mxu0 }
 0x3e6   : > { %v8461_v26 = vadd.f32 %v8460_v45, %v16084_v6  ;;  %3538 = vmin.xlane.f32.xlu1 %v14130_v62  ;;  %v14149_v25 = vpop.xlane.xlu0 %6538  ;;  %v8463_v16 = vadd.f32 %v8462_v23, %v16084_v6  ;;  %v8464_v38 = vpop.f32.mrb[110].mxu0  ;;  %v14158_v36 = vcvt.s32.f32 %v3550_v9  ;;  %v16553_v23 = vld [vmem:[#allocation126_spill] sm:$0xff] }
 0x3e7   : > { %16549 = vst [vmem:[#allocation69_spill] sm:$0xff] %v14143_v34  ;;  %16550 = vst [vmem:[#allocation120_spill] sm:$0xff] %v14145_v42  ;;  %v14152_v40 = vpop.xlane.xlu1 %5518  ;;  %v14155_v24 = vadd.f32 %v8657_v11, %v8656_v12  ;;  %v8465_v29 = vadd.f32 %v8464_v38, %v16086_v30  ;;  %v8573_v51 = vpop.f32.mrb[108].mxu1 }
 0x3e8   : > { %16551 = vst [vmem:[#allocation115_spill] sm:$0xff] %v14149_v25  ;;  %v8660_v58 = vmax.f32 %v8461_v26, 0.0  ;;  %v8466_v55 = vpop.f32.mrb[111].mxu0  ;;  %v8661_v48 = vmax.f32 %v8463_v16, 0.0  ;;  %v8574_v39 = vadd.f32 %v8573_v51, %v16084_v6  ;;  %v8575_v45 = vpop.f32.mrb[109].mxu1 }
 0x3e9   : > { %16552 = vst [vmem:[#allocation35_spill] sm:$0xff] %v14155_v24  ;;  %v8467_v13 = vadd.f32 %v8466_v55, %v16086_v30  ;;  %7669 = vadd.xlane.f32.xlu0 %v16553_v23  ;;  %v8666_v25 = vmax.f32 %v8465_v29, 0.0  ;;  %v8576_v42 = vadd.f32 %v8575_v45, %v16084_v6  ;;  %v8577_v12 = vpop.f32.mrb[110].mxu1 }
 0x3ea   : > { %3553 = vmin.xlane.f32.xlu1 %v14158_v36  ;;  %v14165_v11 = vpop.xlane.xlu0 %4534  ;;  %v14169_v9 = vadd.f32 %v8661_v48, %v8660_v58  ;;  %v8662_v26 = vmax.f32 %v8574_v39, 0.0  ;;  %v8578_v38 = vadd.f32 %v8577_v12, %v16086_v30  ;;  %v8579_v51 = vpop.f32.mrb[111].mxu1  ;;  %v16557_v48 = vld [vmem:[#allocation91_spill] sm:$0xff] }
 0x3eb   : > { %v8667_v16 = vmax.f32 %v8467_v13, 0.0  ;;  %v14172_v55 = vpop.xlane.xlu1 %6523  ;;  %v8663_v23 = vmax.f32 %v8576_v42, 0.0  ;;  %v8580_v29 = vadd.f32 %v8579_v51, %v16086_v30  ;;  %v14178_v6 = vsel %vm1204_vm5, %v13672_v54, %v14165_v11  ;;  %v16560_v51 = vld [vmem:[#allocation17_spill] sm:$0xff] }
 0x3ec   : > { %16554 = vst [vmem:[#allocation27_spill] sm:$0xff] %v14169_v9  ;;  %16555 = vst [vmem:[#allocation58_spill] sm:$0xff] %v14178_v6  ;;  %v8668_v24 = vmax.f32 %v8578_v38, 0.0  ;;  %v8470_v58 = vpop.f32.mrb[112].mxu0  ;;  %v16559_v9 = vld [vmem:[#allocation80_spill] sm:$0xff]  ;;  %v9348_v54 = vsel %vm1136_vm2, %v16561_v59, %v16560_v51 }
 0x3ed   : > { %v14180_v45 = vadd.f32 %v8667_v16, %v8666_v25  ;;  %7624 = vadd.xlane.f32.xlu0 %v16557_v48  ;;  %v14183_v39 = vadd.f32 %v8663_v23, %v8662_v26  ;;  %v8669_v13 = vmax.f32 %v8580_v29, 0.0  ;;  %v8471_v12 = vadd.f32 %v8470_v58, %v16305_v0  ;;  %v8472_v42 = vpop.f32.mrb[113].mxu0 }
 0x3ee   : > { %7618 = vadd.xlane.f32.xlu1 %v16559_v9  ;;  %v14187_v30 = vpop.xlane.xlu0 %5539  ;;  %v8473_v25 = vadd.f32 %v8472_v42, %v16305_v0  ;;  %v8474_v38 = vpop.f32.mrb[114].mxu0  ;;  %v16563_v42 = vld [vmem:[#allocation86_spill] sm:$0xff] }
 0x3ef   : > { %16556 = vst [vmem:[#allocation82_spill] sm:$0xff] %v14180_v45  ;;  %16558 = vst [vmem:[#allocation52_spill] sm:$0xff] %v14183_v39  ;;  %v3467_v16 = vpop.xlane.xlu1 %3466  ;;  %v14193_v6 = vadd.f32 %v8669_v13, %v8668_v24  ;;  %v8672_v26 = vmax.f32 %v8471_v12, 0.0  ;;  %v8583_v29 = vpop.f32.mrb[112].mxu1  ;;  %v8475_v48 = vadd.f32 %v8474_v38, %v16095_v31  ;;  %v5576_v24 = vsel %vm1153_vm3, %v13514_v50, %v13910_v43 }
 0x3f0   : > { %v14196_v23 = vsel %vm1153_vm3, %v9348_v54, %v3467_v16  ;;  %v8476_v9 = vpop.f32.mrb[115].mxu0  ;;  %v8673_v58 = vmax.f32 %v8473_v25, 0.0  ;;  %v8584_v39 = vadd.f32 %v8583_v29, %v16305_v0  ;;  %v8585_v51 = vpop.f32.mrb[113].mxu1  ;;  %v16564_v54 = vld [vmem:[#allocation125_spill] sm:$0xff]  ;;  %v5607_v25 = vstv %s14167_s23  ;;  %s9627_s23 = sshll.u32 %s292_s22, 4  ;;  %s15749_s23 = int_to_ptr.vmem [resolvable:$true] %s9627_s23 }
 0x3f1   : > { %16562 = vst [vmem:[#allocation81_spill] sm:$0xff] %v14193_v6  ;;  %v8477_v59 = vadd.f32 %v8476_v9, %v16095_v31  ;;  %7675 = vadd.xlane.f32.xlu0 %v16563_v42  ;;  %v8586_v13 = vadd.f32 %v8585_v51, %v16305_v0  ;;  %v8587_v12 = vpop.f32.mrb[114].mxu1  ;;  %v8678_v29 = vmax.f32 %v8475_v48, 0.0  ;;  %v5592_v0 = vmul.f32 0.00390625, %v5576_v24  ;;  %p10204_p5 = scmp.lt.s32.totalorder %s15749_s23, %s10202_s9 }
 0x3f2   : > { %7621 = vadd.xlane.f32.xlu1 %v16564_v54  ;;  %v14207_v16 = vpop.xlane.xlu0 %6544  ;;  %v14210_v38 = vadd.f32 %v8673_v58, %v8672_v26  ;;  %v8674_v6 = vmax.f32 %v8584_v39, 0.0  ;;  %v8589_v45 = vpop.f32.mrb[115].mxu1  ;;  %v8588_v28 = vadd.f32 %v8587_v12, %v16095_v31  ;;  %v16566_v54 = vld [vmem:[#allocation92_spill] sm:$0xff]  ;;  %vm14220_vm7 = vcmp.lt.s32.totalorder %v16509_v35, %v5607_v25 }
 0x3f3   : > { %16565 = vst [vmem:[#allocation31_spill] sm:$0xff] %v14207_v16  ;;  %v8679_v9 = vmax.f32 %v8477_v59, 0.0  ;;  %v14212_v34 = vpop.xlane.xlu1 %5524  ;;  %v8675_v42 = vmax.f32 %v8586_v13, 0.0  ;;  %v8590_v50 = vadd.f32 %v8589_v45, %v16095_v31  ;;  %v16570_v13 = vld [vmem:[#allocation127_spill] sm:$0xff]  ;;  %v16573_v16 = vld [vmem:[#allocation21_spill] sm:$0xff] }
 0x3f4   : > { %v8480_v51 = vpop.f32.mrb[116].mxu0  ;;  %v8680_v58 = vmax.f32 %v8588_v28, 0.0 }
 0x3f5   : > { %v14216_v43 = vadd.f32 %v8679_v9, %v8678_v29  ;;  %7630 = vadd.xlane.f32.xlu0 %v16566_v54  ;;  %v14224_v39 = vadd.f32 %v8675_v42, %v8674_v6  ;;  %v8681_v48 = vmax.f32 %v8590_v50, 0.0  ;;  %v8481_v59 = vadd.f32 %v8480_v51, %v16101_v5  ;;  %v8482_v31 = vpop.f32.mrb[117].mxu0 }
 0x3f6   : > { %7672 = vadd.xlane.f32.xlu1 %v16570_v13  ;;  %v4541_v45 = vpop.xlane.xlu0 %4540  ;;  %v8483_v24 = vadd.f32 %v8482_v31, %v16101_v5  ;;  %v8484_v29 = vpop.f32.mrb[118].mxu0 }
 0x3f7   : > { %16569 = vst [vmem:[#allocation66_spill] sm:$0xff] %v14224_v39  ;;  %v14231_v12 = vsel %vm1204_vm5, %v13731_v19, %v4541_v45  ;;  %v14233_v25 = vpop.xlane.xlu1 %6529  ;;  %v14235_v9 = vadd.f32 %v8681_v48, %v8680_v58  ;;  %v8684_v6 = vmax.f32 %v8481_v59, 0.0  ;;  %v8485_v28 = vadd.f32 %v8484_v29, %v16108_v8  ;;  %v8593_v42 = vpop.f32.mrb[116].mxu1 }
 0x3f8   : > { %16571 = vst [vmem:[#allocation37_spill] sm:$0xff] %v14231_v12  ;;  %v8486_v50 = vpop.f32.mrb[119].mxu0  ;;  %v8685_v51 = vmax.f32 %v8483_v24, 0.0  ;;  %v8594_v54 = vadd.f32 %v8593_v42, %v16101_v5  ;;  %v8595_v31 = vpop.f32.mrb[117].mxu1  ;;  %v14243_v19 = vsel %vm14220_vm7, %v5592_v0, -3.4028235e+38  ;;  %v5575_v58 = vsel %vm1153_vm3, %v13571_v2, %v14083_v17 }
 0x3f9   : > { %16572 = vst [vmem:[#allocation126_spill] sm:$0xff] %v14235_v9  ;;  %v8487_v13 = vadd.f32 %v8486_v50, %v16108_v8  ;;  %7681 = vadd.xlane.f32.xlu0 %v16573_v16  ;;  %v8690_v48 = vmax.f32 %v8485_v28, 0.0  ;;  %v8596_v59 = vadd.f32 %v8595_v31, %v16101_v5  ;;  %v8597_v45 = vpop.f32.mrb[118].mxu1  ;;  %v16574_v24 = vld [vmem:[#allocation40_spill] sm:$0xff]  ;;  %v5628_v5 = vsel %vm1204_vm5, %v14243_v19, -inf }
 0x3fa   : > { %7627 = vadd.xlane.f32.xlu1 %v16574_v24  ;;  %v14250_v29 = vpop.xlane.xlu0 %5545  ;;  %v14252_v42 = vadd.f32 %v8685_v51, %v8684_v6  ;;  %v8686_v50 = vmax.f32 %v8594_v54, 0.0  ;;  %v8598_v12 = vadd.f32 %v8597_v45, %v16108_v8  ;;  %v8599_v0 = vpop.f32.mrb[119].mxu1  ;;  %v5578_v17 = vsel %vm1153_vm3, %v13550_v60, %v13968_v37  ;;  %v16577_v45 = vld [vmem:[#allocation94_spill] sm:$0xff] }
 0x3fb   : > { %v8691_v16 = vmax.f32 %v8487_v13, 0.0  ;;  %v14255_v39 = vpop.xlane.xlu1 %4525  ;;  %v8687_v9 = vmax.f32 %v8596_v59, 0.0  ;;  %v8600_v2 = vadd.f32 %v8599_v0, %v16108_v8  ;;  %v5591_v28 = vmul.f32 0.00390625, %v5575_v58 }
 0x3fc   : > { %v8692_v51 = vmax.f32 %v8598_v12, 0.0  ;;  %v8490_v54 = vpop.f32.mrb[120].mxu0  ;;  %v14270_v8 = vsel %vm1204_vm5, %v13687_v46, %v14255_v39  ;;  %v5594_v0 = vmul.f32 0.00390625, %v5578_v17 }
 0x3fd   : > { %v14263_v6 = vadd.f32 %v8691_v16, %v8690_v48  ;;  %5629 = vmax.xlane.f32.xlu0 %v5628_v5  ;;  %v14265_v13 = vadd.f32 %v8687_v9, %v8686_v50  ;;  %v8693_v31 = vmax.f32 %v8600_v2, 0.0  ;;  %v8491_v59 = vadd.f32 %v8490_v54, %v16112_v27  ;;  %v8492_v24 = vpop.f32.mrb[121].mxu0 }
 0x3fe   : > { %7678 = vadd.xlane.f32.xlu1 %v16577_v45  ;;  %v14274_v60 = vpop.xlane.xlu0 %6550  ;;  %v8493_v37 = vadd.f32 %v8492_v24, %v16112_v27  ;;  %v8494_v58 = vpop.f32.mrb[122].mxu0 }
 0x3ff   : > { %16575 = vst [vmem:[#allocation91_spill] sm:$0xff] %v14263_v6  ;;  %16576 = vst [vmem:[#allocation80_spill] sm:$0xff] %v14265_v13  ;;  %v14277_v12 = vpop.xlane.xlu1 %5530  ;;  %v14279_v9 = vadd.f32 %v8693_v31, %v8692_v51  ;;  %v8696_v48 = vmax.f32 %v8491_v59, 0.0  ;;  %v8495_v50 = vadd.f32 %v8494_v58, %v16115_v10  ;;  %v8603_v16 = vpop.f32.mrb[120].mxu1  ;;  %v16580_v51 = vld [vmem:[#allocation129_spill] sm:$0xff]  ;;  %v16592_v13 = vld [vmem:[#allocation51_spill] sm:$0xff] }
 0x400   : > { %16578 = vst [vmem:[#allocation17_spill] sm:$0xff] %v14274_v60  ;;  %v8496_v46 = vpop.f32.mrb[123].mxu0  ;;  %v8697_v2 = vmax.f32 %v8493_v37, 0.0  ;;  %v8604_v5 = vadd.f32 %v8603_v16, %v16112_v27  ;;  %v8605_v45 = vpop.f32.mrb[121].mxu1  ;;  %v14289_v59 = vsel %vm14220_vm7, %v5591_v28, -3.4028235e+38 }
 0x401   : > { %16579 = vst [vmem:[#allocation75_spill] sm:$0xff] %v14279_v9  ;;  %v8497_v54 = vadd.f32 %v8496_v46, %v16115_v10  ;;  %7636 = vadd.xlane.f32.xlu0 %v13509_v18  ;;  %v8702_v24 = vmax.f32 %v8495_v50, 0.0  ;;  %v8606_v60 = vadd.f32 %v8605_v45, %v16112_v27  ;;  %v8607_v6 = vpop.f32.mrb[122].mxu1 }
 0x402   : > { %7633 = vadd.xlane.f32.xlu1 %v16580_v51  ;;  %v4547_v31 = vpop.xlane.xlu0 %4546  ;;  %v14291_v17 = vadd.f32 %v8697_v2, %v8696_v48  ;;  %v8698_v37 = vmax.f32 %v8604_v5, 0.0  ;;  %v8608_v16 = vadd.f32 %v8607_v6, %v16115_v10  ;;  %v8609_v46 = vpop.f32.mrb[123].mxu1  ;;  %v16584_v48 = vld [vmem:[#allocation96_spill] sm:$0xff]  ;;  %v5625_v2 = vsel %vm1204_vm5, %v14289_v59, -inf }
 0x403   : > { %v8703_v58 = vmax.f32 %v8497_v54, 0.0  ;;  %v14294_v9 = vpop.xlane.xlu1 %6535  ;;  %v8699_v18 = vmax.f32 %v8606_v60, 0.0  ;;  %v8610_v27 = vadd.f32 %v8609_v46, %v16115_v10  ;;  %v14299_v50 = vsel %vm1204_vm5, %v13793_v22, %v4547_v31 }
 0x404   : > { %16581 = vst [vmem:[#allocation86_spill] sm:$0xff] %v14291_v17  ;;  %16582 = vst [vmem:[#allocation125_spill] sm:$0xff] %v14299_v50  ;;  %v8704_v28 = vmax.f32 %v8608_v16, 0.0  ;;  %v8500_v51 = vpop.f32.mrb[124].mxu0  ;;  %v14308_v6 = vsel %vm14220_vm7, %v5594_v0, -3.4028235e+38 }
 0x405   : > { %v14301_v45 = vadd.f32 %v8703_v58, %v8702_v24  ;;  %7687 = vadd.xlane.f32.xlu0 %v16584_v48  ;;  %v14310_v60 = vadd.f32 %v8699_v18, %v8698_v37  ;;  %v8705_v10 = vmax.f32 %v8610_v27, 0.0  ;;  %v8501_v5 = vadd.f32 %v8500_v51, %v10864_v53  ;;  %v8502_v22 = vpop.f32.mrb[125].mxu0  ;;  %v16586_v24 = vld [vmem:[#allocation18_spill] sm:$0xff] }
 0x406   : > { %5626 = vmax.xlane.f32.xlu1 %v5625_v2  ;;  %v14313_v54 = vpop.xlane.xlu0 %5551  ;;  %v5577_v31 = vsel %vm1153_vm3, %v16586_v24, %v14152_v40  ;;  %v8503_v58 = vadd.f32 %v8502_v22, %v10864_v53  ;;  %v8504_v46 = vpop.f32.mrb[126].mxu0  ;;  %v5634_v51 = vsel %vm1204_vm5, %v14308_v6, -inf  ;;  %v16588_v48 = vld [vmem:[#allocation42_spill] sm:$0xff] }
 0x407   : > { %16583 = vst [vmem:[#allocation92_spill] sm:$0xff] %v14301_v45  ;;  %16585 = vst [vmem:[#allocation127_spill] sm:$0xff] %v14310_v60  ;;  %v14319_v16 = vpop.xlane.xlu1 %4531  ;;  %v14321_v0 = vadd.f32 %v8705_v10, %v8704_v28  ;;  %v8708_v37 = vmax.f32 %v8501_v5, 0.0  ;;  %v8613_v18 = vpop.f32.mrb[124].mxu1  ;;  %v5580_v2 = vsel %vm1153_vm3, %v16588_v48, %v14046_v41  ;;  %v8505_v22 = vadd.f32 %v8504_v46, %v10866_v57  ;;  %v16589_v60 = vld [vmem:[#allocation43_spill] sm:$0xff] }
 0x408   : > { %v8506_v27 = vpop.f32.mrb[127].mxu0  ;;  %v8709_v50 = vmax.f32 %v8503_v58, 0.0  ;;  %v14331_v40 = vsel %vm1204_vm5, %v13739_v21, %v14319_v16  ;;  %v8615_v28 = vpop.f32.mrb[125].mxu1  ;;  %v5593_v10 = vmul.f32 0.00390625, %v5577_v31  ;;  %v8614_v5 = vadd.f32 %v8613_v18, %v10864_v53 }
 0x409   : > { %16587 = vst [vmem:[#allocation21_spill] sm:$0xff] %v14321_v0  ;;  %5635 = vmax.xlane.f32.xlu0 %v5634_v51  ;;  %v8507_v24 = vadd.f32 %v8506_v27, %v10866_v57  ;;  %v8616_v0 = vadd.f32 %v8615_v28, %v10864_v53  ;;  %v8617_v45 = vpop.f32.mrb[126].mxu1  ;;  %v8714_v21 = vmax.f32 %v8505_v22, 0.0  ;;  %v1297_v53 = vcvt.f32.s32 %v16592_v13  ;;  %v16597_v13 = vld [vmem:[#allocation44_spill] sm:$0xff] }
 0x40a   : > { %7684 = vadd.xlane.f32.xlu1 %v16589_v60  ;;  %v14338_v41 = vpop.xlane.xlu0 %6556  ;;  %v14340_v58 = vadd.f32 %v8709_v50, %v8708_v37  ;;  %v8618_v48 = vadd.f32 %v8617_v45, %v10866_v57  ;;  %v8619_v46 = vpop.f32.mrb[127].mxu1  ;;  %v8710_v31 = vmax.f32 %v8614_v5, 0.0  ;;  %v5596_v28 = vmul.f32 0.00390625, %v5580_v2  ;;  %v16593_v60 = vld [vmem:[#allocation97_spill] sm:$0xff]  ;;  %v16594_v37 = vld [vmem:[#allocation56_spill] sm:$0xff] }
 0x40b   : > { %16590 = vst [vmem:[#allocation40_spill] sm:$0xff] %v14338_v41  ;;  %v14343_v17 = vpop.xlane.xlu1 %5536  ;;  %v8715_v51 = vmax.f32 %v8507_v24, 0.0  ;;  %v8711_v18 = vmax.f32 %v8616_v0, 0.0  ;;  %v8620_v27 = vadd.f32 %v8619_v46, %v10866_v57  ;;  %v5582_v41 = vsel %vm1153_vm3, %v16593_v60, %v14128_v15  ;;  %v16596_v5 = vld [vmem:[#allocation53_spill] sm:$0xff]  ;;  %v16601_v60 = vld [vmem:[#allocation124_spill] sm:$0xff] }
 0x40c   : > { %16591 = vst [vmem:[#allocation94_spill] sm:$0xff] %v14340_v58  ;;  %v8716_v50 = vmax.f32 %v8618_v48, 0.0  ;;  %v14358_v57 = vsel %vm14220_vm7, %v5593_v10, -3.4028235e+38  ;;  %v16599_v48 = vld [vmem:[#allocation90_spill] sm:$0xff]  ;;  %v16600_v10 = vld [vmem:[#allocation24_spill] sm:$0xff] }
 0x40d   : > { %7642 = vadd.xlane.f32.xlu0 %v16594_v37  ;;  %v14351_v22 = vadd.f32 %v8715_v51, %v8714_v21  ;;  %v14353_v45 = vadd.f32 %v8711_v18, %v8710_v31  ;;  %v8717_v58 = vmax.f32 %v8620_v27, 0.0  ;;  %v5598_v21 = vmul.f32 0.00390625, %v5582_v41 }
 0x40e   : > { %7639 = vadd.xlane.f32.xlu1 %v16596_v5  ;;  %v4553_v0 = vpop.xlane.xlu0 %4552  ;;  %v5631_v46 = vsel %vm1204_vm5, %v14358_v57, -inf  ;;  %v5614_v31 = vsel %vm14220_vm7, %v5596_v28, -3.4028235e+38  ;;  %v1298_v51 = vshll.u32 %v1297_v53, 16  ;;  %v5584_v18 = vsel %vm1153_vm3, %v16600_v10, %v14187_v30 }
 0x40f   : > { %16595 = vst [vmem:[#allocation129_spill] sm:$0xff] %v14351_v22  ;;  %v14362_v2 = vsel %vm1204_vm5, %v16597_v13, %v4553_v0  ;;  %v14364_v15 = vpop.xlane.xlu1 %6541  ;;  %v14366_v24 = vadd.f32 %v8717_v58, %v8716_v50  ;;  %v1312_v37 = vcvt.f32.s32 %v16601_v60  ;;  %v16602_v58 = vld [vmem:[#allocation132_spill] sm:$0xff]  ;;  %v16604_v13 = vld [vmem:[#allocation29_spill] sm:$0xff]  ;;  %v5640_v28 = vsel %vm1204_vm5, %v5614_v31, -inf }
 0x410   : > { %16598 = vst [vmem:[#allocation96_spill] sm:$0xff] %v14362_v2  ;;  %v5579_v41 = vsel %vm1153_vm3, %v16602_v58, %v14212_v34  ;;  %v16603_v50 = vld [vmem:[#allocation100_spill] sm:$0xff]  ;;  %v5600_v30 = vmul.f32 0.00390625, %v5584_v18 }
 0x411   : > { %7693 = vadd.xlane.f32.xlu0 %v16599_v48  ;;  %vm4572_vm8 = vcmp.eq.f32.partialorder %v16603_v50, %v14255_v39  ;;  %v5595_v10 = vmul.f32 0.00390625, %v5579_v41  ;;  %v16605_v34 = vld [vmem:[#allocation48_spill] sm:$0xff]  ;;  %v1313_v50 = vshll.u32 %v1312_v37, 16  ;;  %v16607_v37 = vld [vmem:[#allocation14_spill] sm:$0xff] }
 0x412   : > { %5632 = vmax.xlane.f32.xlu1 %v5631_v46  ;;  %v1295_v27 = vpop.xlane.xlu0 %1294  ;;  %v5616_v46 = vsel %vm14220_vm7, %v5598_v21, -3.4028235e+38  ;;  %v5586_v60 = vsel %vm1153_vm3, %v16605_v34, %v14250_v29  ;;  %v4588_v39 = vsel %vm4572_vm8, %v16509_v35, 3  ;;  %v5618_v41 = vsel %vm14220_vm7, %v5600_v30, -3.4028235e+38  ;;  %v16609_v34 = vld [vmem:[#allocation20_spill] sm:$0xff] }
 0x413   : > { %v1296_v5 = vcvt.f32.s32 %v1295_v27  ;;  %v4538_v0 = vpop.xlane.xlu1 %4537  ;;  %v16606_v27 = vld [vmem:[#allocation130_spill] sm:$0xff]  ;;  %v14401_v29 = vsel %vm1204_vm5, %v4588_v39, 2147483647  ;;  %v5581_v30 = vsel %vm1153_vm3, %v16609_v34, %v14277_v12  ;;  %v16619_v2 = vld [vmem:[#allocation128_spill] sm:$0xff] }
 0x414   : > { %v14384_v53 = vsel %vm1204_vm5, %v16604_v13, %v4538_v0  ;;  %v15993_v0 = vmov 0.0  }
 0x415   : > { %v1299_v48 = vadd.s32 %v1298_v51, %v1296_v5  ;;  %5641 = vmax.xlane.f32.xlu0 %v5640_v28  ;;  %v5646_v51 = vsel %vm1204_vm5, %v5616_v46, -inf  ;;  %v5602_v5 = vmul.f32 0.00390625, %v5586_v60  ;;  %v16608_v46 = vld [vmem:[#allocation87_spill] sm:$0xff] }
 0x416   : > { %7690 = vadd.xlane.f32.xlu1 %v16606_v27  ;;  %v1310_v58 = vpop.xlane.xlu0 %1309  ;;  %vm4573_vm10 = vcmp.eq.f32.partialorder %v16608_v46, %v14100_v61  ;;  %v5652_v27 = vsel %vm1204_vm5, %v5618_v41, -inf  ;;  %v16612_v41 = vld [vmem:[#allocation98_spill] sm:$0xff] }
 0x417   : > { %vm1525_vm9 = vcmp.eq.s32.totalorder %v16509_v35, %v1299_v48  ;;  %v1311_v31 = vcvt.f32.s32 %v1310_v58  ;;  %v14395_v18 = vpop.xlane.xlu1 %5542  ;;  %v5613_v48 = vsel %vm14220_vm7, %v5595_v10, -3.4028235e+38  ;;  %v4606_v58 = vshra.s32 %v14401_v29, 16 }
 0x418   : > { %v1573_v13 = vsel %vm1525_vm9, 1.0, %v15993_v0  ;;  %v5637_v61 = vsel %vm1204_vm5, %v5613_v48, -inf  ;;  %v5620_v12 = vsel %vm14220_vm7, %v5602_v5, -3.4028235e+38  ;;  %vm4574_vm12 = vcmp.eq.f32.partialorder %v16612_v41, %v14319_v16 }
 0x419   : > { %v1314_v21 = vadd.s32 %v1313_v50, %v1311_v31  ;;  %5647 = vmax.xlane.f32.xlu0 %v5646_v51  ;;  %v1589_v50 = vsel %vm1204_vm5, %v1573_v13, 0.0  ;;  %v4589_v31 = vsel %vm4573_vm10, %v16509_v35, 3  ;;  %v5597_v51 = vmul.f32 0.00390625, %v5581_v30  ;;  %v16613_v13 = vld [vmem:[#allocation16_spill] sm:$0xff]  ;;  %v16614_v30 = vld [vmem:[#allocation83_spill] sm:$0xff] }
 0x41a   : > { %7645 = vadd.xlane.f32.xlu1 %v16607_v37  ;;  %v14405_v28 = vpop.xlane.xlu0 %5557  ;;  %v5658_v48 = vsel %vm1204_vm5, %v5620_v12, -inf  ;;  %v14438_v5 = vsel %vm1204_vm5, %v4589_v31, 2147483647  ;;  %v4590_v16 = vsel %vm4574_vm12, %v16509_v35, 3 }
 0x41b   : > { %vm1526_vm11 = vcmp.eq.s32.totalorder %v16509_v35, %v1314_v21  ;;  %v14415_v60 = vpop.xlane.xlu1 %6547  ;;  %v5615_v12 = vsel %vm14220_vm7, %v5597_v51, -3.4028235e+38  ;;  %v1342_v51 = vcvt.f32.s32 %v16619_v2 }
 0x41c   : > { %16610 = vst [vmem:[#allocation18_spill] sm:$0xff] %v14415_v60  ;;  %v1574_v39 = vsel %vm1526_vm11, 1.0, %v15993_v0  ;;  %v16625_v60 = vld [vmem:[#allocation110_spill] sm:$0xff] }
 0x41d   : > { %v1590_v10 = vsel %vm1204_vm5, %v1574_v39, 0.0  ;;  %5653 = vmax.xlane.f32.xlu0 %v5652_v27  ;;  %v14435_v39 = vcvt.s32.f32 %v4606_v58  ;;  %v1327_v27 = vcvt.f32.s32 %v16614_v30  ;;  %v16616_v58 = vld [vmem:[#allocation19_spill] sm:$0xff]  ;;  %v14456_v30 = vsel %vm1204_vm5, %v4590_v16, 2147483647 }
 0x41e   : > { %v1591_v21 = vadd.f32 %v1590_v10, %v1589_v50  ;;  %5638 = vmax.xlane.f32.xlu1 %v5637_v61  ;;  %v14426_v37 = vpop.xlane.xlu0 %6562  ;;  %v16615_v50 = vld [vmem:[#allocation102_spill] sm:$0xff]  ;;  %v4636_v16 = vshra.s32 %v14456_v30, 16 }
 0x41f   : > { %16611 = vst [vmem:[#allocation42_spill] sm:$0xff] %v14426_v37  ;;  %v4544_v46 = vpop.xlane.xlu1 %4543  ;;  %v5588_v10 = vsel %vm1153_vm3, %v16615_v50, %v14313_v54  ;;  %v5643_v54 = vsel %vm1204_vm5, %v5615_v12, -inf  ;;  %v1328_v50 = vshll.u32 %v1327_v27, 16  ;;  %v16620_v37 = vld [vmem:[#allocation89_spill] sm:$0xff]  ;;  %v16623_v27 = vld [vmem:[#allocation103_spill] sm:$0xff] }
 0x420   : > { %v14432_v34 = vsel %vm1204_vm5, %v16613_v13, %v4544_v46  ;;  %v4621_v46 = vshra.s32 %v14438_v5, 16  ;;  %v5604_v13 = vmul.f32 0.00390625, %v5588_v10  ;;  %vm4575_vm13 = vcmp.eq.f32.partialorder %v16620_v37, %v14165_v11 }
 0x421   : > { %5659 = vmax.xlane.f32.xlu0 %v5658_v48  ;;  %v16618_v48 = vld [vmem:[#allocation72_spill] sm:$0xff] }
 0x422   : > { %4609 = vmin.xlane.f32.xlu1 %v14435_v39  ;;  %v4559_v61 = vpop.xlane.xlu0 %4558  ;;  %v5622_v2 = vsel %vm14220_vm7, %v5604_v13, -3.4028235e+38  ;;  %v14481_v13 = vcvt.s32.f32 %v4636_v16 }
 0x423   : > { %v14450_v41 = vsel %vm1204_vm5, %v16616_v58, %v4559_v61  ;;  %v5549_v31 = vpop.xlane.xlu1 %5548  ;;  %v16621_v61 = vld [vmem:[#allocation99_spill] sm:$0xff] }
 0x424   : > { %16617 = vst [vmem:[#allocation43_spill] sm:$0xff] %v14450_v41  ;;  %v5583_v58 = vsel %vm1153_vm3, %v16621_v61, %v14343_v17  ;;  %v1343_v17 = vshll.u32 %v1342_v51, 16  ;;  %v16624_v61 = vmov 0.0  }
 0x425   : > { %8719 = vadd.xlane.f32.xlu0 %v16618_v48  ;;  %v14466_v48 = vcvt.s32.f32 %v4621_v46  ;;  %v5599_v11 = vmul.f32 0.00390625, %v5583_v58 }
 0x426   : > { %5644 = vmax.xlane.f32.xlu1 %v5643_v54  ;;  %v1325_v0 = vpop.xlane.xlu0 %1324  ;;  %v4591_v54 = vsel %vm4575_vm13, %v16509_v35, 3  ;;  %vm9482_vm13 = vcmask 1040384  }
 0x427   : > { %v1326_v10 = vcvt.f32.s32 %v1325_v0  ;;  %v14464_v41 = vpop.xlane.xlu1 %6553  ;;  %v14485_v51 = vsel %vm1204_vm5, %v4591_v54, 2147483647  ;;  %v5617_v16 = vsel %vm14220_vm7, %v5599_v11, -3.4028235e+38 }
 0x428   : > { %16622 = vst [vmem:[#allocation51_spill] sm:$0xff] %v14464_v41 }
 0x429   : > { %v1329_v12 = vadd.s32 %v1328_v50, %v1326_v10  ;;  %7717 = vadd.xlane.f32.xlu0 %v16623_v27  ;;  %v5664_v10 = vsel %vm1204_vm5, %v5622_v2, -inf  ;;  %v16627_v2 = vld [vmem:[#allocation134_spill] sm:$0xff] }
 0x42a   : > { %4624 = vmin.xlane.f32.xlu1 %v14466_v48  ;;  %v1340_v37 = vpop.xlane.xlu0 %1339 }
 0x42b   : > { %vm1527_vm14 = vcmp.eq.s32.totalorder %v16509_v35, %v1329_v12  ;;  %v1341_v0 = vcvt.f32.s32 %v1340_v37  ;;  %v4550_v46 = vpop.xlane.xlu1 %4549  ;;  %v16626_v12 = vld [vmem:[#allocation106_spill] sm:$0xff] }
 0x42c   : > { %v1575_v41 = vsel %vm1527_vm14, 1.0, %v16624_v61  ;;  %v14478_v50 = vsel %vm1204_vm5, %v16625_v60, %v4550_v46  ;;  %v5590_v37 = vsel %vm1153_vm3, %v16626_v12, %v14405_v28  ;;  %v16628_v46 = vld [vmem:[#allocation34_spill] sm:$0xff] }
 0x42d   : > { %v1592_v58 = vsel %vm1204_vm5, %v1575_v41, 0.0  ;;  %v1344_v27 = vadd.s32 %v1343_v17, %v1341_v0  ;;  %5665 = vmax.xlane.f32.xlu0 %v5664_v10  ;;  %v5585_v41 = vsel %vm1153_vm3, %v16627_v2, %v14395_v18  ;;  %v4651_v0 = vshra.s32 %v14485_v51, 16  ;;  %v16630_v2 = vld [vmem:[#allocation71_spill] sm:$0xff] }
 0x42e   : > { %v1593_v22 = vadd.f32 %v1592_v58, %v1591_v21  ;;  %4639 = vmin.xlane.f32.xlu1 %v14481_v13  ;;  %v14491_v60 = vpop.xlane.xlu0 %6568  ;;  %v5606_v28 = vmul.f32 0.00390625, %v5590_v37  ;;  %v5649_v10 = vsel %vm1204_vm5, %v5617_v16, -inf  ;;  %v5601_v58 = vmul.f32 0.00390625, %v5585_v41 }
 0x42f   : > { %vm1528_vm15 = vcmp.eq.s32.totalorder %v16509_v35, %v1344_v27  ;;  %v5555_v54 = vpop.xlane.xlu1 %5554  ;;  %v14508_v27 = vcvt.s32.f32 %v4651_v0 }
 0x430   : > { %v1576_v17 = vsel %vm1528_vm15, 1.0, %v16624_v61  ;;  %v5624_v37 = vsel %vm14220_vm7, %v5606_v28, -3.4028235e+38  ;;  %v5619_v16 = vsel %vm14220_vm7, %v5601_v58, -3.4028235e+38 }
 0x431   : > { %v1594_v21 = vsel %vm1204_vm5, %v1576_v17, 0.0  ;;  %8725 = vadd.xlane.f32.xlu0 %v16628_v46  ;;  %v5670_v46 = vsel %vm1204_vm5, %v5624_v37, -inf  ;;  %v5655_v28 = vsel %vm1204_vm5, %v5619_v16, -inf }
 0x432   : > { %v14504_v11 = vadd.f32 %v1594_v21, %v1593_v22  ;;  %5650 = vmax.xlane.f32.xlu1 %v5649_v10  ;;  %v6614_v12 = vpop.xlane.xlu0 %6613  ;;  %v16631_v22 = vld [vmem:[#allocation137_spill] sm:$0xff] }
 0x433   : > { %v14506_v18 = vpop.xlane.xlu1 %6559  ;;  %v5587_v41 = vsel %vm1153_vm3, %v16631_v22, %v5549_v31  ;;  %v16633_v22 = vld [vmem:[#allocation36_spill] sm:$0xff] }
 0x434   : > { %16629 = vst [vmem:[#allocation97_spill] sm:$0xff] %v14506_v18  ;;  %v5603_v10 = vmul.f32 0.00390625, %v5587_v41 }
 0x435   : > { %7723 = vadd.xlane.f32.xlu0 %v16630_v2 }
 0x436   : > { %4654 = vmin.xlane.f32.xlu1 %v14508_v27  ;;  %v14514_v17 = vpop.xlane.xlu0 %6616  ;;  %v5621_v37 = vsel %vm14220_vm7, %v5603_v10, -3.4028235e+38  ;;  %v16637_v10 = vld [vmem:[#allocation41_spill] sm:$0xff] }
 0x437   : > { %v4556_v21 = vpop.xlane.xlu1 %4555 }
 0x438   : > { %v14522_v0 = vsel %vm1204_vm5, %v14062_v47, %v4556_v21  ;;  %v16634_v47 = vld [vmem:[#allocation46_spill] sm:$0xff] }
 0x439   : > { %5671 = vmax.xlane.f32.xlu0 %v5670_v46  ;;  %v16635_v46 = vld [vmem:[#allocation54_spill] sm:$0xff] }
 0x43a   : > { %5656 = vmax.xlane.f32.xlu1 %v5655_v28  ;;  %v14526_v2 = vpop.xlane.xlu0 %4564 }
 0x43b   : > { %16632 = vst [vmem:[#allocation56_spill] sm:$0xff] %v14526_v2  ;;  %v6566_v18 = vpop.xlane.xlu1 %6565  ;;  %v16658_v2 = vld [vmem:[#allocation104_spill] sm:$0xff] }
 0x43c   : > { %v6660_v58 = vsel %vm1136_vm2, %v14111_v20, %v6566_v18  ;;  %v5661_v20 = vsel %vm1204_vm5, %v5621_v37, -inf  ;;  %v5589_v18 = vsel %vm1153_vm3, %v14030_v32, %v5555_v54 }
 0x43d   : > { %v14531_v31 = vsel %vm1153_vm3, %v6660_v58, %v6614_v12  ;;  %8731 = vadd.xlane.f32.xlu0 %v16633_v22  ;;  %v16636_v58 = vld [vmem:[#allocation64_spill] sm:$0xff]  ;;  %v5605_v22 = vmul.f32 0.00390625, %v5589_v18 }
 0x43e   : > { %7714 = vadd.xlane.f32.xlu1 %v16634_v47  ;;  %v14535_v21 = vpop.xlane.xlu0 %6574 }
 0x43f   : > { %v4562_v16 = vpop.xlane.xlu1 %4561  ;;  %v5623_v54 = vsel %vm14220_vm7, %v5605_v22, -3.4028235e+38 }
 0x440   : > { %v14541_v41 = vsel %vm1204_vm5, %v14138_v7, %v4562_v16 }
 0x441   : > { %7729 = vadd.xlane.f32.xlu0 %v16635_v46  ;;  %v16639_v46 = vld [vmem:[#allocation26_spill] sm:$0xff] }
 0x442   : > { %5662 = vmax.xlane.f32.xlu1 %v5661_v20  ;;  %v14545_v12 = vpop.xlane.xlu0 %6622  ;;  %v16640_v20 = vld [vmem:[#allocation12_spill] sm:$0xff] }
 0x443   : > { %v6572_v28 = vpop.xlane.xlu1 %6571 }
 0x444   : > { %v6662_v7 = vsel %vm1136_vm2, %v14172_v55, %v6572_v28  ;;  %v5667_v55 = vsel %vm1204_vm5, %v5623_v54, -inf  ;;  %v16649_v54 = vld [vmem:[#allocation55_spill] sm:$0xff] }
 0x445   : > { %8737 = vadd.xlane.f32.xlu0 %v16636_v58 }
 0x446   : > { %8722 = vadd.xlane.f32.xlu1 %v16637_v10  ;;  %v14551_v47 = vpop.xlane.xlu0 %4570  ;;  %v16642_v10 = vld [vmem:[#allocation111_spill] sm:$0xff] }
 0x447   : > { %16638 = vst [vmem:[#allocation53_spill] sm:$0xff] %v14551_v47  ;;  %v6620_v16 = vpop.xlane.xlu1 %6619  ;;  %v16651_v47 = vld [vmem:[#allocation105_spill] sm:$0xff] }
 0x448   : > { %v14556_v37 = vsel %vm1153_vm3, %v6662_v7, %v6620_v16  ;;  %v16644_v16 = vld [vmem:[#allocation60_spill] sm:$0xff] }
 0x449   : > { %7735 = vadd.xlane.f32.xlu0 %v16639_v46  ;;  %v16645_v46 = vld [vmem:[#allocation78_spill] sm:$0xff] }
 0x44a   : > { %7720 = vadd.xlane.f32.xlu1 %v16640_v20  ;;  %v14560_v32 = vpop.xlane.xlu0 %6580 }
 0x44b   : > { %16641 = vst [vmem:[#allocation44_spill] sm:$0xff] %v14560_v32  ;;  %v4568_v18 = vpop.xlane.xlu1 %4567 }
 0x44c   : > { %v14566_v58 = vsel %vm1204_vm5, %v14196_v23, %v4568_v18  ;;  %v16648_v18 = vld [vmem:[#allocation15_spill] sm:$0xff] }
 0x44d   : > { %8743 = vadd.xlane.f32.xlu0 %v16642_v10 }
 0x44e   : > { %5668 = vmax.xlane.f32.xlu1 %v5667_v55  ;;  %v14570_v28 = vpop.xlane.xlu0 %6628 }
 0x44f   : > { %16643 = vst [vmem:[#allocation90_spill] sm:$0xff] %v14570_v28  ;;  %v6578_v7 = vpop.xlane.xlu1 %6577 }
 0x450   : > { %v6664_v26 = vsel %vm1136_vm2, %v14233_v25, %v6578_v7 }
 0x451   : > { %7741 = vadd.xlane.f32.xlu0 %v16644_v16  ;;  %v16652_v16 = vld [vmem:[#allocation33_spill] sm:$0xff] }
 0x452   : > { %8728 = vadd.xlane.f32.xlu1 %v16645_v46  ;;  %v14574_v20 = vpop.xlane.xlu0 %6586 }
 0x453   : > { %16646 = vst [vmem:[#allocation24_spill] sm:$0xff] %v14574_v20  ;;  %v6626_v22 = vpop.xlane.xlu1 %6625  ;;  %v16659_v20 = vld [vmem:[#allocation133_spill] sm:$0xff] }
 0x454   : > { %v14579_v23 = vsel %vm1153_vm3, %v6664_v26, %v6626_v22  ;;  %v16655_v22 = vld [vmem:[#allocation39_spill] sm:$0xff] }
 0x455   : > { %16647 = vst [vmem:[#allocation124_spill] sm:$0xff] %v14579_v23  ;;  %7648 = vadd.xlane.f32.xlu0 %v16648_v18  ;;  %v16656_v18 = vld [vmem:[#allocation47_spill] sm:$0xff]  ;;  %v2444_v23 = vcvt.f32.s32 %v13913_v63 }
 0x456   : > { %7726 = vadd.xlane.f32.xlu1 %v16649_v54  ;;  %v14583_v10 = vpop.xlane.xlu0 %6634 }
 0x457   : > { %16650 = vst [vmem:[#allocation132_spill] sm:$0xff] %v14583_v10  ;;  %v6584_v55 = vpop.xlane.xlu1 %6583  ;;  %v2414_v10 = vcvt.f32.s32 %v16658_v2 }
 0x458   : > { %v6666_v25 = vsel %vm1136_vm2, %v14294_v9, %v6584_v55  ;;  %v2429_v9 = vcvt.f32.s32 %v13881_v33 }
 0x459   : > { %7744 = vadd.xlane.f32.xlu0 %v16651_v47  ;;  %v2415_v32 = vshll.u32 %v2414_v10, 16 }
 0x45a   : > { %8734 = vadd.xlane.f32.xlu1 %v16652_v16  ;;  %v14587_v46 = vpop.xlane.xlu0 %6592 }
 0x45b   : > { %16653 = vst [vmem:[#allocation100_spill] sm:$0xff] %v14587_v46  ;;  %v6632_v7 = vpop.xlane.xlu1 %6631  ;;  %v16660_v46 = vld [vmem:[#allocation13_spill] sm:$0xff] }
 0x45c   : > { %v14592_v26 = vsel %vm1153_vm3, %v6666_v25, %v6632_v7  ;;  %v3504_v28 = vand.u32 65535, %v16660_v46 }
 0x45d   : > { %16654 = vst [vmem:[#allocation29_spill] sm:$0xff] %v14592_v26  ;;  %7651 = vadd.xlane.f32.xlu0 %v16655_v22 }
 0x45e   : > { %7732 = vadd.xlane.f32.xlu1 %v16656_v18  ;;  %v14596_v54 = vpop.xlane.xlu0 %6640  ;;  %v3506_v26 = vcvt.s32.f32 %v3504_v28  ;;  %v2445_v28 = vshll.u32 %v2444_v23, 16  ;;  %v2459_v23 = vcvt.f32.s32 %v13974_v3 }
 0x45f   : > { %16657 = vst [vmem:[#allocation48_spill] sm:$0xff] %v14596_v54  ;;  %v6590_v47 = vpop.xlane.xlu1 %6589  ;;  %v16661_v54 = vld [vmem:[#allocation108_spill] sm:$0xff] }
 0x460   : > { %v6668_v55 = vsel %vm1136_vm2, %v14364_v15, %v6590_v47 }
 0x462   : > { %8740 = vadd.xlane.f32.xlu1 %v16659_v20  ;;  %v2412_v16 = vpop.xlane.xlu0 %2411  ;;  %v2430_v20 = vshll.u32 %v2429_v9, 16  ;;  %v3519_v9 = vand.u32 65535, %v14038_v49  ;;  %v3534_v49 = vand.u32 65535, %v14079_v56 }
 0x463   : > { %v2413_v25 = vcvt.f32.s32 %v2412_v16  ;;  %v6638_v7 = vpop.xlane.xlu1 %6637 }
 0x464   : > { %v14605_v22 = vsel %vm1153_vm3, %v6668_v55, %v6638_v7  ;;  %v3536_v56 = vcvt.s32.f32 %v3534_v49 }
 0x465   : > { %v2416_v18 = vadd.s32 %v2415_v32, %v2413_v25  ;;  %v16662_v32 = vld [vmem:[#allocation135_spill] sm:$0xff] }
 0x466   : > { %7738 = vadd.xlane.f32.xlu1 %v16661_v54  ;;  %v2427_v2 = vpop.xlane.xlu0 %2426 }
 0x467   : > { %vm2642_vm4 = vcmp.eq.s32.totalorder %v16509_v35, %v2416_v18  ;;  %v2428_v10 = vcvt.f32.s32 %v2427_v2  ;;  %v14610_v33 = vpop.xlane.xlu1 %3508  ;;  %v16663_v18 = vld [vmem:[#allocation85_spill] sm:$0xff] }
 0x468   : > { %vm3510_vm6 = vcmp.eq.f32.partialorder %v14053_v52, %v14610_v33  ;;  %v2674_v47 = vsel %vm2642_vm4, 1.0, %v16624_v61 }
 0x469   : > { %v2431_v15 = vadd.s32 %v2430_v20, %v2428_v10  ;;  %v3511_v46 = vsel %vm3510_vm6, %v3506_v26, inf  ;;  %v2690_v52 = vsel %vm1204_vm5, %v2674_v47, 0.0  ;;  %v3521_v10 = vcvt.s32.f32 %v3519_v9 }
 0x46a   : > { %8746 = vadd.xlane.f32.xlu1 %v16662_v32  ;;  %3512 = vmin.xlane.f32.xlu0 %v3511_v46  ;;  %v2442_v54 = vpop.xlane.xlu0 %2441 }
 0x46b   : > { %vm2643_vm7 = vcmp.eq.s32.totalorder %v16509_v35, %v2431_v15  ;;  %v2443_v63 = vcvt.f32.s32 %v2442_v54  ;;  %v14617_v16 = vpop.xlane.xlu1 %6595  ;;  %v1620_v15 = vrot.slane %v14504_v11, 4 }
 0x46c   : > { %v2675_v55 = vsel %vm2643_vm7, 1.0, %v16624_v61 }
 0x46d   : > { %v2691_v26 = vsel %vm1204_vm5, %v2675_v55, 0.0  ;;  %v2446_v25 = vadd.s32 %v2445_v28, %v2443_v63  ;;  %v16664_v28 = vld [vmem:[#allocation101_spill] sm:$0xff]  ;;  %v2460_v63 = vshll.u32 %v2459_v23, 16 }
 0x46e   : > { %v2692_v7 = vadd.f32 %v2691_v26, %v2690_v52  ;;  %6643 = vadd.xlane.f32.xlu1 %v16663_v18  ;;  %v7667_v2 = vpop.xlane.xlu0 %7666  ;;  %v3549_v52 = vand.u32 65535, %v14114_v44  ;;  %v1621_v26 = vadd.f32 %v1620_v15, %v14504_v11  ;;  %v16665_v18 = vld [vmem:[#allocation122_spill] sm:$0xff]  ;;  %v16666_v15 = vld [vmem:[#allocation112_spill] sm:$0xff] }
 0x46f   : > { %vm2644_vm8 = vcmp.eq.s32.totalorder %v16509_v35, %v2446_v25  ;;  %v14626_v20 = vpop.xlane.xlu1 %3523 }
 0x470   : > { %v2676_v46 = vsel %vm2644_vm8, 1.0, %v16624_v61  ;;  %vm3525_vm9 = vcmp.eq.f32.partialorder %v14119_v4, %v14626_v20 }
 0x471   : > { %v2693_v47 = vsel %vm1204_vm5, %v2676_v46, 0.0  ;;  %v3526_v32 = vsel %vm3525_vm9, %v3521_v10, inf  ;;  %v3551_v10 = vcvt.s32.f32 %v3549_v52  ;;  %v1622_v46 = vrot.slane %v1621_v26, 2 }
 0x472   : > { %v2694_v54 = vadd.f32 %v2693_v47, %v2692_v7  ;;  %7696 = vadd.xlane.f32.xlu1 %v16664_v28  ;;  %3527 = vmin.xlane.f32.xlu0 %v3526_v32  ;;  %v2457_v3 = vpop.xlane.xlu0 %2456 }
 0x473   : > { %v2458_v55 = vcvt.f32.s32 %v2457_v3  ;;  %v14635_v9 = vpop.xlane.xlu1 %3538  ;;  %v1623_v28 = vadd.f32 %v1622_v46, %v1621_v26  ;;  %v16668_v26 = vld [vmem:[#allocation88_spill] sm:$0xff] }
 0x474   : > { %vm3540_vm10 = vcmp.eq.f32.partialorder %v14130_v62, %v14635_v9 }
 0x475   : > { %v2461_v4 = vadd.s32 %v2460_v63, %v2458_v55  ;;  %v3541_v25 = vsel %vm3540_vm10, %v3536_v56, inf  ;;  %v16667_v56 = vld [vmem:[#allocation59_spill] sm:$0xff] }
 0x476   : > { %6598 = vadd.xlane.f32.xlu1 %v16665_v18  ;;  %3542 = vmin.xlane.f32.xlu0 %v3541_v25  ;;  %v7670_v7 = vpop.xlane.xlu0 %7669 }
 0x477   : > { %vm2645_vm11 = vcmp.eq.s32.totalorder %v16509_v35, %v2461_v4  ;;  %v14643_v23 = vpop.xlane.xlu1 %3553  ;;  %v1624_v4 = vrot.slane %v1623_v28, 1 }
 0x478   : > { %v2677_v49 = vsel %vm2645_vm11, 1.0, %v16624_v61  ;;  %vm3555_vm12 = vcmp.eq.f32.partialorder %v14158_v36, %v14643_v23 }
 0x479   : > { %v2695_v44 = vsel %vm1204_vm5, %v2677_v49, 0.0  ;;  %v3556_v62 = vsel %vm3555_vm12, %v3551_v10, inf  ;;  %v1625_v46 = vadd.f32 %v1624_v4, %v1623_v28  ;;  %v16671_v28 = vld [vmem:[#allocation119_spill] sm:$0xff] }
 0x47a   : > { %v2696_v11 = vadd.f32 %v2695_v44, %v2694_v54  ;;  %8749 = vadd.xlane.f32.xlu1 %v16666_v15  ;;  %3557 = vmin.xlane.f32.xlu0 %v3556_v62  ;;  %v7625_v47 = vpop.xlane.xlu0 %7624  ;;  %v16669_v62 = vld [vmem:[#allocation116_spill] sm:$0xff] }
 0x47b   : > { %v7619_v32 = vpop.xlane.xlu1 %7618 }
 0x47c   : > { %v2721_v3 = vrot.slane %v2696_v11, 4  ;;  %v14651_v63 = vsel %vm1136_vm2, %v7619_v32, %v7667_v2  ;;  %v1626_v32 = vmul.f32 0.03125, %v1625_v46  ;;  %v16676_v46 = vld [vmem:[#allocation63_spill] sm:$0xff] }
 0x47e   : > { %v2722_v55 = vadd.f32 %v2721_v3, %v2696_v11  ;;  %6646 = vadd.xlane.f32.xlu1 %v16667_v56  ;;  %8770 = vadd.xlane.f32.xlu0 %v14035_v14  ;;  %v7676_v36 = vpop.xlane.xlu0 %7675  ;;  %v16670_v11 = vld [vmem:[#allocation118_spill] sm:$0xff]  ;;  %v16672_v56 = vld [vmem:[#allocation107_spill] sm:$0xff] }
 0x47f   : > { %v7622_v52 = vpop.xlane.xlu1 %7621 }
 0x480   : > { %v2723_v25 = vrot.slane %v2722_v55, 2  ;;  %v14656_v54 = vsel %vm1136_vm2, %v7622_v52, %v7670_v7 }
 0x482   : > { %v2724_v18 = vadd.f32 %v2723_v25, %v2722_v55  ;;  %8767 = vadd.xlane.f32.xlu1 %v14022_v1  ;;  %8818 = vadd.xlane.f32.xlu0 %v16668_v26  ;;  %v7631_v10 = vpop.xlane.xlu0 %7630  ;;  %v16674_v25 = vld [vmem:[#allocation79_spill] sm:$0xff] }
 0x483   : > { %v7673_v2 = vpop.xlane.xlu1 %7672 }
 0x484   : > { %v2725_v49 = vrot.slane %v2724_v18, 1  ;;  %v14661_v44 = vsel %vm1136_vm2, %v7625_v47, %v7673_v2 }
 0x486   : > { %v2726_v14 = vadd.f32 %v2725_v49, %v2724_v18  ;;  %8815 = vadd.xlane.f32.xlu1 %v16669_v62  ;;  %8776 = vadd.xlane.f32.xlu0 %v16670_v11  ;;  %v7682_v15 = vpop.xlane.xlu0 %7681  ;;  %v16675_v18 = vld [vmem:[#allocation69_spill] sm:$0xff]  ;;  %v16677_v49 = vld [vmem:[#allocation35_spill] sm:$0xff] }
 0x487   : > { %v7628_v7 = vpop.xlane.xlu1 %7627 }
 0x488   : > { %v2727_v3 = vmul.f32 0.03125, %v2726_v14  ;;  %v14666_v1 = vsel %vm1136_vm2, %v7628_v7, %v7676_v36  ;;  %v16680_v7 = vld [vmem:[#allocation82_spill] sm:$0xff] }
 0x48a   : > { %v14668_v55 = vsel %vm9482_vm13, %v1626_v32, %v2727_v3  ;;  %8773 = vadd.xlane.f32.xlu1 %v16671_v28  ;;  %8824 = vadd.xlane.f32.xlu0 %v16672_v56  ;;  %v14672_v47 = vpop.xlane.xlu0 %5629  ;;  %v16682_v28 = vld [vmem:[#allocation27_spill] sm:$0xff]  ;;  %v16683_v56 = vld [vmem:[#allocation81_spill] sm:$0xff] }
 0x48b   : > { %16673 = vst [vmem:[#allocation130_spill] sm:$0xff] %v14672_v47  ;;  %v7679_v52 = vpop.xlane.xlu1 %7678  ;;  %vm5674_vm15 = vcmp.eq.f32.partialorder %v14243_v19, %v14672_v47  ;;  %v16715_v47 = vld [vmem:[#allocation11_spill] sm:$0xff] }
 0x48c   : > { %v14675_v4 = vsel %vm1136_vm2, %v7631_v10, %v7679_v52  ;;  %v16679_v10 = vld [vmem:[#allocation120_spill] sm:$0xff] }
 0x48e   : > { %8821 = vadd.xlane.f32.xlu1 %v16674_v25  ;;  %8782 = vadd.xlane.f32.xlu0 %v16675_v18  ;;  %v7637_v26 = vpop.xlane.xlu0 %7636 }
 0x48f   : > { %v7634_v2 = vpop.xlane.xlu1 %7633 }
 0x490   : > { %v14680_v36 = vsel %vm1136_vm2, %v7634_v2, %v7682_v15  ;;  %v16684_v2 = vld [vmem:[#allocation52_spill] sm:$0xff] }
 0x492   : > { %8779 = vadd.xlane.f32.xlu1 %v16676_v46  ;;  %8830 = vadd.xlane.f32.xlu0 %v16677_v49  ;;  %v7688_v14 = vpop.xlane.xlu0 %7687 }
 0x493   : > { %v5627_v62 = vpop.xlane.xlu1 %5626 }
 0x494   : > { %v14686_v11 = vsel %vm513_vm1, %v14270_v8, %v5627_v62  ;;  %vm5673_vm14 = vcmp.eq.f32.partialorder %v14289_v59, %v5627_v62  ;;  %v16686_v62 = vld [vmem:[#allocation126_spill] sm:$0xff] }
 0x495   : > { %16678 = vst [vmem:[#allocation14_spill] sm:$0xff] %v14686_v11  ;;  %v5689_v18 = vsel %vm5673_vm14, %v16509_v35, 3 }
 0x496   : > { %8827 = vadd.xlane.f32.xlu1 %v16679_v10  ;;  %8788 = vadd.xlane.f32.xlu0 %v16680_v7  ;;  %v14690_v32 = vpop.xlane.xlu0 %5635  ;;  %v14711_v59 = vsel %vm1204_vm5, %v5689_v18, 2147483647 }
 0x497   : > { %16681 = vst [vmem:[#allocation87_spill] sm:$0xff] %v14690_v32  ;;  %v7685_v3 = vpop.xlane.xlu1 %7684  ;;  %vm5676_vm6 = vcmp.eq.f32.partialorder %v14308_v6, %v14690_v32  ;;  %v16711_v32 = vld [vmem:[#allocation86_spill] sm:$0xff] }
 0x498   : > { %v14693_v15 = vsel %vm1136_vm2, %v7637_v26, %v7685_v3 }
 0x49a   : > { %8785 = vadd.xlane.f32.xlu1 %v16682_v28  ;;  %8836 = vadd.xlane.f32.xlu0 %v16683_v56  ;;  %v7643_v52 = vpop.xlane.xlu0 %7642  ;;  %v16688_v28 = vld [vmem:[#allocation66_spill] sm:$0xff] }
 0x49b   : > { %v7640_v25 = vpop.xlane.xlu1 %7639 }
 0x49c   : > { %v14699_v8 = vsel %vm1136_vm2, %v7640_v25, %v7688_v14  ;;  %v5690_v14 = vsel %vm5674_vm15, %v16509_v35, 3 }
 0x49d   : > { %v14724_v7 = vsel %vm1204_vm5, %v5690_v14, 2147483647 }
 0x49e   : > { %8833 = vadd.xlane.f32.xlu1 %v16684_v2  ;;  %8794 = vadd.xlane.f32.xlu0 %v14216_v43  ;;  %v7694_v46 = vpop.xlane.xlu0 %7693  ;;  %v5722_v25 = vshra.s32 %v14724_v7, 16  ;;  %v5692_v2 = vsel %vm5676_vm6, %v16509_v35, 3 }
 0x49f   : > { %v5633_v26 = vpop.xlane.xlu1 %5632 }
 0x4a0   : > { %v14708_v49 = vsel %vm513_vm1, %v14331_v40, %v5633_v26  ;;  %vm5675_vm4 = vcmp.eq.f32.partialorder %v14358_v57, %v5633_v26  ;;  %v5707_v40 = vshra.s32 %v14711_v59, 16  ;;  %v16691_v26 = vld [vmem:[#allocation80_spill] sm:$0xff]  ;;  %v14751_v14 = vcvt.s32.f32 %v5722_v25 }
 0x4a1   : > { %16685 = vst [vmem:[#allocation20_spill] sm:$0xff] %v14708_v49  ;;  %v5691_v3 = vsel %vm5675_vm4, %v16509_v35, 3 }
 0x4a2   : > { %8791 = vadd.xlane.f32.xlu1 %v14210_v38  ;;  %8842 = vadd.xlane.f32.xlu0 %v16686_v62  ;;  %v14716_v10 = vpop.xlane.xlu0 %5641  ;;  %v14740_v18 = vsel %vm1204_vm5, %v5691_v3, 2147483647 }
 0x4a3   : > { %16687 = vst [vmem:[#allocation98_spill] sm:$0xff] %v14716_v10  ;;  %v7691_v43 = vpop.xlane.xlu1 %7690  ;;  %16690 = vst [vmem:[#allocation83_spill] sm:$0xff] %v14740_v18  ;;  %v5737_v62 = vshra.s32 %v14740_v18, 16  ;;  %v16742_v18 = vld [vmem:[#allocation23_spill] sm:$0xff] }
 0x4a4   : > { %v14720_v19 = vsel %vm1136_vm2, %v7643_v52, %v7691_v43  ;;  %v14736_v52 = vcvt.s32.f32 %v5707_v40  ;;  %v14755_v43 = vsel %vm1204_vm5, %v5692_v2, 2147483647  ;;  %v16695_v40 = vld [vmem:[#allocation109_spill] sm:$0xff] }
 0x4a5   : > { %16694 = vst [vmem:[#allocation72_spill] sm:$0xff] %v14755_v43 }
 0x4a6   : > { %8839 = vadd.xlane.f32.xlu1 %v16688_v28  ;;  %8797 = vadd.xlane.f32.xlu0 %v14252_v42  ;;  %v14729_v38 = vpop.xlane.xlu0 %5647 }
 0x4a7   : > { %16689 = vst [vmem:[#allocation16_spill] sm:$0xff] %v14729_v38  ;;  %v7646_v57 = vpop.xlane.xlu1 %7645  ;;  %v16705_v38 = vld [vmem:[#allocation38_spill] sm:$0xff] }
 0x4a8   : > { %v14734_v56 = vsel %vm1136_vm2, %v7646_v57, %v7694_v46  ;;  %v14763_v57 = vcvt.s32.f32 %v5737_v62 }
 0x4aa   : > { %8845 = vadd.xlane.f32.xlu0 %v16691_v26  ;;  %5710 = vmin.xlane.f32.xlu1 %v14736_v52  ;;  %v14745_v42 = vpop.xlane.xlu0 %5653  ;;  %16698 = vst [vmem:[#allocation99_spill] sm:$0xff] %v14763_v57  ;;  %v16699_v26 = vld [vmem:[#allocation91_spill] sm:$0xff] }
 0x4ab   : > { %16692 = vst [vmem:[#allocation102_spill] sm:$0xff] %v14745_v42  ;;  %v5639_v6 = vpop.xlane.xlu1 %5638 }
 0x4ac   : > { %v14749_v46 = vsel %vm513_vm1, %v14384_v53, %v5639_v6  ;;  %v5752_v53 = vshra.s32 %v14755_v43, 16 }
 0x4ad   : > { %16693 = vst [vmem:[#allocation19_spill] sm:$0xff] %v14749_v46 }
 0x4ae   : > { %7747 = vadd.xlane.f32.xlu0 %v16695_v40  ;;  %5725 = vmin.xlane.f32.xlu1 %v14751_v14  ;;  %v14759_v3 = vpop.xlane.xlu0 %5659  ;;  %v14774_v40 = vcvt.s32.f32 %v5752_v53  ;;  %v16709_v53 = vld [vmem:[#allocation50_spill] sm:$0xff] }
 0x4af   : > { %16696 = vst [vmem:[#allocation128_spill] sm:$0xff] %v14759_v3  ;;  %v14761_v28 = vpop.xlane.xlu1 %4609  ;;  %v16702_v3 = vld [vmem:[#allocation45_spill] sm:$0xff] }
 0x4b0   : > { %16697 = vst [vmem:[#allocation89_spill] sm:$0xff] %v14761_v28  ;;  %16701 = vst [vmem:[#allocation110_spill] sm:$0xff] %v14774_v40  ;;  %vm4611_vm7 = vcmp.eq.f32.partialorder %v14435_v39, %v14761_v28 }
 0x4b2   : > { %8800 = vadd.xlane.f32.xlu0 %v16699_v26  ;;  %5740 = vmin.xlane.f32.xlu1 %v14763_v57  ;;  %v14768_v25 = vpop.xlane.xlu0 %8719  ;;  %v16704_v26 = vld [vmem:[#allocation75_spill] sm:$0xff] }
 0x4b3   : > { %v5645_v2 = vpop.xlane.xlu1 %5644 }
 0x4b4   : > { %v14772_v6 = vsel %vm513_vm1, %v14432_v34, %v5645_v2  ;;  %v16708_v34 = vld [vmem:[#allocation25_spill] sm:$0xff] }
 0x4b5   : > { %16700 = vst [vmem:[#allocation103_spill] sm:$0xff] %v14772_v6 }
 0x4b6   : > { %7654 = vadd.xlane.f32.xlu0 %v16702_v3  ;;  %5755 = vmin.xlane.f32.xlu1 %v14774_v40  ;;  %v14778_v62 = vpop.xlane.xlu0 %7717  ;;  %v16740_v40 = vld [vmem:[#allocation28_spill] sm:$0xff] }
 0x4b7   : > { %v14780_v42 = vpop.xlane.xlu1 %4624  ;;  %v6661_v43 = vsel %vm1136_vm2, %v16740_v40, %v14491_v60 }
 0x4b8   : > { %16703 = vst [vmem:[#allocation106_spill] sm:$0xff] %v14780_v42  ;;  %vm4626_vm8 = vcmp.eq.f32.partialorder %v14466_v48, %v14780_v42 }
 0x4ba   : > { %8848 = vadd.xlane.f32.xlu0 %v16704_v26  ;;  %7699 = vadd.xlane.f32.xlu1 %v16705_v38  ;;  %v14784_v10 = vpop.xlane.xlu0 %5665  ;;  %v16712_v26 = vld [vmem:[#allocation136_spill] sm:$0xff] }
 0x4bb   : > { %16706 = vst [vmem:[#allocation134_spill] sm:$0xff] %v14784_v10  ;;  %v14786_v46 = vpop.xlane.xlu1 %4639 }
 0x4bc   : > { %16707 = vst [vmem:[#allocation34_spill] sm:$0xff] %v14786_v46  ;;  %vm4641_vm9 = vcmp.eq.f32.partialorder %v14481_v13, %v14786_v46 }
 0x4be   : > { %7750 = vadd.xlane.f32.xlu0 %v16708_v34  ;;  %6601 = vadd.xlane.f32.xlu1 %v16709_v53  ;;  %v14790_v2 = vpop.xlane.xlu0 %8725  ;;  %v4605_v34 = vand.u32 65535, %v14401_v29  ;;  %v16714_v53 = vld [vmem:[#allocation93_spill] sm:$0xff] }
 0x4bf   : > { %v5651_v3 = vpop.xlane.xlu1 %5650 }
 0x4c0   : > { %v14794_v6 = vsel %vm513_vm1, %v14478_v50, %v5651_v3  ;;  %v4620_v3 = vand.u32 65535, %v14438_v5  ;;  %v16719_v5 = vld [vmem:[#allocation32_spill] sm:$0xff] }
 0x4c1   : > { %16710 = vst [vmem:[#allocation71_spill] sm:$0xff] %v14794_v6  ;;  %v16737_v6 = vld [vmem:[#allocation94_spill] sm:$0xff] }
 0x4c2   : > { %8803 = vadd.xlane.f32.xlu0 %v16711_v32  ;;  %8752 = vadd.xlane.f32.xlu1 %v16712_v26  ;;  %v7724_v38 = vpop.xlane.xlu0 %7723  ;;  %v4607_v32 = vcvt.s32.f32 %v4605_v34  ;;  %v4622_v39 = vcvt.s32.f32 %v4620_v3  ;;  %v4635_v34 = vand.u32 65535, %v14456_v30 }
 0x4c3   : > { %v14800_v10 = vsel %vm1153_vm3, %v14666_v1, %v7724_v38  ;;  %v14802_v49 = vpop.xlane.xlu1 %4654  ;;  %v16718_v38 = vld [vmem:[#allocation67_spill] sm:$0xff] }
 0x4c4   : > { %16713 = vst [vmem:[#allocation137_spill] sm:$0xff] %v14802_v49  ;;  %v4612_v26 = vsel %vm4611_vm7, %v4607_v32, inf  ;;  %v4637_v32 = vcvt.s32.f32 %v4635_v34  ;;  %vm4656_vm10 = vcmp.eq.f32.partialorder %v14508_v27, %v14802_v49  ;;  %v16722_v34 = vld [vmem:[#allocation73_spill] sm:$0xff] }
 0x4c6   : > { %7657 = vadd.xlane.f32.xlu0 %v16714_v53  ;;  %6649 = vadd.xlane.f32.xlu1 %v16715_v47  ;;  %v14807_v11 = vpop.xlane.xlu0 %5671  ;;  %v4627_v53 = vsel %vm4626_vm8, %v4622_v39, inf  ;;  %v4642_v3 = vsel %vm4641_vm9, %v4637_v32, inf }
 0x4c7   : > { %16716 = vst [vmem:[#allocation36_spill] sm:$0xff] %v14807_v11  ;;  %v5657_v50 = vpop.xlane.xlu1 %5656  ;;  %v16730_v11 = vld [vmem:[#allocation74_spill] sm:$0xff] }
 0x4c8   : > { %v14814_v1 = vsel %vm513_vm1, %v14522_v0, %v5657_v50 }
 0x4c9   : > { %16717 = vst [vmem:[#allocation46_spill] sm:$0xff] %v14814_v1  ;;  %v16735_v1 = vld [vmem:[#allocation113_spill] sm:$0xff] }
 0x4ca   : > { %7702 = vadd.xlane.f32.xlu1 %v16718_v38  ;;  %4613 = vmin.xlane.f32.xlu0 %v4612_v26  ;;  %v14817_v29 = vpop.xlane.xlu0 %8731  ;;  %v4650_v26 = vand.u32 65535, %v14485_v51  ;;  %v16721_v38 = vld [vmem:[#allocation70_spill] sm:$0xff] }
 0x4cb   : > { %v14821_v47 = vpop.xlane.xlu1 %7714 }
 0x4cc   : > { %v4652_v13 = vcvt.s32.f32 %v4650_v26  ;;  %v16726_v26 = vld [vmem:[#allocation57_spill] sm:$0xff] }
 0x4ce   : > { %6604 = vadd.xlane.f32.xlu1 %v16719_v5  ;;  %4628 = vmin.xlane.f32.xlu0 %v4627_v53  ;;  %v14825_v0 = vpop.xlane.xlu0 %7729  ;;  %v4657_v53 = vsel %vm4656_vm10, %v4652_v13, inf  ;;  %v16723_v5 = vld [vmem:[#allocation131_spill] sm:$0xff] }
 0x4cf   : > { %v5663_v50 = vpop.xlane.xlu1 %5662 }
 0x4d0   : > { %v14832_v48 = vsel %vm513_vm1, %v14541_v41, %v5663_v50  ;;  %v16724_v50 = vld [vmem:[#allocation127_spill] sm:$0xff] }
 0x4d1   : > { %16720 = vst [vmem:[#allocation54_spill] sm:$0xff] %v14832_v48  ;;  %v16731_v48 = vld [vmem:[#allocation49_spill] sm:$0xff] }
 0x4d2   : > { %8755 = vadd.xlane.f32.xlu1 %v16721_v38  ;;  %4643 = vmin.xlane.f32.xlu0 %v4642_v3  ;;  %v14835_v30 = vpop.xlane.xlu0 %8737  ;;  %v16727_v38 = vld [vmem:[#allocation114_spill] sm:$0xff] }
 0x4d3   : > { %v14839_v39 = vpop.xlane.xlu1 %8722 }
 0x4d6   : > { %6652 = vadd.xlane.f32.xlu1 %v16722_v34  ;;  %4658 = vmin.xlane.f32.xlu0 %v4657_v53  ;;  %v14842_v51 = vpop.xlane.xlu0 %7735  ;;  %v16728_v34 = vld [vmem:[#allocation65_spill] sm:$0xff] }
 0x4d7   : > { %v14844_v41 = vpop.xlane.xlu1 %7720 }
 0x4da   : > { %7705 = vadd.xlane.f32.xlu1 %v16723_v5  ;;  %8851 = vadd.xlane.f32.xlu0 %v16724_v50  ;;  %v14848_v32 = vpop.xlane.xlu0 %8743  ;;  %v16729_v5 = vld [vmem:[#allocation92_spill] sm:$0xff] }
 0x4db   : > { %v5669_v3 = vpop.xlane.xlu1 %5668 }
 0x4dc   : > { %v14852_v27 = vsel %vm513_vm1, %v14566_v58, %v5669_v3 }
 0x4dd   : > { %16725 = vst [vmem:[#allocation64_spill] sm:$0xff] %v14852_v27 }
 0x4de   : > { %6607 = vadd.xlane.f32.xlu1 %v16726_v26  ;;  %7753 = vadd.xlane.f32.xlu0 %v16727_v38  ;;  %v14858_v53 = vpop.xlane.xlu0 %7741  ;;  %v16732_v26 = vld [vmem:[#allocation68_spill] sm:$0xff]  ;;  %v16733_v38 = vld [vmem:[#allocation21_spill] sm:$0xff] }
 0x4df   : > { %v14856_v13 = vpop.xlane.xlu1 %8728 }
 0x4e2   : > { %8758 = vadd.xlane.f32.xlu1 %v16728_v34  ;;  %8806 = vadd.xlane.f32.xlu0 %v16729_v5  ;;  %v14866_v58 = vpop.xlane.xlu0 %7648  ;;  %v16734_v5 = vld [vmem:[#allocation123_spill] sm:$0xff] }
 0x4e3   : > { %v14862_v50 = vpop.xlane.xlu1 %7726 }
 0x4e6   : > { %6655 = vadd.xlane.f32.xlu1 %v16730_v11  ;;  %7660 = vadd.xlane.f32.xlu0 %v16731_v48  ;;  %v14874_v34 = vpop.xlane.xlu0 %7744  ;;  %v16736_v48 = vld [vmem:[#allocation61_spill] sm:$0xff] }
 0x4e7   : > { %v14868_v3 = vpop.xlane.xlu1 %8734 }
 0x4ea   : > { %7708 = vadd.xlane.f32.xlu1 %v16732_v26  ;;  %8854 = vadd.xlane.f32.xlu0 %v16733_v38  ;;  %v14883_v49 = vpop.xlane.xlu0 %7651  ;;  %v3515_v38 = vcvt.f32.s32 %v14610_v33  ;;  %v6677_v33 = vsel %vm1153_vm3, %v6661_v43, %v14514_v17  ;;  %v16743_v17 = vld [vmem:[#allocation22_spill] sm:$0xff] }
 0x4eb   : > { %v14872_v27 = vpop.xlane.xlu1 %7732  ;;  %v6693_v60 = vmul.f32 0.00390625, %v6677_v33 }
 0x4ee   : > { %6610 = vadd.xlane.f32.xlu1 %v16734_v5  ;;  %7756 = vadd.xlane.f32.xlu0 %v16735_v1  ;;  %v16738_v5 = vld [vmem:[#allocation77_spill] sm:$0xff]  ;;  %v16739_v1 = vld [vmem:[#allocation95_spill] sm:$0xff] }
 0x4ef   : > { %v14878_v11 = vpop.xlane.xlu1 %8740 }
 0x4f2   : > { %8761 = vadd.xlane.f32.xlu1 %v16736_v48  ;;  %8809 = vadd.xlane.f32.xlu0 %v16737_v6  ;;  %v3516_v6 = vshll.u32 %v3515_v38, 16 }
 0x4f3   : > { %v7739_v26 = vpop.xlane.xlu1 %7738 }
 0x4f4   : > { %v14889_v46 = vsel %vm1153_vm3, %v14720_v19, %v7739_v26  ;;  %v16741_v19 = vld [vmem:[#allocation84_spill] sm:$0xff]  ;;  %v6692_v26 = vmul.f32 0.00390625, %v14531_v31 }
 0x4f6   : > { %6658 = vadd.xlane.f32.xlu1 %v16738_v5  ;;  %7663 = vadd.xlane.f32.xlu0 %v16739_v1  ;;  %v7777_v5 = vsel %vm1153_vm3, %v14651_v63, %v14821_v47  ;;  %v3530_v1 = vcvt.f32.s32 %v14626_v20  ;;  %v3545_v47 = vcvt.f32.s32 %v14635_v9  ;;  %v7778_v9 = vsel %vm1153_vm3, %v14656_v54, %v14778_v62 }
 0x4f7   : > { %v3513_v42 = vpop.xlane.xlu0 %3512  ;;  %v14893_v48 = vpop.xlane.xlu1 %8746  ;;  %v7793_v40 = vmul.f32 0.00390625, %v7777_v5 }
 0x4f8   : > { %v3514_v28 = vcvt.f32.s32 %v3513_v42  ;;  %v6708_v42 = vstv %s6032_s27  ;;  %v3531_v20 = vshll.u32 %v3530_v1, 16 }
 0x4f9   : > { %vm14912_vm11 = vcmp.lt.s32.totalorder %v16509_v35, %v6708_v42 }
 0x4fa   : > { %v3517_v57 = vadd.s32 %v3516_v6, %v3514_v28  ;;  %8857 = vadd.xlane.f32.xlu0 %v14353_v45  ;;  %7711 = vadd.xlane.f32.xlu1 %v16741_v19  ;;  %v7809_v45 = vstv %s7133_s28  ;;  %v14920_v63 = vsel %vm14912_vm11, %v6692_v26, -3.4028235e+38  ;;  %v6694_v6 = vmul.f32 0.00390625, %v14556_v37  ;;  %v16748_v26 = vld [vmem:[#allocation30_spill] sm:$0xff]  ;;  %v16749_v37 = vld [vmem:[#allocation129_spill] sm:$0xff]  ;;  %s15760_s28 = scalar_lea.hbm %s15891_s7, %s10004_s24 }
 0x4fb   : > { %v14906_v38 = vpop.xlane.xlu1 %6643  ;;  %vm14926_vm13 = vcmp.lt.s32.totalorder %v16509_v35, %v7809_v45  ;;  %v14932_v19 = vsel %vm14912_vm11, %v6693_v60, -3.4028235e+38  ;;  %v6663_v5 = vsel %vm1136_vm2, %v16748_v26, %v14535_v21  ;;  %v7779_v21 = vsel %vm1153_vm3, %v14661_v44, %v14844_v41 }
 0x4fc   : > { %vm3743_vm12 = vcmp.eq.s32.totalorder %v16509_v35, %v3517_v57  ;;  %v14944_v42 = vsel %vm14926_vm13, %v7793_v40, -3.4028235e+38  ;;  %v6679_v1 = vsel %vm1153_vm3, %v6663_v5, %v14545_v12  ;;  %v3560_v45 = vcvt.f32.s32 %v14643_v23 }
 0x4fd   : > { %v3775_v60 = vsel %vm3743_vm12, 1.0, %v16624_v61  ;;  %v7827_v44 = vsel %vm1204_vm5, %v14944_v42, -inf  ;;  %v14963_v41 = vsel %vm14912_vm11, %v6694_v6, -3.4028235e+38  ;;  %v6729_v6 = vsel %vm1204_vm5, %v14932_v19, -inf }
 0x4fe   : > { %8764 = vadd.xlane.f32.xlu0 %v16742_v18  ;;  %7759 = vadd.xlane.f32.xlu1 %v16743_v17  ;;  %v3546_v17 = vshll.u32 %v3545_v47, 16 }
 0x4ff   : > { %v3528_v31 = vpop.xlane.xlu0 %3527  ;;  %v14916_v28 = vpop.xlane.xlu1 %7696 }
 0x500   : > { %v3529_v18 = vcvt.f32.s32 %v3528_v31  ;;  %v7794_v31 = vmul.f32 0.00390625, %v7778_v9 }
 0x502   : > { %v3532_v57 = vadd.s32 %v3531_v20, %v3529_v18  ;;  %8860 = vadd.xlane.f32.xlu0 %v14366_v24  ;;  %8812 = vadd.xlane.f32.xlu1 %v16749_v37  ;;  %v6726_v24 = vsel %vm1204_vm5, %v14920_v63, -inf  ;;  %v7795_v20 = vmul.f32 0.00390625, %v7779_v21  ;;  %v3791_v18 = vsel %vm1204_vm5, %v3775_v60, 0.0  ;;  %v16750_v60 = vld [vmem:[#allocation124_spill] sm:$0xff] }
 0x503   : > { %v3543_v54 = vpop.xlane.xlu0 %3542  ;;  %v14952_v62 = vpop.xlane.xlu1 %6598  ;;  %v6695_v21 = vmul.f32 0.00390625, %v6679_v1  ;;  %v7781_v1 = vsel %vm1153_vm3, %v14675_v4, %v14862_v50  ;;  %v7796_v4 = vmul.f32 0.00390625, %v14800_v10 }
 0x504   : > { %vm3744_vm14 = vcmp.eq.s32.totalorder %v16509_v35, %v3532_v57  ;;  %v3544_v40 = vcvt.f32.s32 %v3543_v54  ;;  %v3561_v57 = vshll.u32 %v3560_v45, 16  ;;  %v6696_v54 = vmul.f32 0.00390625, %v16750_v60 }
 0x505   : > { %v3776_v12 = vsel %vm3744_vm14, 1.0, %v16624_v61  ;;  %v14982_v45 = vsel %vm14926_vm13, %v7795_v20, -3.4028235e+38  ;;  %v7797_v50 = vmul.f32 0.00390625, %v7781_v1 }
 0x506   : > { %v3792_v47 = vsel %vm1204_vm5, %v3776_v12, 0.0  ;;  %v3547_v23 = vadd.s32 %v3546_v17, %v3544_v40  ;;  %7828 = vmax.xlane.f32.xlu0 %v7827_v44  ;;  %6727 = vmax.xlane.f32.xlu1 %v6726_v24  ;;  %v6732_v24 = vsel %vm1204_vm5, %v14963_v41, -inf  ;;  %v14986_v44 = vsel %vm14926_vm13, %v7794_v31, -3.4028235e+38 }
 0x507   : > { %v3793_v26 = vadd.f32 %v3792_v47, %v3791_v18  ;;  %v3558_v5 = vpop.xlane.xlu0 %3557  ;;  %v14968_v9 = vpop.xlane.xlu1 %8749  ;;  %v7833_v20 = vsel %vm1204_vm5, %v14982_v45, -inf  ;;  %v7830_v31 = vsel %vm1204_vm5, %v14986_v44, -inf }
 0x508   : > { %vm3745_vm15 = vcmp.eq.s32.totalorder %v16509_v35, %v3547_v23  ;;  %v3559_v37 = vcvt.f32.s32 %v3558_v5 }
 0x509   : > { %v3777_v17 = vsel %vm3745_vm15, 1.0, %v16624_v61 }
 0x50a   : > { %v3794_v40 = vsel %vm1204_vm5, %v3777_v17, 0.0  ;;  %v3562_v12 = vadd.s32 %v3561_v57, %v3559_v37  ;;  %6733 = vmax.xlane.f32.xlu0 %v6732_v24  ;;  %6730 = vmax.xlane.f32.xlu1 %v6729_v6  ;;  %v15001_v57 = vsel %vm14912_vm11, %v6695_v21, -3.4028235e+38  ;;  %v6714_v37 = vsel %vm14912_vm11, %v6696_v54, -3.4028235e+38 }
 0x50b   : > { %v3795_v18 = vadd.f32 %v3794_v40, %v3793_v26  ;;  %v8771_v47 = vpop.xlane.xlu0 %8770  ;;  %v14991_v23 = vpop.xlane.xlu1 %6646  ;;  %16751 = vst [vmem:[#allocation41_spill] sm:$0xff] %v15001_v57  ;;  %v8910_v21 = vstv %s14973_s21  ;;  %v6738_v10 = vsel %vm1204_vm5, %v6714_v37, -inf  ;;  %v6735_v1 = vsel %vm1204_vm5, %v15001_v57, -inf  ;;  %s10197_s21 = scalar_lea.vmem %s15749_s23, 128 }
 0x50c   : > { %vm3746_vm4 = vcmp.eq.s32.totalorder %v16509_v35, %v3562_v12  ;;  %v8863_v60 = vsel %vm1136_vm2, %v14839_v39, %v8771_v47  ;;  %v15019_v39 = vsel %vm14926_vm13, %v7796_v4, -3.4028235e+38  ;;  %v16754_v47 = vld [vmem:[#allocation90_spill] sm:$0xff]  ;;  %vm15028_vm6 = vcmp.lt.s32.totalorder %v16509_v35, %v8910_v21  ;;  %p10198_p2 = scmp.ne.s32.totalorder %s15749_s23, %s10197_s21  ;;  %p10205_p6 = scmp.lt.s32.totalorder %s10203_s14, %s10197_s21 }
 0x50d   : > { %v3778_v5 = vsel %vm3746_vm4, 1.0, %v16624_v61  ;;  %vm9485_vm4 = vcmask 1042432  }
 0x50e   : > { %v3796_v26 = vsel %vm1204_vm5, %v3778_v5, 0.0  ;;  %7834 = vmax.xlane.f32.xlu0 %v7833_v20  ;;  %7831 = vmax.xlane.f32.xlu1 %v7830_v31  ;;  %v16752_v5 = vld [vmem:[#allocation44_spill] sm:$0xff]  ;;  %v16753_v20 = vld [vmem:[#allocation121_spill] sm:$0xff]  ;;  %p10199_p3 = pnand %p10198_p2, %p10389_p10  ;;  %p10206_p7 = por %p10205_p6, %p10204_p5 }
 0x50f   : > { %v3797_v6 = vadd.f32 %v3796_v26, %v3795_v18  ;;  %v8819_v17 = vpop.xlane.xlu0 %8818  ;;  %v8768_v24 = vpop.xlane.xlu1 %8767  ;;  %v6665_v31 = vsel %vm1136_vm2, %v16753_v20, %v16752_v5  ;;  %v7815_v18 = vsel %vm14926_vm13, %v7797_v50, -3.4028235e+38  ;;  %v7836_v50 = vsel %vm1204_vm5, %v15019_v39, -inf }
 0x510   : > { %v8879_v40 = vsel %vm1153_vm3, %v8863_v60, %v8819_v17  ;;  %v6681_v26 = vsel %vm1153_vm3, %v6665_v31, %v16754_v47  ;;  %v8862_v60 = vsel %vm1136_vm2, %v14768_v25, %v8768_v24  ;;  %v7839_v5 = vsel %vm1204_vm5, %v7815_v18, -inf  ;;  %p10200_p4 = pneg %p10199_p3 }
 0x511   : > { %v3822_v12 = vrot.slane %v3797_v6, 4  ;;  %v8895_v54 = vmul.f32 0.00390625, %v8879_v40 }
 0x512   : > { %6739 = vmax.xlane.f32.xlu0 %v6738_v10  ;;  %6736 = vmax.xlane.f32.xlu1 %v6735_v1  ;;  %p10207_p8 = pnand %p10206_p7, %p10200_p4 }
 0x513   : > { %v3823_v37 = vadd.f32 %v3822_v12, %v3797_v6  ;;  %v8777_v17 = vpop.xlane.xlu0 %8776  ;;  %v8816_v57 = vpop.xlane.xlu1 %8815  ;;  %v6697_v6 = vmul.f32 0.00390625, %v6681_v26  ;;  %v15038_v25 = vsel %vm15028_vm6, %v8895_v54, -3.4028235e+38 }
 0x514   : > { %v8878_v4 = vsel %vm1153_vm3, %v8862_v60, %v8816_v57  ;;  %v8865_v21 = vsel %vm1136_vm2, %v14856_v13, %v8777_v17  ;;  %v8931_v54 = vsel %vm1204_vm5, %v15038_v25, -inf }
 0x515   : > { %v3824_v10 = vrot.slane %v3823_v37, 2  ;;  %v8894_v1 = vmul.f32 0.00390625, %v8878_v4  ;;  %v6715_v13 = vsel %vm14912_vm11, %v6697_v6, -3.4028235e+38  ;;  %v7783_v6 = vsel %vm1153_vm3, %v14693_v15, %v14872_v27 }
 0x516   : > { %7837 = vmax.xlane.f32.xlu1 %v7836_v50  ;;  %7840 = vmax.xlane.f32.xlu0 %v7839_v5  ;;  %v16757_v50 = vld [vmem:[#allocation29_spill] sm:$0xff] }
 0x517   : > { %v3825_v24 = vadd.f32 %v3824_v10, %v3823_v37  ;;  %v8825_v12 = vpop.xlane.xlu0 %8824  ;;  %v8774_v57 = vpop.xlane.xlu1 %8773  ;;  %v15044_v20 = vsel %vm15028_vm6, %v8894_v1, -3.4028235e+38  ;;  %v7782_v37 = vsel %vm1153_vm3, %v14680_v36, %v14825_v0  ;;  %v6698_v5 = vmul.f32 0.00390625, %v16757_v50 }
 0x518   : > { %v8881_v31 = vsel %vm1153_vm3, %v8865_v21, %v8825_v12  ;;  %v8928_v18 = vsel %vm1204_vm5, %v15044_v20, -inf  ;;  %v8864_v17 = vsel %vm1136_vm2, %v14790_v2, %v8774_v57 }
 0x519   : > { %v3826_v47 = vrot.slane %v3825_v24, 1  ;;  %v8897_v26 = vmul.f32 0.00390625, %v8881_v31  ;;  %v6741_v31 = vsel %vm1204_vm5, %v6715_v13, -inf  ;;  %v16759_v13 = vld [vmem:[#allocation115_spill] sm:$0xff] }
 0x51a   : > { %8932 = vmax.xlane.f32.xlu1 %v8931_v54  ;;  %8929 = vmax.xlane.f32.xlu0 %v8928_v18  ;;  %v7798_v18 = vmul.f32 0.00390625, %v7782_v37  ;;  %v7799_v54 = vmul.f32 0.00390625, %v7783_v6 }
 0x51b   : > { %v3827_v60 = vadd.f32 %v3826_v47, %v3825_v24  ;;  %v8783_v4 = vpop.xlane.xlu0 %8782  ;;  %v8822_v10 = vpop.xlane.xlu1 %8821  ;;  %v15066_v36 = vsel %vm15028_vm6, %v8897_v26, -3.4028235e+38  ;;  %v6716_v26 = vsel %vm14912_vm11, %v6698_v5, -3.4028235e+38 }
 0x51c   : > { %v8880_v1 = vsel %vm1153_vm3, %v8864_v17, %v8822_v10  ;;  %v8867_v0 = vsel %vm1136_vm2, %v14868_v3, %v8783_v4  ;;  %v16758_v3 = vld [vmem:[#allocation24_spill] sm:$0xff]  ;;  %v7816_v17 = vsel %vm14926_vm13, %v7798_v18, -3.4028235e+38  ;;  %v6744_v5 = vsel %vm1204_vm5, %v6716_v26, -inf }
 0x51d   : > { %v3828_v21 = vmul.f32 0.03125, %v3827_v60  ;;  %v8896_v12 = vmul.f32 0.00390625, %v8880_v1  ;;  %v6667_v37 = vsel %vm1136_vm2, %v16759_v13, %v16758_v3  ;;  %v16760_v4 = vld [vmem:[#allocation132_spill] sm:$0xff]  ;;  %v7842_v6 = vsel %vm1204_vm5, %v7816_v17, -inf }
 0x51e   : > { %6742 = vmax.xlane.f32.xlu1 %v6741_v31  ;;  %v6683_v10 = vsel %vm1153_vm3, %v6667_v37, %v16760_v4 }
 0x51f   : > { %v15070_v2 = vsel %vm538_vm0, %v14668_v55, %v3828_v21  ;;  %v8831_v24 = vpop.xlane.xlu0 %8830  ;;  %v8780_v57 = vpop.xlane.xlu1 %8779  ;;  %v15076_v47 = vsel %vm15028_vm6, %v8896_v12, -3.4028235e+38  ;;  %v8937_v55 = vsel %vm1204_vm5, %v15066_v36, -inf  ;;  %v6699_v18 = vmul.f32 0.00390625, %v6683_v10 }
 0x520   : > { %v8883_v15 = vsel %vm1153_vm3, %v8867_v0, %v8831_v24  ;;  %v8934_v27 = vsel %vm1204_vm5, %v15076_v47, -inf  ;;  %v8866_v1 = vsel %vm1136_vm2, %v14817_v29, %v8780_v57  ;;  %v7817_v0 = vsel %vm14926_vm13, %v7799_v54, -3.4028235e+38 }
 0x521   : > { %8935 = vmax.xlane.f32.xlu0 %v8934_v27  ;;  %v8899_v60 = vmul.f32 0.00390625, %v8883_v15  ;;  %v7784_v29 = vsel %vm1153_vm3, %v14699_v8, %v14842_v51  ;;  %v7845_v27 = vsel %vm1204_vm5, %v7817_v0, -inf  ;;  %v6717_v8 = vsel %vm14912_vm11, %v6699_v18, -3.4028235e+38 }
 0x522   : > { %8938 = vmax.xlane.f32.xlu1 %v8937_v55  ;;  %v6700_v55 = vmul.f32 0.00390625, %v14605_v22  ;;  %v7800_v3 = vmul.f32 0.00390625, %v7784_v29  ;;  %v16764_v29 = vld [vmem:[#allocation18_spill] sm:$0xff] }
 0x523   : > { %v8789_v50 = vpop.xlane.xlu0 %8788  ;;  %v8828_v21 = vpop.xlane.xlu1 %8827  ;;  %v8917_v24 = vsel %vm15028_vm6, %v8899_v60, -3.4028235e+38 }
 0x524   : > { %v8882_v12 = vsel %vm1153_vm3, %v8866_v1, %v8828_v21  ;;  %v8943_v26 = vsel %vm1204_vm5, %v8917_v24, -inf  ;;  %v8869_v13 = vsel %vm1136_vm2, %v14878_v11, %v8789_v50  ;;  %v6747_v1 = vsel %vm1204_vm5, %v6717_v8, -inf  ;;  %v16761_v50 = vld [vmem:[#allocation100_spill] sm:$0xff]  ;;  %v16762_v21 = vld [vmem:[#allocation31_spill] sm:$0xff] }
 0x525   : > { %v8898_v31 = vmul.f32 0.00390625, %v8882_v12  ;;  %6745 = vmax.xlane.f32.xlu0 %v6744_v5  ;;  %v6718_v11 = vsel %vm14912_vm11, %v6700_v55, -3.4028235e+38  ;;  %v6669_v12 = vsel %vm1136_vm2, %v16762_v21, %v16761_v50 }
 0x526   : > { %7843 = vmax.xlane.f32.xlu1 %v7842_v6  ;;  %v6750_v24 = vsel %vm1204_vm5, %v6718_v11, -inf }
 0x527   : > { %v8837_v57 = vpop.xlane.xlu0 %8836  ;;  %v8786_v15 = vpop.xlane.xlu1 %8785  ;;  %v8916_v54 = vsel %vm15028_vm6, %v8898_v31, -3.4028235e+38  ;;  %v16763_v31 = vld [vmem:[#allocation48_spill] sm:$0xff] }
 0x528   : > { %v8885_v51 = vsel %vm1153_vm3, %v8869_v13, %v8837_v57  ;;  %v8868_v37 = vsel %vm1136_vm2, %v14835_v30, %v8786_v15  ;;  %v8940_v4 = vsel %vm1204_vm5, %v8916_v54, -inf  ;;  %v7818_v30 = vsel %vm14926_vm13, %v7800_v3, -3.4028235e+38 }
 0x529   : > { %7846 = vmax.xlane.f32.xlu0 %v7845_v27  ;;  %v8901_v5 = vmul.f32 0.00390625, %v8885_v51  ;;  %v6685_v6 = vsel %vm1153_vm3, %v6669_v12, %v16763_v31  ;;  %v6670_v57 = vsel %vm1136_vm2, %v16764_v29, %v14617_v16  ;;  %v7801_v15 = vmul.f32 0.00390625, %v14889_v46 }
 0x52a   : > { %8944 = vmax.xlane.f32.xlu1 %v8943_v26  ;;  %v7848_v27 = vsel %vm1204_vm5, %v7818_v30, -inf  ;;  %v6701_v26 = vmul.f32 0.00390625, %v6685_v6  ;;  %v6686_v54 = vsel %vm1153_vm3, %v6670_v57, %v14906_v38  ;;  %v7786_v16 = vsel %vm1153_vm3, %v14734_v56, %v14858_v53 }
 0x52b   : > { %v8795_v22 = vpop.xlane.xlu0 %8794  ;;  %v8834_v60 = vpop.xlane.xlu1 %8833  ;;  %v8919_v3 = vsel %vm15028_vm6, %v8901_v5, -3.4028235e+38  ;;  %v6702_v51 = vmul.f32 0.00390625, %v6686_v54  ;;  %v16765_v5 = vld [vmem:[#allocation17_spill] sm:$0xff] }
 0x52c   : > { %v8884_v17 = vsel %vm1153_vm3, %v8868_v37, %v8834_v60  ;;  %v8949_v38 = vsel %vm1204_vm5, %v8919_v3, -inf  ;;  %v7819_v60 = vsel %vm14926_vm13, %v7801_v15, -3.4028235e+38  ;;  %v6719_v53 = vsel %vm14912_vm11, %v6701_v26, -3.4028235e+38 }
 0x52d   : > { %v8900_v10 = vmul.f32 0.00390625, %v8884_v17  ;;  %8941 = vmax.xlane.f32.xlu0 %v8940_v4  ;;  %v7802_v17 = vmul.f32 0.00390625, %v7786_v16  ;;  %v8871_v4 = vsel %vm1136_vm2, %v14893_v48, %v8795_v22  ;;  %v7851_v50 = vsel %vm1204_vm5, %v7819_v60, -inf }
 0x52e   : > { %6748 = vmax.xlane.f32.xlu1 %v6747_v1  ;;  %v6753_v48 = vsel %vm1204_vm5, %v6719_v53, -inf  ;;  %v6720_v22 = vsel %vm14912_vm11, %v6702_v51, -3.4028235e+38  ;;  %v5706_v3 = vand.u32 65535, %v14711_v59 }
 0x52f   : > { %v8843_v0 = vpop.xlane.xlu0 %8842  ;;  %v8792_v18 = vpop.xlane.xlu1 %8791  ;;  %v8918_v55 = vsel %vm15028_vm6, %v8900_v10, -3.4028235e+38  ;;  %v7820_v30 = vsel %vm14926_vm13, %v7802_v17, -3.4028235e+38 }
 0x530   : > { %v8946_v8 = vsel %vm1204_vm5, %v8918_v55, -inf  ;;  %v8870_v37 = vsel %vm1136_vm2, %v14848_v32, %v8792_v18  ;;  %v7771_v32 = vsel %vm1136_vm2, %v14866_v58, %v14916_v28  ;;  %v8887_v10 = vsel %vm1153_vm3, %v8871_v4, %v8843_v0 }
 0x531   : > { %6751 = vmax.xlane.f32.xlu0 %v6750_v24  ;;  %v7787_v12 = vsel %vm1153_vm3, %v7771_v32, %v14874_v34  ;;  %v6671_v58 = vsel %vm1136_vm2, %v16765_v5, %v14952_v62  ;;  %v8903_v28 = vmul.f32 0.00390625, %v8887_v10  ;;  %v6756_v18 = vsel %vm1204_vm5, %v6720_v22, -inf  ;;  %v16766_v32 = vld [vmem:[#allocation83_spill] sm:$0xff] }
 0x532   : > { %7849 = vmax.xlane.f32.xlu1 %v7848_v27  ;;  %v6687_v31 = vsel %vm1153_vm3, %v6671_v58, %v14991_v23  ;;  %v7803_v24 = vmul.f32 0.00390625, %v7787_v12  ;;  %v7854_v34 = vsel %vm1204_vm5, %v7820_v30, -inf  ;;  %v5736_v10 = vand.u32 65535, %v16766_v32  ;;  %v16767_v22 = vld [vmem:[#allocation99_spill] sm:$0xff]  ;;  %v16768_v58 = vld [vmem:[#allocation72_spill] sm:$0xff] }
 0x533   : > { %v15143_v13 = vpop.xlane.xlu0 %8797  ;;  %v8840_v46 = vpop.xlane.xlu1 %8839  ;;  %v6703_v29 = vmul.f32 0.00390625, %v6687_v31  ;;  %v8921_v57 = vsel %vm15028_vm6, %v8903_v28, -3.4028235e+38  ;;  %v5751_v28 = vand.u32 65535, %v16768_v58 }
 0x534   : > { %v8886_v56 = vsel %vm1153_vm3, %v8870_v37, %v8840_v46  ;;  %v8955_v55 = vsel %vm1204_vm5, %v8921_v57, -inf  ;;  %v7821_v26 = vsel %vm14926_vm13, %v7803_v24, -3.4028235e+38  ;;  %v5708_v37 = vcvt.s32.f32 %v5706_v3  ;;  %v16771_v57 = vld [vmem:[#allocation51_spill] sm:$0xff] }
 0x535   : > { %8947 = vmax.xlane.f32.xlu0 %v8946_v8  ;;  %v8902_v21 = vmul.f32 0.00390625, %v8886_v56  ;;  %v6721_v54 = vsel %vm14912_vm11, %v6703_v29, -3.4028235e+38  ;;  %v7857_v8 = vsel %vm1204_vm5, %v7821_v26, -inf  ;;  %v5738_v5 = vcvt.s32.f32 %v5736_v10 }
 0x536   : > { %8950 = vmax.xlane.f32.xlu1 %v8949_v38  ;;  %v6759_v51 = vsel %vm1204_vm5, %v6721_v54, -inf  ;;  %v5721_v38 = vand.u32 65535, %v14724_v7 }
 0x537   : > { %v8846_v1 = vpop.xlane.xlu0 %8845  ;;  %v15160_v11 = vpop.xlane.xlu1 %5710  ;;  %v8920_v62 = vsel %vm15028_vm6, %v8902_v21, -3.4028235e+38 }
 0x538   : > { %v8952_v23 = vsel %vm1204_vm5, %v8920_v62, -inf  ;;  %vm5712_vm0 = vcmp.eq.f32.partialorder %v14736_v52, %v15160_v11  ;;  %v5723_v53 = vcvt.s32.f32 %v5721_v38  ;;  %v5753_v62 = vcvt.s32.f32 %v5751_v28 }
 0x539   : > { %7852 = vmax.xlane.f32.xlu0 %v7851_v50  ;;  %v5713_v4 = vsel %vm5712_vm0, %v5708_v37, inf }
 0x53a   : > { %6754 = vmax.xlane.f32.xlu1 %v6753_v48 }
 0x53b   : > { %v7748_v6 = vpop.xlane.xlu0 %7747  ;;  %v15175_v0 = vpop.xlane.xlu1 %5725 }
 0x53c   : > { %vm5727_vm7 = vcmp.eq.f32.partialorder %v14751_v14, %v15175_v0 }
 0x53d   : > { %6757 = vmax.xlane.f32.xlu0 %v6756_v18  ;;  %v5728_v48 = vsel %vm5727_vm7, %v5723_v53, inf }
 0x53e   : > { %7855 = vmax.xlane.f32.xlu1 %v7854_v34 }
 0x53f   : > { %v8801_v15 = vpop.xlane.xlu0 %8800  ;;  %v15183_v27 = vpop.xlane.xlu1 %5740 }
 0x540   : > { %vm5742_vm8 = vcmp.eq.f32.partialorder %v16767_v22, %v15183_v27 }
 0x541   : > { %8953 = vmax.xlane.f32.xlu0 %v8952_v23  ;;  %v5743_v18 = vsel %vm5742_vm8, %v5738_v5, inf }
 0x542   : > { %8956 = vmax.xlane.f32.xlu1 %v8955_v55 }
 0x543   : > { %v7655_v16 = vpop.xlane.xlu0 %7654  ;;  %v15192_v46 = vpop.xlane.xlu1 %5755 }
 0x545   : > { %7858 = vmax.xlane.f32.xlu0 %v7857_v8 }
 0x546   : > { %6760 = vmax.xlane.f32.xlu1 %v6759_v51 }
 0x547   : > { %v8849_v60 = vpop.xlane.xlu0 %8848  ;;  %v7700_v17 = vpop.xlane.xlu1 %7699 }
 0x548   : > { %v7772_v59 = vsel %vm1136_vm2, %v14883_v49, %v7700_v17  ;;  %v8872_v49 = vsel %vm1136_vm2, %v14968_v9, %v15143_v13  ;;  %v16769_v9 = vld [vmem:[#allocation110_spill] sm:$0xff] }
 0x549   : > { %v7788_v56 = vsel %vm1153_vm3, %v7772_v59, %v7748_v6  ;;  %5714 = vmin.xlane.f32.xlu0 %v5713_v4  ;;  %v8888_v12 = vsel %vm1153_vm3, %v8872_v49, %v8846_v1  ;;  %vm5757_vm9 = vcmp.eq.f32.partialorder %v16769_v9, %v15192_v46  ;;  %v16770_v1 = vld [vmem:[#allocation89_spill] sm:$0xff]  ;;  %v16772_v59 = vld [vmem:[#allocation106_spill] sm:$0xff] }
 0x54a   : > { %v7804_v52 = vmul.f32 0.00390625, %v7788_v56  ;;  %v8904_v24 = vmul.f32 0.00390625, %v8888_v12  ;;  %v4616_v29 = vcvt.f32.s32 %v16770_v1  ;;  %v5758_v54 = vsel %vm5757_vm9, %v5753_v62, inf }
 0x54b   : > { %v7751_v50 = vpop.xlane.xlu0 %7750  ;;  %v6602_v21 = vpop.xlane.xlu1 %6601  ;;  %v4631_v4 = vcvt.f32.s32 %v16772_v59 }
 0x54c   : > { %v7822_v7 = vsel %vm14926_vm13, %v7804_v52, -3.4028235e+38  ;;  %v6672_v23 = vsel %vm1136_vm2, %v16771_v57, %v6602_v21  ;;  %v8922_v37 = vsel %vm15028_vm6, %v8904_v24, -3.4028235e+38  ;;  %v4617_v38 = vshll.u32 %v4616_v29, 16  ;;  %v16774_v24 = vld [vmem:[#allocation137_spill] sm:$0xff] }
 0x54d   : > { %5729 = vmin.xlane.f32.xlu0 %v5728_v48  ;;  %v7860_v14 = vsel %vm1204_vm5, %v7822_v7, -inf  ;;  %v8958_v53 = vsel %vm1204_vm5, %v8922_v37, -inf  ;;  %v16773_v7 = vld [vmem:[#allocation34_spill] sm:$0xff]  ;;  %v4632_v12 = vshll.u32 %v4631_v4, 16  ;;  %v4661_v9 = vcvt.f32.s32 %v16774_v24 }
 0x54e   : > { %7861 = vmax.xlane.f32.xlu1 %v7860_v14  ;;  %v4646_v49 = vcvt.f32.s32 %v16773_v7 }
 0x54f   : > { %v15215_v30 = vpop.xlane.xlu0 %8803  ;;  %v8753_v31 = vpop.xlane.xlu1 %8752 }
 0x550   : > { %v8873_v6 = vsel %vm1136_vm2, %v8753_v31, %v8801_v15  ;;  %v4647_v28 = vshll.u32 %v4646_v49, 16 }
 0x551   : > { %v8889_v13 = vsel %vm1153_vm3, %v8873_v6, %v8849_v60  ;;  %5744 = vmin.xlane.f32.xlu0 %v5743_v18 }
 0x552   : > { %v8905_v34 = vmul.f32 0.00390625, %v8889_v13 }
 0x553   : > { %v15224_v55 = vpop.xlane.xlu0 %7657  ;;  %v6650_v26 = vpop.xlane.xlu1 %6649 }
 0x554   : > { %v6688_v15 = vsel %vm1153_vm3, %v6672_v23, %v6650_v26  ;;  %v8923_v3 = vsel %vm15028_vm6, %v8905_v34, -3.4028235e+38  ;;  %v16775_v26 = vld [vmem:[#allocation40_spill] sm:$0xff] }
 0x555   : > { %v6704_v8 = vmul.f32 0.00390625, %v6688_v15  ;;  %5759 = vmin.xlane.f32.xlu0 %v5758_v54  ;;  %v8961_v51 = vsel %vm1204_vm5, %v8923_v3, -inf }
 0x556   : > { %8962 = vmax.xlane.f32.xlu1 %v8961_v51 }
 0x557   : > { %v4614_v60 = vpop.xlane.xlu0 %4613  ;;  %v7703_v17 = vpop.xlane.xlu1 %7702  ;;  %v6722_v10 = vsel %vm14912_vm11, %v6704_v8, -3.4028235e+38  ;;  %v4662_v8 = vshll.u32 %v4661_v9, 16 }
 0x558   : > { %v4615_v56 = vcvt.f32.s32 %v4614_v60  ;;  %v7773_v52 = vsel %vm1136_vm2, %v7655_v16, %v7703_v17  ;;  %v6762_v16 = vsel %vm1204_vm5, %v6722_v10, -inf }
 0x559   : > { %v7789_v32 = vsel %vm1153_vm3, %v7773_v52, %v7751_v50  ;;  %8959 = vmax.xlane.f32.xlu0 %v8958_v53 }
 0x55a   : > { %v4618_v21 = vadd.s32 %v4617_v38, %v4615_v56  ;;  %v7805_v48 = vmul.f32 0.00390625, %v7789_v32 }
 0x55b   : > { %v4629_v22 = vpop.xlane.xlu0 %4628  ;;  %v6605_v14 = vpop.xlane.xlu1 %6604 }
 0x55c   : > { %vm4844_vm10 = vcmp.eq.s32.totalorder %v16509_v35, %v4618_v21  ;;  %v4630_v5 = vcvt.f32.s32 %v4629_v22  ;;  %v7823_v50 = vsel %vm14926_vm13, %v7805_v48, -3.4028235e+38  ;;  %v6673_v15 = vsel %vm1136_vm2, %v16775_v26, %v6605_v14 }
 0x55d   : > { %6763 = vmax.xlane.f32.xlu0 %v6762_v16  ;;  %v4876_v31 = vsel %vm4844_vm10, 1.0, %v16624_v61  ;;  %v7863_v34 = vsel %vm1204_vm5, %v7823_v50, -inf }
 0x55e   : > { %v4633_v58 = vadd.s32 %v4632_v12, %v4630_v5  ;;  %v4892_v1 = vsel %vm1204_vm5, %v4876_v31, 0.0 }
 0x55f   : > { %v4644_v6 = vpop.xlane.xlu0 %4643  ;;  %v8756_v18 = vpop.xlane.xlu1 %8755 }
 0x560   : > { %vm4845_vm12 = vcmp.eq.s32.totalorder %v16509_v35, %v4633_v58  ;;  %v4645_v13 = vcvt.f32.s32 %v4644_v6  ;;  %v8874_v56 = vsel %vm1136_vm2, %v8756_v18, %v15215_v30 }
 0x561   : > { %v4877_v62 = vsel %vm4845_vm12, 1.0, %v16624_v61  ;;  %7864 = vmax.xlane.f32.xlu0 %v7863_v34  ;;  %v16776_v34 = vld [vmem:[#allocation97_spill] sm:$0xff] }
 0x562   : > { %v4893_v29 = vsel %vm1204_vm5, %v4877_v62, 0.0  ;;  %v4648_v57 = vadd.s32 %v4647_v28, %v4645_v13 }
 0x563   : > { %v4894_v23 = vadd.f32 %v4893_v29, %v4892_v1  ;;  %v4659_v54 = vpop.xlane.xlu0 %4658  ;;  %v6653_v3 = vpop.xlane.xlu1 %6652 }
 0x564   : > { %vm4846_vm14 = vcmp.eq.s32.totalorder %v16509_v35, %v4648_v57  ;;  %v4660_v51 = vcvt.f32.s32 %v4659_v54  ;;  %v6689_v37 = vsel %vm1153_vm3, %v6673_v15, %v6653_v3 }
 0x565   : > { %v4878_v38 = vsel %vm4846_vm14, 1.0, %v16624_v61  ;;  %v6705_v60 = vmul.f32 0.00390625, %v6689_v37 }
 0x566   : > { %v4895_v17 = vsel %vm1204_vm5, %v4878_v38, 0.0  ;;  %v4663_v59 = vadd.s32 %v4662_v8, %v4660_v51 }
 0x567   : > { %v4896_v4 = vadd.f32 %v4895_v17, %v4894_v23  ;;  %v8852_v52 = vpop.xlane.xlu0 %8851  ;;  %v7706_v53 = vpop.xlane.xlu1 %7705  ;;  %v6723_v32 = vsel %vm14912_vm11, %v6705_v60, -3.4028235e+38 }
 0x568   : > { %vm4847_vm15 = vcmp.eq.s32.totalorder %v16509_v35, %v4663_v59  ;;  %v8890_v10 = vsel %vm1153_vm3, %v8874_v56, %v8852_v52  ;;  %v6765_v21 = vsel %vm1204_vm5, %v6723_v32, -inf  ;;  %v7774_v30 = vsel %vm1136_vm2, %v15224_v55, %v7706_v53 }
 0x569   : > { %v4879_v48 = vsel %vm4847_vm15, 1.0, %v16624_v61  ;;  %v8906_v7 = vmul.f32 0.00390625, %v8890_v10  ;;  %6766 = vmax.xlane.f32.xlu1 %v6765_v21  ;;  %vm9398_vm15 = vcmask 39936  }
 0x56a   : > { %v4897_v49 = vsel %vm1204_vm5, %v4879_v48, 0.0 }
 0x56b   : > { %v4898_v22 = vadd.f32 %v4897_v49, %v4896_v4  ;;  %v7754_v14 = vpop.xlane.xlu0 %7753  ;;  %v6608_v12 = vpop.xlane.xlu1 %6607  ;;  %v8924_v5 = vsel %vm15028_vm6, %v8906_v7, -3.4028235e+38 }
 0x56c   : > { %v7790_v16 = vsel %vm1153_vm3, %v7774_v30, %v7754_v14  ;;  %v8964_v50 = vsel %vm1204_vm5, %v8924_v5, -inf  ;;  %v6674_v62 = vsel %vm1136_vm2, %v16776_v34, %v6608_v12 }
 0x56d   : > { %v4923_v58 = vrot.slane %v4898_v22, 4  ;;  %v7806_v28 = vmul.f32 0.00390625, %v7790_v16  ;;  %8965 = vmax.xlane.f32.xlu0 %v8964_v50 }
 0x56f   : > { %v4924_v31 = vadd.f32 %v4923_v58, %v4898_v22  ;;  %v8807_v6 = vpop.xlane.xlu0 %8806  ;;  %v8759_v18 = vpop.xlane.xlu1 %8758  ;;  %v7824_v24 = vsel %vm14926_vm13, %v7806_v28, -3.4028235e+38  ;;  %v16777_v22 = vld [vmem:[#allocation42_spill] sm:$0xff] }
 0x570   : > { %v7866_v55 = vsel %vm1204_vm5, %v7824_v24, -inf  ;;  %v8875_v54 = vsel %vm1136_vm2, %v8759_v18, %v8807_v6 }
 0x571   : > { %v4925_v9 = vrot.slane %v4924_v31, 2  ;;  %7867 = vmax.xlane.f32.xlu1 %v7866_v55 }
 0x573   : > { %v4926_v13 = vadd.f32 %v4925_v9, %v4924_v31  ;;  %v7661_v1 = vpop.xlane.xlu0 %7660  ;;  %v6656_v29 = vpop.xlane.xlu1 %6655 }
 0x574   : > { %v6690_v57 = vsel %vm1153_vm3, %v6674_v62, %v6656_v29 }
 0x575   : > { %v4927_v23 = vrot.slane %v4926_v13, 1  ;;  %v6706_v26 = vmul.f32 0.00390625, %v6690_v57 }
 0x577   : > { %v4928_v15 = vadd.f32 %v4927_v23, %v4926_v13  ;;  %v8855_v3 = vpop.xlane.xlu0 %8854  ;;  %v7709_v8 = vpop.xlane.xlu1 %7708  ;;  %v6724_v51 = vsel %vm14912_vm11, %v6706_v26, -3.4028235e+38 }
 0x578   : > { %v8891_v37 = vsel %vm1153_vm3, %v8875_v54, %v8855_v3  ;;  %v6768_v38 = vsel %vm1204_vm5, %v6724_v51, -inf  ;;  %v7775_v4 = vsel %vm1136_vm2, %v7661_v1, %v7709_v8 }
 0x579   : > { %v4929_v60 = vmul.f32 0.03125, %v4928_v15  ;;  %v8907_v17 = vmul.f32 0.00390625, %v8891_v37  ;;  %6769 = vmax.xlane.f32.xlu0 %v6768_v38 }
 0x57b   : > { %v15283_v59 = vsel %vm9485_vm4, %v15070_v2, %v4929_v60  ;;  %v7757_v56 = vpop.xlane.xlu0 %7756  ;;  %v6611_v52 = vpop.xlane.xlu1 %6610  ;;  %v8925_v53 = vsel %vm15028_vm6, %v8907_v17, -3.4028235e+38  ;;  %vm9415_vm4 = vcmask 48128  }
 0x57c   : > { %v7791_v32 = vsel %vm1153_vm3, %v7775_v4, %v7757_v56  ;;  %v8967_v10 = vsel %vm1204_vm5, %v8925_v53, -inf  ;;  %v6675_v30 = vsel %vm1136_vm2, %v16777_v22, %v6611_v52 }
 0x57d   : > { %v7807_v21 = vmul.f32 0.00390625, %v7791_v32  ;;  %8968 = vmax.xlane.f32.xlu1 %v8967_v10 }
 0x57f   : > { %v8810_v48 = vpop.xlane.xlu0 %8809  ;;  %v8762_v7 = vpop.xlane.xlu1 %8761  ;;  %v7825_v49 = vsel %vm14926_vm13, %v7807_v21, -3.4028235e+38 }
 0x580   : > { %v7869_v2 = vsel %vm1204_vm5, %v7825_v49, -inf  ;;  %v8876_v50 = vsel %vm1136_vm2, %v8762_v7, %v8810_v48 }
 0x581   : > { %7870 = vmax.xlane.f32.xlu0 %v7869_v2 }
 0x583   : > { %v7664_v14 = vpop.xlane.xlu0 %7663  ;;  %v6659_v12 = vpop.xlane.xlu1 %6658 }
 0x584   : > { %v6691_v5 = vsel %vm1153_vm3, %v6675_v30, %v6659_v12 }
 0x585   : > { %v6707_v16 = vmul.f32 0.00390625, %v6691_v5 }
 0x587   : > { %v8858_v58 = vpop.xlane.xlu0 %8857  ;;  %v7712_v28 = vpop.xlane.xlu1 %7711  ;;  %v6725_v31 = vsel %vm14912_vm11, %v6707_v16, -3.4028235e+38 }
 0x588   : > { %v8892_v6 = vsel %vm1153_vm3, %v8876_v50, %v8858_v58  ;;  %v6771_v18 = vsel %vm1204_vm5, %v6725_v31, -inf  ;;  %v7776_v55 = vsel %vm1136_vm2, %v7664_v14, %v7712_v28 }
 0x589   : > { %v8908_v24 = vmul.f32 0.00390625, %v8892_v6  ;;  %6772 = vmax.xlane.f32.xlu1 %v6771_v18 }
 0x58b   : > { %v8765_v9 = vpop.xlane.xlu0 %8764  ;;  %v7760_v13 = vpop.xlane.xlu1 %7759  ;;  %v8926_v34 = vsel %vm15028_vm6, %v8908_v24, -3.4028235e+38 }
 0x58c   : > { %v7792_v62 = vsel %vm1153_vm3, %v7776_v55, %v7760_v13  ;;  %v8970_v1 = vsel %vm1204_vm5, %v8926_v34, -inf  ;;  %v9498_v13 = vld [vmem:[%s15888_s4 + $0x8] sm:$0xff]  ;;  %v16778_v34 = vld [vmem:[#allocation41_spill] sm:$0xff] }
 0x58d   : > { %v7808_v29 = vmul.f32 0.00390625, %v7792_v62  ;;  %8971 = vmax.xlane.f32.xlu0 %v8970_v1  ;;  %v16006_v62 = vmov 0.0|0.0  }
 0x58e   : > { %10060 = vmatprep.subr.bf16.mxu0 %v16006_v62 }
 0x58f   : > { %v8861_v43 = vpop.xlane.xlu0 %8860  ;;  %v8813_v57 = vpop.xlane.xlu1 %8812  ;;  %v7826_v23 = vsel %vm14926_vm13, %v7808_v29, -3.4028235e+38 }
 0x590   : > { %v8877_v26 = vsel %vm1136_vm2, %v8765_v9, %v8813_v57  ;;  %v7872_v15 = vsel %vm1204_vm5, %v7826_v23, -inf  ;;  %v9497_v9 = vld [vmem:[%s15888_s4] sm:$0xff] }
 0x591   : > { %v8893_v54 = vsel %vm1153_vm3, %v8877_v26, %v8861_v43  ;;  %7873 = vmax.xlane.f32.xlu1 %v7872_v15  ;;  %v10061_v1 = vpack.c.bf16 %v9498_v13, %v9497_v9  ;;  %v9501_v9 = vld [vmem:[%s15888_s4 + $0x20] sm:$0xff] }
 0x592   : > { %v8909_v3 = vmul.f32 0.00390625, %v8893_v54 }
 0x593   : > { %v15311_v8 = vpop.xlane.xlu0 %7828  ;;  %v15313_v51 = vpop.xlane.xlu1 %6727  ;;  %10062 = vmatpush3.bf16.msra.mxu0 %v10061_v1 }
 0x594   : > { %vm7875_vm11 = vcmp.eq.f32.partialorder %v14944_v42, %v15311_v8  ;;  %vm6774_vm0 = vcmp.eq.f32.partialorder %v14920_v63, %v15313_v51  ;;  %v8927_v33 = vsel %vm15028_vm6, %v8909_v3, -3.4028235e+38  ;;  %10063 = vmatprep.subr.bf16.mxu0 %v16006_v62 }
 0x595   : > { %v6790_v37 = vsel %vm6774_vm0, %v16509_v35, 3  ;;  %v8973_v38 = vsel %vm1204_vm5, %v8927_v33, -inf  ;;  %v7891_v17 = vsel %vm7875_vm11, %v16509_v35, 3  ;;  %vm9432_vm11 = vcmask 56320  }
 0x596   : > { %v15324_v60 = vsel %vm1204_vm5, %v6790_v37, 2147483647  ;;  %8974 = vmax.xlane.f32.xlu0 %v8973_v38  ;;  %v15341_v53 = vsel %vm1204_vm5, %v7891_v17, 2147483647  ;;  %v9499_v17 = vld [vmem:[%s15888_s4 + $0x10] sm:$0xff] }
 0x597   : > { %v15327_v4 = vpop.xlane.xlu0 %6733  ;;  %v15329_v56 = vpop.xlane.xlu1 %6730  ;;  %v6808_v42 = vshra.s32 %v15324_v60, 16  ;;  %v7909_v7 = vshra.s32 %v15341_v53, 16 }
 0x598   : > { %vm6775_vm2 = vcmp.eq.f32.partialorder %v14932_v19, %v15329_v56  ;;  %vm6776_vm3 = vcmp.eq.f32.partialorder %v14963_v41, %v15327_v4 }
 0x599   : > { %v6791_v63 = vsel %vm6775_vm2, %v16509_v35, 3  ;;  %v15335_v40 = vcvt.s32.f32 %v6808_v42  ;;  %v6792_v2 = vsel %vm6776_vm3, %v16509_v35, 3  ;;  %v15366_v41 = vcvt.s32.f32 %v7909_v7 }
 0x59a   : > { %v15338_v52 = vsel %vm1204_vm5, %v6791_v63, 2147483647  ;;  %v15370_v14 = vsel %vm1204_vm5, %v6792_v2, 2147483647 }
 0x59b   : > { %v15343_v32 = vpop.xlane.xlu0 %7834  ;;  %6811 = vmin.xlane.f32.xlu0 %v15335_v40  ;;  %v15346_v10 = vpop.xlane.xlu1 %7831  ;;  %v6823_v21 = vshra.s32 %v15338_v52, 16  ;;  %v6838_v50 = vshra.s32 %v15370_v14, 16 }
 0x59c   : > { %vm7876_vm13 = vcmp.eq.f32.partialorder %v14986_v44, %v15346_v10  ;;  %vm7877_vm6 = vcmp.eq.f32.partialorder %v14982_v45, %v15343_v32 }
 0x59d   : > { %v7892_v19 = vsel %vm7876_vm13, %v16509_v35, 3  ;;  %v15354_v48 = vcvt.s32.f32 %v6823_v21  ;;  %v15393_v18 = vcvt.s32.f32 %v6838_v50  ;;  %v7893_v45 = vsel %vm7877_vm6, %v16509_v35, 3 }
 0x59e   : > { %v15358_v49 = vsel %vm1204_vm5, %v7892_v19, 2147483647  ;;  %v15421_v23 = vsel %vm1204_vm5, %v7893_v45, 2147483647  ;;  %vm10300_vm6 = vmmov 0  }
 0x59f   : > { %v15361_v22 = vpop.xlane.xlu0 %6739  ;;  %6826 = vmin.xlane.f32.xlu0 %v15354_v48  ;;  %v15364_v30 = vpop.xlane.xlu1 %6736  ;;  %v7924_v44 = vshra.s32 %v15358_v49, 16  ;;  %v7939_v3 = vshra.s32 %v15421_v23, 16  ;;  %10057 = vmatprep.mubr.msk.f32.mxu0 %vm10300_vm6, %v16624_v61 }
 0x5a0   : > { %vm6777_vm9 = vcmp.eq.f32.partialorder %v16778_v34, %v15364_v30 }
 0x5a1   : > { %v15377_v16 = vcvt.s32.f32 %v7924_v44  ;;  %v6793_v26 = vsel %vm6777_vm9, %v16509_v35, 3  ;;  %v15450_v21 = vcvt.s32.f32 %v7939_v3  ;;  %v16779_v3 = vld [vmem:[#allocation14_spill] sm:$0xff] }
 0x5a2   : > { %v15434_v33 = vsel %vm1204_vm5, %v6793_v26, 2147483647 }
 0x5a3   : > { %v15372_v12 = vpop.xlane.xlu0 %7840  ;;  %7912 = vmin.xlane.f32.xlu0 %v15366_v41  ;;  %v15375_v5 = vpop.xlane.xlu1 %7837  ;;  %v6853_v19 = vshra.s32 %v15434_v33, 16 }
 0x5a4   : > { %vm7878_vm12 = vcmp.eq.f32.partialorder %v15019_v39, %v15375_v5 }
 0x5a5   : > { %v7894_v44 = vsel %vm7878_vm12, %v16509_v35, 3  ;;  %v15463_v39 = vcvt.s32.f32 %v6853_v19 }
 0x5a7   : > { %v15380_v58 = vpop.xlane.xlu0 %8929  ;;  %7927 = vmin.xlane.f32.xlu0 %v15377_v16  ;;  %v15383_v28 = vpop.xlane.xlu1 %8932 }
 0x5a8   : > { %vm8976_vm7 = vcmp.eq.f32.partialorder %v15044_v20, %v15380_v58  ;;  %vm8977_vm8 = vcmp.eq.f32.partialorder %v15038_v25, %v15383_v28 }
 0x5a9   : > { %v8992_v31 = vsel %vm8976_vm7, %v16509_v35, 3  ;;  %v8993_v6 = vsel %vm8977_vm8, %v16509_v35, 3  ;;  %vm9487_vm7 = vcmask 1043456  }
 0x5aa   : > { %v15396_v24 = vsel %vm1204_vm5, %v8992_v31, 2147483647  ;;  %v15399_v55 = vsel %vm1204_vm5, %v8993_v6, 2147483647  ;;  %v15467_v31 = vsel %vm1204_vm5, %v7894_v44, 2147483647 }
 0x5ab   : > { %6841 = vmin.xlane.f32.xlu0 %v15393_v18  ;;  %v15403_v20 = vpop.xlane.xlu1 %6742  ;;  %v9010_v25 = vshra.s32 %v15396_v24, 16  ;;  %v9025_v43 = vshra.s32 %v15399_v55, 16  ;;  %v7954_v1 = vshra.s32 %v15467_v31, 16 }
 0x5ad   : > { %v15415_v29 = vcvt.s32.f32 %v9010_v25  ;;  %v15430_v54 = vcvt.s32.f32 %v9025_v43 }
 0x5ae   : > { %v15418_v57 = vpop.xlane.xlu0 %8935 }
 0x5af   : > { %9013 = vmin.xlane.f32.xlu0 %v15415_v29  ;;  %v15425_v15 = vpop.xlane.xlu1 %8938  ;;  %vm8978_vm10 = vcmp.eq.f32.partialorder %v15076_v47, %v15418_v57  ;;  %v9500_v47 = vld [vmem:[%s15888_s4 + $0x18] sm:$0xff] }
 0x5b0   : > { %v8994_v38 = vsel %vm8978_vm10, %v16509_v35, 3  ;;  %v10064_v63 = vpack.c.bf16 %v9500_v47, %v9499_v17  ;;  %vm8979_vm14 = vcmp.eq.f32.partialorder %v15066_v36, %v15425_v15  ;;  %v9502_v36 = vld [vmem:[%s15888_s4 + $0x28] sm:$0xff]  ;;  %v15494_v47 = vcvt.s32.f32 %v7954_v1 }
 0x5b1   : > { %v15454_v7 = vsel %vm1204_vm5, %v8994_v38, 2147483647  ;;  %v8995_v25 = vsel %vm8979_vm14, %v16509_v35, 3  ;;  %v10067_v13 = vpack.c.bf16 %v9502_v36, %v9501_v9  ;;  %v9399_v38 = vsel %vm9398_vm15, %v16779_v3, %v15313_v51  ;;  %v16780_v9 = vld [vmem:[#allocation130_spill] sm:$0xff]  ;;  %v16781_v36 = vld [vmem:[#allocation76_spill] sm:$0xff] }
 0x5b2   : > { %v15436_v37 = vpop.xlane.xlu0 %6745  ;;  %10065 = vmatpush3.bf16.msra.mxu0 %v10064_v63  ;;  %v9040_v50 = vshra.s32 %v15454_v7, 16  ;;  %v15483_v43 = vsel %vm1204_vm5, %v8995_v25, 2147483647  ;;  %v9416_v19 = vsel %vm9415_vm4, %v9399_v38, %v15311_v8  ;;  %v9504_v25 = vld [vmem:[%s15888_s4 + $0x38] sm:$0xff] }
 0x5b3   : > { %9028 = vmin.xlane.f32.xlu0 %v15430_v54  ;;  %v15448_v42 = vpop.xlane.xlu1 %7843  ;;  %10066 = vmatprep.subr.bf16.mxu0 %v16006_v62  ;;  %v9055_v63 = vshra.s32 %v15483_v43, 16  ;;  %v9433_v51 = vsel %vm9432_vm11, %v9416_v19, %v15380_v58 }
 0x5b4   : > { %v15479_v34 = vcvt.s32.f32 %v9040_v50  ;;  %v9503_v50 = vld [vmem:[%s15888_s4 + $0x30] sm:$0xff] }
 0x5b5   : > { %v10070_v8 = vpack.c.bf16 %v9504_v25, %v9503_v50  ;;  %v15515_v58 = vcvt.s32.f32 %v9055_v63 }
 0x5b6   : > { %v15456_v2 = vpop.xlane.xlu0 %7846  ;;  %10068 = vmatpush3.bf16.msra.mxu0 %v10067_v13  ;;  %v9383_v13 = vsel %vm513_vm1, %v16781_v36, %v16780_v9  ;;  %v16784_v9 = vld [vmem:[#allocation87_spill] sm:$0xff]  ;;  %v16785_v36 = vld [vmem:[#allocation58_spill] sm:$0xff] }
 0x5b7   : > { %7942 = vmin.xlane.f32.xlu0 %v15450_v21  ;;  %v15469_v6 = vpop.xlane.xlu1 %8944  ;;  %10069 = vmatprep.subr.bf16.mxu0 %v16006_v62  ;;  %v9400_v1 = vsel %vm9398_vm15, %v9383_v13, %v15329_v56  ;;  %v16783_v56 = vld [vmem:[#allocation20_spill] sm:$0xff] }
 0x5b8   : > { %v9417_v3 = vsel %vm9415_vm4, %v9400_v1, %v15346_v10  ;;  %v9401_v63 = vsel %vm9398_vm15, %v16783_v56, %v15327_v4  ;;  %v9385_v4 = vsel %vm513_vm1, %v16785_v36, %v16784_v9  ;;  %v16786_v56 = vld [vmem:[#allocation19_spill] sm:$0xff]  ;;  %v16788_v9 = vld [vmem:[#allocation37_spill] sm:$0xff] }
 0x5b9   : > { %v9434_v62 = vsel %vm9432_vm11, %v9417_v3, %v15383_v28  ;;  %v9418_v10 = vsel %vm9415_vm4, %v9401_v63, %v15343_v32  ;;  %v9505_v28 = vld [vmem:[%s15888_s4 + $0x40] sm:$0xff]  ;;  %v9403_v63 = vsel %vm9398_vm15, %v16786_v56, %v15361_v22  ;;  %v16787_v22 = vld [vmem:[#allocation98_spill] sm:$0xff] }
 0x5ba   : > { %v8942_v45 = vpop.xlane.xlu0 %8941  ;;  %10071 = vmatpush3.bf16.msra.mxu0 %v10070_v8  ;;  %v9435_v25 = vsel %vm9432_vm11, %v9418_v10, %v15418_v57  ;;  %v9402_v8 = vsel %vm9398_vm15, %v9385_v4, %v15364_v30  ;;  %v9420_v10 = vsel %vm9415_vm4, %v9403_v63, %v15372_v12  ;;  %v9387_v12 = vsel %vm513_vm1, %v16788_v9, %v16787_v22  ;;  %v9509_v56 = vld [vmem:[%s15888_s4 + $0x60] sm:$0xff] }
 0x5bb   : > { %6856 = vmin.xlane.f32.xlu0 %v15463_v39  ;;  %v15492_v17 = vpop.xlane.xlu1 %6748  ;;  %v9419_v57 = vsel %vm9415_vm4, %v9402_v8, %v15375_v5  ;;  %v5717_v5 = vcvt.f32.s32 %v15160_v11  ;;  %v9404_v4 = vsel %vm9398_vm15, %v9387_v12, %v15403_v20  ;;  %v5732_v8 = vcvt.f32.s32 %v15175_v0  ;;  %v9510_v20 = vld [vmem:[%s15888_s4 + $0x68] sm:$0xff] }
 0x5bc   : > { %v9436_v3 = vsel %vm9432_vm11, %v9419_v57, %v15425_v15  ;;  %v9507_v15 = vld [vmem:[%s15888_s4 + $0x50] sm:$0xff]  ;;  %v9421_v11 = vsel %vm9415_vm4, %v9404_v4, %v15448_v42  ;;  %v10079_v63 = vpack.c.bf16 %v9510_v20, %v9509_v56  ;;  %v16790_v12 = vld [vmem:[#allocation16_spill] sm:$0xff]  ;;  %v16792_v20 = vld [vmem:[#allocation71_spill] sm:$0xff] }
 0x5bd   : > { %v9438_v57 = vsel %vm9432_vm11, %v9421_v11, %v15469_v6  ;;  %v5747_v6 = vcvt.f32.s32 %v15183_v27 }
 0x5be   : > { %v15485_v26 = vpop.xlane.xlu0 %6751 }
 0x5bf   : > { %9043 = vmin.xlane.f32.xlu0 %v15479_v34  ;;  %v15519_v38 = vpop.xlane.xlu1 %7849  ;;  %v5748_v4 = vshll.u32 %v5747_v6, 16 }
 0x5c2   : > { %v15499_v44 = vpop.xlane.xlu0 %8947 }
 0x5c3   : > { %7957 = vmin.xlane.f32.xlu0 %v15494_v47  ;;  %v8951_v13 = vpop.xlane.xlu1 %8950 }
 0x5c4   : > { %9449 = vxpose.xlu1.b32.start [1/16] (narrow) %v9433_v51, 8  ;;  %v16782_v51 = vmov 0.0|0.0  }
 0x5c5   : > { %10072 = vmatprep.subr.bf16.mxu0 %v16782_v51 }
 0x5c6   : > { %v15521_v19 = vpop.xlane.xlu0 %7852 }
 0x5c7   : > { %9058 = vmin.xlane.f32.xlu0 %v15515_v58  ;;  %v15559_v30 = vpop.xlane.xlu1 %6754 }
 0x5c8   : > { %9450 = vxpose.xlu1.b32.cont [2/16] (narrow) %v9434_v62, 8  ;;  %v9506_v62 = vld [vmem:[%s15888_s4 + $0x48] sm:$0xff] }
 0x5c9   : > { %v10073_v32 = vpack.c.bf16 %v9506_v62, %v9505_v28  ;;  %v9437_v28 = vsel %vm9432_vm11, %v9420_v10, %v8942_v45  ;;  %v9508_v62 = vld [vmem:[%s15888_s4 + $0x58] sm:$0xff]  ;;  %v16789_v10 = vld [vmem:[#allocation103_spill] sm:$0xff] }
 0x5ca   : > { %v15532_v50 = vpop.xlane.xlu0 %6757  ;;  %v10076_v36 = vpack.c.bf16 %v9508_v62, %v9507_v15  ;;  %v9405_v0 = vsel %vm9398_vm15, %v16789_v10, %v15436_v37  ;;  %v5733_v62 = vshll.u32 %v5732_v8, 16  ;;  %v5762_v8 = vcvt.f32.s32 %v15192_v46 }
 0x5cb   : > { %10074 = vmatpush3.bf16.msra.mxu0 %v10073_v32  ;;  %v5718_v32 = vshll.u32 %v5717_v5, 16  ;;  %v7856_v42 = vpop.xlane.xlu1 %7855  ;;  %v9407_v46 = vsel %vm9398_vm15, %v16792_v20, %v15485_v26  ;;  %v16794_v26 = vld [vmem:[#allocation96_spill] sm:$0xff] }
 0x5cc   : > { %9451 = vxpose.xlu1.b32.cont [3/16] (narrow) %v9435_v25, 8  ;;  %10075 = vmatprep.subr.bf16.mxu0 %v16782_v51 }
 0x5ce   : > { %v15549_v1 = vpop.xlane.xlu0 %8953 }
 0x5cf   : > { %10077 = vmatpush3.bf16.msra.mxu0 %v10076_v36  ;;  %v16791_v36 = vld [vmem:[#allocation125_spill] sm:$0xff] }
 0x5d0   : > { %9452 = vxpose.xlu1.b32.cont [4/16] (narrow) %v9436_v3, 8  ;;  %10078 = vmatprep.subr.bf16.mxu0 %v16782_v51  ;;  %v9389_v37 = vsel %vm513_vm1, %v16791_v36, %v16790_v12 }
 0x5d1   : > { %v9406_v27 = vsel %vm9398_vm15, %v9389_v37, %v15492_v17  ;;  %v9511_v17 = vld [vmem:[%s15888_s4 + $0x70] sm:$0xff] }
 0x5d2   : > { %v15561_v25 = vpop.xlane.xlu0 %7858  ;;  %v9423_v11 = vsel %vm9415_vm4, %v9406_v27, %v15519_v38 }
 0x5d3   : > { %10080 = vmatpush3.bf16.msra.mxu0 %v10079_v63 }
 0x5d4   : > { %9453 = vxpose.xlu1.b32.cont [5/16] (narrow) %v9437_v28, 8  ;;  %v9422_v28 = vsel %vm9415_vm4, %v9405_v0, %v15456_v2  ;;  %10081 = vmatprep.subr.bf16.mxu0 %v16782_v51  ;;  %v9440_v51 = vsel %vm9432_vm11, %v9423_v11, %v8951_v13  ;;  %v9424_v0 = vsel %vm9415_vm4, %v9407_v46, %v15521_v19 }
 0x5d5   : > { %v9439_v22 = vsel %vm9432_vm11, %v9422_v28, %v15499_v44  ;;  %v5763_v28 = vshll.u32 %v5762_v8, 16 }
 0x5d6   : > { %v5715_v45 = vpop.xlane.xlu0 %5714 }
 0x5d7   : > { %v5716_v3 = vcvt.f32.s32 %v5715_v45  ;;  %v8957_v45 = vpop.xlane.xlu1 %8956 }
 0x5d8   : > { %9454 = vxpose.xlu1.b32.cont [6/16] (narrow) %v9438_v57, 8 }
 0x5d9   : > { %v5719_v5 = vadd.s32 %v5718_v32, %v5716_v3  ;;  %v9512_v3 = vld [vmem:[%s15888_s4 + $0x78] sm:$0xff] }
 0x5da   : > { %v5730_v15 = vpop.xlane.xlu0 %5729  ;;  %v10082_v56 = vpack.c.bf16 %v9512_v3, %v9511_v17  ;;  %v16796_v17 = vld [vmem:[#allocation128_spill] sm:$0xff]  ;;  %v16797_v3 = vld [vmem:[#allocation43_spill] sm:$0xff] }
 0x5db   : > { %vm5945_vm0 = vcmp.eq.s32.totalorder %v16509_v35, %v5719_v5  ;;  %v5731_v9 = vcvt.f32.s32 %v5730_v15  ;;  %v9441_v15 = vsel %vm9432_vm11, %v9424_v0, %v15549_v1  ;;  %v6761_v12 = vpop.xlane.xlu1 %6760 }
 0x5dc   : > { %9455 = vxpose.xlu1.b32.cont [7/16] (narrow) %v9439_v22, 8  ;;  %v5977_v44 = vsel %vm5945_vm0, 1.0, %v16624_v61  ;;  %10083 = vmatpush3.bf16.msra.mxu0 %v10082_v56  ;;  %v16793_v22 = vld [vmem:[#allocation102_spill] sm:$0xff] }
 0x5dd   : > { %v5734_v2 = vadd.s32 %v5733_v62, %v5731_v9  ;;  %v5993_v13 = vsel %vm1204_vm5, %v5977_v44, 0.0  ;;  %v9391_v9 = vsel %vm513_vm1, %v16794_v26, %v16793_v22 }
 0x5de   : > { %v5745_v32 = vpop.xlane.xlu0 %5744  ;;  %v9408_v19 = vsel %vm9398_vm15, %v9391_v9, %v15559_v30  ;;  %v16795_v30 = vld [vmem:[#allocation46_spill] sm:$0xff] }
 0x5df   : > { %vm5946_vm2 = vcmp.eq.s32.totalorder %v16509_v35, %v5734_v2  ;;  %v5746_v57 = vcvt.f32.s32 %v5745_v32  ;;  %v9425_v2 = vsel %vm9415_vm4, %v9408_v19, %v7856_v42  ;;  %v7862_v11 = vpop.xlane.xlu1 %7861  ;;  %v9409_v8 = vsel %vm9398_vm15, %v16795_v30, %v15532_v50 }
 0x5e0   : > { %v5978_v38 = vsel %vm5946_vm2, 1.0, %v16624_v61  ;;  %9456 = vxpose.xlu1.b32.cont [8/16] (narrow) %v9440_v51, 8  ;;  %v9426_v42 = vsel %vm9415_vm4, %v9409_v8, %v15561_v25 }
 0x5e1   : > { %v5994_v63 = vsel %vm1204_vm5, %v5978_v38, 0.0  ;;  %v5749_v10 = vadd.s32 %v5748_v4, %v5746_v57  ;;  %v9442_v4 = vsel %vm9432_vm11, %v9425_v2, %v8957_v45  ;;  %v9393_v38 = vsel %vm513_vm1, %v16797_v3, %v16796_v17  ;;  %v16800_v2 = vld [vmem:[#allocation62_spill] sm:$0xff] }
 0x5e2   : > { %v5995_v5 = vadd.f32 %v5994_v63, %v5993_v13  ;;  %v5760_v6 = vpop.xlane.xlu0 %5759  ;;  %v9410_v46 = vsel %vm9398_vm15, %v9393_v38, %v6761_v12 }
 0x5e3   : > { %vm5947_vm3 = vcmp.eq.s32.totalorder %v16509_v35, %v5749_v10  ;;  %v5761_v62 = vcvt.f32.s32 %v5760_v6  ;;  %v8963_v20 = vpop.xlane.xlu1 %8962  ;;  %v9427_v13 = vsel %vm9415_vm4, %v9410_v46, %v7862_v11 }
 0x5e4   : > { %v5979_v36 = vsel %vm5947_vm3, 1.0, %v16624_v61  ;;  %9457 = vxpose.xlu1.b32.cont [9/16] (narrow) %v9441_v15, 8  ;;  %v9444_v63 = vsel %vm9432_vm11, %v9427_v13, %v8963_v20  ;;  %v16804_v20 = vld [vmem:[#allocation117_spill] sm:$0xff] }
 0x5e5   : > { %v5996_v37 = vsel %vm1204_vm5, %v5979_v36, 0.0  ;;  %v5764_v27 = vadd.s32 %v5763_v28, %v5761_v62  ;;  %v16798_v62 = vld [vmem:[#allocation54_spill] sm:$0xff] }
 0x5e6   : > { %v5997_v1 = vadd.f32 %v5996_v37, %v5995_v5  ;;  %v8960_v32 = vpop.xlane.xlu0 %8959 }
 0x5e7   : > { %vm5948_vm13 = vcmp.eq.s32.totalorder %v16509_v35, %v5764_v27  ;;  %v9443_v57 = vsel %vm9432_vm11, %v9426_v42, %v8960_v32  ;;  %v16799_v27 = vld [vmem:[#allocation56_spill] sm:$0xff] }
 0x5e8   : > { %v5980_v44 = vsel %vm5948_vm13, 1.0, %v16624_v61  ;;  %9458 = vxpose.xlu1.b32.cont [10/16] (narrow) %v9442_v4, 8  ;;  %v16801_v4 = vld [vmem:[#allocation134_spill] sm:$0xff]  ;;  %v16802_v42 = vld [vmem:[#allocation64_spill] sm:$0xff] }
 0x5e9   : > { %v5998_v51 = vsel %vm1204_vm5, %v5980_v44, 0.0 }
 0x5ea   : > { %v5999_v45 = vadd.f32 %v5998_v51, %v5997_v1  ;;  %v6764_v0 = vpop.xlane.xlu0 %6763  ;;  %v9379_v1 = vsel %vm1204_vm5, %v16800_v2, %v16799_v27 }
 0x5eb   : > { %v9411_v22 = vsel %vm9398_vm15, %v16798_v62, %v6764_v0  ;;  %v9395_v11 = vsel %vm513_vm1, %v9379_v1, %v16801_v4  ;;  %v6822_v62 = vand.u32 65535, %v15338_v52  ;;  %v6852_v4 = vand.u32 65535, %v15434_v33 }
 0x5ec   : > { %v6024_v56 = vrot.slane %v5999_v45, 4  ;;  %9459 = vxpose.xlu1.b32.cont [11/16] (narrow) %v9443_v57, 8 }
 0x5ee   : > { %v6025_v50 = vadd.f32 %v6024_v56, %v5999_v45  ;;  %v7865_v28 = vpop.xlane.xlu0 %7864  ;;  %v16803_v56 = vld [vmem:[#allocation53_spill] sm:$0xff] }
 0x5ef   : > { %v9428_v9 = vsel %vm9415_vm4, %v9411_v22, %v7865_v28  ;;  %v9381_v46 = vsel %vm1204_vm5, %v16804_v20, %v16803_v56 }
 0x5f0   : > { %v6026_v10 = vrot.slane %v6025_v50, 2  ;;  %9460 = vxpose.xlu1.b32.cont [12/16] (narrow) %v9444_v63, 8 }
 0x5f2   : > { %v6027_v25 = vadd.f32 %v6026_v10, %v6025_v50  ;;  %v16805_v50 = vld [vmem:[#allocation36_spill] sm:$0xff] }
 0x5f3   : > { %v9397_v63 = vsel %vm513_vm1, %v9381_v46, %v16805_v50 }
 0x5f4   : > { %v6028_v5 = vrot.slane %v6027_v25, 1 }
 0x5f6   : > { %v6029_v6 = vadd.f32 %v6028_v5, %v6027_v25  ;;  %v6767_v19 = vpop.xlane.xlu1 %6766 }
 0x5f7   : > { %v9412_v44 = vsel %vm9398_vm15, %v9395_v11, %v6767_v19 }
 0x5f8   : > { %v6030_v15 = vmul.f32 0.03125, %v6029_v6  ;;  %v6807_v6 = vand.u32 65535, %v15324_v60 }
 0x5fa   : > { %v15654_v26 = vsel %vm9487_vm7, %v15283_v59, %v6030_v15  ;;  %v8966_v12 = vpop.xlane.xlu0 %8965  ;;  %v6809_v15 = vcvt.s32.f32 %v6807_v6 }
 0x5fb   : > { %v9445_v36 = vsel %vm9432_vm11, %v9428_v9, %v8966_v12  ;;  %v6824_v12 = vcvt.s32.f32 %v6822_v62 }
 0x5fc   : > { %9461 = vxpose.xlu1.b32.cont [13/16] (narrow) %v9445_v36, 8 }
 0x5fe   : > { %v7868_v37 = vpop.xlane.xlu1 %7867 }
 0x5ff   : > { %v9429_v59 = vsel %vm9415_vm4, %v9412_v44, %v7868_v37  ;;  %v6837_v37 = vand.u32 65535, %v15370_v14  ;;  %v6854_v44 = vcvt.s32.f32 %v6852_v4  ;;  %v7908_v14 = vand.u32 65535, %v15341_v53 }
 0x600   : > { %v7938_v53 = vand.u32 65535, %v15421_v23 }
 0x601   : > { %v6839_v27 = vcvt.s32.f32 %v6837_v37 }
 0x606   : > { %v6770_v8 = vpop.xlane.xlu0 %6769 }
 0x607   : > { %v9413_v45 = vsel %vm9398_vm15, %v16802_v42, %v6770_v8 }
 0x60a   : > { %v8969_v32 = vpop.xlane.xlu1 %8968 }
 0x60b   : > { %v9446_v30 = vsel %vm9432_vm11, %v9429_v59, %v8969_v32  ;;  %v7923_v32 = vand.u32 65535, %v15358_v49  ;;  %v7953_v49 = vand.u32 65535, %v15467_v31 }
 0x60c   : > { %9462 = vxpose.xlu1.b32.cont [14/16] (narrow) %v9446_v30, 8 }
 0x60d   : > { %v7925_v33 = vcvt.s32.f32 %v7923_v32 }
 0x60e   : > { %v7871_v51 = vpop.xlane.xlu0 %7870 }
 0x60f   : > { %v9430_v57 = vsel %vm9415_vm4, %v9413_v45, %v7871_v51  ;;  %v9009_v45 = vand.u32 65535, %v15396_v24 }
 0x616   : > { %v6773_v38 = vpop.xlane.xlu1 %6772 }
 0x617   : > { %v9414_v10 = vsel %vm9398_vm15, %v9397_v63, %v6773_v38 }
 0x61a   : > { %v8972_v17 = vpop.xlane.xlu0 %8971 }
 0x61b   : > { %v9447_v3 = vsel %vm9432_vm11, %v9430_v57, %v8972_v17  ;;  %v9024_v57 = vand.u32 65535, %v15399_v55 }
 0x61c   : > { %9463 = vxpose.xlu1.b32.cont [15/16] (narrow) %v9447_v3, 8  ;;  %v9054_v3 = vand.u32 65535, %v15483_v43 }
 0x61d   : > { %v9026_v31 = vcvt.s32.f32 %v9024_v57 }
 0x61e   : > { %v7874_v13 = vpop.xlane.xlu1 %7873 }
 0x61f   : > { %v9431_v0 = vsel %vm9415_vm4, %v9414_v10, %v7874_v13 }
 0x623   : > { %v8975_v25 = vpop.xlane.xlu0 %8974 }
 0x624   : > { %v9448_v5 = vsel %vm9432_vm11, %v9431_v0, %v8975_v25 }
 0x625   : > { %9464 = vxpose.xlu1.b32.end [16/16] (narrow) %v9448_v5, 8 }
 0x628   : > { %v15679_v28 = vpop.xlane.xlu0 %6811 }
 0x629   : > { %vm6813_vm8 = vcmp.eq.f32.partialorder %v15335_v40, %v15679_v28  ;;  %v6818_v56 = vcvt.f32.s32 %v15679_v28 }
 0x62a   : > { %v6814_v22 = vsel %vm6813_vm8, %v6809_v15, inf }
 0x62b   : > { %6815 = vmin.xlane.f32.xlu0 %v6814_v22  ;;  %v6819_v46 = vshll.u32 %v6818_v56, 16 }
 0x62c   : > { %v15684_v9 = vpop.xlane.xlu0 %6826 }
 0x62d   : > { %vm6828_vm1 = vcmp.eq.f32.partialorder %v15354_v48, %v15684_v9  ;;  %v6833_v43 = vcvt.f32.s32 %v15684_v9 }
 0x62e   : > { %v6829_v36 = vsel %vm6828_vm1, %v6824_v12, inf }
 0x62f   : > { %6830 = vmin.xlane.f32.xlu0 %v6829_v36  ;;  %v6834_v63 = vshll.u32 %v6833_v43, 16 }
 0x630   : > { %v15688_v60 = vpop.xlane.xlu0 %7912 }
 0x631   : > { %vm7914_vm12 = vcmp.eq.f32.partialorder %v15366_v41, %v15688_v60 }
 0x634   : > { %v15690_v19 = vpop.xlane.xlu0 %7927 }
 0x635   : > { %vm7929_vm14 = vcmp.eq.f32.partialorder %v15377_v16, %v15690_v19  ;;  %v7955_v16 = vcvt.s32.f32 %v7953_v49 }
 0x636   : > { %v7930_v51 = vsel %vm7929_vm14, %v7925_v33, inf }
 0x638   : > { %v15693_v52 = vpop.xlane.xlu0 %6841 }
 0x639   : > { %vm6843_vm9 = vcmp.eq.f32.partialorder %v15393_v18, %v15693_v52  ;;  %v7910_v18 = vcvt.s32.f32 %v7908_v14 }
 0x63a   : > { %v6844_v40 = vsel %vm6843_vm9, %v6839_v27, inf }
 0x63b   : > { %6845 = vmin.xlane.f32.xlu0 %v6844_v40  ;;  %v7915_v8 = vsel %vm7914_vm12, %v7910_v18, inf }
 0x63c   : > { %v15697_v2 = vpop.xlane.xlu0 %9013 }
 0x63d   : > { %vm9015_vm11 = vcmp.eq.f32.partialorder %v15415_v29, %v15697_v2 }
 0x640   : > { %v15699_v1 = vpop.xlane.xlu0 %9028 }
 0x641   : > { %vm9030_vm0 = vcmp.eq.f32.partialorder %v15430_v54, %v15699_v1 }
 0x642   : > { %v9031_v24 = vsel %vm9030_vm0, %v9026_v31, inf }
 0x644   : > { %v15701_v48 = vpop.xlane.xlu0 %7942 }
 0x645   : > { %vm7944_vm15 = vcmp.eq.f32.partialorder %v15450_v21, %v15701_v48  ;;  %v9011_v21 = vcvt.s32.f32 %v9009_v45 }
 0x647   : > { %v9016_v17 = vsel %vm9015_vm11, %v9011_v21, inf }
 0x648   : > { %v15704_v11 = vpop.xlane.xlu0 %6856 }
 0x649   : > { %vm6858_vm10 = vcmp.eq.f32.partialorder %v15463_v39, %v15704_v11  ;;  %v7940_v39 = vcvt.s32.f32 %v7938_v53 }
 0x64a   : > { %v6859_v59 = vsel %vm6858_vm10, %v6854_v44, inf }
 0x64b   : > { %6860 = vmin.xlane.f32.xlu0 %v6859_v59  ;;  %v7945_v42 = vsel %vm7944_vm15, %v7940_v39, inf }
 0x64c   : > { %v15712_v30 = vpop.xlane.xlu0 %9043 }
 0x64d   : > { %vm9045_vm2 = vcmp.eq.f32.partialorder %v15479_v34, %v15712_v30 }
 0x64f   : > { %7916 = vmin.xlane.f32.xlu0 %v7915_v8 }
 0x650   : > { %v15719_v41 = vpop.xlane.xlu0 %7957 }
 0x651   : > { %vm7959_vm4 = vcmp.eq.f32.partialorder %v15494_v47, %v15719_v41  ;;  %v9039_v47 = vand.u32 65535, %v15454_v7  ;;  %v9056_v7 = vcvt.s32.f32 %v9054_v3 }
 0x652   : > { %v7960_v23 = vsel %vm7959_vm4, %v7955_v16, inf }
 0x653   : > { %7931 = vmin.xlane.f32.xlu0 %v7930_v51  ;;  %v9041_v55 = vcvt.s32.f32 %v9039_v47 }
 0x654   : > { %v15736_v29 = vpop.xlane.xlu0 %9058 }
 0x655   : > { %v9046_v54 = vsel %vm9045_vm2, %v9041_v55, inf  ;;  %vm9060_vm3 = vcmp.eq.f32.partialorder %v15515_v58, %v15736_v29 }
 0x656   : > { %v9061_v34 = vsel %vm9060_vm3, %v9056_v7, inf }
 0x657   : > { %7946 = vmin.xlane.f32.xlu0 %v7945_v42 }
 0x65b   : > { %7961 = vmin.xlane.f32.xlu0 %v7960_v23 }
 0x65f   : > { %9017 = vmin.xlane.f32.xlu0 %v9016_v17 }
 0x663   : > { %9032 = vmin.xlane.f32.xlu0 %v9031_v24 }
 0x667   : > { %9047 = vmin.xlane.f32.xlu0 %v9046_v54 }
 0x669   : > { %v9465_v38 = vpop.trf.xlu1 }
 0x66a   : > { %9481 = vst [vmem:[%s292_s22] sm:$0xff] %v9465_v38  ;;  %10058 = vmatmul.mubr.f32.vlgmr.msra.gmra.mrb[128].mxu0 %v9465_v38 }
 0x66b   : > { %9062 = vmin.xlane.f32.xlu0 %v9061_v34 }
 0x6b8   : > { %v6816_v20 = vpop.xlane.xlu0 %6815 }
 0x6b9   : > { %v6817_v13 = vcvt.f32.s32 %v6816_v20 }
 0x6bb   : > { %v6820_v50 = vadd.s32 %v6819_v46, %v6817_v13 }
 0x6bc   : > { %v6831_v58 = vpop.xlane.xlu0 %6830 }
 0x6bd   : > { %vm7046_vm13 = vcmp.eq.s32.totalorder %v16509_v35, %v6820_v50  ;;  %v6832_v10 = vcvt.f32.s32 %v6831_v58 }
 0x6be   : > { %v7078_v25 = vsel %vm7046_vm13, 1.0, %v16624_v61 }
 0x6bf   : > { %v6835_v0 = vadd.s32 %v6834_v63, %v6832_v10  ;;  %v7094_v6 = vsel %vm1204_vm5, %v7078_v25, 0.0 }
 0x6c1   : > { %vm7047_vm6 = vcmp.eq.s32.totalorder %v16509_v35, %v6835_v0 }
 0x6c2   : > { %v7079_v5 = vsel %vm7047_vm6, 1.0, %v16624_v61 }
 0x6c3   : > { %v7095_v28 = vsel %vm1204_vm5, %v7079_v5, 0.0 }
 0x6c4   : > { %v7096_v15 = vadd.f32 %v7095_v28, %v7094_v6 }
 0x6c5   : > { %10210 = shalt.err (!%p10207_p8)
}
 0x6c6   : > { %s10211_s16 = scalar_lea.hbm %s15760_s28, 128  ;;  %s10215_s27 = scalar_lea.hbm %s15891_s7, 256 }
 0x6c7   : > { %p10212_p9 = scmp.ne.s32.totalorder %s15760_s28, %s10211_s16  ;;  %p10216_p0 = scmp.lt.u32.totalorder %s15760_s28, %s15891_s7 }
 0x6c8   : > { %p10217_p1 = scmp.lt.u32.totalorder %s10215_s27, %s10211_s16  ;;  %p10219_p3 = scmp.lt.u32.totalorder %s10211_s16, %s15760_s28 }
 0x6c9   : > { %p10213_p12 = pnand %p10212_p9, %p10389_p10 }
 0x6ca   : > { %p10218_p2 = por %p10217_p1, %p10216_p0 }
 0x6cb   : > { %p10214_p13 = pneg %p10213_p12 }
 0x6cc   : > { %p10220_p4 = por %p10219_p3, %p10218_p2 }
 0x6ce   : > { %p10221_p5 = pnand %p10220_p4, %p10214_p13 }
 0x6d0   : > { %10224 = shalt.err (!%p10221_p5)
}
 0x6d1   : > { %10086 = dma.vmem_to_hbm [thread:$0]  (%p10389_p10), %s15749_s23, 128, %s15760_s28, %s9597_s29   ;;  %v6848_v62 = vcvt.f32.s32 %v15693_v52  ;;  %v6846_v22 = vpop.xlane.xlu0 %6845  ;;  %v6863_v4 = vcvt.f32.s32 %v15704_v11  ;;  %v7919_v14 = vcvt.f32.s32 %v15688_v60  ;;  %v7934_v33 = vcvt.f32.s32 %v15690_v19 }
 0x6d2   : > { %v6847_v12 = vcvt.f32.s32 %v6846_v22  ;;  %v7949_v60 = vcvt.f32.s32 %v15701_v48  ;;  %v7964_v47 = vcvt.f32.s32 %v15719_v41  ;;  %v9020_v38 = vcvt.f32.s32 %v15697_v2  ;;  %p306_p6 = scmp.lt.s32.totalorder %s10372_s13, 1  ;;  %s285_s25 = scalar_lea.vmem [#allocation4], %s9749_s17 }
 0x6d3   : > { %v6849_v9 = vshll.u32 %v6848_v62, 16  ;;  %v6864_v59 = vshll.u32 %v6863_v4, 16  ;;  %v7920_v8 = vshll.u32 %v7919_v14, 16  ;;  %v7935_v16 = vshll.u32 %v7934_v33, 16  ;;  %s9614_s27 = sshll.u32 %s285_s25, 4  ;;  %s10302_s17 = smov [#allocation4]   ;;  %s15843_s27 = int_to_ptr.vmem [resolvable:$true] %s9614_s27 }
 0x6d4   : > { %v7950_v31 = vshll.u32 %v7949_v60, 16  ;;  %v7965_v46 = vshll.u32 %v7964_v47, 16  ;;  %v9021_v63 = vshll.u32 %v9020_v38, 16  ;;  %v9035_v5 = vcvt.f32.s32 %v15699_v1  ;;  %s307_s23 = scalar_select %p306_p6, %s10372_s13, 1  ;;  %v10001_v38 = vld [vmem:[%s15889_s5] ss:$0 sm:$0xff] }
 0x6d5   : > { %v6850_v36 = vadd.s32 %v6849_v9, %v6847_v12  ;;  %vm9489_vm12 = vcmask 1044480   ;;  %vm9491_vm0 = vcmask 1045504   ;;  %vm9493_vm3 = vcmask 1046528   ;;  %s10225_s29 = scalar_lea.vmem %s15843_s27, 128  ;;  %s10229_s21 = sshll.u32 %s10302_s17, 4  ;;  %s10230_s21 = int_to_ptr.vmem [resolvable:$false] %s10229_s21 }
 0x6d6   : > { %s9753_s28 = sshll.u32 %s307_s23, 3  ;;  %s15841_s23 = scalar_lea.hbm %s15890_s6, %s10004_s24 }
 0x6d7   : > { %vm7048_vm7 = vcmp.eq.s32.totalorder %v16509_v35, %v6850_v36  ;;  %v9036_v36 = vshll.u32 %v9035_v5, 16  ;;  %s309_s14 = scalar_lea.vmem %s15892_s8, %s9753_s28  ;;  %s9592_s28 = scalar_lea.sflag [#allocation5], %s15732_s26 }
 0x6d8   : > { %v7080_v37 = vsel %vm7048_vm7, 1.0, %v16624_v61  ;;  %v6861_v44 = vpop.xlane.xlu0 %6860  ;;  %p10226_p7 = scmp.ne.s32.totalorder %s15843_s27, %s10225_s29  ;;  %s10231_s13 = scalar_lea.vmem %s10230_s21, 256 }
 0x6d9   : > { %v7097_v27 = vsel %vm1204_vm5, %v7080_v37, 0.0  ;;  %v6862_v18 = vcvt.f32.s32 %v6861_v44  ;;  %v9050_v37 = vcvt.f32.s32 %v15712_v30  ;;  %p10232_p12 = scmp.lt.s32.totalorder %s15843_s27, %s10230_s21  ;;  %p10233_p13 = scmp.lt.s32.totalorder %s10231_s13, %s10225_s29 }
 0x6da   : > { %v7098_v40 = vadd.f32 %v7097_v27, %v7096_v15  ;;  %p10227_p8 = pnand %p10226_p7, %p10389_p10 }
 0x6db   : > { %v6865_v32 = vadd.s32 %v6864_v59, %v6862_v18  ;;  %v9051_v59 = vshll.u32 %v9050_v37, 16  ;;  %v9065_v18 = vcvt.f32.s32 %v15736_v29  ;;  %p10234_p0 = por %p10233_p13, %p10232_p12 }
 0x6dc   : > { %v7917_v52 = vpop.xlane.xlu0 %7916  ;;  %p10228_p9 = pneg %p10227_p8 }
 0x6dd   : > { %vm7049_vm8 = vcmp.eq.s32.totalorder %v16509_v35, %v6865_v32  ;;  %v7918_v53 = vcvt.f32.s32 %v7917_v52 }
 0x6de   : > { %v7081_v51 = vsel %vm7049_vm8, 1.0, %v16624_v61  ;;  %p10235_p1 = pnand %p10234_p0, %p10228_p9 }
 0x6df   : > { %v7099_v39 = vsel %vm1204_vm5, %v7081_v51, 0.0  ;;  %v7921_v49 = vadd.s32 %v7920_v8, %v7918_v53 }
 0x6e0   : > { %v7100_v42 = vadd.f32 %v7099_v39, %v7098_v40  ;;  %v7932_v11 = vpop.xlane.xlu0 %7931 }
 0x6e1   : > { %vm8147_vm1 = vcmp.eq.s32.totalorder %v16509_v35, %v7921_v49  ;;  %v7933_v45 = vcvt.f32.s32 %v7932_v11  ;;  %v9066_v49 = vshll.u32 %v9065_v18, 16 }
 0x6e2   : > { %v7125_v23 = vrot.slane %v7100_v42, 4  ;;  %v8179_v19 = vsel %vm8147_vm1, 1.0, %v16624_v61 }
 0x6e3   : > { %v7936_v21 = vadd.s32 %v7935_v16, %v7933_v45  ;;  %v8195_v48 = vsel %vm1204_vm5, %v8179_v19, 0.0 }
 0x6e4   : > { %v7126_v57 = vadd.f32 %v7125_v23, %v7100_v42  ;;  %v7947_v17 = vpop.xlane.xlu0 %7946 }
 0x6e5   : > { %vm8148_vm9 = vcmp.eq.s32.totalorder %v16509_v35, %v7936_v21  ;;  %v7948_v24 = vcvt.f32.s32 %v7947_v17 }
 0x6e6   : > { %v7127_v55 = vrot.slane %v7126_v57, 2  ;;  %v8180_v3 = vsel %vm8148_vm9, 1.0, %v16624_v61 }
 0x6e7   : > { %v8196_v54 = vsel %vm1204_vm5, %v8180_v3, 0.0  ;;  %v7951_v7 = vadd.s32 %v7950_v31, %v7948_v24 }
 0x6e8   : > { %v7128_v34 = vadd.f32 %v7127_v55, %v7126_v57  ;;  %v8197_v56 = vadd.f32 %v8196_v54, %v8195_v48  ;;  %v7962_v20 = vpop.xlane.xlu0 %7961 }
 0x6e9   : > { %vm8149_vm10 = vcmp.eq.s32.totalorder %v16509_v35, %v7951_v7  ;;  %v7963_v41 = vcvt.f32.s32 %v7962_v20 }
 0x6ea   : > { %v7129_v43 = vrot.slane %v7128_v34, 1  ;;  %v8181_v13 = vsel %vm8149_vm10, 1.0, %v16624_v61 }
 0x6eb   : > { %v8198_v50 = vsel %vm1204_vm5, %v8181_v13, 0.0  ;;  %v7966_v58 = vadd.s32 %v7965_v46, %v7963_v41 }
 0x6ec   : > { %v7130_v10 = vadd.f32 %v7129_v43, %v7128_v34  ;;  %v8199_v0 = vadd.f32 %v8198_v50, %v8197_v56  ;;  %v9018_v25 = vpop.xlane.xlu0 %9017 }
 0x6ed   : > { %vm8150_vm14 = vcmp.eq.s32.totalorder %v16509_v35, %v7966_v58  ;;  %v9019_v2 = vcvt.f32.s32 %v9018_v25 }
 0x6ee   : > { %v7131_v6 = vmul.f32 0.03125, %v7130_v10  ;;  %v8182_v28 = vsel %vm8150_vm14, 1.0, %v16624_v61 }
 0x6ef   : > { %v8200_v15 = vsel %vm1204_vm5, %v8182_v28, 0.0  ;;  %v9022_v62 = vadd.s32 %v9021_v63, %v9019_v2 }
 0x6f0   : > { %v9490_v22 = vsel %vm9489_vm12, %v15654_v26, %v7131_v6  ;;  %v8201_v9 = vadd.f32 %v8200_v15, %v8199_v0  ;;  %v9033_v12 = vpop.xlane.xlu0 %9032 }
 0x6f1   : > { %vm9248_vm15 = vcmp.eq.s32.totalorder %v16509_v35, %v9022_v62  ;;  %v9034_v1 = vcvt.f32.s32 %v9033_v12 }
 0x6f2   : > { %v8226_v27 = vrot.slane %v8201_v9, 4  ;;  %v9280_v44 = vsel %vm9248_vm15, 1.0, %v16624_v61 }
 0x6f3   : > { %v9037_v40 = vadd.s32 %v9036_v36, %v9034_v1  ;;  %v9296_v30 = vsel %vm1204_vm5, %v9280_v44, 0.0 }
 0x6f4   : > { %v8227_v4 = vadd.f32 %v8226_v27, %v8201_v9  ;;  %v9048_v14 = vpop.xlane.xlu0 %9047 }
 0x6f5   : > { %vm9249_vm4 = vcmp.eq.s32.totalorder %v16509_v35, %v9037_v40  ;;  %v9049_v26 = vcvt.f32.s32 %v9048_v14 }
 0x6f6   : > { %v8228_v32 = vrot.slane %v8227_v4, 2  ;;  %v9281_v52 = vsel %vm9249_vm4, 1.0, %v16624_v61 }
 0x6f7   : > { %v9297_v8 = vsel %vm1204_vm5, %v9281_v52, 0.0  ;;  %v9052_v33 = vadd.s32 %v9051_v59, %v9049_v26 }
 0x6f8   : > { %v8229_v53 = vadd.f32 %v8228_v32, %v8227_v4  ;;  %v9298_v51 = vadd.f32 %v9297_v8, %v9296_v30  ;;  %v9063_v39 = vpop.xlane.xlu0 %9062 }
 0x6f9   : > { %vm9250_vm11 = vcmp.eq.s32.totalorder %v16509_v35, %v9052_v33  ;;  %v9064_v42 = vcvt.f32.s32 %v9063_v39 }
 0x6fa   : > { %v8230_v29 = vrot.slane %v8229_v53, 1  ;;  %v9282_v11 = vsel %vm9250_vm11, 1.0, %v16624_v61 }
 0x6fb   : > { %v9299_v16 = vsel %vm1204_vm5, %v9282_v11, 0.0  ;;  %v9067_v60 = vadd.s32 %v9066_v49, %v9064_v42 }
 0x6fc   : > { %v8231_v45 = vadd.f32 %v8230_v29, %v8229_v53  ;;  %v9300_v23 = vadd.f32 %v9299_v16, %v9298_v51 }
 0x6fd   : > { %vm9251_vm2 = vcmp.eq.s32.totalorder %v16509_v35, %v9067_v60 }
 0x6fe   : > { %v8232_v21 = vmul.f32 0.03125, %v8231_v45  ;;  %v9283_v57 = vsel %vm9251_vm2, 1.0, %v16624_v61 }
 0x6ff   : > { %v9301_v19 = vsel %vm1204_vm5, %v9283_v57, 0.0 }
 0x700   : > { %v9492_v17 = vsel %vm9491_vm0, %v9490_v22, %v8232_v21  ;;  %v9302_v31 = vadd.f32 %v9301_v19, %v9300_v23 }
 0x702   : > { %v9327_v47 = vrot.slane %v9302_v31, 4 }
 0x704   : > { %v9328_v24 = vadd.f32 %v9327_v47, %v9302_v31 }
 0x706   : > { %v9329_v55 = vrot.slane %v9328_v24, 2 }
 0x708   : > { %v9330_v3 = vadd.f32 %v9329_v55, %v9328_v24 }
 0x70a   : > { %v9331_v48 = vrot.slane %v9330_v3, 1 }
 0x70c   : > { %v9332_v54 = vadd.f32 %v9331_v48, %v9330_v3 }
 0x70e   : > { %v9333_v35 = vmul.f32 0.03125, %v9332_v54 }
 0x710   : > { %v9494_v61 = vsel %vm9493_vm3, %v9492_v17, %v9333_v35 }
 0x711   : > { %v9495_v7 = vsel %vm1204_vm5, %v9494_v61, 0.0 }
 0x712   : > { %9496 = vst [vmem:[%s309_s14] sm:$0xff] %v9495_v7 }
 0x73d   : > { %v9586_v34 = vpop.f32.mrb[128].mxu0 }
 0x73e   : > { %v9587_v56 = vadd.f32 %v10001_v38, %v9586_v34  ;;  %v10059_v20 = vpop.f32.mrb[129].mxu0 }
 0x740   : > { %9590 = vst [vmem:[%s285_s25] sm:$0xff] %v9587_v56 }
 0x741   : > { %10238 = shalt.err (!%p10235_p1)
}
 0x742   : > { %s10239_s26 = scalar_lea.hbm %s15841_s23, 128  ;;  %s10243_s16 = scalar_lea.hbm %s15890_s6, 256 }
 0x743   : > { %p10240_p2 = scmp.ne.s32.totalorder %s15841_s23, %s10239_s26  ;;  %p10244_p5 = scmp.lt.u32.totalorder %s15841_s23, %s15890_s6 }
 0x744   : > { %p10245_p6 = scmp.lt.u32.totalorder %s10243_s16, %s10239_s26  ;;  %p10247_p8 = scmp.lt.u32.totalorder %s10239_s26, %s15841_s23 }
 0x745   : > { %p10241_p3 = pnand %p10240_p2, %p10389_p10 }
 0x746   : > { %p10246_p7 = por %p10245_p6, %p10244_p5 }
 0x747   : > { %p10242_p4 = pneg %p10241_p3 }
 0x748   : > { %p10248_p9 = por %p10247_p8, %p10246_p7 }
 0x74a   : > { %p10249_p12 = pnand %p10248_p9, %p10242_p4 }
 0x74c   : > { %10252 = shalt.err (!%p10249_p12)
}
 0x74d   : > { %10085 = dma.vmem_to_hbm [thread:$0]  (%p10389_p10), %s15843_s27, 128, %s15841_s23, %s9592_s28  }
 0x74e PF: > { %p10096_p13 = scmp.ge.s32.totalorder %s10293_s12, 2  ;;  %s9642_s30 = sand.u32 1, %s10281_s10  }
 0x74f   : > { %s9643_s9 = scalar_lea.sflag [#allocation5], %s9642_s30 }
 0x750   : > { %p10090_p0 = pnand %p10096_p13, %p10393_p11 }
 0x752   : > { %10272 = dma.done.wait (!%p10090_p0), %s9643_s9, 128  }
 0x753   : > { %10274 = vsyncadd (!%p10090_p0), %s9643_s9, 4294967168  ;;  %s9652_s29 = scalar_lea.sflag [#allocation7], %s9642_s30 }
 0x754   : > { %10276 = dma.done.wait (!%p10090_p0), %s9652_s29, 128  }
 0x755   : > { %10278 = vsyncadd (!%p10090_p0), %s9652_s29, 4294967168  ;;  %p28_p10 = scmp.ge.s32.totalorder %s10376_s15, 4   ;;  %s16806_s10 = smov %s10285_s0 }
 0x756   : > { %s16807_s0 = smov %s10289_s11  ;;  %s16808_s11 = smov %s10387_s18 }
 0x757   : > { %s16809_s12 = smov %s10376_s15  ;;  %30 = sbr.rel (!%p28_p10) target bundleno = 20 (0x14), region = 111 }
 0x75e   :  { %9664 = vsyncpa [#allocation5], 1 }
 0x75f   :  { %9666 = vsyncpa [#allocation5 + $0x1], 1 }
 0x760   :  { %9667 = vsyncpa [#allocation7], 1 }
 0x761   :  { %9669 = vsyncpa [#allocation7 + $0x1], 1 }

</bundles_post_ra>
